<compile_context>
chip_gen: v7x
topology: tpu7x:2x2x1
jax: 0.10.0
libtpu: 0.0.40
codegen_flags: <defaults>
</compile_context>

<pallas_src>
import functools
import math

import jax
import jax.numpy as jnp
import numpy as np
from jax.experimental import pallas as pl
from jax.experimental.pallas import tpu as pltpu

NEG_BIG = -1e9  # additive mask for cross-window entries of the dense score block


def getHW(size):
    if isinstance(size, int):
        return (size, size)
    return tuple(size)


# ----------------------------- static (host) helpers -----------------------------

def relative_position_index(window_size):
    wsh, wsw = window_size
    coords = np.stack(np.meshgrid(np.arange(wsh), np.arange(wsw), indexing="ij"))
    coords_flat = coords.reshape(2, -1)
    rel = coords_flat[:, :, None] - coords_flat[:, None, :]
    rel = rel.transpose(1, 2, 0).copy()
    rel[:, :, 0] += wsh - 1
    rel[:, :, 1] += wsw - 1
    rel[:, :, 0] *= 2 * wsw - 1
    return rel.sum(-1)                                           # (wd, wd)


def create_mask(image_resolution, window_size, shift_size):
    H, W = image_resolution
    wsh, wsw = window_size
    sh, sw = getHW(shift_size)
    wd = wsh * wsw
    image_mask = np.zeros((1, H, W, 1), np.float32)
    h_slices = (slice(0, -wsh), slice(-wsh, -sh), slice(-sh, None))
    w_slices = (slice(0, -wsw), slice(-wsw, -sw), slice(-sw, None))
    cnt = 0
    for h in h_slices:
        for w in w_slices:
            image_mask[:, h, w, :] = cnt
            cnt += 1
    mw = image_mask.reshape(1, H // wsh, wsh, W // wsw, wsw, 1)
    mw = mw.transpose(0, 1, 3, 2, 4, 5).reshape(1, -1, wd)
    mask = mw[:, :, None, :] - mw[:, :, :, None]
    mask = np.where(mask != 0, np.float32(-100.0), np.float32(0.0))
    return mask[0].astype(np.float32)                            # (nw, wd, wd)


def build_window_gather(image_resolution, window_size, shift):
    # Maps window-partition order (of the forward-shifted image) to row-major token
    # indices of the unshifted image: window partition + cyclic shift in ONE gather.
    H, W = image_resolution
    wsh, wsw = window_size
    sh, sw = shift
    win_h, win_w = H // wsh, W // wsw
    h_pos = np.arange(win_h)[:, None] * wsh + np.arange(wsh)[None, :]   # (win_h, wsh)
    w_pos = np.arange(win_w)[:, None] * wsw + np.arange(wsw)[None, :]   # (win_w, wsw)
    h_src = (h_pos + sh) % H
    w_src = (w_pos + sw) % W
    idx = h_src[:, None, :, None] * W + w_src[None, :, None, :]         # (wh, ww, wsh, wsw)
    return idx.reshape(-1).astype(np.int32)


def build_reverse_shift_gather(image_resolution, shift):
    # "Reinterpret window-order tokens as (H, W) and roll by (+sh, +sw)" as one gather.
    H, W = image_resolution
    sh, sw = shift
    h_src = (np.arange(H) - sh) % H
    w_src = (np.arange(W) - sw) % W
    return (h_src[:, None] * W + w_src[None, :]).reshape(-1).astype(np.int32)


def _pick_windows_per_step(nw, wd, max_tokens=256):
    # Largest divisor of nw whose token count stays under max_tokens.  At 256 tokens the
    # per-step working set (bf16 x/out blocks, (nh, T, T) bf16 dense bias, f32 q/k/v and
    # per-head (T, T) scores) is ~2-3 MiB -> comfortably under the 32 MiB scoped-VMEM
    # budget we request (portable to v7x's 64 MiB physical VMEM).
    best = 1
    for c in range(1, nw + 1):
        if nw % c == 0 and c * wd <= max_tokens:
            best = c
    return best


# --------------------------------- Pallas kernel ---------------------------------

def _swmsa_fused_kernel(x_ref, bias_ref, wq_ref, wk_ref, wv_ref, bqkv_ref,
                        wp_ref, bp_ref, o_ref, *, nh, hd, scale):
    # x_ref:    (T, E)      bf16  window-order tokens, lane-dense E = nh*hd
    # bias_ref: (nh, T, T)  bf16  block-diag rel-pos bias [+ shift mask], NEG_BIG off-block
    # wq/wk/wv: (E, E)      bf16  block-diagonal QKV weights
    # bqkv_ref: (3, E)      f32   head-tiled q/k/v biases
    # wp_ref:   (E, E)      bf16  output projection;  bp_ref: (1, E) f32
    # o_ref:    (T, E)      bf16
    x2 = x_ref[...]
    bqkv = bqkv_ref[...]

    # Full-width (K = E = 128) MXU contractions for the shared per-head QKV linear.
    q = jnp.dot(x2, wq_ref[...], preferred_element_type=jnp.float32) + bqkv[0:1, :]
    k = jnp.dot(x2, wk_ref[...], preferred_element_type=jnp.float32) + bqkv[1:2, :]
    v = jnp.dot(x2, wv_ref[...], preferred_element_type=jnp.float32) + bqkv[2:3, :]

    qb = (q * scale).astype(jnp.bfloat16)
    kb = k.astype(jnp.bfloat16)
    vb = v.astype(jnp.bfloat16)

    heads = []
    for h in range(nh):                      # static unroll; nh is small
        lo, hi = h * hd, (h + 1) * hd
        # Dense (T, T) scores across the whole chunk; the additive bias enforces the
        # per-window block structure (off-window entries get NEG_BIG -> exp() == 0),
        # so the softmax runs on lane-dense 256-wide rows and @V gets K = T depth.
        s = jnp.einsum("qd,kd->qk", qb[:, lo:hi], kb[:, lo:hi],
                       preferred_element_type=jnp.float32)
        s = s + bias_ref[h]
        m = jnp.max(s, axis=-1, keepdims=True)
        p = jnp.exp(s - m)
        p = p * pl.reciprocal(jnp.sum(p, axis=-1, keepdims=True), approx=True)
        heads.append(jnp.dot(p.astype(jnp.bfloat16), vb[:, lo:hi],
                             preferred_element_type=jnp.float32).astype(jnp.bfloat16))

    # Head re-merge along lanes + single 128-wide output projection (fused Linear).
    merged = jnp.concatenate(heads, axis=-1)                     # (T, E) bf16
    out = jnp.dot(merged, wp_ref[...], preferred_element_type=jnp.float32) + bp_ref[...]
    o_ref[...] = out.astype(o_ref.dtype)


def swmsa_attention_pallas(x_tok, dense_bias, wq_bd, wk_bd, wv_bd, bqkv_t, wp, bp,
                           *, nh, hd, nwc, wd):
    # x_tok: (B, Ntok, E) bf16 window-order tokens;  dense_bias: (nc, nh, T, T) bf16
    B, Ntok, E = x_tok.shape
    T = nwc * wd
    nc = Ntok // T
    assert E == nh * hd
    assert E % 128 == 0, "fused SWMSA kernel assumes lane-dense E (multiple of 128)"
    assert T % 8 == 0

    kernel = functools.partial(_swmsa_fused_kernel, nh=nh, hd=hd,
                               scale=1.0 / math.sqrt(hd))
    return pl.pallas_call(
        kernel,
        out_shape=jax.ShapeDtypeStruct((B, Ntok, E), jnp.bfloat16),
        grid=(nc, B),   # chunk outer, batch inner: bias/weight block indices stay fixed
        in_specs=[
            pl.BlockSpec((None, T, E), lambda c, b: (b, c, 0)),
            pl.BlockSpec((None, nh, T, T), lambda c, b: (c, 0, 0, 0)),
            pl.BlockSpec((E, E), lambda c, b: (0, 0)),
            pl.BlockSpec((E, E), lambda c, b: (0, 0)),
            pl.BlockSpec((E, E), lambda c, b: (0, 0)),
            pl.BlockSpec((3, E), lambda c, b: (0, 0)),
            pl.BlockSpec((E, E), lambda c, b: (0, 0)),
            pl.BlockSpec((1, E), lambda c, b: (0, 0)),
        ],
        out_specs=pl.BlockSpec((None, T, E), lambda c, b: (b, c, 0)),
        compiler_params=pltpu.CompilerParams(
            dimension_semantics=("parallel", "parallel"),
            vmem_limit_bytes=32 * 1024 * 1024),
    )(x_tok, dense_bias, wq_bd, wk_bd, wv_bd, bqkv_t, wp, bp)


# --------------------------------- glue / forward ---------------------------------

def build_dense_bias(rel_bias, mask, nwc):
    # rel_bias: (nh, wd, wd) f32;  mask: (nw, wd, wd) f32 (zeros when shift == 0)
    nh, wd, _ = rel_bias.shape
    nw = mask.shape[0]
    nc = nw // nwc
    T = nwc * wd
    comb = rel_bias[None, :, :, :] + mask[:, None, :, :]                   # (nw, nh, wd, wd)
    comb = comb.reshape(nc, nwc, nh, wd, wd).transpose(0, 2, 1, 3, 4)      # (nc, nh, nwc, wd, wd)
    eye = jnp.eye(nwc, dtype=comb.dtype)
    dense = jnp.einsum("chnij,nm->chnimj", comb, eye).reshape(nc, nh, T, T)
    off_block = 1.0 - np.kron(np.eye(nwc, dtype=np.float32),
                              np.ones((wd, wd), np.float32))               # (T, T)
    dense = dense + NEG_BIG * jnp.asarray(off_block)[None, None]
    return dense.astype(jnp.bfloat16)


def window_partition(x, window_size):  # reference path only
    B, H, W, E = x.shape
    wsh, wsw = window_size
    win_h, win_w = H // wsh, W // wsw
    x = x.reshape(B, win_h, wsh, win_w, wsw, E)
    x = jnp.transpose(x, (0, 1, 3, 2, 4, 5))
    return x.reshape(B, win_h * win_w, wsh * wsw, E)


def init_params(key, embed_dim, num_heads, window_size):
    hd = embed_dim // num_heads
    wsh, wsw = window_size
    k = jax.random.split(key, 5)
    return dict(
        wqkv=jax.random.normal(k[0], (hd, 3 * hd), jnp.float32) * 0.1,
        bqkv=jax.random.normal(k[1], (3 * hd,), jnp.float32) * 0.1,
        wproj=jax.random.normal(k[2], (embed_dim, embed_dim), jnp.float32) * 0.1,
        bproj=jax.random.normal(k[3], (embed_dim,), jnp.float32) * 0.1,
        # PyTorch inits the table to zeros; small random values exercise the bias path.
        bias_table=jax.random.normal(
            k[4], ((2 * wsh - 1) * (2 * wsw - 1), num_heads), jnp.float32) * 0.1,
    )


def swmsa_forward(params, x, *, image_resolution, window_size, num_heads,
                  shift_size=0, use_pallas=True):
    B, N, E = x.shape
    H, W = image_resolution
    wsh, wsw = window_size
    nh = num_heads
    hd = E // nh
    wd = wsh * wsw
    nw = (H // wsh) * (W // wsw)
    sh, sw = getHW(shift_size)

    rel_idx = relative_position_index(window_size)
    rel_bias = params["bias_table"][rel_idx.reshape(-1)].reshape(wd, wd, nh)
    rel_bias = jnp.transpose(rel_bias, (2, 0, 1))                          # (nh, wd, wd)

    if shift_size != 0:
        mask = jnp.asarray(create_mask((H, W), window_size, shift_size))   # (nw, wd, wd)
    else:
        mask = jnp.zeros((nw, wd, wd), jnp.float32)

    wqkv, bqkv = params["wqkv"], params["bqkv"]
    wq_s, wk_s, wv_s = wqkv[:, :hd], wqkv[:, hd:2 * hd], wqkv[:, 2 * hd:]
    bq_s, bk_s, bv_s = bqkv[:hd], bqkv[hd:2 * hd], bqkv[2 * hd:]

    if not use_pallas:
        # pure-JAX f32 reference: straight port of the PyTorch module
        x_img = x.reshape(B, H, W, E)
        if shift_size != 0:
            x_img = jnp.roll(x_img, shift=(-sh, -sw), axis=(1, 2))
        xw = window_partition(x_img, window_size)                          # (B, nw, wd, E)
        xh = xw.reshape(B, nw, wd, nh, hd).transpose(0, 1, 3, 2, 4)        # (B, nw, nh, wd, hd)
        q = jnp.einsum("bnhwd,de->bnhwe", xh, wq_s) + bq_s
        k = jnp.einsum("bnhwd,de->bnhwe", xh, wk_s) + bk_s
        v = jnp.einsum("bnhwd,de->bnhwe", xh, wv_s) + bv_s
        s = jnp.einsum("bnhqd,bnhkd->bnhqk", q, k) / math.sqrt(hd)
        s = s + rel_bias[None, None] + mask[None, :, None]
        p = jax.nn.softmax(s, axis=-1)
        attn = jnp.einsum("bnhqk,bnhkd->bnhqd", p, v)
        attn = attn.transpose(0, 1, 3, 2, 4).reshape(B, nw * wd, E)
        out_tok = attn @ params["wproj"] + params["bproj"]
        if shift_size != 0:
            out_tok = jnp.roll(out_tok.reshape(B, H, W, E), shift=(sh, sw),
                               axis=(1, 2)).reshape(B, N, E)
        return out_tok

    # --- Pallas path ---
    # Window partition (+ forward cyclic shift) as ONE static token gather; tokens stay
    # lane-dense (last dim E = 128) all the way into the kernel -- no head-split transpose.
    gather_idx = jnp.asarray(build_window_gather((H, W), window_size, (sh, sw)))
    x_tok = jnp.take(x, gather_idx, axis=1).astype(jnp.bfloat16)           # (B, nw*wd, E)

    nwc = _pick_windows_per_step(nw, wd)
    dense_bias = build_dense_bias(rel_bias, mask, nwc)                     # (nc, nh, T, T) bf16

    eye_h = jnp.eye(nh, dtype=jnp.float32)
    wq_bd = jnp.kron(eye_h, wq_s).astype(jnp.bfloat16)                     # (E, E) block-diag
    wk_bd = jnp.kron(eye_h, wk_s).astype(jnp.bfloat16)
    wv_bd = jnp.kron(eye_h, wv_s).astype(jnp.bfloat16)
    bqkv_t = jnp.stack([jnp.tile(bq_s, nh), jnp.tile(bk_s, nh), jnp.tile(bv_s, nh)])

    out_tok = swmsa_attention_pallas(
        x_tok, dense_bias, wq_bd, wk_bd, wv_bd, bqkv_t,
        params["wproj"].astype(jnp.bfloat16), params["bproj"].reshape(1, E),
        nh=nh, hd=hd, nwc=nwc, wd=wd)                                      # (B, nw*wd, E) bf16

    if shift_size != 0:
        # TODO(synk): fold this reverse cyclic shift into the consumer of the kernel
        # output (or the kernel's out index_map) to drop the final permutation pass.
        rev_idx = jnp.asarray(build_reverse_shift_gather((H, W), (sh, sw)))
        out_tok = jnp.take(out_tok, rev_idx, axis=1)
    # nn.Dropout(p=0.0) is an identity; tokens stay in window-partition order for the
    # unshifted path, exactly like the PyTorch module.
    return out_tok.reshape(B, N, E)


# -------------------------------------- main --------------------------------------

if __name__ == "__main__":
    B = 2
    image_resolution = (16, 16)
    window_size = (4, 4)
    num_heads = 4
    embed_dim = 128          # E = 128 -> lane-dense input/output blocks
    H, W = image_resolution
    N = H * W

    key = jax.random.PRNGKey(0)
    kx, kp = jax.random.split(key)
    x = jax.random.normal(kx, (B, N, embed_dim), jnp.float32)
    params = init_params(kp, embed_dim, num_heads, window_size)

    for shift in (0, 2):     # exercise both the plain and the shifted-window path
        out = swmsa_forward(params, x, image_resolution=image_resolution,
                            window_size=window_size, num_heads=num_heads,
                            shift_size=shift, use_pallas=True)
        out = jax.block_until_ready(out)
        ref = swmsa_forward(params, x, image_resolution=image_resolution,
                            window_size=window_size, num_heads=num_heads,
                            shift_size=shift, use_pallas=False)
        # bf16 MXU operands + bf16 output + approximate EUP reciprocal vs f32 reference
        np.testing.assert_allclose(np.asarray(out.astype(jnp.float32)),
                                   np.asarray(ref), rtol=5e-2, atol=5e-2)

    print("KERNEL_OK")
</pallas_src>

<mosaic_0001>
module attributes {stable_mosaic.version = 11 : i64} {
  func.func @_swmsa_fused_kernel(%arg0: i32, %arg1: i32, %arg2: memref<1x256x128xbf16, #tpu.memory_space<vmem>>, %arg3: memref<1x4x256x256xbf16, #tpu.memory_space<vmem>>, %arg4: memref<128x128xbf16, #tpu.memory_space<vmem>>, %arg5: memref<128x128xbf16, #tpu.memory_space<vmem>>, %arg6: memref<128x128xbf16, #tpu.memory_space<vmem>>, %arg7: memref<3x128xf32, #tpu.memory_space<vmem>>, %arg8: memref<128x128xbf16, #tpu.memory_space<vmem>>, %arg9: memref<1x128xf32, #tpu.memory_space<vmem>>, %arg10: memref<1x256x128xbf16, #tpu.memory_space<vmem>>) attributes {dimension_semantics = [#tpu.dimension_semantics<parallel>, #tpu.dimension_semantics<parallel>], iteration_bounds = array<i64: 1, 2>, scalar_prefetch = 0 : i64, scratch_operands = 0 : i64, tpu.core_type = #tpu.core_type<tc>, window_params = [{transform_indices = @transform_0, window_bounds = array<i64: 1, 256, 128>}, {transform_indices = @transform_1, window_bounds = array<i64: 1, 4, 256, 256>}, {pipeline_mode = #tpu.pipeline_mode<synchronous>, transform_indices = @transform_2, window_bounds = array<i64: 128, 128>}, {pipeline_mode = #tpu.pipeline_mode<synchronous>, transform_indices = @transform_3, window_bounds = array<i64: 128, 128>}, {pipeline_mode = #tpu.pipeline_mode<synchronous>, transform_indices = @transform_4, window_bounds = array<i64: 128, 128>}, {pipeline_mode = #tpu.pipeline_mode<synchronous>, transform_indices = @transform_5, window_bounds = array<i64: 3, 128>}, {pipeline_mode = #tpu.pipeline_mode<synchronous>, transform_indices = @transform_6, window_bounds = array<i64: 128, 128>}, {pipeline_mode = #tpu.pipeline_mode<synchronous>, transform_indices = @transform_7, window_bounds = array<i64: 1, 128>}, {transform_indices = @transform_8, window_bounds = array<i64: 1, 256, 128>}]} {
    %c0 = arith.constant 0 : index
    %c0_0 = arith.constant 0 : index
    %c0_1 = arith.constant 0 : index
    %0 = vector.load %arg2[%c0, %c0_0, %c0_1] : memref<1x256x128xbf16, #tpu.memory_space<vmem>>, vector<1x256x128xbf16>
    %1 = vector.shape_cast %0 : vector<1x256x128xbf16> to vector<256x128xbf16>
    %c0_2 = arith.constant 0 : index
    %c0_3 = arith.constant 0 : index
    %2 = vector.load %arg7[%c0_2, %c0_3] : memref<3x128xf32, #tpu.memory_space<vmem>>, vector<3x128xf32>
    %c0_4 = arith.constant 0 : index
    %c0_5 = arith.constant 0 : index
    %3 = vector.load %arg4[%c0_4, %c0_5] : memref<128x128xbf16, #tpu.memory_space<vmem>>, vector<128x128xbf16>
    %cst = arith.constant dense<0.000000e+00> : vector<256x128xf32>
    %4 = tpu.matmul %1, %3, %cst {dimension_numbers = #tpu.dot_dimension_numbers<[1], [0], [0], [1], [0, 0, 1, 1], [], []>} : vector<256x128xbf16>, vector<128x128xbf16>, vector<256x128xf32> -> vector<256x128xf32>
    %5 = vector.extract_strided_slice %2 {offsets = [0, 0], sizes = [1, 128], strides = [1, 1]} : vector<3x128xf32> to vector<1x128xf32>
    %6 = vector.broadcast %5 : vector<1x128xf32> to vector<256x128xf32>
    %7 = arith.addf %4, %6 : vector<256x128xf32>
    %c0_6 = arith.constant 0 : index
    %c0_7 = arith.constant 0 : index
    %8 = vector.load %arg5[%c0_6, %c0_7] : memref<128x128xbf16, #tpu.memory_space<vmem>>, vector<128x128xbf16>
    %cst_8 = arith.constant dense<0.000000e+00> : vector<256x128xf32>
    %9 = tpu.matmul %1, %8, %cst_8 {dimension_numbers = #tpu.dot_dimension_numbers<[1], [0], [0], [1], [0, 0, 1, 1], [], []>} : vector<256x128xbf16>, vector<128x128xbf16>, vector<256x128xf32> -> vector<256x128xf32>
    %10 = vector.extract_strided_slice %2 {offsets = [1, 0], sizes = [1, 128], strides = [1, 1]} : vector<3x128xf32> to vector<1x128xf32>
    %11 = vector.broadcast %10 : vector<1x128xf32> to vector<256x128xf32>
    %12 = arith.addf %9, %11 : vector<256x128xf32>
    %c0_9 = arith.constant 0 : index
    %c0_10 = arith.constant 0 : index
    %13 = vector.load %arg6[%c0_9, %c0_10] : memref<128x128xbf16, #tpu.memory_space<vmem>>, vector<128x128xbf16>
    %cst_11 = arith.constant dense<0.000000e+00> : vector<256x128xf32>
    %14 = tpu.matmul %1, %13, %cst_11 {dimension_numbers = #tpu.dot_dimension_numbers<[1], [0], [0], [1], [0, 0, 1, 1], [], []>} : vector<256x128xbf16>, vector<128x128xbf16>, vector<256x128xf32> -> vector<256x128xf32>
    %15 = vector.extract_strided_slice %2 {offsets = [2, 0], sizes = [1, 128], strides = [1, 1]} : vector<3x128xf32> to vector<1x128xf32>
    %16 = vector.broadcast %15 : vector<1x128xf32> to vector<256x128xf32>
    %17 = arith.addf %14, %16 : vector<256x128xf32>
    %cst_12 = arith.constant 0.176776692 : f32
    %18 = vector.broadcast %cst_12 : f32 to vector<256x128xf32>
    %19 = arith.mulf %7, %18 : vector<256x128xf32>
    %20 = arith.truncf %19 : vector<256x128xf32> to vector<256x128xbf16>
    %21 = arith.truncf %12 : vector<256x128xf32> to vector<256x128xbf16>
    %22 = arith.truncf %17 : vector<256x128xf32> to vector<256x128xbf16>
    %23 = vector.extract_strided_slice %20 {offsets = [0, 0], sizes = [256, 32], strides = [1, 1]} : vector<256x128xbf16> to vector<256x32xbf16>
    %24 = vector.extract_strided_slice %21 {offsets = [0, 0], sizes = [256, 32], strides = [1, 1]} : vector<256x128xbf16> to vector<256x32xbf16>
    "tpu.trace_start"() <{level = 10 : i32, message = "qd,kd->qk"}> : () -> ()
    %cst_13 = arith.constant dense<0.000000e+00> : vector<256x256xf32>
    %25 = tpu.matmul %23, %24, %cst_13 {dimension_numbers = #tpu.dot_dimension_numbers<[1], [1], [0], [0], [0, 0, 1, 0], [], []>} : vector<256x32xbf16>, vector<256x32xbf16>, vector<256x256xf32> -> vector<256x256xf32>
    "tpu.trace_stop"() : () -> ()
    %c0_14 = arith.constant 0 : index
    %c0_15 = arith.constant 0 : index
    %c0_16 = arith.constant 0 : index
    %c0_17 = arith.constant 0 : index
    %26 = vector.load %arg3[%c0_14, %c0_15, %c0_16, %c0_17] : memref<1x4x256x256xbf16, #tpu.memory_space<vmem>>, vector<1x1x256x256xbf16>
    %27 = vector.shape_cast %26 : vector<1x1x256x256xbf16> to vector<256x256xbf16>
    %28 = arith.extf %27 : vector<256x256xbf16> to vector<256x256xf32>
    %29 = arith.addf %25, %28 : vector<256x256xf32>
    %cst_18 = arith.constant dense<0xFF800000> : vector<256xf32>
    %30 = vector.multi_reduction <maximumf>, %29, %cst_18 [1] : vector<256x256xf32> to vector<256xf32>
    %31 = vector.shape_cast %30 : vector<256xf32> to vector<256x1xf32>
    %32 = vector.broadcast %31 : vector<256x1xf32> to vector<256x256xf32>
    %33 = arith.subf %29, %32 : vector<256x256xf32>
    %34 = math.exp %33 : vector<256x256xf32>
    %cst_19 = arith.constant dense<0.000000e+00> : vector<256xf32>
    %35 = vector.multi_reduction <add>, %34, %cst_19 [1] : vector<256x256xf32> to vector<256xf32>
    %36 = vector.shape_cast %35 : vector<256xf32> to vector<256x1xf32>
    %37 = tpu.reciprocal %36 {approx = true} : vector<256x1xf32> -> vector<256x1xf32>
    %38 = vector.broadcast %37 : vector<256x1xf32> to vector<256x256xf32>
    %39 = arith.mulf %34, %38 : vector<256x256xf32>
    %40 = arith.truncf %39 : vector<256x256xf32> to vector<256x256xbf16>
    %41 = vector.extract_strided_slice %22 {offsets = [0, 0], sizes = [256, 32], strides = [1, 1]} : vector<256x128xbf16> to vector<256x32xbf16>
    %cst_20 = arith.constant dense<0.000000e+00> : vector<256x32xf32>
    %42 = tpu.matmul %40, %41, %cst_20 {dimension_numbers = #tpu.dot_dimension_numbers<[1], [0], [0], [1], [0, 0, 1, 1], [], []>} : vector<256x256xbf16>, vector<256x32xbf16>, vector<256x32xf32> -> vector<256x32xf32>
    %43 = arith.truncf %42 : vector<256x32xf32> to vector<256x32xbf16>
    %44 = vector.extract_strided_slice %20 {offsets = [0, 32], sizes = [256, 32], strides = [1, 1]} : vector<256x128xbf16> to vector<256x32xbf16>
    %45 = vector.extract_strided_slice %21 {offsets = [0, 32], sizes = [256, 32], strides = [1, 1]} : vector<256x128xbf16> to vector<256x32xbf16>
    "tpu.trace_start"() <{level = 10 : i32, message = "qd,kd->qk"}> : () -> ()
    %cst_21 = arith.constant dense<0.000000e+00> : vector<256x256xf32>
    %46 = tpu.matmul %44, %45, %cst_21 {dimension_numbers = #tpu.dot_dimension_numbers<[1], [1], [0], [0], [0, 0, 1, 0], [], []>} : vector<256x32xbf16>, vector<256x32xbf16>, vector<256x256xf32> -> vector<256x256xf32>
    "tpu.trace_stop"() : () -> ()
    %c0_22 = arith.constant 0 : index
    %c1 = arith.constant 1 : index
    %c0_23 = arith.constant 0 : index
    %c0_24 = arith.constant 0 : index
    %47 = vector.load %arg3[%c0_22, %c1, %c0_23, %c0_24] : memref<1x4x256x256xbf16, #tpu.memory_space<vmem>>, vector<1x1x256x256xbf16>
    %48 = vector.shape_cast %47 : vector<1x1x256x256xbf16> to vector<256x256xbf16>
    %49 = arith.extf %48 : vector<256x256xbf16> to vector<256x256xf32>
    %50 = arith.addf %46, %49 : vector<256x256xf32>
    %cst_25 = arith.constant dense<0xFF800000> : vector<256xf32>
    %51 = vector.multi_reduction <maximumf>, %50, %cst_25 [1] : vector<256x256xf32> to vector<256xf32>
    %52 = vector.shape_cast %51 : vector<256xf32> to vector<256x1xf32>
    %53 = vector.broadcast %52 : vector<256x1xf32> to vector<256x256xf32>
    %54 = arith.subf %50, %53 : vector<256x256xf32>
    %55 = math.exp %54 : vector<256x256xf32>
    %cst_26 = arith.constant dense<0.000000e+00> : vector<256xf32>
    %56 = vector.multi_reduction <add>, %55, %cst_26 [1] : vector<256x256xf32> to vector<256xf32>
    %57 = vector.shape_cast %56 : vector<256xf32> to vector<256x1xf32>
    %58 = tpu.reciprocal %57 {approx = true} : vector<256x1xf32> -> vector<256x1xf32>
    %59 = vector.broadcast %58 : vector<256x1xf32> to vector<256x256xf32>
    %60 = arith.mulf %55, %59 : vector<256x256xf32>
    %61 = arith.truncf %60 : vector<256x256xf32> to vector<256x256xbf16>
    %62 = vector.extract_strided_slice %22 {offsets = [0, 32], sizes = [256, 32], strides = [1, 1]} : vector<256x128xbf16> to vector<256x32xbf16>
    %cst_27 = arith.constant dense<0.000000e+00> : vector<256x32xf32>
    %63 = tpu.matmul %61, %62, %cst_27 {dimension_numbers = #tpu.dot_dimension_numbers<[1], [0], [0], [1], [0, 0, 1, 1], [], []>} : vector<256x256xbf16>, vector<256x32xbf16>, vector<256x32xf32> -> vector<256x32xf32>
    %64 = arith.truncf %63 : vector<256x32xf32> to vector<256x32xbf16>
    %65 = vector.extract_strided_slice %20 {offsets = [0, 64], sizes = [256, 32], strides = [1, 1]} : vector<256x128xbf16> to vector<256x32xbf16>
    %66 = vector.extract_strided_slice %21 {offsets = [0, 64], sizes = [256, 32], strides = [1, 1]} : vector<256x128xbf16> to vector<256x32xbf16>
    "tpu.trace_start"() <{level = 10 : i32, message = "qd,kd->qk"}> : () -> ()
    %cst_28 = arith.constant dense<0.000000e+00> : vector<256x256xf32>
    %67 = tpu.matmul %65, %66, %cst_28 {dimension_numbers = #tpu.dot_dimension_numbers<[1], [1], [0], [0], [0, 0, 1, 0], [], []>} : vector<256x32xbf16>, vector<256x32xbf16>, vector<256x256xf32> -> vector<256x256xf32>
    "tpu.trace_stop"() : () -> ()
    %c0_29 = arith.constant 0 : index
    %c2 = arith.constant 2 : index
    %c0_30 = arith.constant 0 : index
    %c0_31 = arith.constant 0 : index
    %68 = vector.load %arg3[%c0_29, %c2, %c0_30, %c0_31] : memref<1x4x256x256xbf16, #tpu.memory_space<vmem>>, vector<1x1x256x256xbf16>
    %69 = vector.shape_cast %68 : vector<1x1x256x256xbf16> to vector<256x256xbf16>
    %70 = arith.extf %69 : vector<256x256xbf16> to vector<256x256xf32>
    %71 = arith.addf %67, %70 : vector<256x256xf32>
    %cst_32 = arith.constant dense<0xFF800000> : vector<256xf32>
    %72 = vector.multi_reduction <maximumf>, %71, %cst_32 [1] : vector<256x256xf32> to vector<256xf32>
    %73 = vector.shape_cast %72 : vector<256xf32> to vector<256x1xf32>
    %74 = vector.broadcast %73 : vector<256x1xf32> to vector<256x256xf32>
    %75 = arith.subf %71, %74 : vector<256x256xf32>
    %76 = math.exp %75 : vector<256x256xf32>
    %cst_33 = arith.constant dense<0.000000e+00> : vector<256xf32>
    %77 = vector.multi_reduction <add>, %76, %cst_33 [1] : vector<256x256xf32> to vector<256xf32>
    %78 = vector.shape_cast %77 : vector<256xf32> to vector<256x1xf32>
    %79 = tpu.reciprocal %78 {approx = true} : vector<256x1xf32> -> vector<256x1xf32>
    %80 = vector.broadcast %79 : vector<256x1xf32> to vector<256x256xf32>
    %81 = arith.mulf %76, %80 : vector<256x256xf32>
    %82 = arith.truncf %81 : vector<256x256xf32> to vector<256x256xbf16>
    %83 = vector.extract_strided_slice %22 {offsets = [0, 64], sizes = [256, 32], strides = [1, 1]} : vector<256x128xbf16> to vector<256x32xbf16>
    %cst_34 = arith.constant dense<0.000000e+00> : vector<256x32xf32>
    %84 = tpu.matmul %82, %83, %cst_34 {dimension_numbers = #tpu.dot_dimension_numbers<[1], [0], [0], [1], [0, 0, 1, 1], [], []>} : vector<256x256xbf16>, vector<256x32xbf16>, vector<256x32xf32> -> vector<256x32xf32>
    %85 = arith.truncf %84 : vector<256x32xf32> to vector<256x32xbf16>
    %86 = vector.extract_strided_slice %20 {offsets = [0, 96], sizes = [256, 32], strides = [1, 1]} : vector<256x128xbf16> to vector<256x32xbf16>
    %87 = vector.extract_strided_slice %21 {offsets = [0, 96], sizes = [256, 32], strides = [1, 1]} : vector<256x128xbf16> to vector<256x32xbf16>
    "tpu.trace_start"() <{level = 10 : i32, message = "qd,kd->qk"}> : () -> ()
    %cst_35 = arith.constant dense<0.000000e+00> : vector<256x256xf32>
    %88 = tpu.matmul %86, %87, %cst_35 {dimension_numbers = #tpu.dot_dimension_numbers<[1], [1], [0], [0], [0, 0, 1, 0], [], []>} : vector<256x32xbf16>, vector<256x32xbf16>, vector<256x256xf32> -> vector<256x256xf32>
    "tpu.trace_stop"() : () -> ()
    %c0_36 = arith.constant 0 : index
    %c3 = arith.constant 3 : index
    %c0_37 = arith.constant 0 : index
    %c0_38 = arith.constant 0 : index
    %89 = vector.load %arg3[%c0_36, %c3, %c0_37, %c0_38] : memref<1x4x256x256xbf16, #tpu.memory_space<vmem>>, vector<1x1x256x256xbf16>
    %90 = vector.shape_cast %89 : vector<1x1x256x256xbf16> to vector<256x256xbf16>
    %91 = arith.extf %90 : vector<256x256xbf16> to vector<256x256xf32>
    %92 = arith.addf %88, %91 : vector<256x256xf32>
    %cst_39 = arith.constant dense<0xFF800000> : vector<256xf32>
    %93 = vector.multi_reduction <maximumf>, %92, %cst_39 [1] : vector<256x256xf32> to vector<256xf32>
    %94 = vector.shape_cast %93 : vector<256xf32> to vector<256x1xf32>
    %95 = vector.broadcast %94 : vector<256x1xf32> to vector<256x256xf32>
    %96 = arith.subf %92, %95 : vector<256x256xf32>
    %97 = math.exp %96 : vector<256x256xf32>
    %cst_40 = arith.constant dense<0.000000e+00> : vector<256xf32>
    %98 = vector.multi_reduction <add>, %97, %cst_40 [1] : vector<256x256xf32> to vector<256xf32>
    %99 = vector.shape_cast %98 : vector<256xf32> to vector<256x1xf32>
    %100 = tpu.reciprocal %99 {approx = true} : vector<256x1xf32> -> vector<256x1xf32>
    %101 = vector.broadcast %100 : vector<256x1xf32> to vector<256x256xf32>
    %102 = arith.mulf %97, %101 : vector<256x256xf32>
    %103 = arith.truncf %102 : vector<256x256xf32> to vector<256x256xbf16>
    %104 = vector.extract_strided_slice %22 {offsets = [0, 96], sizes = [256, 32], strides = [1, 1]} : vector<256x128xbf16> to vector<256x32xbf16>
    %cst_41 = arith.constant dense<0.000000e+00> : vector<256x32xf32>
    %105 = tpu.matmul %103, %104, %cst_41 {dimension_numbers = #tpu.dot_dimension_numbers<[1], [0], [0], [1], [0, 0, 1, 1], [], []>} : vector<256x256xbf16>, vector<256x32xbf16>, vector<256x32xf32> -> vector<256x32xf32>
    %106 = arith.truncf %105 : vector<256x32xf32> to vector<256x32xbf16>
    %107 = tpu.concatenate %43, %64, %85, %106 in 1 : vector<256x32xbf16>, vector<256x32xbf16>, vector<256x32xbf16>, vector<256x32xbf16> -> vector<256x128xbf16>
    %c0_42 = arith.constant 0 : index
    %c0_43 = arith.constant 0 : index
    %108 = vector.load %arg8[%c0_42, %c0_43] : memref<128x128xbf16, #tpu.memory_space<vmem>>, vector<128x128xbf16>
    %cst_44 = arith.constant dense<0.000000e+00> : vector<256x128xf32>
    %109 = tpu.matmul %107, %108, %cst_44 {dimension_numbers = #tpu.dot_dimension_numbers<[1], [0], [0], [1], [0, 0, 1, 1], [], []>} : vector<256x128xbf16>, vector<128x128xbf16>, vector<256x128xf32> -> vector<256x128xf32>
    %c0_45 = arith.constant 0 : index
    %c0_46 = arith.constant 0 : index
    %110 = vector.load %arg9[%c0_45, %c0_46] : memref<1x128xf32, #tpu.memory_space<vmem>>, vector<1x128xf32>
    %111 = vector.broadcast %110 : vector<1x128xf32> to vector<256x128xf32>
    %112 = arith.addf %109, %111 : vector<256x128xf32>
    %113 = arith.truncf %112 : vector<256x128xf32> to vector<256x128xbf16>
    %c0_47 = arith.constant 0 : index
    %c0_48 = arith.constant 0 : index
    %c0_49 = arith.constant 0 : index
    %114 = vector.load %arg10[%c0_47, %c0_48, %c0_49] : memref<1x256x128xbf16, #tpu.memory_space<vmem>>, vector<1x256x128xbf16>
    %115 = vector.shape_cast %114 : vector<1x256x128xbf16> to vector<256x128xbf16>
    %116 = vector.shape_cast %113 : vector<256x128xbf16> to vector<1x256x128xbf16>
    tpu.vector_store %arg10[%c0_47, %c0_48, %c0_49], %116 {strides = array<i32>} : memref<1x256x128xbf16, #tpu.memory_space<vmem>>, vector<1x256x128xbf16>,
    return
  }
  func.func @transform_0(%arg0: i32, %arg1: i32) -> (i32, i32, i32) {
    %c0_i32 = arith.constant 0 : i32
    %c0_i32_0 = arith.constant 0 : i32
    return %arg1, %arg0, %c0_i32 : i32, i32, i32
  }
  func.func @transform_1(%arg0: i32, %arg1: i32) -> (i32, i32, i32, i32) {
    %c0_i32 = arith.constant 0 : i32
    %c0_i32_0 = arith.constant 0 : i32
    %c0_i32_1 = arith.constant 0 : i32
    %c0_i32_2 = arith.constant 0 : i32
    return %arg0, %c0_i32, %c0_i32_0, %c0_i32_1 : i32, i32, i32, i32
  }
  func.func @transform_2(%arg0: i32, %arg1: i32) -> (i32, i32) {
    %c0_i32 = arith.constant 0 : i32
    %c0_i32_0 = arith.constant 0 : i32
    %c0_i32_1 = arith.constant 0 : i32
    return %c0_i32, %c0_i32_0 : i32, i32
  }
  func.func @transform_3(%arg0: i32, %arg1: i32) -> (i32, i32) {
    %c0_i32 = arith.constant 0 : i32
    %c0_i32_0 = arith.constant 0 : i32
    %c0_i32_1 = arith.constant 0 : i32
    return %c0_i32, %c0_i32_0 : i32, i32
  }
  func.func @transform_4(%arg0: i32, %arg1: i32) -> (i32, i32) {
    %c0_i32 = arith.constant 0 : i32
    %c0_i32_0 = arith.constant 0 : i32
    %c0_i32_1 = arith.constant 0 : i32
    return %c0_i32, %c0_i32_0 : i32, i32
  }
  func.func @transform_5(%arg0: i32, %arg1: i32) -> (i32, i32) {
    %c0_i32 = arith.constant 0 : i32
    %c0_i32_0 = arith.constant 0 : i32
    %c0_i32_1 = arith.constant 0 : i32
    return %c0_i32, %c0_i32_0 : i32, i32
  }
  func.func @transform_6(%arg0: i32, %arg1: i32) -> (i32, i32) {
    %c0_i32 = arith.constant 0 : i32
    %c0_i32_0 = arith.constant 0 : i32
    %c0_i32_1 = arith.constant 0 : i32
    return %c0_i32, %c0_i32_0 : i32, i32
  }
  func.func @transform_7(%arg0: i32, %arg1: i32) -> (i32, i32) {
    %c0_i32 = arith.constant 0 : i32
    %c0_i32_0 = arith.constant 0 : i32
    %c0_i32_1 = arith.constant 0 : i32
    return %c0_i32, %c0_i32_0 : i32, i32
  }
  func.func @transform_8(%arg0: i32, %arg1: i32) -> (i32, i32, i32) {
    %c0_i32 = arith.constant 0 : i32
    %c0_i32_0 = arith.constant 0 : i32
    return %arg1, %arg0, %c0_i32 : i32, i32, i32
  }
}

</mosaic_0001>

<bundles_post_ra>
// kernel: tpu_custom_call.1
= control target key start
LH: loop header
LB: loop body
LE: loop exit
PB: predicated region body
PF: predicated region fallthrough
CT: control target
= control target key end

     0   :  { %s14426_s0 = inlined_call_operand.hbm [shape: bf16[2,256,128], index: 0, kind: input, shape index: {}]   ;;  %s14427_s1 = inlined_call_operand.hbm [shape: bf16[1,4,256,256], index: 1, kind: input, shape index: {}]   ;;  %s14428_s2 = inlined_call_operand.hbm [shape: bf16[128,128], index: 2, kind: input, shape index: {}]   ;;  %s14429_s3 = inlined_call_operand.hbm [shape: bf16[128,128], index: 3, kind: input, shape index: {}]   ;;  %s14430_s4 = inlined_call_operand.hbm [shape: bf16[128,128], index: 4, kind: input, shape index: {}]   ;;  %s14431_s5 = inlined_call_operand.vmem [shape: f32[3,128], index: 5, kind: input, shape index: {}]   ;;  %s14432_s6 = inlined_call_operand.hbm [shape: bf16[128,128], index: 6, kind: input, shape index: {}]   ;;  %s14433_s7 = inlined_call_operand.vmem [shape: f32[1,128], index: 7, kind: input, shape index: {}]   ;;  %s14434_s8 = inlined_call_operand.hbm [shape: bf16[2,256,128], index: 8, kind: output, shape index: {}]  }
   0x1   :  { %14832 = sst [smem:[#allocation213_spill]] %s14433_s7 }
   0x2   :  { %14833 = sst [smem:[#allocation214_spill]] %s14434_s8 }
   0x3   :  { %13 = vsyncpa [#allocation3], 0 }
   0x4   :  { %15 = vsyncpa [#allocation3 + $0x1], 0 }
   0x5   :  { %16 = vsyncpa [#allocation6], 0 }
   0x6   :  { %17 = vsyncpa [#allocation9], 0 }
   0x7   :  { %18 = vsyncpa [#allocation12], 0 }
   0x8   :  { %19 = vsyncpa [#allocation4], 0 }
   0x9   :  { %21 = vsyncpa [#allocation4 + $0x1], 0  ;;  %s9350_s27 = smov 0   ;;  %s9352_s28 = smov 0  }
   0xa   :  { %s9354_s29 = smov 0   ;;  %s9356_s30 = smov 0  }
   0xb   :  { %s9358_s9 = smov 0   ;;  %s9360_s10 = smov 0  }
   0xc LB: > { %14834 = sst [smem:[#allocation19_spill]] %s9280_s30  ;;  %s14438_s11 = sadd.s32 4294967295, %s9288_s10   ;;  %s9288_s10 = sphi %s9360_s10, %s27_s10   ;;  %s9284_s9 = sphi %s9358_s9, %s16025_s9   ;;  %s9280_s30 = sphi %s9356_s30, %s16024_s30   ;;  %s9276_s29 = sphi %s9354_s29, %s16023_s29   ;;  %s9272_s28 = sphi %s9352_s28, %s16022_s28   ;;  %s9268_s27 = sphi %s9350_s27, %s16021_s27  }
   0xd   : > { %p6827_p0 = scmp.ge.s32.totalorder %s9288_s10, 1  ;;  %p9384_p1 = scmp.eq.s32.totalorder %s14438_s11, 0 }
   0xe   : > { %p252_p2 = scmp.lt.s32.totalorder %s9288_s10, 3  ;;  %s9290_s14 = smov [#allocation5]  }
   0xf   : > { %s14835_s12 = scalar_select %p9384_p1, 1, 0 }
  0x10   : > { %p9389_p3 = pnand %p6827_p0, %p252_p2  ;;  %s267_s15 = sshll.u32 %s9290_s14, 4  ;;  %s268_s15 = int_to_ptr.vmem [resolvable:$true] %s267_s15 }
  0x11   : > { %s9291_s17 = smov [#allocation8]   ;;  %s9024_s21 = scalar_lea.hbm %s14427_s1, 16384 }
  0x12   : > { %s14836_s13 = scalar_select %p9389_p3, 1, 0 }
  0x13   : > { %p8108_p4 = pneg %p9389_p3  ;;  %s293_s18 = sshll.u32 %s9291_s17, 4  ;;  %s294_s18 = int_to_ptr.vmem [resolvable:$true] %s293_s18 }
  0x14   : > { %p9025_p7 = scmp.ne.s32.totalorder %s14427_s1, %s9024_s21  ;;  %p9031_p11 = scmp.lt.u32.totalorder %s9024_s21, %s14427_s1 }
  0x15   : > { %p9398_p6 = pnand %p8108_p4, %p9384_p1 }
  0x17   : > { %p9410_p8 = pneg %p9398_p6 }
  0x19   : > { %p9027_p9 = pnand %p9410_p8, %p9025_p7 }
  0x1b   : > { %p9028_p10 = pneg %p9027_p9 }
  0x1d   : > { %p9033_p12 = pnand %p9031_p11, %p9028_p10 }
  0x1f   : > { %9036 = shalt.err (!%p9033_p12)
}
  0x20   : > { %s9037_s14 = scalar_lea.vmem %s268_s15, 16384  ;;  %p9045_p4 = scmp.lt.s32.totalorder %s268_s15, %s268_s15 }
  0x21   : > { %p9038_p13 = scmp.ne.s32.totalorder %s268_s15, %s9037_s14  ;;  %p9046_p5 = scmp.lt.s32.totalorder %s9037_s14, %s9037_s14 }
  0x23   : > { %p9040_p0 = pnand %p9038_p13, %p9410_p8  ;;  %p9047_p3 = por %p9046_p5, %p9045_p4 }
  0x25   : > { %p9041_p2 = pneg %p9040_p0 }
  0x27   : > { %p9048_p1 = pnand %p9047_p3, %p9041_p2 }
  0x29   : > { %9051 = shalt.err (!%p9048_p1)
}
  0x2a   : > { %s9292_s17 = smov 128   ;;  %s9293_s19 = smov 8  }
  0x2b   : > { %8111 = dma.hbm_to_vmem [thread:$0]  (!%p9398_p6), %s14427_s1, 16384, %s268_s15, [#allocation6], %s9292_s17, %s9292_s17, %s9293_s19  }
  0x2c   : > { %s9294_s22 = smov [#allocation7]   ;;  %s9052_s11 = scalar_lea.hbm %s14429_s3, 1024 }
  0x2d   : > { %s280_s23 = sshll.u32 %s9294_s22, 4  ;;  %p9053_p1 = scmp.ne.s32.totalorder %s14429_s3, %s9052_s11  ;;  %s281_s23 = int_to_ptr.vmem [resolvable:$true] %s280_s23 }
  0x2e   : > { %p9059_p7 = scmp.lt.u32.totalorder %s9052_s11, %s14429_s3 }
  0x2f   : > { %p9055_p3 = pnand %p9053_p1, %p9410_p8 }
  0x31   : > { %p9056_p5 = pneg %p9055_p3 }
  0x33   : > { %p9061_p9 = pnand %p9059_p7, %p9056_p5 }
  0x35   : > { %9064 = shalt.err (!%p9061_p9)
}
  0x36   : > { %s9065_s15 = scalar_lea.vmem %s294_s18, 1024  ;;  %p9073_p13 = scmp.lt.s32.totalorder %s294_s18, %s294_s18 }
  0x37   : > { %p9066_p10 = scmp.ne.s32.totalorder %s294_s18, %s9065_s15  ;;  %p9074_p0 = scmp.lt.s32.totalorder %s9065_s15, %s9065_s15 }
  0x39   : > { %p9068_p11 = pnand %p9066_p10, %p9410_p8  ;;  %p9075_p2 = por %p9074_p0, %p9073_p13 }
  0x3b   : > { %p9069_p12 = pneg %p9068_p11 }
  0x3d   : > { %p9076_p4 = pnand %p9075_p2, %p9069_p12 }
  0x3f   : > { %9079 = shalt.err (!%p9076_p4)
}
  0x40   : > { %s14440_s8 = smov 64   ;;  %s9296_s17 = smov 4  }
  0x41   : > { %8117 = dma.hbm_to_vmem [thread:$0]  (!%p9398_p6), %s14429_s3, 1024, %s294_s18, [#allocation9], %s14440_s8, %s14440_s8, %s9296_s17  }
  0x42   : > { %s9080_s20 = scalar_lea.hbm %s14428_s2, 1024 }
  0x43   : > { %p9081_p1 = scmp.ne.s32.totalorder %s14428_s2, %s9080_s20  ;;  %p9087_p7 = scmp.lt.u32.totalorder %s9080_s20, %s14428_s2 }
  0x45   : > { %p9083_p3 = pnand %p9081_p1, %p9410_p8 }
  0x47   : > { %p9084_p5 = pneg %p9083_p3 }
  0x49   : > { %p9089_p9 = pnand %p9087_p7, %p9084_p5 }
  0x4b   : > { %9092 = shalt.err (!%p9089_p9)
}
  0x4c   : > { %s9093_s14 = scalar_lea.vmem %s281_s23, 1024  ;;  %p9101_p13 = scmp.lt.s32.totalorder %s281_s23, %s281_s23 }
  0x4d   : > { %p9094_p10 = scmp.ne.s32.totalorder %s281_s23, %s9093_s14  ;;  %p9102_p0 = scmp.lt.s32.totalorder %s9093_s14, %s9093_s14 }
  0x4f   : > { %p9096_p11 = pnand %p9094_p10, %p9410_p8  ;;  %p9103_p2 = por %p9102_p0, %p9101_p13 }
  0x51   : > { %p9097_p12 = pneg %p9096_p11 }
  0x53   : > { %p9104_p4 = pnand %p9103_p2, %p9097_p12 }
  0x55   : > { %9107 = shalt.err (!%p9104_p4)
}
  0x56   : > { %8114 = dma.hbm_to_vmem [thread:$0]  (!%p9398_p6), %s14428_s2, 1024, %s281_s23, [#allocation6], %s14440_s8, %s14440_s8, %s9296_s17  }
  0x57   : > { %s9297_s7 = smov [#allocation10]   ;;  %s9298_s11 = smov [#allocation11]  }
  0x58   : > { %s306_s30 = sshll.u32 %s9297_s7, 4  ;;  %s322_s19 = sshll.u32 %s9298_s11, 4  ;;  %s307_s30 = int_to_ptr.vmem [resolvable:$true] %s306_s30  ;;  %s323_s19 = int_to_ptr.vmem [resolvable:$true] %s322_s19 }
  0x59   : > { %s9108_s22 = scalar_lea.hbm %s14430_s4, 1024 }
  0x5a   : > { %p9109_p1 = scmp.ne.s32.totalorder %s14430_s4, %s9108_s22  ;;  %p9115_p7 = scmp.lt.u32.totalorder %s9108_s22, %s14430_s4 }
  0x5c   : > { %p9111_p3 = pnand %p9109_p1, %p9410_p8 }
  0x5e   : > { %p9112_p5 = pneg %p9111_p3 }
  0x60   : > { %p9117_p9 = pnand %p9115_p7, %p9112_p5 }
  0x62   : > { %9120 = shalt.err (!%p9117_p9)
}
  0x63   : > { %s9121_s23 = scalar_lea.vmem %s307_s30, 1024  ;;  %p9129_p13 = scmp.lt.s32.totalorder %s307_s30, %s307_s30 }
  0x64   : > { %p9122_p10 = scmp.ne.s32.totalorder %s307_s30, %s9121_s23  ;;  %p9130_p0 = scmp.lt.s32.totalorder %s9121_s23, %s9121_s23 }
  0x66   : > { %p9124_p11 = pnand %p9122_p10, %p9410_p8  ;;  %p9131_p2 = por %p9130_p0, %p9129_p13 }
  0x68   : > { %p9125_p12 = pneg %p9124_p11 }
  0x6a   : > { %p9132_p4 = pnand %p9131_p2, %p9125_p12 }
  0x6c   : > { %9135 = shalt.err (!%p9132_p4)
}
  0x6d   : > { %8120 = dma.hbm_to_vmem [thread:$0]  (!%p9398_p6), %s14430_s4, 1024, %s307_s30, [#allocation9], %s14440_s8, %s14440_s8, %s9296_s17  }
  0x6e   : > { %s9136_s21 = scalar_lea.hbm %s14432_s6, 1024 }
  0x6f   : > { %p9137_p1 = scmp.ne.s32.totalorder %s14432_s6, %s9136_s21  ;;  %p9143_p7 = scmp.lt.u32.totalorder %s9136_s21, %s14432_s6 }
  0x71   : > { %p9139_p3 = pnand %p9137_p1, %p9410_p8 }
  0x73   : > { %p9140_p5 = pneg %p9139_p3 }
  0x75   : > { %p9145_p9 = pnand %p9143_p7, %p9140_p5 }
  0x77   : > { %9148 = shalt.err (!%p9145_p9)
}
  0x78   : > { %s9149_s18 = scalar_lea.vmem %s323_s19, 1024  ;;  %p9157_p13 = scmp.lt.s32.totalorder %s323_s19, %s323_s19 }
  0x79   : > { %p9150_p10 = scmp.ne.s32.totalorder %s323_s19, %s9149_s18  ;;  %p9158_p0 = scmp.lt.s32.totalorder %s9149_s18, %s9149_s18 }
  0x7b   : > { %p9152_p11 = pnand %p9150_p10, %p9410_p8  ;;  %p9159_p2 = por %p9158_p0, %p9157_p13 }
  0x7d   : > { %p9153_p12 = pneg %p9152_p11 }
  0x7f   : > { %p9160_p4 = pnand %p9159_p2, %p9153_p12 }
  0x81   : > { %9163 = shalt.err (!%p9160_p4)
}
  0x82   : > { %8123 = dma.hbm_to_vmem [thread:$0]  (!%p9398_p6), %s14432_s6, 1024, %s323_s19, [#allocation12], %s14440_s8, %s14440_s8, %s9296_s17  }
  0x83   : > { %s6826_s16 = sadd.s32 4294967294, %s9288_s10   ;;  %s36_s24 = sadd.s32 1, %s9284_s9 }
  0x84   : > { %s48_s15 = sadd.s32 1, %s9276_s29  ;;  %p37_p8 = scmp.ge.s32.totalorder %s36_s24, 2 }
  0x85   : > { %p55_p1 = scmp.ne.s32.totalorder %s9276_s29, %s9272_s28  ;;  %p56_p3 = scmp.eq.s32.totalorder %s9288_s10, 0 }
  0x86   : > { %p61_p5 = scmp.ne.s32.totalorder %s9272_s28, %s9268_s27  ;;  %s16027_s24 = smov (%p37_p8, %s36_s24), 0 }
  0x87   : > { %p9520_p7 = por %p56_p3, %p55_p1  ;;  %p14840_p9 = scmp.ne.s32.totalorder %s14835_s12, 0 }
  0x88   : > { %s43_s11 = ssub.s32 %s9284_s9, %s16027_s24  ;;  %s14842_s20 = sadd.s32 4294967295, %s9288_s10  }
  0x89   : > { %p9526_p6 = por %p14840_p9, %p61_p5  ;;  %p239_p10 = scmp.eq.s32.totalorder %s14842_s20, 1 }
  0x8a   : > { %p46_p11 = scmp.eq.s32.totalorder %s43_s11, 0  ;;  %p245_p12 = scmp.eq.s32.totalorder %s6826_s16, 1 }
  0x8b   : > { %p9534_p13 = por %p239_p10, %p55_p1  ;;  %p8137_p0 = scmp.lt.s32.totalorder %s9288_s10, 2 }
  0x8c   : > { %s9540_s22 = scalar_select %p46_p11, %s9276_s29, %s48_s15  }
  0x8d   : > { %s14843_s21 = scalar_select %p9534_p13, 1, 0 }
  0x8e   : > { %p9542_p2 = por %p245_p12, %p61_p5  ;;  %s339_s26 = sand.u32 1, %s9276_s29  }
  0x8f   : > { %s6834_s14 = sshll.u32 %s339_s26, 7  ;;  %s6995_s18 = sshll.u32 %s9284_s9, 11 }
  0x90   : > { %s14844_s25 = scalar_select %p9542_p2, 1, 0 }
  0x91   : > { %s9551_s20 = scalar_lea.hbm %s14426_s0, %s6995_s18  ;;  %s343_s16 = scalar_lea.vmem [#allocation2], %s6834_s14 }
  0x92   : > { %s352_s11 = sshll.u32 %s343_s16, 4  ;;  %p9557_p4 = pnand %p8137_p0, %p9520_p7  ;;  %s9553_s11 = int_to_ptr.vmem [resolvable:$true] %s352_s11 }
  0x93   : > { %s9561_s8 = scalar_lea.sflag [#allocation3], %s339_s26  ;;  %s9164_s30 = scalar_lea.hbm %s9551_s20, 2048 }
  0x94   : > { %p9165_p8 = scmp.ne.s32.totalorder %s9551_s20, %s9164_s30  ;;  %p9166_p1 = pneg %p9557_p4 }
  0x95   : > { %s9169_s7 = scalar_lea.hbm %s14426_s0, 4096  ;;  %p9170_p7 = scmp.lt.u32.totalorder %s9551_s20, %s14426_s0 }
  0x96   : > { %p9167_p3 = pnand %p9166_p1, %p9165_p8  ;;  %p9171_p9 = scmp.lt.u32.totalorder %s9169_s7, %s9164_s30 }
  0x97   : > { %p9173_p11 = scmp.lt.u32.totalorder %s9164_s30, %s9551_s20 }
  0x98   : > { %p9168_p5 = pneg %p9167_p3  ;;  %p9172_p10 = por %p9171_p9, %p9170_p7 }
  0x9a   : > { %p9174_p12 = por %p9173_p11, %p9172_p10 }
  0x9c   : > { %p9175_p0 = pnand %p9174_p12, %p9168_p5 }
  0x9e   : > { %9178 = shalt.err (!%p9175_p0)
}
  0x9f   : > { %s9179_s26 = scalar_lea.vmem %s9553_s11, 2048  ;;  %s9299_s14 = smov [#allocation2]  }
  0xa0   : > { %p9180_p8 = scmp.ne.s32.totalorder %s9553_s11, %s9179_s26  ;;  %s9184_s18 = sshll.u32 %s9299_s14, 4  ;;  %s9185_s18 = int_to_ptr.vmem [resolvable:$false] %s9184_s18 }
  0xa1   : > { %s9186_s23 = scalar_lea.vmem %s9185_s18, 4096  ;;  %p9187_p13 = scmp.lt.s32.totalorder %s9553_s11, %s9185_s18 }
  0xa2   : > { %p9182_p3 = pnand %p9180_p8, %p9166_p1  ;;  %p9188_p7 = scmp.lt.s32.totalorder %s9186_s23, %s9179_s26 }
  0xa4   : > { %p9183_p2 = pneg %p9182_p3  ;;  %p9189_p9 = por %p9188_p7, %p9187_p13 }
  0xa6   : > { %p9190_p10 = pnand %p9189_p9, %p9183_p2 }
  0xa8   : > { %9193 = shalt.err (!%p9190_p10)
}
  0xa9   : > { %s14846_s30 = smov 64   ;;  %p14847_p1 = scmp.ne.s32.totalorder %s14836_s13, 0 }
  0xaa   : > { %8127 = dma.hbm_to_vmem [thread:$0]  (!%p9557_p4), %s9551_s20, 2048, %s9553_s11, %s9561_s8, %s14846_s30, %s14846_s30, %s9296_s17  }
  0xab   : > { %364 = sbr.rel (%p14847_p1) target bundleno = 3424 (0xd60), region = 52 }
  0xb2   : > { %s9595_s7 = sand.u32 1, %s9272_s28  }
  0xb3   : > { %s6838_s16 = sshll.u32 %s9595_s7, 7  ;;  %s367_s26 = scalar_lea.sflag [#allocation3], %s9595_s7 }
  0xb4   : > { %s9601_s15 = scalar_lea.vmem [#allocation2], %s6838_s16 }
  0xb5   : > { %9247 = dma.done.wait (%p9526_p6), %s367_s26, 2048  }
  0xb6   : > { %9249 = vsyncadd (%p9526_p6), %s367_s26, 4294965248  ;;  %p14848_p13 = scmp.ne.s32.totalorder %s14835_s12, 0 }
  0xb8   : > { %9251 = dma.done.wait (%p14848_p13), [#allocation6], 17408  }
  0xb9   : > { %9253 = vsyncadd (%p14848_p13), [#allocation6], 4294949888 }
  0xba   : > { %9255 = dma.done.wait (%p14848_p13), [#allocation9], 2048  }
  0xbb   : > { %9257 = vsyncadd (%p14848_p13), [#allocation9], 4294965248 }
  0xbc   : > { %9259 = dma.done.wait (%p14848_p13), [#allocation12], 1024  }
  0xbd   : > { %9261 = vsyncadd (%p14848_p13), [#allocation12], 4294966272  ;;  %v8205_v0 = vld [vmem:[#allocation8] sm:$0xff]   ;;  %v8207_v2 = vld [vmem:[#allocation8 + $0x8] sm:$0xff]   ;;  %v475_v32 = vlaneseq  ;;  %s9300_s8 = smov 64   ;;  %s9301_s17 = smov 96  }
  0xbe   : > { %v8206_v1 = vld [vmem:[#allocation7] sm:$0xff]   ;;  %7908 = vmatprep.subr.bf16.mxu1 %v8205_v0  ;;  %v8208_v3 = vld [vmem:[#allocation7 + $0x8] sm:$0xff]   ;;  %v8209_v4 = vld [vmem:[#allocation8 + $0x10] sm:$0xff]   ;;  %s9302_s19 = smov 32   ;;  %vm1418_vm0 = vcmask 261120   ;;  %vm6231_vm1 = vcmask 785408  }
  0xbf   : > { %7909 = vmatpush3.bf16.msra.mxu1 %v8205_v0  ;;  %7860 = vmatprep.subr.bf16.mxu0 %v8206_v1  ;;  %v8210_v5 = vld [vmem:[#allocation7 + $0x10] sm:$0xff]   ;;  %v8211_v6 = vld [vmem:[#allocation8 + $0x18] sm:$0xff]   ;;  %v8213_v8 = vld [vmem:[#allocation8 + $0x20] sm:$0xff]   ;;  %v9692_v33 = vshrl.u32 %v475_v32, 7  ;;  %vm6198_vm2 = vcmask 523264   ;;  %s16015_s23 = sld [smem:[#allocation213_spill]] }
  0xc0   : > { %7861 = vmatpush3.bf16.msra.mxu0 %v8206_v1  ;;  %7910 = vmatprep.subr.bf16.mxu1 %v8207_v2  ;;  %v8212_v7 = vld [vmem:[#allocation7 + $0x18] sm:$0xff]   ;;  %v8214_v9 = vld [vmem:[#allocation7 + $0x20] sm:$0xff]   ;;  %v8215_v10 = vld [vmem:[#allocation8 + $0x28] sm:$0xff]   ;;  %s14322_s30 = scalar_lea.vmem [#allocation13], %s6838_s16  ;;  %s16016_s16 = sld [smem:[#allocation19_spill]] }
  0xc1   : > { %7862 = vmatprep.subr.bf16.mxu0 %v8208_v3  ;;  %v9620_v11 = vld [vmem:[%s9601_s15] sm:$0xff]   ;;  %v8216_v12 = vld [vmem:[#allocation7 + $0x28] sm:$0xff]   ;;  %v8217_v13 = vld [vmem:[#allocation8 + $0x30] sm:$0xff]   ;;  %14849 = vst [vmem:[#allocation20_spill] sm:$0xff] %v9692_v33  ;;  %v802_v34 = vsub.s32 1, %v9692_v33  ;;  %v477_v35 = vsub.s32 0, %v9692_v33 }
  0xc2   : > { %7924 = vmatprep.mubr.bf16.mxu1 %v9620_v11  ;;  %7876 = vmatprep.mubr.bf16.mxu0 %v9620_v11  ;;  %v8218_v14 = vld [vmem:[#allocation7 + $0x30] sm:$0xff]   ;;  %v8219_v15 = vld [vmem:[#allocation8 + $0x38] sm:$0xff]   ;;  %v8222_v17 = vld [vmem:[%s9601_s15 + $0x8] sm:$0xff]   ;;  %s6673_s20 = scalar_lea.sflag [#allocation4], %s9595_s7  ;;  %p16018_p2 = scmp.ne.s32.totalorder %s14843_s21, 0 }
  0xc3   : > { %7911 = vmatpush3.bf16.msra.mxu1 %v8207_v2  ;;  %v8220_v16 = vld [vmem:[#allocation7 + $0x38] sm:$0xff]   ;;  %v8223_v18 = vld [vmem:[%s9601_s15 + $0x10] sm:$0xff]   ;;  %v9630_v20 = vld [vmem:[%s9601_s15 + $0x20] sm:$0xff]   ;;  %s9303_s14 = smov [#allocation13]  }
  0xc4   : > { %7863 = vmatpush3.bf16.msra.mxu0 %v8208_v3  ;;  %7912 = vmatprep.subr.bf16.mxu1 %v8209_v4  ;;  %v9627_v19 = vld [vmem:[%s9601_s15 + $0x18] sm:$0xff]   ;;  %v9637_v21 = vld [vmem:[%s9601_s15 + $0x28] sm:$0xff]   ;;  %v9640_v22 = vld [vmem:[%s9601_s15 + $0x30] sm:$0xff]   ;;  %s9198_s18 = sshll.u32 %s9303_s14, 4  ;;  %s9199_s18 = int_to_ptr.vmem [resolvable:$false] %s9198_s18 }
  0xc5   : > { %7864 = vmatprep.subr.bf16.mxu0 %v8210_v5  ;;  %v9647_v23 = vld [vmem:[%s9601_s15 + $0x38] sm:$0xff]   ;;  %v9650_v24 = vld [vmem:[%s9601_s15 + $0x40] sm:$0xff]   ;;  %v9657_v25 = vld [vmem:[%s9601_s15 + $0x48] sm:$0xff]  }
  0xc6   : > { %v9660_v26 = vld [vmem:[%s9601_s15 + $0x50] sm:$0xff]   ;;  %v9667_v27 = vld [vmem:[%s9601_s15 + $0x58] sm:$0xff]   ;;  %v9670_v28 = vld [vmem:[%s9601_s15 + $0x60] sm:$0xff]   ;;  %s7028_s26 = sshll.u32 %s16016_s16, 11 }
  0xc7   : > { %7913 = vmatpush3.bf16.msra.mxu1 %v8209_v4  ;;  %v9677_v29 = vld [vmem:[%s9601_s15 + $0x68] sm:$0xff]   ;;  %v9680_v30 = vld [vmem:[%s9601_s15 + $0x70] sm:$0xff]   ;;  %v9687_v31 = vld [vmem:[%s9601_s15 + $0x78] sm:$0xff]  }
  0xc8   : > { %7865 = vmatpush3.bf16.msra.mxu0 %v8210_v5  ;;  %7914 = vmatprep.subr.bf16.mxu1 %v8211_v6  ;;  %v458_v36 = vld [vmem:[%s14431_s5] sm:$0x7] }
  0xc9   : > { %7866 = vmatprep.subr.bf16.mxu0 %v8212_v7  ;;  %v9699_v37 = vrot.slane %v458_v36, %v802_v34  ;;  %v9701_v38 = vrot.slane %v458_v36, %v477_v35 }
  0xcb   : > { %7915 = vmatpush3.bf16.msra.mxu1 %v8211_v6 }
  0xcc   : > { %7867 = vmatpush3.bf16.msra.mxu0 %v8212_v7  ;;  %7916 = vmatprep.subr.bf16.mxu1 %v8213_v8 }
  0xcd   : > { %7868 = vmatprep.subr.bf16.mxu0 %v8214_v9 }
  0xcf   : > { %7917 = vmatpush3.bf16.msra.mxu1 %v8213_v8 }
  0xd0   : > { %7869 = vmatpush3.bf16.msra.mxu0 %v8214_v9  ;;  %7918 = vmatprep.subr.bf16.mxu1 %v8215_v10 }
  0xd1   : > { %7870 = vmatprep.subr.bf16.mxu0 %v8216_v12 }
  0xd3   : > { %7919 = vmatpush3.bf16.msra.mxu1 %v8215_v10 }
  0xd4   : > { %7871 = vmatpush3.bf16.msra.mxu0 %v8216_v12  ;;  %7920 = vmatprep.subr.bf16.mxu1 %v8217_v13 }
  0xd5   : > { %7872 = vmatprep.subr.bf16.mxu0 %v8218_v14 }
  0xd7   : > { %7921 = vmatpush3.bf16.msra.mxu1 %v8217_v13 }
  0xd8   : > { %7873 = vmatpush3.bf16.msra.mxu0 %v8218_v14  ;;  %7922 = vmatprep.subr.bf16.mxu1 %v8219_v15 }
  0xd9   : > { %7874 = vmatprep.subr.bf16.mxu0 %v8220_v16 }
  0xdb   : > { %7923 = vmatpush3.bf16.msra.mxu1 %v8219_v15 }
  0xdc   : > { %7875 = vmatpush3.bf16.msra.mxu0 %v8220_v16 }
  0xde   : > { %7925 = vmatmul.mubr.bf16.vlgmr.msra.gmra.mrb[0].mxu1 %v8222_v17 }
  0xdf   : > { %7877 = vmatmul.mubr.bf16.vlgmr.msra.gmra.mrb[0].mxu0 %v8222_v17  ;;  %7928 = vmatprep.mubr.bf16.mxu1 %v8223_v18 }
  0xe0   : > { %7880 = vmatprep.mubr.bf16.mxu0 %v8223_v18 }
  0xe6   : > { %7929 = vmatmul.mubr.bf16.gmra.mrb[4].mxu1 %v9627_v19 }
  0xe7   : > { %7932 = vmatprep.mubr.bf16.mxu1 %v9630_v20  ;;  %7881 = vmatmul.mubr.bf16.gmra.mrb[4].mxu0 %v9627_v19 }
  0xe8   : > { %7884 = vmatprep.mubr.bf16.mxu0 %v9630_v20 }
  0xee   : > { %7933 = vmatmul.mubr.bf16.gmra.mrb[8].mxu1 %v9637_v21 }
  0xef   : > { %7936 = vmatprep.mubr.bf16.mxu1 %v9640_v22  ;;  %7885 = vmatmul.mubr.bf16.gmra.mrb[8].mxu0 %v9637_v21 }
  0xf0   : > { %7888 = vmatprep.mubr.bf16.mxu0 %v9640_v22 }
  0xf6   : > { %7937 = vmatmul.mubr.bf16.gmra.mrb[12].mxu1 %v9647_v23 }
  0xf7   : > { %7940 = vmatprep.mubr.bf16.mxu1 %v9650_v24  ;;  %7889 = vmatmul.mubr.bf16.gmra.mrb[12].mxu0 %v9647_v23 }
  0xf8   : > { %7892 = vmatprep.mubr.bf16.mxu0 %v9650_v24 }
  0xfe   : > { %7941 = vmatmul.mubr.bf16.gmra.mrb[16].mxu1 %v9657_v25 }
  0xff   : > { %7944 = vmatprep.mubr.bf16.mxu1 %v9660_v26  ;;  %7893 = vmatmul.mubr.bf16.gmra.mrb[16].mxu0 %v9657_v25 }
 0x100   : > { %7896 = vmatprep.mubr.bf16.mxu0 %v9660_v26 }
 0x106   : > { %7945 = vmatmul.mubr.bf16.gmra.mrb[20].mxu1 %v9667_v27 }
 0x107   : > { %7948 = vmatprep.mubr.bf16.mxu1 %v9670_v28  ;;  %7897 = vmatmul.mubr.bf16.gmra.mrb[20].mxu0 %v9667_v27 }
 0x108   : > { %7900 = vmatprep.mubr.bf16.mxu0 %v9670_v28 }
 0x10e   : > { %7949 = vmatmul.mubr.bf16.gmra.mrb[24].mxu1 %v9677_v29 }
 0x10f   : > { %7952 = vmatprep.mubr.bf16.mxu1 %v9680_v30  ;;  %7901 = vmatmul.mubr.bf16.gmra.mrb[24].mxu0 %v9677_v29 }
 0x110   : > { %7904 = vmatprep.mubr.bf16.mxu0 %v9680_v30 }
 0x116   : > { %7953 = vmatmul.mubr.bf16.gmra.mrb[28].mxu1 %v9687_v31 }
 0x117   : > { %7905 = vmatmul.mubr.bf16.gmra.mrb[28].mxu0 %v9687_v31 }
 0x118   : > { %7972 = vmatprep.mubr.bf16.mxu0 %v9620_v11 }
 0x1b1   : > { %v7926_v39 = vpop.f32.mrb[0].mxu1 }
 0x1b2   : > { %v886_v40 = vpop.f32.mrb[1].mxu1  ;;  %v7878_v41 = vpop.f32.mrb[0].mxu0  ;;  %v895_v45 = vadd.f32 %v7926_v39, %v9699_v37 }
 0x1b3   : > { %v666_v42 = vadd.f32 %v7878_v41, %v9701_v38  ;;  %v7927_v43 = vpop.f32.mrb[2].mxu1  ;;  %v657_v44 = vpop.f32.mrb[1].mxu0  ;;  %v887_v50 = vadd.f32 %v886_v40, %v9699_v37 }
 0x1b4   : > { %v898_v46 = vadd.f32 %v7927_v43, %v9699_v37  ;;  %v658_v47 = vadd.f32 %v657_v44, %v9701_v38  ;;  %v889_v48 = vpop.f32.mrb[3].mxu1  ;;  %v7879_v49 = vpop.f32.mrb[2].mxu0 }
 0x1b5   : > { %v1244_v51 = vmul.f32 0.17677669, %v666_v42  ;;  %v890_v52 = vadd.f32 %v889_v48, %v9699_v37  ;;  %v669_v53 = vadd.f32 %v7879_v49, %v9701_v38  ;;  %v660_v54 = vpop.f32.mrb[3].mxu0 }
 0x1b6   : > { %v9710_v55 = vpack.c.bf16 %v898_v46, %v895_v45  ;;  %v1242_v56 = vmul.f32 0.17677669, %v658_v47  ;;  %v661_v57 = vadd.f32 %v660_v54, %v9701_v38 }
 0x1b7   : > { %v9713_v58 = vpack.c.bf16 %v890_v52, %v887_v50  ;;  %v1245_v59 = vmul.f32 0.17677669, %v669_v53 }
 0x1b8   : > { %v1243_v60 = vmul.f32 0.17677669, %v661_v57  ;;  %3763 = vrot.lane.b32.xlu0 %v9710_v55, %s9300_s8  ;;  %2560 = vrot.lane.b32.xlu1 %v9710_v55, %s9301_s17 }
 0x1b9   : > { %v9719_v61 = vpack.c.bf16 %v1245_v59, %v1244_v51  ;;  %v7930_v62 = vpop.f32.mrb[4].mxu1 }
 0x1ba   : > { %v9721_v63 = vpack.c.bf16 %v1243_v60, %v1242_v56  ;;  %v902_v0 = vpop.f32.mrb[5].mxu1  ;;  %v7882_v1 = vpop.f32.mrb[4].mxu0  ;;  %v911_v5 = vadd.f32 %v7930_v62, %v9699_v37 }
 0x1bb   : > { %14850 = vst [vmem:[#allocation21_spill] sm:$0xff] %v9719_v61  ;;  %v7931_v2 = vpop.f32.mrb[6].mxu1  ;;  %v682_v3 = vadd.f32 %v7882_v1, %v9701_v38  ;;  %v673_v4 = vpop.f32.mrb[5].mxu0  ;;  %v903_v10 = vadd.f32 %v902_v0, %v9699_v37 }
 0x1bc   : > { %14851 = vst [vmem:[#allocation22_spill] sm:$0xff] %v9721_v63  ;;  %4950 = vrot.lane.b32.xlu1 %v9710_v55, %s9302_s19  ;;  %2558 = vrot.lane.b32.xlu0 %v9713_v58, %s9301_s17  ;;  %v914_v6 = vadd.f32 %v7931_v2, %v9699_v37  ;;  %v905_v7 = vpop.f32.mrb[7].mxu1  ;;  %v674_v8 = vadd.f32 %v673_v4, %v9701_v38  ;;  %v7883_v9 = vpop.f32.mrb[6].mxu0 }
 0x1bd   : > { %7212 = vmatprep.mubr.msk.bf16.mxu1 %vm1418_vm0, %v9721_v63  ;;  %v906_v11 = vadd.f32 %v905_v7, %v9699_v37  ;;  %v1248_v12 = vmul.f32 0.17677669, %v682_v3  ;;  %v685_v13 = vadd.f32 %v7883_v9, %v9701_v38  ;;  %v676_v14 = vpop.f32.mrb[7].mxu0 }
 0x1be   : > { %v9736_v15 = vpack.c.bf16 %v914_v6, %v911_v5  ;;  %v1246_v16 = vmul.f32 0.17677669, %v674_v8  ;;  %v677_v17 = vadd.f32 %v676_v14, %v9701_v38 }
 0x1bf   : > { %v9739_v18 = vpack.c.bf16 %v906_v11, %v903_v10  ;;  %v1249_v32 = vmul.f32 0.17677669, %v685_v13 }
 0x1c0   : > { %3761 = vrot.lane.b32.xlu1 %v9713_v58, %s9300_s8  ;;  %2510 = vrot.lane.b32.xlu0 %v9721_v63, %s9301_s17  ;;  %v1247_v34 = vmul.f32 0.17677669, %v677_v17 }
 0x1c1   : > { %v7934_v35 = vpop.f32.mrb[8].mxu1  ;;  %v9745_v36 = vpack.c.bf16 %v1249_v32, %v1248_v12 }
 0x1c2   : > { %v918_v39 = vpop.f32.mrb[9].mxu1  ;;  %v9747_v40 = vpack.c.bf16 %v1247_v34, %v1246_v16  ;;  %v7886_v41 = vpop.f32.mrb[8].mxu0  ;;  %v927_v45 = vadd.f32 %v7934_v35, %v9699_v37 }
 0x1c3   : > { %14852 = vst [vmem:[#allocation23_spill] sm:$0xff] %v9745_v36  ;;  %v7935_v42 = vpop.f32.mrb[10].mxu1  ;;  %v698_v43 = vadd.f32 %v7886_v41, %v9701_v38  ;;  %v689_v44 = vpop.f32.mrb[9].mxu0  ;;  %v919_v50 = vadd.f32 %v918_v39, %v9699_v37 }
 0x1c4   : > { %14853 = vst [vmem:[#allocation24_spill] sm:$0xff] %v9747_v40  ;;  %4948 = vrot.lane.b32.xlu1 %v9713_v58, %s9302_s19  ;;  %3729 = vrot.lane.b32.xlu0 %v9721_v63, %s9300_s8  ;;  %v930_v46 = vadd.f32 %v7935_v42, %v9699_v37  ;;  %v921_v47 = vpop.f32.mrb[11].mxu1  ;;  %v690_v48 = vadd.f32 %v689_v44, %v9701_v38  ;;  %v7887_v49 = vpop.f32.mrb[10].mxu0 }
 0x1c5   : > { %v922_v51 = vadd.f32 %v921_v47, %v9699_v37  ;;  %v1252_v52 = vmul.f32 0.17677669, %v698_v43  ;;  %v701_v53 = vadd.f32 %v7887_v49, %v9701_v38  ;;  %v692_v54 = vpop.f32.mrb[11].mxu0 }
 0x1c6   : > { %v9760_v56 = vpack.c.bf16 %v930_v46, %v927_v45  ;;  %v1250_v57 = vmul.f32 0.17677669, %v690_v48  ;;  %v693_v59 = vadd.f32 %v692_v54, %v9701_v38 }
 0x1c7   : > { %v9763_v60 = vpack.c.bf16 %v922_v51, %v919_v50  ;;  %v1253_v62 = vmul.f32 0.17677669, %v701_v53 }
 0x1c8   : > { %2512 = vrot.lane.b32.xlu1 %v9719_v61, %s9301_s17  ;;  %2564 = vrot.lane.b32.xlu0 %v9736_v15, %s9301_s17  ;;  %v1251_v0 = vmul.f32 0.17677669, %v693_v59 }
 0x1c9   : > { %v7938_v1 = vpop.f32.mrb[12].mxu1  ;;  %v9769_v2 = vpack.c.bf16 %v1253_v62, %v1252_v52 }
 0x1ca   : > { %v934_v3 = vpop.f32.mrb[13].mxu1  ;;  %v9771_v4 = vpack.c.bf16 %v1251_v0, %v1250_v57  ;;  %v7890_v5 = vpop.f32.mrb[12].mxu0  ;;  %v943_v9 = vadd.f32 %v7938_v1, %v9699_v37 }
 0x1cb   : > { %14854 = vst [vmem:[#allocation25_spill] sm:$0xff] %v9769_v2  ;;  %v7939_v6 = vpop.f32.mrb[14].mxu1  ;;  %v714_v7 = vadd.f32 %v7890_v5, %v9701_v38  ;;  %v705_v8 = vpop.f32.mrb[13].mxu0  ;;  %v935_v14 = vadd.f32 %v934_v3, %v9699_v37 }
 0x1cc   : > { %14855 = vst [vmem:[#allocation26_spill] sm:$0xff] %v9771_v4  ;;  %3731 = vrot.lane.b32.xlu1 %v9719_v61, %s9300_s8  ;;  %3767 = vrot.lane.b32.xlu0 %v9736_v15, %s9300_s8  ;;  %v946_v10 = vadd.f32 %v7939_v6, %v9699_v37  ;;  %v937_v11 = vpop.f32.mrb[15].mxu1  ;;  %v706_v12 = vadd.f32 %v705_v8, %v9701_v38  ;;  %v7891_v13 = vpop.f32.mrb[14].mxu0 }
 0x1cd   : > { %v938_v16 = vadd.f32 %v937_v11, %v9699_v37  ;;  %v1256_v17 = vmul.f32 0.17677669, %v714_v7  ;;  %v717_v32 = vadd.f32 %v7891_v13, %v9701_v38  ;;  %v708_v34 = vpop.f32.mrb[15].mxu0  ;;  %v1468_v13 = vsel %vm1418_vm0, %v9713_v58, 0 }
 0x1ce   : > { %v9784_v35 = vpack.c.bf16 %v946_v10, %v943_v9  ;;  %v1254_v39 = vmul.f32 0.17677669, %v706_v12  ;;  %v709_v41 = vadd.f32 %v708_v34, %v9701_v38 }
 0x1cf   : > { %v9787_v42 = vpack.c.bf16 %v938_v16, %v935_v14  ;;  %v1257_v43 = vmul.f32 0.17677669, %v717_v32 }
 0x1d0   : > { %4954 = vrot.lane.b32.xlu1 %v9736_v15, %s9302_s19  ;;  %2562 = vrot.lane.b32.xlu0 %v9739_v18, %s9301_s17  ;;  %v1255_v44 = vmul.f32 0.17677669, %v709_v41 }
 0x1d1   : > { %v7942_v45 = vpop.f32.mrb[16].mxu1  ;;  %v9793_v46 = vpack.c.bf16 %v1257_v43, %v1256_v17 }
 0x1d2   : > { %v950_v47 = vpop.f32.mrb[17].mxu1  ;;  %v9795_v48 = vpack.c.bf16 %v1255_v44, %v1254_v39  ;;  %v7894_v49 = vpop.f32.mrb[16].mxu0  ;;  %v959_v53 = vadd.f32 %v7942_v45, %v9699_v37 }
 0x1d3   : > { %14856 = vst [vmem:[#allocation27_spill] sm:$0xff] %v9793_v46  ;;  %v7943_v50 = vpop.f32.mrb[18].mxu1  ;;  %v730_v51 = vadd.f32 %v7894_v49, %v9701_v38  ;;  %v721_v52 = vpop.f32.mrb[17].mxu0  ;;  %v951_v0 = vadd.f32 %v950_v47, %v9699_v37 }
 0x1d4   : > { %14857 = vst [vmem:[#allocation28_spill] sm:$0xff] %v9795_v48  ;;  %v962_v54 = vadd.f32 %v7943_v50, %v9699_v37  ;;  %v953_v57 = vpop.f32.mrb[19].mxu1  ;;  %3765 = vrot.lane.b32.xlu1 %v9739_v18, %s9300_s8  ;;  %3735 = vrot.lane.b32.xlu0 %v9745_v36, %s9300_s8  ;;  %v722_v59 = vadd.f32 %v721_v52, %v9701_v38  ;;  %v7895_v62 = vpop.f32.mrb[18].mxu0 }
 0x1d5   : > { %v954_v1 = vadd.f32 %v953_v57, %v9699_v37  ;;  %v1260_v3 = vmul.f32 0.17677669, %v730_v51  ;;  %v733_v5 = vadd.f32 %v7895_v62, %v9701_v38  ;;  %v724_v6 = vpop.f32.mrb[19].mxu0 }
 0x1d6   : > { %v9808_v7 = vpack.c.bf16 %v962_v54, %v959_v53  ;;  %v1258_v8 = vmul.f32 0.17677669, %v722_v59  ;;  %v725_v9 = vadd.f32 %v724_v6, %v9701_v38 }
 0x1d7   : > { %v9811_v10 = vpack.c.bf16 %v954_v1, %v951_v0  ;;  %v1261_v11 = vmul.f32 0.17677669, %v733_v5  ;;  %v1471_v5 = vsel %vm1418_vm0, %v9710_v55, 0 }
 0x1d8   : > { %4952 = vrot.lane.b32.xlu1 %v9739_v18, %s9302_s19  ;;  %2514 = vrot.lane.b32.xlu0 %v9747_v40, %s9301_s17  ;;  %v1259_v12 = vmul.f32 0.17677669, %v725_v9 }
 0x1d9   : > { %8052 = vmatprep.subr.msk.bf16.mxu1 %vm1418_vm0, %v9811_v10  ;;  %v7946_v14 = vpop.f32.mrb[20].mxu1  ;;  %v9821_v16 = vpack.c.bf16 %v1261_v11, %v1260_v3 }
 0x1da   : > { %7197 = vmatpush3.bf16.xpose.msra.mxu1 %v1468_v13  ;;  %v975_v17 = vadd.f32 %v7946_v14, %v9699_v37  ;;  %v966_v32 = vpop.f32.mrb[21].mxu1  ;;  %v9824_v34 = vpack.c.bf16 %v1259_v12, %v1258_v8  ;;  %v7898_v39 = vpop.f32.mrb[20].mxu0 }
 0x1db   : > { %14858 = vst [vmem:[#allocation29_spill] sm:$0xff] %v9821_v16  ;;  %8053 = vmatprep.subr.msk.bf16.mxu1 %vm1418_vm0, %v9808_v7  ;;  %v967_v41 = vadd.f32 %v966_v32, %v9699_v37  ;;  %v7947_v43 = vpop.f32.mrb[22].mxu1  ;;  %v746_v44 = vadd.f32 %v7898_v39, %v9701_v38  ;;  %v737_v45 = vpop.f32.mrb[21].mxu0 }
 0x1dc   : > { %14859 = vst [vmem:[#allocation30_spill] sm:$0xff] %v9824_v34  ;;  %2516 = vrot.lane.b32.xlu1 %v9745_v36, %s9301_s17  ;;  %3733 = vrot.lane.b32.xlu0 %v9747_v40, %s9300_s8  ;;  %v978_v58 = vadd.f32 %v7947_v43, %v9699_v37  ;;  %v969_v47 = vpop.f32.mrb[23].mxu1  ;;  %v738_v49 = vadd.f32 %v737_v45, %v9701_v38  ;;  %v7899_v50 = vpop.f32.mrb[22].mxu0 }
 0x1dd   : > { %v970_v51 = vadd.f32 %v969_v47, %v9699_v37  ;;  %v1264_v52 = vmul.f32 0.17677669, %v746_v44  ;;  %v749_v53 = vadd.f32 %v7899_v50, %v9701_v38  ;;  %v740_v54 = vpop.f32.mrb[23].mxu0 }
 0x1de   : > { %v9838_v57 = vpack.c.bf16 %v978_v58, %v975_v17  ;;  %v1262_v59 = vmul.f32 0.17677669, %v738_v49  ;;  %v741_v62 = vadd.f32 %v740_v54, %v9701_v38 }
 0x1df   : > { %v9841_v0 = vpack.c.bf16 %v970_v51, %v967_v41  ;;  %v1265_v1 = vmul.f32 0.17677669, %v749_v53 }
 0x1e0   : > { %4958 = vrot.lane.b32.xlu1 %v9760_v56, %s9302_s19  ;;  %2568 = vrot.lane.b32.xlu0 %v9760_v56, %s9301_s17  ;;  %v1263_v3 = vmul.f32 0.17677669, %v741_v62  ;;  %v1474_v62 = vsel %vm1418_vm0, %v9739_v18, 0 }
 0x1e1   : > { %v7950_v6 = vpop.f32.mrb[24].mxu1  ;;  %v9849_v8 = vpack.c.bf16 %v1265_v1, %v1264_v52 }
 0x1e2   : > { %7199 = vmatpush3.bf16.xpose.msra.mxu1 %v1471_v5  ;;  %v991_v9 = vadd.f32 %v7950_v6, %v9699_v37  ;;  %v982_v11 = vpop.f32.mrb[25].mxu1  ;;  %v9852_v12 = vpack.c.bf16 %v1263_v3, %v1262_v59  ;;  %v7902_v13 = vpop.f32.mrb[24].mxu0 }
 0x1e3   : > { %14860 = vst [vmem:[#allocation31_spill] sm:$0xff] %v9849_v8  ;;  %8054 = vmatprep.subr.msk.bf16.mxu1 %vm1418_vm0, %v9841_v0  ;;  %v983_v14 = vadd.f32 %v982_v11, %v9699_v37  ;;  %v7951_v17 = vpop.f32.mrb[26].mxu1  ;;  %v762_v32 = vadd.f32 %v7902_v13, %v9701_v38  ;;  %v753_v39 = vpop.f32.mrb[25].mxu0 }
 0x1e4   : > { %14861 = vst [vmem:[#allocation32_spill] sm:$0xff] %v9852_v12  ;;  %3769 = vrot.lane.b32.xlu1 %v9763_v60, %s9300_s8  ;;  %3771 = vrot.lane.b32.xlu0 %v9760_v56, %s9300_s8  ;;  %v994_v55 = vadd.f32 %v7951_v17, %v9699_v37  ;;  %v985_v41 = vpop.f32.mrb[27].mxu1  ;;  %v754_v43 = vadd.f32 %v753_v39, %v9701_v38  ;;  %v7903_v44 = vpop.f32.mrb[26].mxu0 }
 0x1e5   : > { %v986_v45 = vadd.f32 %v985_v41, %v9699_v37  ;;  %v1268_v58 = vmul.f32 0.17677669, %v762_v32  ;;  %v765_v47 = vadd.f32 %v7903_v44, %v9701_v38  ;;  %v756_v49 = vpop.f32.mrb[27].mxu0 }
 0x1e6   : > { %v9866_v50 = vpack.c.bf16 %v994_v55, %v991_v9  ;;  %v1266_v51 = vmul.f32 0.17677669, %v754_v43  ;;  %v757_v52 = vadd.f32 %v756_v49, %v9701_v38 }
 0x1e7   : > { %v9869_v53 = vpack.c.bf16 %v986_v45, %v983_v14  ;;  %v1269_v54 = vmul.f32 0.17677669, %v765_v47 }
 0x1e8   : > { %4956 = vrot.lane.b32.xlu1 %v9763_v60, %s9302_s19  ;;  %2566 = vrot.lane.b32.xlu0 %v9763_v60, %s9301_s17  ;;  %v1267_v59 = vmul.f32 0.17677669, %v757_v52 }
 0x1e9   : > { %v7954_v1 = vpop.f32.mrb[28].mxu1  ;;  %v9877_v3 = vpack.c.bf16 %v1269_v54, %v1268_v58 }
 0x1ea   : > { %7201 = vmatpush3.bf16.xpose.msra.mxu1 %v1474_v62  ;;  %v1007_v5 = vadd.f32 %v7954_v1, %v9699_v37  ;;  %v998_v6 = vpop.f32.mrb[29].mxu1  ;;  %v9880_v9 = vpack.c.bf16 %v1267_v59, %v1266_v51  ;;  %v7906_v11 = vpop.f32.mrb[28].mxu0 }
 0x1eb   : > { %14862 = vst [vmem:[#allocation33_spill] sm:$0xff] %v9877_v3  ;;  %8055 = vmatprep.subr.msk.bf16.mxu1 %vm1418_vm0, %v9838_v57  ;;  %v999_v13 = vadd.f32 %v998_v6, %v9699_v37  ;;  %v7955_v14 = vpop.f32.mrb[30].mxu1  ;;  %v778_v17 = vadd.f32 %v7906_v11, %v9701_v38  ;;  %v769_v32 = vpop.f32.mrb[29].mxu0 }
 0x1ec   : > { %14863 = vst [vmem:[#allocation34_spill] sm:$0xff] %v9880_v9  ;;  %2520 = vrot.lane.b32.xlu1 %v9769_v2, %s9301_s17  ;;  %3739 = vrot.lane.b32.xlu0 %v9769_v2, %s9300_s8  ;;  %v1010_v18 = vadd.f32 %v7955_v14, %v9699_v37  ;;  %v1001_v39 = vpop.f32.mrb[31].mxu1  ;;  %v770_v55 = vadd.f32 %v769_v32, %v9701_v38  ;;  %v7907_v41 = vpop.f32.mrb[30].mxu0 }
 0x1ed   : > { %v1002_v43 = vadd.f32 %v1001_v39, %v9699_v37  ;;  %v1272_v44 = vmul.f32 0.17677669, %v778_v17  ;;  %v781_v45 = vadd.f32 %v7907_v41, %v9701_v38  ;;  %v772_v58 = vpop.f32.mrb[31].mxu0  ;;  %v1477_v37 = vsel %vm1418_vm0, %v9736_v15, 0 }
 0x1ee   : > { %v9894_v47 = vpack.c.bf16 %v1010_v18, %v1007_v5  ;;  %v1270_v49 = vmul.f32 0.17677669, %v770_v55  ;;  %v773_v51 = vadd.f32 %v772_v58, %v9701_v38  ;;  %v1480_v38 = vsel %vm1418_vm0, %v9763_v60, 0 }
 0x1ef   : > { %v9897_v52 = vpack.c.bf16 %v1002_v43, %v999_v13  ;;  %v1273_v54 = vmul.f32 0.17677669, %v781_v45  ;;  %v1483_v15 = vsel %vm1418_vm0, %v9760_v56, 0  ;;  %v1486_v60 = vsel %vm1418_vm0, %v9787_v42, 0 }
 0x1f0   : > { %3737 = vrot.lane.b32.xlu1 %v9771_v4, %s9300_s8  ;;  %2518 = vrot.lane.b32.xlu0 %v9771_v4, %s9301_s17  ;;  %v1271_v59 = vmul.f32 0.17677669, %v773_v51  ;;  %v1489_v56 = vsel %vm1418_vm0, %v9784_v35, 0 }
 0x1f1   : > { %v9905_v62 = vpack.c.bf16 %v1273_v54, %v1272_v44 }
 0x1f2   : > { %7203 = vmatpush3.bf16.xpose.msra.mxu1 %v1477_v37  ;;  %v9907_v1 = vpack.c.bf16 %v1271_v59, %v1270_v49 }
 0x1f3   : > { %14864 = vst [vmem:[#allocation35_spill] sm:$0xff] %v9905_v62  ;;  %8056 = vmatprep.subr.msk.bf16.mxu1 %vm1418_vm0, %v9869_v53 }
 0x1f4   : > { %14865 = vst [vmem:[#allocation36_spill] sm:$0xff] %v9907_v1  ;;  %3773 = vrot.lane.b32.xlu1 %v9787_v42, %s9300_s8  ;;  %2572 = vrot.lane.b32.xlu0 %v9784_v35, %s9301_s17 }
 0x1f8   : > { %2524 = vrot.lane.b32.xlu1 %v9793_v46, %s9301_s17  ;;  %3775 = vrot.lane.b32.xlu0 %v9784_v35, %s9300_s8 }
 0x1fa   : > { %7205 = vmatpush3.bf16.xpose.msra.mxu1 %v1480_v38 }
 0x1fb   : > { %8057 = vmatprep.subr.msk.bf16.mxu1 %vm1418_vm0, %v9866_v50 }
 0x1fc   : > { %3741 = vrot.lane.b32.xlu1 %v9795_v48, %s9300_s8  ;;  %2570 = vrot.lane.b32.xlu0 %v9787_v42, %s9301_s17 }
 0x200   : > { %2576 = vrot.lane.b32.xlu1 %v9808_v7, %s9301_s17  ;;  %3743 = vrot.lane.b32.xlu0 %v9793_v46, %s9300_s8 }
 0x202   : > { %7207 = vmatpush3.bf16.xpose.msra.mxu1 %v1483_v15 }
 0x203   : > { %8058 = vmatprep.subr.msk.bf16.mxu1 %vm1418_vm0, %v9897_v52 }
 0x204   : > { %3779 = vrot.lane.b32.xlu1 %v9808_v7, %s9300_s8  ;;  %2522 = vrot.lane.b32.xlu0 %v9795_v48, %s9301_s17 }
 0x208   : > { %2528 = vrot.lane.b32.xlu1 %v9821_v16, %s9301_s17  ;;  %4966 = vrot.lane.b32.xlu0 %v9808_v7, %s9302_s19 }
 0x20a   : > { %7209 = vmatpush3.bf16.xpose.msra.mxu1 %v1486_v60 }
 0x20b   : > { %8059 = vmatprep.subr.msk.bf16.mxu1 %vm1418_vm0, %v9894_v47 }
 0x20c   : > { %2580 = vrot.lane.b32.xlu1 %v9838_v57, %s9301_s17  ;;  %2574 = vrot.lane.b32.xlu0 %v9811_v10, %s9301_s17 }
 0x210   : > { %3783 = vrot.lane.b32.xlu1 %v9838_v57, %s9300_s8  ;;  %3777 = vrot.lane.b32.xlu0 %v9811_v10, %s9300_s8 }
 0x212   : > { %7211 = vmatpush3.bf16.xpose.msra.mxu1 %v1489_v56 }
 0x214   : > { %2578 = vrot.lane.b32.xlu1 %v9841_v0, %s9301_s17  ;;  %4964 = vrot.lane.b32.xlu0 %v9811_v10, %s9302_s19 }
 0x218   : > { %2532 = vrot.lane.b32.xlu1 %v9849_v8, %s9301_s17  ;;  %3747 = vrot.lane.b32.xlu0 %v9821_v16, %s9300_s8 }
 0x219   : > { %7213 = vmatmul.mubr.msk.bf16.vlgmr.msra.gmra.mrb[32].mxu1 %vm1418_vm0, %v9721_v63 }
 0x21a   : > { %7214 = vmatprep.mubr.msk.bf16.mxu1 %vm1418_vm0, %v9719_v61 }
 0x21c   : > { %2584 = vrot.lane.b32.xlu1 %v9866_v50, %s9301_s17  ;;  %2526 = vrot.lane.b32.xlu0 %v9824_v34, %s9301_s17 }
 0x220   : > { %3787 = vrot.lane.b32.xlu1 %v9866_v50, %s9300_s8  ;;  %3745 = vrot.lane.b32.xlu0 %v9824_v34, %s9300_s8 }
 0x221   : > { %7215 = vmatmul.mubr.msk.bf16.gmra.mrb[36].mxu1 %vm1418_vm0, %v9719_v61 }
 0x222   : > { %7216 = vmatprep.mubr.msk.bf16.mxu1 %vm1418_vm0, %v9747_v40 }
 0x224   : > { %4974 = vrot.lane.b32.xlu1 %v9866_v50, %s9302_s19  ;;  %4970 = vrot.lane.b32.xlu0 %v9838_v57, %s9302_s19 }
 0x228   : > { %2582 = vrot.lane.b32.xlu1 %v9869_v53, %s9301_s17  ;;  %3781 = vrot.lane.b32.xlu0 %v9841_v0, %s9300_s8 }
 0x229   : > { %7217 = vmatmul.mubr.msk.bf16.gmra.mrb[40].mxu1 %vm1418_vm0, %v9747_v40 }
 0x22a   : > { %v9991_v7 = vpop.permute.xlu0 %3763  ;;  %v9993_v10 = vpop.permute.xlu1 %2560  ;;  %7218 = vmatprep.mubr.msk.bf16.mxu1 %vm1418_vm0, %v9745_v36 }
 0x22c   : > { %2536 = vrot.lane.b32.xlu1 %v9877_v3, %s9301_s17  ;;  %4968 = vrot.lane.b32.xlu0 %v9841_v0, %s9302_s19 }
 0x22e   : > { %v10001_v57 = vpop.permute.xlu1 %4950  ;;  %v10003_v50 = vpop.permute.xlu0 %2558 }
 0x22f   : > { %v2639_v63 = vsel %vm1418_vm0, %v10003_v50, 0  ;;  %v8241_v50 = vld [vmem:[#allocation10 + $0x20] sm:$0xff]  }
 0x230   : > { %2588 = vrot.lane.b32.xlu1 %v9894_v47, %s9301_s17  ;;  %3751 = vrot.lane.b32.xlu0 %v9849_v8, %s9300_s8 }
 0x231   : > { %7219 = vmatmul.mubr.msk.bf16.gmra.mrb[44].mxu1 %vm1418_vm0, %v9745_v36 }
 0x232   : > { %v10011_v5 = vpop.permute.xlu1 %3761  ;;  %v10013_v6 = vpop.permute.xlu0 %2510  ;;  %7220 = vmatprep.mubr.msk.bf16.mxu1 %vm1418_vm0, %v9771_v4 }
 0x234   : > { %3791 = vrot.lane.b32.xlu1 %v9894_v47, %s9300_s8  ;;  %2530 = vrot.lane.b32.xlu0 %v9852_v12, %s9301_s17 }
 0x236   : > { %v10021_v0 = vpop.permute.xlu1 %4948  ;;  %v10023_v11 = vpop.permute.xlu0 %3729 }
 0x238   : > { %2586 = vrot.lane.b32.xlu1 %v9897_v52, %s9301_s17  ;;  %3749 = vrot.lane.b32.xlu0 %v9852_v12, %s9300_s8 }
 0x239   : > { %7221 = vmatmul.mubr.msk.bf16.gmra.mrb[48].mxu1 %vm1418_vm0, %v9771_v4  ;;  %v8237_v4 = vld [vmem:[#allocation10] sm:$0xff]  }
 0x23a   : > { %v10031_v13 = vpop.permute.xlu1 %2512  ;;  %v10033_v14 = vpop.permute.xlu0 %2564  ;;  %7222 = vmatprep.mubr.msk.bf16.mxu1 %vm1418_vm0, %v9769_v2  ;;  %7956 = vmatprep.subr.bf16.mxu0 %v8237_v4 }
 0x23b   : > { %7957 = vmatpush3.bf16.msra.mxu0 %v8237_v4 }
 0x23c   : > { %2540 = vrot.lane.b32.xlu1 %v9905_v62, %s9301_s17  ;;  %3785 = vrot.lane.b32.xlu0 %v9869_v53, %s9300_s8 }
 0x23e   : > { %v10041_v17 = vpop.permute.xlu1 %3731  ;;  %v10043_v32 = vpop.permute.xlu0 %3767 }
 0x240   : > { %4976 = vrot.lane.b32.xlu1 %v9897_v52, %s9302_s19  ;;  %4972 = vrot.lane.b32.xlu0 %v9869_v53, %s9302_s19 }
 0x241   : > { %7223 = vmatmul.mubr.msk.bf16.gmra.mrb[52].mxu1 %vm1418_vm0, %v9769_v2 }
 0x242   : > { %v10051_v18 = vpop.permute.xlu1 %4954  ;;  %v10053_v39 = vpop.permute.xlu0 %2562  ;;  %7224 = vmatprep.mubr.msk.bf16.mxu1 %vm1418_vm0, %v9795_v48 }
 0x244   : > { %4962 = vrot.lane.b32.xlu1 %v9784_v35, %s9302_s19  ;;  %3755 = vrot.lane.b32.xlu0 %v9877_v3, %s9300_s8 }
 0x246   : > { %v10061_v55 = vpop.permute.xlu1 %3765  ;;  %v10063_v41 = vpop.permute.xlu0 %3735 }
 0x248   : > { %4978 = vrot.lane.b32.xlu1 %v9894_v47, %s9302_s19  ;;  %2534 = vrot.lane.b32.xlu0 %v9880_v9, %s9301_s17 }
 0x249   : > { %7225 = vmatmul.mubr.msk.bf16.gmra.mrb[56].mxu1 %vm1418_vm0, %v9795_v48 }
 0x24a   : > { %v10071_v53 = vpop.permute.xlu1 %4952  ;;  %v10073_v43 = vpop.permute.xlu0 %2514  ;;  %7226 = vmatprep.mubr.msk.bf16.mxu1 %vm1418_vm0, %v9793_v46 }
 0x24c   : > { %3753 = vrot.lane.b32.xlu0 %v9880_v9, %s9300_s8  ;;  %3757 = vrot.lane.b32.xlu1 %v9907_v1, %s9300_s8 }
 0x24e   : > { %v10081_v35 = vpop.permute.xlu1 %2516  ;;  %v10083_v44 = vpop.permute.xlu0 %3733 }
 0x250   : > { %3789 = vrot.lane.b32.xlu0 %v9897_v52, %s9300_s8 }
 0x251   : > { %7227 = vmatmul.mubr.msk.bf16.gmra.mrb[60].mxu1 %vm1418_vm0, %v9793_v46 }
 0x252   : > { %v10089_v45 = vpop.permute.xlu1 %4958  ;;  %v10091_v58 = vpop.permute.xlu0 %2568  ;;  %7228 = vmatprep.mubr.msk.bf16.mxu1 %vm1418_vm0, %v9824_v34 }
 0x253   : > { %14866 = vst [vmem:[#allocation37_spill] sm:$0xff] %v10089_v45 }
 0x254   : > { %2538 = vrot.lane.b32.xlu0 %v9907_v1, %s9301_s17 }
 0x256   : > { %v10097_v47 = vpop.permute.xlu1 %3769  ;;  %v10099_v49 = vpop.permute.xlu0 %3771 }
 0x258   : > { %4960 = vrot.lane.b32.xlu0 %v9787_v42, %s9302_s19 }
 0x259   : > { %7229 = vmatmul.mubr.msk.bf16.gmra.mrb[64].mxu1 %vm1418_vm0, %v9824_v34 }
 0x25a   : > { %v10105_v51 = vpop.permute.xlu1 %4956  ;;  %v10107_v52 = vpop.permute.xlu0 %2566  ;;  %7230 = vmatprep.mubr.msk.bf16.mxu1 %vm1418_vm0, %v9821_v16 }
 0x25c   : > { %3759 = vrot.lane.b32.xlu0 %v9905_v62, %s9300_s8 }
 0x25e   : > { %v10113_v54 = vpop.permute.xlu1 %2520  ;;  %v10115_v59 = vpop.permute.xlu0 %3739 }
 0x261   : > { %7231 = vmatmul.mubr.msk.bf16.gmra.mrb[68].mxu1 %vm1418_vm0, %v9821_v16 }
 0x262   : > { %v10119_v42 = vpop.permute.xlu1 %3737  ;;  %v10121_v37 = vpop.permute.xlu0 %2518  ;;  %7232 = vmatprep.mubr.msk.bf16.mxu1 %vm1418_vm0, %v9852_v12 }
 0x266   : > { %v10125_v38 = vpop.permute.xlu1 %3773  ;;  %v10127_v15 = vpop.permute.xlu0 %2572 }
 0x269   : > { %7233 = vmatmul.mubr.msk.bf16.gmra.mrb[72].mxu1 %vm1418_vm0, %v9852_v12 }
 0x26a   : > { %v10131_v60 = vpop.permute.xlu1 %2524  ;;  %v10133_v56 = vpop.permute.xlu0 %3775  ;;  %7234 = vmatprep.mubr.msk.bf16.mxu1 %vm1418_vm0, %v9849_v8 }
 0x26e   : > { %v10137_v16 = vpop.permute.xlu1 %3741  ;;  %v10139_v34 = vpop.permute.xlu0 %2570 }
 0x26f   : > { %14867 = vst [vmem:[#allocation38_spill] sm:$0xff] %v10137_v16  ;;  %v9022_v16 = vld [vmem:[%s9601_s15 + $0x10] sm:$0xff]  }
 0x271   : > { %7235 = vmatmul.mubr.msk.bf16.gmra.mrb[76].mxu1 %vm1418_vm0, %v9849_v8  ;;  %v8238_v8 = vld [vmem:[#allocation10 + $0x8] sm:$0xff]  }
 0x272   : > { %v2577_v46 = vpop.permute.xlu1 %2576  ;;  %v10143_v48 = vpop.permute.xlu0 %3743  ;;  %7236 = vmatprep.mubr.msk.bf16.mxu1 %vm1418_vm0, %v9880_v9  ;;  %7958 = vmatprep.subr.bf16.mxu0 %v8238_v8 }
 0x273   : > { %14868 = vst [vmem:[#allocation39_spill] sm:$0xff] %v10143_v48  ;;  %7959 = vmatpush3.bf16.msra.mxu0 %v8238_v8  ;;  %v8239_v48 = vld [vmem:[#allocation10 + $0x10] sm:$0xff]   ;;  %v8240_v8 = vld [vmem:[#allocation10 + $0x18] sm:$0xff]  }
 0x274   : > { %7960 = vmatprep.subr.bf16.mxu0 %v8239_v48 }
 0x276   : > { %v10147_v12 = vpop.permute.xlu1 %3779  ;;  %v10149_v2 = vpop.permute.xlu0 %2522 }
 0x277   : > { %7961 = vmatpush3.bf16.msra.mxu0 %v8239_v48  ;;  %v8242_v48 = vld [vmem:[#allocation10 + $0x28] sm:$0xff]  }
 0x278   : > { %7962 = vmatprep.subr.bf16.mxu0 %v8240_v8 }
 0x279   : > { %7237 = vmatmul.mubr.msk.bf16.gmra.mrb[80].mxu1 %vm1418_vm0, %v9880_v9 }
 0x27a   : > { %v10153_v36 = vpop.permute.xlu1 %2528  ;;  %v10155_v40 = vpop.permute.xlu0 %4966  ;;  %7238 = vmatprep.mubr.msk.bf16.mxu1 %vm1418_vm0, %v9877_v3 }
 0x27b   : > { %7963 = vmatpush3.bf16.msra.mxu0 %v8240_v8 }
 0x27c   : > { %7964 = vmatprep.subr.bf16.mxu0 %v8241_v50 }
 0x27e   : > { %v2581_v33 = vpop.permute.xlu1 %2580  ;;  %v2575_v61 = vpop.permute.xlu0 %2574 }
 0x27f   : > { %8060 = vmatprep.subr.msk.bf16.mxu1 %vm1418_vm0, %v2575_v61  ;;  %v2642_v61 = vsel %vm1418_vm0, %v9993_v10, 0  ;;  %7965 = vmatpush3.bf16.msra.mxu0 %v8241_v50  ;;  %v8243_v10 = vld [vmem:[#allocation10 + $0x30] sm:$0xff]   ;;  %v8244_v50 = vld [vmem:[#allocation10 + $0x38] sm:$0xff]  }
 0x280   : > { %7357 = vmatpush3.bf16.xpose.msra.mxu1 %v2639_v63  ;;  %7966 = vmatprep.subr.bf16.mxu0 %v8242_v48 }
 0x281   : > { %7239 = vmatmul.mubr.msk.bf16.gmra.mrb[84].mxu1 %vm1418_vm0, %v9877_v3  ;;  %8061 = vmatprep.subr.msk.bf16.mxu1 %vm1418_vm0, %v2577_v46 }
 0x282   : > { %v10165_v4 = vpop.permute.xlu1 %3783  ;;  %7240 = vmatprep.mubr.msk.bf16.mxu1 %vm1418_vm0, %v9907_v1  ;;  %v3778_v63 = vpop.permute.xlu0 %3777 }
 0x283   : > { %7967 = vmatpush3.bf16.msra.mxu0 %v8242_v48 }
 0x284   : > { %7968 = vmatprep.subr.bf16.mxu0 %v8243_v10 }
 0x286   : > { %v2579_v9 = vpop.permute.xlu1 %2578  ;;  %v10178_v8 = vpop.permute.xlu0 %4964 }
 0x287   : > { %7969 = vmatpush3.bf16.msra.mxu0 %v8243_v10 }
 0x288   : > { %7359 = vmatpush3.bf16.xpose.msra.mxu1 %v2642_v61  ;;  %v2645_v61 = vsel %vm1418_vm0, %v10053_v39, 0  ;;  %7970 = vmatprep.subr.bf16.mxu0 %v8244_v50  ;;  %v2648_v39 = vsel %vm1418_vm0, %v10033_v14, 0 }
 0x289   : > { %7241 = vmatmul.mubr.msk.bf16.gmra.mrb[88].mxu1 %vm1418_vm0, %v9907_v1  ;;  %8062 = vmatprep.subr.msk.bf16.mxu1 %vm1418_vm0, %v2579_v9 }
 0x28a   : > { %v10174_v46 = vpop.permute.xlu1 %2532  ;;  %7242 = vmatprep.mubr.msk.bf16.mxu1 %vm1418_vm0, %v9905_v62  ;;  %v10189_v48 = vpop.permute.xlu0 %3747 }
 0x28b   : > { %14869 = vst [vmem:[#allocation40_spill] sm:$0xff] %v10189_v48  ;;  %7971 = vmatpush3.bf16.msra.mxu0 %v8244_v50  ;;  %v2651_v48 = vsel %vm1418_vm0, %v10107_v52, 0 }
 0x28e   : > { %v2585_v3 = vpop.permute.xlu1 %2584 }
 0x290   : > { %7361 = vmatpush3.bf16.xpose.msra.mxu1 %v2645_v61  ;;  %v9021_v61 = vld [vmem:[%s9601_s15 + $0x8] sm:$0xff]   ;;  %s6688_s15 = sshll.u32 %s14322_s30, 4  ;;  %s14373_s15 = int_to_ptr.vmem [resolvable:$true] %s6688_s15 }
 0x291   : > { %7243 = vmatmul.mubr.msk.bf16.gmra.mrb[92].mxu1 %vm1418_vm0, %v9905_v62  ;;  %8063 = vmatprep.subr.msk.bf16.mxu1 %vm1418_vm0, %v2581_v33  ;;  %v10196_v33 = vpop.permute.xlu0 %2526  ;;  %s9194_s11 = scalar_lea.vmem %s14373_s15, 2048  ;;  %p9201_p11 = scmp.lt.s32.totalorder %s14373_s15, %s9199_s18 }
 0x292   : > { %v10185_v9 = vpop.permute.xlu1 %3787  ;;  %7372 = vmatprep.mubr.msk.bf16.mxu1 %vm1418_vm0, %v10013_v6  ;;  %7973 = vmatmul.mubr.bf16.vlgmr.msra.gmra.mrb[32].mxu0 %v9021_v61  ;;  %p9195_p6 = scmp.ne.s32.totalorder %s14373_s15, %s9194_s11 }
 0x293   : > { %7976 = vmatprep.mubr.bf16.mxu0 %v9022_v16 }
 0x294   : > { %p9196_p4 = pnand %p9195_p6, %p16018_p2 }
 0x295   : > { %v10204_v45 = vpop.permute.xlu0 %3745 }
 0x296   : > { %v10191_v1 = vpop.permute.xlu1 %4974  ;;  %p9197_p5 = pneg %p9196_p4 }
 0x298   : > { %7363 = vmatpush3.bf16.xpose.msra.mxu1 %v2648_v39 }
 0x299   : > { %v10209_v50 = vpop.permute.xlu0 %4970 }
 0x29a   : > { %v2583_v62 = vpop.permute.xlu1 %2582  ;;  %7977 = vmatmul.mubr.bf16.gmra.mrb[36].mxu0 %v9627_v19  ;;  %v2657_v19 = vsel %vm1418_vm0, %v10139_v34, 0 }
 0x29b   : > { %8064 = vmatprep.subr.msk.bf16.mxu1 %vm1418_vm0, %v2583_v62  ;;  %7980 = vmatprep.mubr.bf16.mxu0 %v9630_v20  ;;  %v2654_v62 = vsel %vm1418_vm0, %v10091_v58, 0 }
 0x29e   : > { %v10200_v10 = vpop.permute.xlu1 %2536 }
 0x2a0   : > { %7365 = vmatpush3.bf16.xpose.msra.mxu1 %v2651_v48 }
 0x2a1   : > { %8065 = vmatprep.subr.msk.bf16.mxu1 %vm1418_vm0, %v2585_v3  ;;  %v3782_v3 = vpop.permute.xlu0 %3781 }
 0x2a2   : > { %v2589_v14 = vpop.permute.xlu1 %2588  ;;  %7981 = vmatmul.mubr.bf16.gmra.mrb[40].mxu0 %v9637_v21  ;;  %v2660_v21 = vsel %vm1418_vm0, %v10127_v15, 0 }
 0x2a3   : > { %7984 = vmatprep.mubr.bf16.mxu0 %v9640_v22 }
 0x2a5   : > { %v10222_v20 = vpop.permute.xlu0 %4968 }
 0x2a6   : > { %v10211_v16 = vpop.permute.xlu1 %3791 }
 0x2a8   : > { %7367 = vmatpush3.bf16.xpose.msra.mxu1 %v2654_v62 }
 0x2a9   : > { %v10227_v58 = vpop.permute.xlu0 %3751 }
 0x2aa   : > { %v2587_v52 = vpop.permute.xlu1 %2586  ;;  %7985 = vmatmul.mubr.bf16.gmra.mrb[44].mxu0 %v9647_v23  ;;  %v3842_v23 = vsel %vm1418_vm0, %v10011_v5, 0  ;;  %v3857_v5 = vsel %vm1418_vm0, %v10099_v49, 0 }
 0x2ab   : > { %8066 = vmatprep.subr.msk.bf16.mxu1 %vm1418_vm0, %v2587_v52  ;;  %7988 = vmatprep.mubr.bf16.mxu0 %v9650_v24 }
 0x2ad   : > { %v10232_v22 = vpop.permute.xlu0 %2530 }
 0x2b0   : > { %7369 = vmatpush3.bf16.xpose.msra.mxu1 %v2657_v19 }
 0x2b1   : > { %8067 = vmatprep.subr.msk.bf16.mxu1 %vm1418_vm0, %v2589_v14  ;;  %v10244_v24 = vpop.permute.xlu0 %3749 }
 0x2b2   : > { %7989 = vmatmul.mubr.bf16.gmra.mrb[48].mxu0 %v9657_v25  ;;  %v3845_v25 = vsel %vm1418_vm0, %v9991_v7, 0  ;;  %v1322_v7 = vld [vmem:[#allocation5] sm:$0xff] }
 0x2b3   : > { %7992 = vmatprep.mubr.bf16.mxu0 %v9660_v26 }
 0x2b5   : > { %v3786_v26 = vpop.permute.xlu0 %3785 }
 0x2b8   : > { %7371 = vmatpush3.bf16.xpose.msra.mxu1 %v2660_v21 }
 0x2b9   : > { %8068 = vmatprep.subr.msk.bf16.mxu1 %vm1418_vm0, %v3778_v63  ;;  %v3860_v63 = vsel %vm1418_vm0, %v10125_v38, 0  ;;  %v1325_v38 = vld [vmem:[#allocation5 + $0x18] sm:$0xff] }
 0x2ba   : > { %7993 = vmatmul.mubr.bf16.gmra.mrb[52].mxu0 %v9667_v27  ;;  %v3848_v27 = vsel %vm1418_vm0, %v10061_v55, 0  ;;  %v1355_v55 = vunpack.c.h.bf16 %v1322_v7  ;;  %v1361_v19 = vunpack.c.h.bf16 %v1325_v38 }
 0x2bb   : > { %7996 = vmatprep.mubr.bf16.mxu0 %v9670_v28  ;;  %v10259_v28 = vpop.permute.xlu0 %4972 }
 0x2bf   : > { %7373 = vmatmul.mubr.msk.bf16.vlgmr.msra.gmra.mrb[96].mxu1 %vm1418_vm0, %v10013_v6 }
 0x2c0   : > { %7374 = vmatprep.mubr.msk.bf16.mxu1 %vm1418_vm0, %v10031_v13  ;;  %7517 = vmatpush3.bf16.xpose.msra.mxu1 %v3842_v23 }
 0x2c1   : > { %8069 = vmatprep.subr.msk.bf16.mxu1 %vm1418_vm0, %v10147_v12  ;;  %v3854_v12 = vsel %vm1418_vm0, %v10097_v47, 0 }
 0x2c2   : > { %7997 = vmatmul.mubr.bf16.gmra.mrb[56].mxu0 %v9677_v29  ;;  %v10266_v29 = vpop.permute.xlu0 %3755 }
 0x2c3   : > { %8000 = vmatprep.mubr.bf16.mxu0 %v9680_v30  ;;  %v3851_v30 = vsel %vm1418_vm0, %v10043_v32, 0  ;;  %v1354_v32 = vunpack.c.l.bf16 %v1322_v7 }
 0x2c6   : > { %v10275_v34 = vpop.permute.xlu0 %2534 }
 0x2c7   : > { %7375 = vmatmul.mubr.msk.bf16.gmra.mrb[100].mxu1 %vm1418_vm0, %v10031_v13  ;;  %v1323_v13 = vld [vmem:[#allocation5 + $0x8] sm:$0xff] }
 0x2c8   : > { %7376 = vmatprep.mubr.msk.bf16.mxu1 %vm1418_vm0, %v10073_v43  ;;  %7519 = vmatpush3.bf16.xpose.msra.mxu1 %v3845_v25  ;;  %v1357_v47 = vunpack.c.h.bf16 %v1323_v13 }
 0x2c9   : > { %8070 = vmatprep.subr.msk.bf16.mxu1 %vm1418_vm0, %v3782_v3  ;;  %v1360_v3 = vunpack.c.l.bf16 %v1325_v38  ;;  %v1329_v38 = vld [vmem:[#allocation5 + $0x38] sm:$0xff] }
 0x2ca   : > { %8001 = vmatmul.mubr.bf16.gmra.mrb[60].mxu0 %v9687_v31  ;;  %v10285_v31 = vpop.permute.xlu0 %3753 }
 0x2ce   : > { %v3790_v6 = vpop.permute.xlu0 %3789 }
 0x2cf   : > { %7377 = vmatmul.mubr.msk.bf16.gmra.mrb[104].mxu1 %vm1418_vm0, %v10073_v43  ;;  %v1356_v43 = vunpack.c.l.bf16 %v1323_v13 }
 0x2d0   : > { %7378 = vmatprep.mubr.msk.bf16.mxu1 %vm1418_vm0, %v10081_v35  ;;  %7521 = vmatpush3.bf16.xpose.msra.mxu1 %v3848_v27  ;;  %v1326_v27 = vld [vmem:[#allocation5 + $0x20] sm:$0xff] }
 0x2d1   : > { %8071 = vmatprep.subr.msk.bf16.mxu1 %vm1418_vm0, %v10165_v4  ;;  %v1363_v13 = vunpack.c.h.bf16 %v1326_v27 }
 0x2d7   : > { %7379 = vmatmul.mubr.msk.bf16.gmra.mrb[108].mxu1 %vm1418_vm0, %v10081_v35 }
 0x2d8   : > { %7380 = vmatprep.mubr.msk.bf16.mxu1 %vm1418_vm0, %v10121_v37  ;;  %7523 = vmatpush3.bf16.xpose.msra.mxu1 %v3851_v30 }
 0x2d9   : > { %8072 = vmatprep.subr.msk.bf16.mxu1 %vm1418_vm0, %v3786_v26 }
 0x2df   : > { %7381 = vmatmul.mubr.msk.bf16.gmra.mrb[112].mxu1 %vm1418_vm0, %v10121_v37 }
 0x2e0   : > { %7382 = vmatprep.mubr.msk.bf16.mxu1 %vm1418_vm0, %v10113_v54  ;;  %7525 = vmatpush3.bf16.xpose.msra.mxu1 %v3854_v12 }
 0x2e1   : > { %8073 = vmatprep.subr.msk.bf16.mxu1 %vm1418_vm0, %v10185_v9 }
 0x2e7   : > { %7383 = vmatmul.mubr.msk.bf16.gmra.mrb[116].mxu1 %vm1418_vm0, %v10113_v54  ;;  %v1324_v54 = vld [vmem:[#allocation5 + $0x10] sm:$0xff] }
 0x2e8   : > { %7384 = vmatprep.mubr.msk.bf16.mxu1 %vm1418_vm0, %v10149_v2  ;;  %7527 = vmatpush3.bf16.xpose.msra.mxu1 %v3857_v5  ;;  %v1358_v14 = vunpack.c.l.bf16 %v1324_v54  ;;  %v1359_v62 = vunpack.c.h.bf16 %v1324_v54  ;;  %v1328_v54 = vld [vmem:[#allocation5 + $0x30] sm:$0xff] }
 0x2e9   : > { %8074 = vmatprep.subr.msk.bf16.mxu1 %vm1418_vm0, %v3790_v6  ;;  %v1327_v6 = vld [vmem:[#allocation5 + $0x28] sm:$0xff] }
 0x2ec   : > { %v1549_v35 = vpop.f32.mrb[32].mxu1 }
 0x2ed   : > { %v1551_v37 = vpop.f32.mrb[33].mxu1  ;;  %v10294_v15 = vadd.f32 %v1549_v35, %v1354_v32  ;;  %v1364_v32 = vunpack.c.l.bf16 %v1327_v6 }
 0x2ee   : > { %v1553_v49 = vpop.f32.mrb[34].mxu1  ;;  %v10296_v4 = vadd.f32 %v1551_v37, %v1355_v55 }
 0x2ef   : > { %v1555_v9 = vpop.f32.mrb[35].mxu1  ;;  %7385 = vmatmul.mubr.msk.bf16.gmra.mrb[120].mxu1 %vm1418_vm0, %v10149_v2  ;;  %v10302_v48 = vadd.f32 %v1553_v49, %v1356_v43  ;;  %v1365_v43 = vunpack.c.h.bf16 %v1327_v6 }
 0x2f0   : > { %7386 = vmatprep.mubr.msk.bf16.mxu1 %vm1418_vm0, %v10131_v60  ;;  %7529 = vmatpush3.bf16.xpose.msra.mxu1 %v3860_v63  ;;  %v1708_v39 = vmax.f32 %v10294_v15, %v10296_v4  ;;  %v10308_v61 = vadd.f32 %v1555_v9, %v1357_v47 }
 0x2f1   : > { %8075 = vmatprep.subr.msk.bf16.mxu1 %vm1418_vm0, %v10211_v16  ;;  %v3863_v16 = vsel %vm1418_vm0, %v10133_v56, 0  ;;  %v1362_v56 = vunpack.c.l.bf16 %v1326_v27 }
 0x2f2   : > { %1709 = vmax.xlane.f32.xlu1 %v1708_v39  ;;  %v1711_v2 = vmax.f32 %v10302_v48, %v10308_v61 }
 0x2f4   : > { %v1559_v52 = vpop.f32.mrb[36].mxu1  ;;  %1712 = vmax.xlane.f32.xlu0 %v1711_v2 }
 0x2f5   : > { %v1561_v21 = vpop.f32.mrb[37].mxu1  ;;  %v10314_v23 = vadd.f32 %v1559_v52, %v1358_v14  ;;  %v1366_v14 = vunpack.c.l.bf16 %v1328_v54 }
 0x2f6   : > { %v1563_v25 = vpop.f32.mrb[38].mxu1  ;;  %v10316_v26 = vadd.f32 %v1561_v21, %v1359_v62  ;;  %v1367_v62 = vunpack.c.h.bf16 %v1328_v54 }
 0x2f7   : > { %v1565_v30 = vpop.f32.mrb[39].mxu1  ;;  %7387 = vmatmul.mubr.msk.bf16.gmra.mrb[124].mxu1 %vm1418_vm0, %v10131_v60  ;;  %v10326_v7 = vadd.f32 %v1563_v25, %v1360_v3  ;;  %v1369_v3 = vunpack.c.h.bf16 %v1329_v38 }
 0x2f8   : > { %7388 = vmatprep.mubr.msk.bf16.mxu1 %vm1418_vm0, %v10196_v33  ;;  %7531 = vmatpush3.bf16.xpose.msra.mxu1 %v3863_v16  ;;  %v1714_v12 = vmax.f32 %v10314_v23, %v10316_v26  ;;  %v10328_v5 = vadd.f32 %v1565_v30, %v1361_v19  ;;  %v1330_v16 = vld [vmem:[#allocation5 + $0x40] sm:$0xff] }
 0x2f9   : > { %8076 = vmatprep.subr.msk.bf16.mxu1 %vm1418_vm0, %v10178_v8 }
 0x2fa   : > { %1715 = vmax.xlane.f32.xlu1 %v1714_v12  ;;  %v1717_v55 = vmax.f32 %v10326_v7, %v10328_v5 }
 0x2fc   : > { %v1569_v60 = vpop.f32.mrb[40].mxu1 }
 0x2fd   : > { %v1571_v35 = vpop.f32.mrb[41].mxu1  ;;  %v10334_v47 = vadd.f32 %v1569_v60, %v1362_v56  ;;  %v1371_v60 = vunpack.c.h.bf16 %v1330_v16 }
 0x2fe   : > { %v1573_v37 = vpop.f32.mrb[42].mxu1  ;;  %1718 = vmax.xlane.f32.xlu1 %v1717_v55  ;;  %v10336_v49 = vadd.f32 %v1571_v35, %v1363_v13  ;;  %v1331_v13 = vld [vmem:[#allocation5 + $0x48] sm:$0xff] }
 0x2ff   : > { %v1575_v63 = vpop.f32.mrb[43].mxu1  ;;  %7389 = vmatmul.mubr.msk.bf16.gmra.mrb[128].mxu1 %vm1418_vm0, %v10196_v33  ;;  %v10340_v8 = vadd.f32 %v1573_v37, %v1364_v32  ;;  %v1368_v33 = vunpack.c.l.bf16 %v1329_v38  ;;  %v1370_v32 = vunpack.c.l.bf16 %v1330_v16  ;;  %v1372_v55 = vunpack.c.l.bf16 %v1331_v13 }
 0x300   : > { %7390 = vmatprep.mubr.msk.bf16.mxu1 %vm1418_vm0, %v10153_v36  ;;  %v1720_v9 = vmax.f32 %v10334_v47, %v10336_v49  ;;  %v10346_v39 = vadd.f32 %v1575_v63, %v1365_v43 }
 0x302   : > { %1721 = vmax.xlane.f32.xlu0 %v1720_v9  ;;  %v1723_v2 = vmax.f32 %v10340_v8, %v10346_v39 }
 0x304   : > { %v1579_v52 = vpop.f32.mrb[44].mxu1  ;;  %1724 = vmax.xlane.f32.xlu1 %v1723_v2 }
 0x305   : > { %v1581_v19 = vpop.f32.mrb[45].mxu1  ;;  %v10350_v21 = vadd.f32 %v1579_v52, %v1366_v14  ;;  %v1332_v14 = vld [vmem:[#allocation5 + $0x50] sm:$0xff] }
 0x306   : > { %v1583_v25 = vpop.f32.mrb[46].mxu1  ;;  %v10352_v27 = vadd.f32 %v1581_v19, %v1367_v62 }
 0x307   : > { %v1585_v30 = vpop.f32.mrb[47].mxu1  ;;  %7391 = vmatmul.mubr.msk.bf16.gmra.mrb[132].mxu1 %vm1418_vm0, %v10153_v36  ;;  %v10360_v6 = vadd.f32 %v1583_v25, %v1368_v33  ;;  %v1373_v36 = vunpack.c.h.bf16 %v1331_v13  ;;  %v1374_v33 = vunpack.c.l.bf16 %v1332_v14  ;;  %v1375_v25 = vunpack.c.h.bf16 %v1332_v14 }
 0x308   : > { %7392 = vmatprep.mubr.msk.bf16.mxu1 %vm1418_vm0, %v10232_v22  ;;  %v1726_v12 = vmax.f32 %v10350_v21, %v10352_v27  ;;  %v10362_v56 = vadd.f32 %v1585_v30, %v1369_v3  ;;  %v1333_v3 = vld [vmem:[#allocation5 + $0x58] sm:$0xff] }
 0x309   : > { %v1377_v30 = vunpack.c.h.bf16 %v1333_v3 }
 0x30a   : > { %1727 = vmax.xlane.f32.xlu1 %v1726_v12  ;;  %v1729_v35 = vmax.f32 %v10360_v6, %v10362_v56 }
 0x30c   : > { %v1589_v43 = vpop.f32.mrb[48].mxu1 }
 0x30d   : > { %v1591_v37 = vpop.f32.mrb[49].mxu1  ;;  %v10366_v54 = vadd.f32 %v1589_v43, %v1370_v32 }
 0x30e   : > { %v1593_v63 = vpop.f32.mrb[50].mxu1  ;;  %1730 = vmax.xlane.f32.xlu1 %v1729_v35  ;;  %v10368_v9 = vadd.f32 %v1591_v37, %v1371_v60 }
 0x30f   : > { %v1595_v38 = vpop.f32.mrb[51].mxu1  ;;  %7393 = vmatmul.mubr.msk.bf16.gmra.mrb[136].mxu1 %vm1418_vm0, %v10232_v22  ;;  %v10372_v2 = vadd.f32 %v1593_v63, %v1372_v55  ;;  %v1376_v22 = vunpack.c.l.bf16 %v1333_v3  ;;  %v1334_v55 = vld [vmem:[#allocation5 + $0x60] sm:$0xff]  ;;  %v1335_v63 = vld [vmem:[#allocation5 + $0x68] sm:$0xff] }
 0x310   : > { %7394 = vmatprep.mubr.msk.bf16.mxu1 %vm1418_vm0, %v10174_v46  ;;  %v1732_v62 = vmax.f32 %v10366_v54, %v10368_v9  ;;  %v10378_v52 = vadd.f32 %v1595_v38, %v1373_v36  ;;  %v1378_v14 = vunpack.c.l.bf16 %v1334_v55  ;;  %v1379_v38 = vunpack.c.h.bf16 %v1334_v55 }
 0x312   : > { %14870 = vst [vmem:[#allocation41_spill] sm:$0xff] %v10378_v52  ;;  %1733 = vmax.xlane.f32.xlu0 %v1732_v62  ;;  %v1735_v19 = vmax.f32 %v10372_v2, %v10378_v52  ;;  %v1380_v62 = vunpack.c.l.bf16 %v1335_v63 }
 0x314   : > { %v1599_v16 = vpop.f32.mrb[52].mxu1  ;;  %1736 = vmax.xlane.f32.xlu1 %v1735_v19 }
 0x315   : > { %v1601_v12 = vpop.f32.mrb[53].mxu1  ;;  %v10382_v13 = vadd.f32 %v1599_v16, %v1374_v33 }
 0x316   : > { %v1603_v32 = vpop.f32.mrb[54].mxu1  ;;  %v10384_v60 = vadd.f32 %v1601_v12, %v1375_v25 }
 0x317   : > { %v1605_v43 = vpop.f32.mrb[55].mxu1  ;;  %7395 = vmatmul.mubr.msk.bf16.gmra.mrb[140].mxu1 %vm1418_vm0, %v10174_v46  ;;  %v10392_v36 = vadd.f32 %v1603_v32, %v1376_v22  ;;  %v1381_v46 = vunpack.c.h.bf16 %v1335_v63  ;;  %v1336_v22 = vld [vmem:[#allocation5 + $0x70] sm:$0xff] }
 0x318   : > { %7396 = vmatprep.mubr.msk.bf16.mxu1 %vm1418_vm0, %v10275_v34  ;;  %v1738_v35 = vmax.f32 %v10382_v13, %v10384_v60  ;;  %v10394_v37 = vadd.f32 %v1605_v43, %v1377_v30  ;;  %v1382_v63 = vunpack.c.l.bf16 %v1336_v22 }
 0x31a   : > { %1739 = vmax.xlane.f32.xlu1 %v1738_v35  ;;  %v1741_v3 = vmax.f32 %v10392_v36, %v10394_v37  ;;  %v1337_v35 = vld [vmem:[#allocation5 + $0x78] sm:$0xff] }
 0x31c   : > { %v1609_v33 = vpop.f32.mrb[56].mxu1 }
 0x31d   : > { %v1611_v19 = vpop.f32.mrb[57].mxu1  ;;  %v10398_v25 = vadd.f32 %v1609_v33, %v1378_v14  ;;  %v1384_v33 = vunpack.c.l.bf16 %v1337_v35 }
 0x31e   : > { %v1613_v16 = vpop.f32.mrb[58].mxu1  ;;  %1742 = vmax.xlane.f32.xlu1 %v1741_v3  ;;  %v10400_v12 = vadd.f32 %v1611_v19, %v1379_v38  ;;  %v1383_v38 = vunpack.c.h.bf16 %v1336_v22 }
 0x31f   : > { %14871 = vst [vmem:[#allocation42_spill] sm:$0xff] %v10398_v25  ;;  %v1615_v30 = vpop.f32.mrb[59].mxu1  ;;  %7397 = vmatmul.mubr.msk.bf16.gmra.mrb[144].mxu1 %vm1418_vm0, %v10275_v34  ;;  %v10404_v32 = vadd.f32 %v1613_v16, %v1380_v62  ;;  %v1385_v34 = vunpack.c.h.bf16 %v1337_v35  ;;  %v1339_v35 = vld [vmem:[#allocation5 + $0x88] sm:$0xff] }
 0x320   : > { %14872 = vst [vmem:[#allocation43_spill] sm:$0xff] %v10400_v12  ;;  %7398 = vmatprep.mubr.msk.bf16.mxu1 %vm1418_vm0, %v10200_v10  ;;  %v1744_v55 = vmax.f32 %v10398_v25, %v10400_v12  ;;  %v10410_v43 = vadd.f32 %v1615_v30, %v1381_v46  ;;  %v1338_v12 = vld [vmem:[#allocation5 + $0x80] sm:$0xff]  ;;  %v2539_v46 = vpop.permute.xlu0 %2538 }
 0x321   : > { %14873 = vst [vmem:[#allocation44_spill] sm:$0xff] %v10404_v32 }
 0x322   : > { %14874 = vst [vmem:[#allocation45_spill] sm:$0xff] %v10410_v43  ;;  %1745 = vmax.xlane.f32.xlu0 %v1744_v55  ;;  %v1747_v14 = vmax.f32 %v10404_v32, %v10410_v43 }
 0x324   : > { %v1619_v3 = vpop.f32.mrb[60].mxu1  ;;  %1748 = vmax.xlane.f32.xlu1 %v1747_v14 }
 0x325   : > { %v1621_v62 = vpop.f32.mrb[61].mxu1  ;;  %v10414_v19 = vadd.f32 %v1619_v3, %v1382_v63  ;;  %v1386_v63 = vunpack.c.l.bf16 %v1338_v12  ;;  %v1388_v3 = vunpack.c.l.bf16 %v1339_v35 }
 0x326   : > { %v1623_v16 = vpop.f32.mrb[62].mxu1  ;;  %v10416_v52 = vadd.f32 %v1621_v62, %v1383_v38  ;;  %v1387_v38 = vunpack.c.h.bf16 %v1338_v12 }
 0x327   : > { %14875 = vst [vmem:[#allocation46_spill] sm:$0xff] %v10414_v19  ;;  %v1625_v30 = vpop.f32.mrb[63].mxu1  ;;  %7399 = vmatmul.mubr.msk.bf16.gmra.mrb[148].mxu1 %vm1418_vm0, %v10200_v10  ;;  %v10420_v55 = vadd.f32 %v1623_v16, %v1384_v33  ;;  %v1389_v10 = vunpack.c.h.bf16 %v1339_v35 }
 0x328   : > { %14876 = vst [vmem:[#allocation47_spill] sm:$0xff] %v10416_v52  ;;  %v1750_v22 = vmax.f32 %v10414_v19, %v10416_v52  ;;  %v10424_v43 = vadd.f32 %v1625_v30, %v1385_v34  ;;  %7400 = vmatprep.mubr.msk.bf16.mxu1 %vm1418_vm0, %v2539_v46  ;;  %v1340_v30 = vld [vmem:[#allocation5 + $0x90] sm:$0xff]  ;;  %v2541_v52 = vpop.permute.xlu1 %2540 }
 0x329   : > { %14877 = vst [vmem:[#allocation48_spill] sm:$0xff] %v10420_v55  ;;  %v1390_v35 = vunpack.c.l.bf16 %v1340_v30 }
 0x32a   : > { %14878 = vst [vmem:[#allocation49_spill] sm:$0xff] %v10424_v43  ;;  %1751 = vmax.xlane.f32.xlu0 %v1750_v22  ;;  %v1753_v14 = vmax.f32 %v10420_v55, %v10424_v43 }
 0x32c   : > { %v1629_v62 = vpop.f32.mrb[64].mxu1  ;;  %1754 = vmax.xlane.f32.xlu1 %v1753_v14  ;;  %v1341_v14 = vld [vmem:[#allocation5 + $0x98] sm:$0xff] }
 0x32d   : > { %v10429_v33 = vadd.f32 %v1629_v62, %v1386_v63  ;;  %v1631_v16 = vpop.f32.mrb[65].mxu1  ;;  %v1392_v62 = vunpack.c.l.bf16 %v1341_v14 }
 0x32e   : > { %v10431_v32 = vadd.f32 %v1631_v16, %v1387_v38  ;;  %v1633_v34 = vpop.f32.mrb[66].mxu1  ;;  %v1391_v38 = vunpack.c.h.bf16 %v1340_v30  ;;  %v1393_v16 = vunpack.c.h.bf16 %v1341_v14 }
 0x32f   : > { %14879 = vst [vmem:[#allocation50_spill] sm:$0xff] %v10429_v33  ;;  %v10433_v19 = vadd.f32 %v1633_v34, %v1388_v3  ;;  %v1635_v25 = vpop.f32.mrb[67].mxu1  ;;  %7401 = vmatmul.mubr.msk.bf16.gmra.mrb[152].mxu1 %vm1418_vm0, %v2539_v46 }
 0x330   : > { %14880 = vst [vmem:[#allocation51_spill] sm:$0xff] %v10431_v32  ;;  %v10436_v22 = vadd.f32 %v1635_v25, %v1389_v10  ;;  %v1756_v12 = vmax.f32 %v10429_v33, %v10431_v32  ;;  %7402 = vmatprep.mubr.msk.bf16.mxu1 %vm1418_vm0, %v2541_v52  ;;  %v1342_v32 = vld [vmem:[#allocation5 + $0xa0] sm:$0xff] }
 0x331   : > { %v1394_v14 = vunpack.c.l.bf16 %v1342_v32 }
 0x332   : > { %14881 = vst [vmem:[#allocation52_spill] sm:$0xff] %v10436_v22  ;;  %v1759_v63 = vmax.f32 %v10433_v19, %v10436_v22  ;;  %1757 = vmax.xlane.f32.xlu0 %v1756_v12  ;;  %v1343_v12 = vld [vmem:[#allocation5 + $0xa8] sm:$0xff] }
 0x334   : > { %v1639_v3 = vpop.f32.mrb[68].mxu1  ;;  %1760 = vmax.xlane.f32.xlu1 %v1759_v63  ;;  %v1395_v63 = vunpack.c.h.bf16 %v1342_v32 }
 0x335   : > { %v10443_v34 = vadd.f32 %v1639_v3, %v1390_v35  ;;  %v1641_v25 = vpop.f32.mrb[69].mxu1  ;;  %v1397_v3 = vunpack.c.h.bf16 %v1343_v12 }
 0x336   : > { %v10445_v46 = vadd.f32 %v1641_v25, %v1391_v38  ;;  %v1643_v10 = vpop.f32.mrb[70].mxu1  ;;  %v1396_v38 = vunpack.c.l.bf16 %v1343_v12  ;;  %v1345_v12 = vld [vmem:[#allocation5 + $0xb8] sm:$0xff] }
 0x337   : > { %14882 = vst [vmem:[#allocation53_spill] sm:$0xff] %v10443_v34  ;;  %v10447_v33 = vadd.f32 %v1643_v10, %v1392_v62  ;;  %v1645_v43 = vpop.f32.mrb[71].mxu1  ;;  %7403 = vmatmul.mubr.msk.bf16.gmra.mrb[156].mxu1 %vm1418_vm0, %v2541_v52  ;;  %v1344_v10 = vld [vmem:[#allocation5 + $0xb0] sm:$0xff] }
 0x338   : > { %14883 = vst [vmem:[#allocation54_spill] sm:$0xff] %v10445_v46  ;;  %v10450_v55 = vadd.f32 %v1645_v43, %v1393_v16  ;;  %7532 = vmatprep.mubr.msk.bf16.mxu1 %vm1418_vm0, %v10023_v11  ;;  %v1762_v30 = vmax.f32 %v10443_v34, %v10445_v46  ;;  %v5029_v46 = vsel %vm1418_vm0, %v10021_v0, 0  ;;  %v1398_v0 = vunpack.c.l.bf16 %v1344_v10 }
 0x33a   : > { %v1765_v35 = vmax.f32 %v10447_v33, %v10450_v55  ;;  %1763 = vmax.xlane.f32.xlu0 %v1762_v30 }
 0x33c   : > { %v1649_v62 = vpop.f32.mrb[72].mxu1  ;;  %1766 = vmax.xlane.f32.xlu1 %v1765_v35  ;;  %v1399_v35 = vunpack.c.h.bf16 %v1344_v10 }
 0x33d   : > { %v10458_v52 = vadd.f32 %v1649_v62, %v1394_v14  ;;  %v1651_v43 = vpop.f32.mrb[73].mxu1 }
 0x33e   : > { %v10460_v16 = vadd.f32 %v1651_v43, %v1395_v63  ;;  %v1653_v25 = vpop.f32.mrb[74].mxu1  ;;  %v1346_v43 = vld [vmem:[#allocation5 + $0xc0] sm:$0xff] }
 0x33f   : > { %14884 = vst [vmem:[#allocation55_spill] sm:$0xff] %v10458_v52  ;;  %v10464_v34 = vadd.f32 %v1653_v25, %v1396_v38  ;;  %v1655_v22 = vpop.f32.mrb[75].mxu1  ;;  %7533 = vmatmul.mubr.msk.bf16.vlgmr.msra.gmra.mrb[160].mxu1 %vm1418_vm0, %v10023_v11  ;;  %v1400_v11 = vunpack.c.l.bf16 %v1345_v12  ;;  %v1401_v38 = vunpack.c.h.bf16 %v1345_v12  ;;  %v1347_v12 = vld [vmem:[#allocation5 + $0xc8] sm:$0xff] }
 0x340   : > { %14885 = vst [vmem:[#allocation56_spill] sm:$0xff] %v10460_v16  ;;  %v1768_v32 = vmax.f32 %v10458_v52, %v10460_v16  ;;  %v10470_v30 = vadd.f32 %v1655_v22, %v1397_v3  ;;  %7677 = vmatpush3.bf16.xpose.msra.mxu1 %v5029_v46  ;;  %7534 = vmatprep.mubr.msk.bf16.mxu1 %vm1418_vm0, %v10041_v17 }
 0x341   : > { %14886 = vst [vmem:[#allocation57_spill] sm:$0xff] %v10464_v34  ;;  %8077 = vmatprep.subr.msk.bf16.mxu1 %vm1418_vm0, %v10155_v40  ;;  %v5032_v40 = vsel %vm1418_vm0, %v10001_v57, 0  ;;  %v1402_v57 = vunpack.c.l.bf16 %v1346_v43 }
 0x342   : > { %14887 = vst [vmem:[#allocation58_spill] sm:$0xff] %v10470_v30  ;;  %v1771_v14 = vmax.f32 %v10464_v34, %v10470_v30  ;;  %1769 = vmax.xlane.f32.xlu1 %v1768_v32 }
 0x344   : > { %v1659_v63 = vpop.f32.mrb[76].mxu1  ;;  %1772 = vmax.xlane.f32.xlu0 %v1771_v14  ;;  %v1403_v14 = vunpack.c.h.bf16 %v1346_v43 }
 0x345   : > { %v10478_v22 = vadd.f32 %v1659_v63, %v1398_v0  ;;  %v1661_v46 = vpop.f32.mrb[77].mxu1 }
 0x346   : > { %v10480_v62 = vadd.f32 %v1661_v46, %v1399_v35  ;;  %v1663_v3 = vpop.f32.mrb[78].mxu1 }
 0x347   : > { %14888 = vst [vmem:[#allocation59_spill] sm:$0xff] %v10478_v22  ;;  %v10484_v25 = vadd.f32 %v1663_v3, %v1400_v11  ;;  %v1665_v16 = vpop.f32.mrb[79].mxu1  ;;  %7535 = vmatmul.mubr.msk.bf16.gmra.mrb[164].mxu1 %vm1418_vm0, %v10041_v17  ;;  %v1404_v17 = vunpack.c.l.bf16 %v1347_v12  ;;  %v1405_v11 = vunpack.c.h.bf16 %v1347_v12  ;;  %v1348_v3 = vld [vmem:[#allocation5 + $0xd0] sm:$0xff]  ;;  %v1349_v12 = vld [vmem:[#allocation5 + $0xd8] sm:$0xff] }
 0x348   : > { %14889 = vst [vmem:[#allocation60_spill] sm:$0xff] %v10480_v62  ;;  %v1774_v10 = vmax.f32 %v10478_v22, %v10480_v62  ;;  %v10490_v32 = vadd.f32 %v1665_v16, %v1401_v38  ;;  %7679 = vmatpush3.bf16.xpose.msra.mxu1 %v5032_v40  ;;  %7536 = vmatprep.mubr.msk.bf16.mxu1 %vm1418_vm0, %v10083_v44 }
 0x349   : > { %14890 = vst [vmem:[#allocation61_spill] sm:$0xff] %v10484_v25  ;;  %8078 = vmatprep.subr.msk.bf16.mxu1 %vm1418_vm0, %v10222_v20  ;;  %v5035_v20 = vsel %vm1418_vm0, %v10071_v53, 0  ;;  %v1406_v53 = vunpack.c.l.bf16 %v1348_v3 }
 0x34a   : > { %14891 = vst [vmem:[#allocation62_spill] sm:$0xff] %v10490_v32  ;;  %v1777_v0 = vmax.f32 %v10484_v25, %v10490_v32  ;;  %1775 = vmax.xlane.f32.xlu0 %v1774_v10 }
 0x34c   : > { %v1669_v35 = vpop.f32.mrb[80].mxu1  ;;  %1778 = vmax.xlane.f32.xlu1 %v1777_v0  ;;  %v1407_v0 = vunpack.c.h.bf16 %v1348_v3 }
 0x34d   : > { %v10498_v16 = vadd.f32 %v1669_v35, %v1402_v57  ;;  %v1671_v63 = vpop.f32.mrb[81].mxu1 }
 0x34e   : > { %v10500_v38 = vadd.f32 %v1671_v63, %v1403_v14  ;;  %v1673_v46 = vpop.f32.mrb[82].mxu1 }
 0x34f   : > { %14892 = vst [vmem:[#allocation63_spill] sm:$0xff] %v10498_v16  ;;  %v10504_v40 = vadd.f32 %v1673_v46, %v1404_v17  ;;  %v1675_v62 = vpop.f32.mrb[83].mxu1  ;;  %7537 = vmatmul.mubr.msk.bf16.gmra.mrb[168].mxu1 %vm1418_vm0, %v10083_v44  ;;  %v1408_v44 = vunpack.c.l.bf16 %v1349_v12  ;;  %v1409_v17 = vunpack.c.h.bf16 %v1349_v12  ;;  %v1350_v46 = vld [vmem:[#allocation5 + $0xe0] sm:$0xff]  ;;  %v1351_v12 = vld [vmem:[#allocation5 + $0xe8] sm:$0xff] }
 0x350   : > { %14893 = vst [vmem:[#allocation64_spill] sm:$0xff] %v10500_v38  ;;  %v1780_v43 = vmax.f32 %v10498_v16, %v10500_v38  ;;  %v10510_v10 = vadd.f32 %v1675_v62, %v1405_v11  ;;  %7681 = vmatpush3.bf16.xpose.msra.mxu1 %v5035_v20  ;;  %7538 = vmatprep.mubr.msk.bf16.mxu1 %vm1418_vm0, %v10063_v41 }
 0x351   : > { %14894 = vst [vmem:[#allocation65_spill] sm:$0xff] %v10504_v40  ;;  %8079 = vmatprep.subr.msk.bf16.mxu1 %vm1418_vm0, %v10209_v50  ;;  %v5038_v50 = vsel %vm1418_vm0, %v10051_v18, 0  ;;  %v1410_v18 = vunpack.c.l.bf16 %v1350_v46 }
 0x352   : > { %14895 = vst [vmem:[#allocation66_spill] sm:$0xff] %v10510_v10  ;;  %v1783_v57 = vmax.f32 %v10504_v40, %v10510_v10  ;;  %1781 = vmax.xlane.f32.xlu1 %v1780_v43 }
 0x354   : > { %v1679_v14 = vpop.f32.mrb[84].mxu1  ;;  %1784 = vmax.xlane.f32.xlu0 %v1783_v57  ;;  %v1411_v57 = vunpack.c.h.bf16 %v1350_v46 }
 0x355   : > { %v10518_v62 = vadd.f32 %v1679_v14, %v1406_v53  ;;  %v1681_v35 = vpop.f32.mrb[85].mxu1 }
 0x356   : > { %v10520_v11 = vadd.f32 %v1681_v35, %v1407_v0  ;;  %v1683_v63 = vpop.f32.mrb[86].mxu1 }
 0x357   : > { %14896 = vst [vmem:[#allocation67_spill] sm:$0xff] %v10518_v62  ;;  %v10524_v20 = vadd.f32 %v1683_v63, %v1408_v44  ;;  %v1685_v38 = vpop.f32.mrb[87].mxu1  ;;  %7539 = vmatmul.mubr.msk.bf16.gmra.mrb[172].mxu1 %vm1418_vm0, %v10063_v41  ;;  %v1412_v41 = vunpack.c.l.bf16 %v1351_v12  ;;  %v1413_v44 = vunpack.c.h.bf16 %v1351_v12  ;;  %v1352_v63 = vld [vmem:[#allocation5 + $0xf0] sm:$0xff] }
 0x358   : > { %14897 = vst [vmem:[#allocation68_spill] sm:$0xff] %v10520_v11  ;;  %v1786_v3 = vmax.f32 %v10518_v62, %v10520_v11  ;;  %v10530_v43 = vadd.f32 %v1685_v38, %v1409_v17  ;;  %7683 = vmatpush3.bf16.xpose.msra.mxu1 %v5038_v50  ;;  %7540 = vmatprep.mubr.msk.bf16.mxu1 %vm1418_vm0, %v10119_v42 }
 0x359   : > { %14898 = vst [vmem:[#allocation69_spill] sm:$0xff] %v10524_v20  ;;  %8080 = vmatprep.subr.msk.bf16.mxu1 %vm1418_vm0, %v10259_v28  ;;  %v5041_v28 = vsel %vm1418_vm0, %v10105_v51, 0 }
 0x35a   : > { %14899 = vst [vmem:[#allocation70_spill] sm:$0xff] %v10530_v43  ;;  %v1789_v53 = vmax.f32 %v10524_v20, %v10530_v43  ;;  %1787 = vmax.xlane.f32.xlu0 %v1786_v3 }
 0x35c   : > { %v1689_v0 = vpop.f32.mrb[88].mxu1  ;;  %1790 = vmax.xlane.f32.xlu1 %v1789_v53  ;;  %v4977_v53 = vpop.permute.xlu1 %4976 }
 0x35d   : > { %v10538_v38 = vadd.f32 %v1689_v0, %v1410_v18  ;;  %v1691_v14 = vpop.f32.mrb[89].mxu1  ;;  %v1414_v18 = vunpack.c.l.bf16 %v1352_v63 }
 0x35e   : > { %v10540_v17 = vadd.f32 %v1691_v14, %v1411_v57  ;;  %v1693_v35 = vpop.f32.mrb[90].mxu1 }
 0x35f   : > { %14900 = vst [vmem:[#allocation71_spill] sm:$0xff] %v10538_v38  ;;  %7541 = vmatmul.mubr.msk.bf16.gmra.mrb[176].mxu1 %vm1418_vm0, %v10119_v42  ;;  %v10546_v50 = vadd.f32 %v1693_v35, %v1412_v41  ;;  %v1695_v46 = vpop.f32.mrb[91].mxu1  ;;  %v1415_v42 = vunpack.c.h.bf16 %v1352_v63 }
 0x360   : > { %14901 = vst [vmem:[#allocation72_spill] sm:$0xff] %v10540_v17  ;;  %v1792_v3 = vmax.f32 %v10538_v38, %v10540_v17  ;;  %7685 = vmatpush3.bf16.xpose.msra.mxu1 %v5041_v28  ;;  %7542 = vmatprep.mubr.msk.bf16.mxu1 %vm1418_vm0, %v10115_v59  ;;  %v10552_v12 = vadd.f32 %v1695_v46, %v1413_v44  ;;  %v14906_v44 = vld [vmem:[#allocation37_spill] sm:$0xff]  ;;  %v14907_v46 = vld [vmem:[#allocation38_spill] sm:$0xff] }
 0x361   : > { %14902 = vst [vmem:[#allocation73_spill] sm:$0xff] %v10546_v50  ;;  %8081 = vmatprep.subr.msk.bf16.mxu1 %vm1418_vm0, %v10191_v1  ;;  %v5044_v28 = vsel %vm1418_vm0, %v14906_v44, 0 }
 0x362   : > { %14903 = vst [vmem:[#allocation74_spill] sm:$0xff] %v10552_v12  ;;  %v1795_v51 = vmax.f32 %v10546_v50, %v10552_v12  ;;  %1793 = vmax.xlane.f32.xlu0 %v1792_v3  ;;  %v4963_v3 = vpop.permute.xlu1 %4962 }
 0x364   : > { %v1699_v57 = vpop.f32.mrb[92].mxu1 }
 0x365   : > { %v10558_v41 = vadd.f32 %v1699_v57, %v1414_v18  ;;  %v1701_v0 = vpop.f32.mrb[93].mxu1  ;;  %v4961_v18 = vpop.permute.xlu0 %4960  ;;  %v14909_v57 = vld [vmem:[#allocation39_spill] sm:$0xff] }
 0x366   : > { %v10560_v14 = vadd.f32 %v1701_v0, %v1415_v42  ;;  %1796 = vmax.xlane.f32.xlu0 %v1795_v51  ;;  %v10562_v35 = vpop.f32.mrb[94].mxu1  ;;  %v14908_v51 = vld [vmem:[#allocation22_spill] sm:$0xff]  ;;  %v5047_v42 = vsel %vm1418_vm0, %v4961_v18, 0  ;;  %v5050_v0 = vsel %vm1418_vm0, %v4963_v3, 0  ;;  %v7974_v18 = vpop.f32.mrb[32].mxu0 }
 0x367   : > { %14904 = vst [vmem:[#allocation75_spill] sm:$0xff] %v10558_v41  ;;  %7543 = vmatmul.mubr.msk.bf16.gmra.mrb[180].mxu1 %vm1418_vm0, %v10115_v59  ;;  %v10568_v1 = vpop.f32.mrb[95].mxu1  ;;  %v4979_v59 = vpop.permute.xlu1 %4978  ;;  %v9023_v3 = vld [vmem:[%s14431_s5] sm:$0x7] }
 0x368   : > { %14905 = vst [vmem:[#allocation76_spill] sm:$0xff] %v10560_v14  ;;  %v1798_v63 = vmax.f32 %v10558_v41, %v10560_v14  ;;  %7687 = vmatpush3.bf16.xpose.msra.mxu1 %v5044_v28  ;;  %7544 = vmatprep.mubr.msk.bf16.mxu1 %vm1418_vm0, %v14907_v46  ;;  %v14912_v14 = vld [vmem:[#allocation40_spill] sm:$0xff] }
 0x369   : > { %8082 = vmatprep.subr.msk.bf16.mxu1 %vm1418_vm0, %v4977_v53  ;;  %v14910_v53 = vld [vmem:[#allocation21_spill] sm:$0xff]  ;;  %v10592_v28 = vpop.permute.xlu0 %3759 }
 0x36a   : > { %1799 = vmax.xlane.f32.xlu0 %v1798_v63  ;;  %v14911_v63 = vld [vmem:[#allocation20_spill] sm:$0xff] }
 0x36b   : > { %v10590_v44 = vpop.permute.xlu1 %3757 }
 0x36d   : > { %4916 = vrot.lane.b32.xlu1 %v14908_v51, %s9302_s19  ;;  %v1115_v51 = vpop.f32.mrb[33].mxu0 }
 0x36f   : > { %7545 = vmatmul.mubr.msk.bf16.gmra.mrb[184].mxu1 %vm1418_vm0, %v14907_v46  ;;  %v1031_v46 = vsub.s32 2, %v14911_v63 }
 0x370   : > { %7689 = vmatpush3.bf16.xpose.msra.mxu1 %v5047_v42  ;;  %7546 = vmatprep.mubr.msk.bf16.mxu1 %vm1418_vm0, %v14909_v57 }
 0x371   : > { %8083 = vmatprep.subr.msk.bf16.mxu1 %vm1418_vm0, %v4979_v59  ;;  %4918 = vrot.lane.b32.xlu1 %v14910_v53, %s9302_s19  ;;  %v10600_v59 = vrot.slane %v9023_v3, %v1031_v46 }
 0x373   : > { %v1124_v12 = vadd.f32 %v7974_v18, %v10600_v59 }
 0x377   : > { %7547 = vmatmul.mubr.msk.bf16.gmra.mrb[188].mxu1 %vm1418_vm0, %v14909_v57  ;;  %v7975_v57 = vpop.f32.mrb[34].mxu0 }
 0x378   : > { %7691 = vmatpush3.bf16.xpose.msra.mxu1 %v5050_v0  ;;  %7548 = vmatprep.mubr.msk.bf16.mxu1 %vm1418_vm0, %v10204_v45  ;;  %v1118_v63 = vpop.f32.mrb[35].mxu0  ;;  %v1127_v50 = vadd.f32 %v7975_v57, %v10600_v59 }
 0x379   : > { %v1119_v17 = vadd.f32 %v1118_v63, %v10600_v59  ;;  %v7978_v46 = vpop.f32.mrb[36].mxu0 }
 0x37a   : > { %v10612_v43 = vpack.c.bf16 %v1127_v50, %v1124_v12  ;;  %v1140_v18 = vadd.f32 %v7978_v46, %v10600_v59 }
 0x37c   : > { %14913 = vst [vmem:[#allocation37_spill] sm:$0xff] %v10612_v43 }
 0x37f   : > { %7549 = vmatmul.mubr.msk.bf16.gmra.mrb[192].mxu1 %vm1418_vm0, %v10204_v45  ;;  %v1710_v42 = vpop.xlane.xlu1 %1709  ;;  %v1116_v45 = vadd.f32 %v1115_v51, %v10600_v59 }
 0x380   : > { %v1804_v53 = vsub.f32 %v10294_v15, %v1710_v42  ;;  %v1805_v0 = vsub.f32 %v10296_v4, %v1710_v42  ;;  %7550 = vmatprep.mubr.msk.bf16.mxu1 %vm1418_vm0, %v14912_v14  ;;  %v1131_v42 = vpop.f32.mrb[37].mxu0 }
 0x381   : > { %v1713_v41 = vpop.xlane.xlu0 %1712  ;;  %v10614_v20 = vpack.c.bf16 %v1119_v17, %v1116_v45  ;;  %v1132_v51 = vadd.f32 %v1131_v42, %v10600_v59  ;;  %v7979_v11 = vpop.f32.mrb[38].mxu0 }
 0x382   : > { %v1868_v3 = vmul.f32 1.442695, %v1804_v53  ;;  %v1870_v38 = vmul.f32 1.442695, %v1805_v0  ;;  %v1806_v15 = vsub.f32 %v10302_v48, %v1713_v41  ;;  %v1807_v4 = vsub.f32 %v10308_v61, %v1713_v41  ;;  %v1134_v0 = vpop.f32.mrb[39].mxu0 }
 0x383   : > { %14914 = vst [vmem:[#allocation38_spill] sm:$0xff] %v10614_v20  ;;  %v1143_v53 = vadd.f32 %v7979_v11, %v10600_v59  ;;  %v1135_v48 = vadd.f32 %v1134_v0, %v10600_v59  ;;  %v7982_v61 = vpop.f32.mrb[40].mxu0 }
 0x384   : > { %8253 = vpow2.f32 %v1868_v3  ;;  %v1872_v57 = vmul.f32 1.442695, %v1806_v15  ;;  %v1874_v63 = vmul.f32 1.442695, %v1807_v4  ;;  %v1156_v17 = vadd.f32 %v7982_v61, %v10600_v59  ;;  %v1147_v12 = vpop.f32.mrb[41].mxu0 }
 0x385   : > { %8255 = vpow2.f32 %v1870_v38  ;;  %v10620_v50 = vpack.c.bf16 %v1143_v53, %v1140_v18  ;;  %v10625_v45 = vpack.c.bf16 %v1135_v48, %v1132_v51  ;;  %v1148_v11 = vadd.f32 %v1147_v12, %v10600_v59  ;;  %v7983_v46 = vpop.f32.mrb[42].mxu0 }
 0x386   : > { %8257 = vpow2.f32 %v1872_v57  ;;  %v1159_v15 = vadd.f32 %v7983_v46, %v10600_v59  ;;  %v1150_v4 = vpop.f32.mrb[43].mxu0 }
 0x387   : > { %14915 = vst [vmem:[#allocation22_spill] sm:$0xff] %v10620_v50  ;;  %8259 = vpow2.f32 %v1874_v63  ;;  %7551 = vmatmul.mubr.msk.bf16.gmra.mrb[196].mxu1 %vm1418_vm0, %v14912_v14  ;;  %v1716_v41 = vpop.xlane.xlu1 %1715  ;;  %14916 = vst [vmem:[#allocation39_spill] sm:$0xff] %v10625_v45  ;;  %v1151_v42 = vadd.f32 %v1150_v4, %v10600_v59  ;;  %v7986_v18 = vpop.f32.mrb[44].mxu0 }
 0x388   : > { %v1808_v38 = vsub.f32 %v10314_v23, %v1716_v41  ;;  %v1809_v3 = vsub.f32 %v10316_v26, %v1716_v41  ;;  %7552 = vmatprep.mubr.msk.bf16.mxu1 %vm1418_vm0, %v10244_v24  ;;  %v10634_v51 = vpack.c.bf16 %v1159_v15, %v1156_v17  ;;  %v1172_v63 = vadd.f32 %v7986_v18, %v10600_v59  ;;  %v1163_v53 = vpop.f32.mrb[45].mxu0 }
 0x389   : > { %v10637_v23 = vpack.c.bf16 %v1151_v42, %v1148_v11  ;;  %v1164_v26 = vadd.f32 %v1163_v53, %v10600_v59  ;;  %v7987_v48 = vpop.f32.mrb[46].mxu0 }
 0x38a   : > { %v1876_v14 = vmul.f32 1.442695, %v1808_v38  ;;  %v1878_v57 = vmul.f32 1.442695, %v1809_v3  ;;  %14917 = vst [vmem:[#allocation21_spill] sm:$0xff] %v10634_v51  ;;  %v1175_v41 = vadd.f32 %v7987_v48, %v10600_v59  ;;  %v1166_v46 = vpop.f32.mrb[47].mxu0 }
 0x38b   : > { %v1719_v0 = vpop.xlane.xlu1 %1718  ;;  %14918 = vst [vmem:[#allocation20_spill] sm:$0xff] %v10637_v23  ;;  %v1167_v17 = vadd.f32 %v1166_v46, %v10600_v59  ;;  %v7990_v38 = vpop.f32.mrb[48].mxu0 }
 0x38c   : > { %8261 = vpow2.f32 %v1876_v14  ;;  %v1810_v61 = vsub.f32 %v10326_v7, %v1719_v0  ;;  %v1811_v12 = vsub.f32 %v10328_v5, %v1719_v0  ;;  %v10646_v4 = vpack.c.bf16 %v1175_v41, %v1172_v63  ;;  %v1179_v42 = vpop.f32.mrb[49].mxu0 }
 0x38d   : > { %8263 = vpow2.f32 %v1878_v57  ;;  %v10652_v7 = vpack.c.bf16 %v1167_v17, %v1164_v26  ;;  %v1188_v5 = vadd.f32 %v7990_v38, %v10600_v59  ;;  %v1180_v14 = vadd.f32 %v1179_v42, %v10600_v59  ;;  %v7991_v57 = vpop.f32.mrb[50].mxu0  ;;  %v1353_v42 = vld [vmem:[#allocation5 + $0xf8] sm:$0xff] }
 0x38e   : > { %v10644_v3 = vpop.eup %8253  ;;  %v1880_v15 = vmul.f32 1.442695, %v1810_v61  ;;  %v1882_v11 = vmul.f32 1.442695, %v1811_v12  ;;  %14919 = vst [vmem:[#allocation40_spill] sm:$0xff] %v10646_v4  ;;  %v1182_v0 = vpop.f32.mrb[51].mxu0  ;;  %v1416_v62 = vunpack.c.l.bf16 %v1353_v42 }
 0x38f   : > { %v10648_v18 = vpop.eup %8255  ;;  %7553 = vmatmul.mubr.msk.bf16.gmra.mrb[200].mxu1 %vm1418_vm0, %v10244_v24  ;;  %14920 = vst [vmem:[#allocation77_spill] sm:$0xff] %v10652_v7  ;;  %v1191_v24 = vadd.f32 %v7991_v57, %v10600_v59  ;;  %v1183_v26 = vadd.f32 %v1182_v0, %v10600_v59 }
 0x390   : > { %v10656_v53 = vpop.eup %8257  ;;  %8265 = vpow2.f32 %v1880_v15  ;;  %7554 = vmatprep.mubr.msk.bf16.mxu1 %vm1418_vm0, %v10227_v58  ;;  %v1996_v63 = vadd.f32 %v10648_v18, %v10644_v3  ;;  %v7994_v15 = vpop.f32.mrb[52].mxu0 }
 0x391   : > { %v10662_v48 = vpop.eup %8259  ;;  %8267 = vpow2.f32 %v1882_v11  ;;  %v10670_v41 = vpack.c.bf16 %v1191_v24, %v1188_v5  ;;  %v10672_v46 = vpack.c.bf16 %v1183_v26, %v1180_v14  ;;  %v10676_v11 = vpop.xlane.xlu1 %1724  ;;  %v1204_v14 = vadd.f32 %v7994_v15, %v10600_v59 }
 0x392   : > { %1997 = vadd.xlane.f32.xlu0 %v1996_v63  ;;  %v10666_v61 = vpop.f32.mrb[96].mxu1  ;;  %v1999_v38 = vadd.f32 %v10662_v48, %v10656_v53  ;;  %v1195_v0 = vpop.f32.mrb[53].mxu0 }
 0x393   : > { %v10668_v12 = vpop.f32.mrb[97].mxu1  ;;  %14921 = vst [vmem:[#allocation78_spill] sm:$0xff] %v10670_v41  ;;  %14922 = vst [vmem:[#allocation79_spill] sm:$0xff] %v10672_v46  ;;  %7244 = vmatprep.subr.bf16.mxu0 %v10672_v46  ;;  %v1196_v24 = vadd.f32 %v1195_v0, %v10600_v59  ;;  %v7995_v26 = vpop.f32.mrb[54].mxu0  ;;  %v1417_v46 = vunpack.c.h.bf16 %v1353_v42  ;;  %v2399_v0 = vld [vmem:[#allocation5 + $0x108] sm:$0xff] }
 0x394   : > { %v2724_v17 = vpop.f32.mrb[98].mxu1  ;;  %7245 = vmatpush3.bf16.msra.mxu0 %v10614_v20  ;;  %v1198_v20 = vpop.f32.mrb[55].mxu0  ;;  %v2432_v30 = vunpack.c.l.bf16 %v2399_v0  ;;  %v2433_v34 = vunpack.c.h.bf16 %v2399_v0 }
 0x395   : > { %v2726_v57 = vpop.f32.mrb[99].mxu1  ;;  %7246 = vmatprep.subr.bf16.mxu0 %v10670_v41  ;;  %v1199_v15 = vadd.f32 %v1198_v20, %v10600_v59  ;;  %v10714_v20 = vadd.f32 %v10568_v1, %v1417_v46 }
 0x396   : > { %v10679_v63 = vpop.eup %8261  ;;  %2000 = vadd.xlane.f32.xlu0 %v1999_v38 }
 0x397   : > { %v10682_v5 = vpop.eup %8263  ;;  %7555 = vmatmul.mubr.msk.bf16.gmra.mrb[204].mxu1 %vm1418_vm0, %v10227_v58  ;;  %v10693_v10 = vpop.xlane.xlu1 %1727  ;;  %v1207_v58 = vadd.f32 %v7995_v26, %v10600_v59  ;;  %v10708_v25 = vpack.c.bf16 %v1199_v15, %v1196_v24  ;;  %v10711_v26 = vadd.f32 %v10562_v35, %v1416_v62  ;;  %14926 = vst [vmem:[#allocation83_spill] sm:$0xff] %v10714_v20 }
 0x398   : > { %7556 = vmatprep.mubr.msk.bf16.mxu1 %vm1418_vm0, %v10285_v31  ;;  %v2002_v38 = vadd.f32 %v10682_v5, %v10679_v63  ;;  %7247 = vmatpush3.bf16.msra.mxu0 %v10612_v43  ;;  %v10735_v15 = vadd.f32 %v2724_v17, %v2432_v30 }
 0x399   : > { %v10706_v32 = vpack.c.bf16 %v1207_v58, %v1204_v14  ;;  %14924 = vst [vmem:[#allocation81_spill] sm:$0xff] %v10708_v25  ;;  %14925 = vst [vmem:[#allocation82_spill] sm:$0xff] %v10711_v26  ;;  %7248 = vmatprep.subr.bf16.mxu0 %v10708_v25  ;;  %v1801_v24 = vmax.f32 %v10711_v26, %v10714_v20 }
 0x39a   : > { %v10697_v40 = vpop.eup %8265  ;;  %2003 = vadd.xlane.f32.xlu0 %v2002_v38  ;;  %v10699_v41 = vpop.f32.mrb[100].mxu1  ;;  %14927 = vst [vmem:[#allocation84_spill] sm:$0xff] %v10735_v15 }
 0x39b   : > { %v10702_v42 = vpop.eup %8267  ;;  %v10704_v16 = vpop.f32.mrb[101].mxu1  ;;  %14923 = vst [vmem:[#allocation80_spill] sm:$0xff] %v10706_v32 }
 0x39c   : > { %v10716_v22 = vpop.f32.mrb[102].mxu1  ;;  %v7998_v38 = vpop.f32.mrb[56].mxu0  ;;  %v2005_v52 = vadd.f32 %v10702_v42, %v10697_v40  ;;  %7249 = vmatpush3.bf16.msra.mxu0 %v10625_v45 }
 0x39d   : > { %v10718_v43 = vpop.f32.mrb[103].mxu1  ;;  %v1211_v14 = vpop.f32.mrb[57].mxu0  ;;  %v1220_v35 = vadd.f32 %v7998_v38, %v10600_v59  ;;  %7250 = vmatprep.subr.bf16.mxu0 %v10706_v32 }
 0x39e   : > { %v10724_v62 = vpop.xlane.xlu1 %1730  ;;  %2006 = vadd.xlane.f32.xlu1 %v2005_v52  ;;  %v1212_v1 = vadd.f32 %v1211_v14, %v10600_v59  ;;  %v7999_v46 = vpop.f32.mrb[58].mxu0  ;;  %v10737_v52 = vadd.f32 %v2726_v57, %v2433_v34 }
 0x39f   : > { %7557 = vmatmul.mubr.msk.bf16.gmra.mrb[208].mxu1 %vm1418_vm0, %v10285_v31  ;;  %v1214_v58 = vpop.f32.mrb[59].mxu0  ;;  %v1223_v31 = vadd.f32 %v7999_v46, %v10600_v59 }
 0x3a0   : > { %7558 = vmatprep.mubr.msk.bf16.mxu1 %vm1418_vm0, %v10266_v29  ;;  %14928 = vst [vmem:[#allocation85_spill] sm:$0xff] %v10737_v52  ;;  %v1215_v0 = vadd.f32 %v1214_v58, %v10600_v59  ;;  %7251 = vmatpush3.bf16.msra.mxu0 %v10620_v50  ;;  %v2882_v34 = vmax.f32 %v10735_v15, %v10737_v52  ;;  %v8002_v57 = vpop.f32.mrb[60].mxu0 }
 0x3a1   : > { %v10748_v45 = vpack.c.bf16 %v1223_v31, %v1220_v35  ;;  %v1227_v46 = vpop.f32.mrb[61].mxu0 }
 0x3a2   : > { %v10741_v38 = vpop.f32.mrb[104].mxu1  ;;  %1802 = vmax.xlane.f32.xlu1 %v1801_v24  ;;  %v10744_v14 = vpop.xlane.xlu1 %1736  ;;  %v10750_v32 = vpack.c.bf16 %v1215_v0, %v1212_v1  ;;  %v1228_v0 = vadd.f32 %v1227_v46, %v10600_v59 }
 0x3a3   : > { %v10746_v25 = vpop.f32.mrb[105].mxu1  ;;  %14929 = vst [vmem:[#allocation86_spill] sm:$0xff] %v10748_v45  ;;  %v8003_v1 = vpop.f32.mrb[62].mxu0 }
 0x3a4   : > { %14930 = vst [vmem:[#allocation87_spill] sm:$0xff] %v10750_v32  ;;  %v10752_v30 = vpop.f32.mrb[106].mxu1  ;;  %7252 = vmatprep.subr.bf16.mxu0 %v10750_v32  ;;  %v1230_v31 = vpop.f32.mrb[63].mxu0 }
 0x3a5   : > { %v10756_v17 = vpop.f32.mrb[107].mxu1  ;;  %7253 = vmatpush3.bf16.msra.mxu0 %v10637_v23  ;;  %v1231_v32 = vadd.f32 %v1230_v31, %v10600_v59 }
 0x3a6   : > { %2883 = vmax.xlane.f32.xlu1 %v2882_v34  ;;  %7254 = vmatprep.subr.bf16.mxu0 %v10748_v45 }
 0x3a7   : > { %7559 = vmatmul.mubr.msk.bf16.gmra.mrb[212].mxu1 %vm1418_vm0, %v10266_v29  ;;  %v1740_v35 = vpop.xlane.xlu1 %1739 }
 0x3a8   : > { %v1824_v24 = vsub.f32 %v10382_v13, %v1740_v35  ;;  %v1825_v58 = vsub.f32 %v10384_v60, %v1740_v35  ;;  %7560 = vmatprep.mubr.msk.bf16.mxu1 %vm1418_vm0, %v10590_v44  ;;  %v10774_v60 = vpack.c.bf16 %v1231_v32, %v1228_v0  ;;  %v1722_v0 = vpop.xlane.xlu0 %1721 }
 0x3a9   : > { %7255 = vmatpush3.bf16.msra.mxu0 %v10634_v51 }
 0x3aa   : > { %v1908_v34 = vmul.f32 1.442695, %v1824_v24  ;;  %v1910_v23 = vmul.f32 1.442695, %v1825_v58  ;;  %v10769_v50 = vpop.f32.mrb[108].mxu1  ;;  %14931 = vst [vmem:[#allocation88_spill] sm:$0xff] %v10774_v60  ;;  %v1236_v24 = vadd.f32 %v8002_v57, %v10600_v59  ;;  %7256 = vmatprep.subr.bf16.mxu0 %v10774_v60 }
 0x3ab   : > { %v10772_v29 = vpop.f32.mrb[109].mxu1  ;;  %v1743_v13 = vpop.xlane.xlu1 %1742 }
 0x3ac   : > { %8269 = vpow2.f32 %v1908_v34  ;;  %v1826_v35 = vsub.f32 %v10392_v36, %v1743_v13  ;;  %v1827_v46 = vsub.f32 %v10394_v37, %v1743_v13  ;;  %v10778_v52 = vpop.f32.mrb[110].mxu1  ;;  %v1239_v36 = vadd.f32 %v8003_v1, %v10600_v59  ;;  %v14932_v37 = vld [vmem:[#allocation24_spill] sm:$0xff] }
 0x3ad   : > { %8271 = vpow2.f32 %v1910_v23  ;;  %v10780_v31 = vpop.f32.mrb[111].mxu1  ;;  %7257 = vmatpush3.bf16.msra.mxu0 %v10652_v7  ;;  %v1813_v13 = vsub.f32 %v10336_v49, %v1722_v0  ;;  %v1815_v49 = vsub.f32 %v10346_v39, %v10676_v11 }
 0x3ae   : > { %v1912_v58 = vmul.f32 1.442695, %v1826_v35  ;;  %v1914_v45 = vmul.f32 1.442695, %v1827_v46  ;;  %v10792_v32 = vpack.c.bf16 %v1239_v36, %v1236_v24 }
 0x3af   : > { %7561 = vmatmul.mubr.msk.bf16.gmra.mrb[216].mxu1 %vm1418_vm0, %v10590_v44 }
 0x3b0   : > { %8273 = vpow2.f32 %v1912_v58  ;;  %4920 = vrot.lane.b32.xlu0 %v14932_v37, %s9302_s19  ;;  %7562 = vmatprep.mubr.msk.bf16.mxu1 %vm1418_vm0, %v10592_v28  ;;  %14933 = vst [vmem:[#allocation24_spill] sm:$0xff] %v10792_v32  ;;  %v1814_v37 = vsub.f32 %v10340_v8, %v10676_v11  ;;  %v1890_v8 = vmul.f32 1.442695, %v1815_v49  ;;  %v1818_v11 = vsub.f32 %v10360_v6, %v10724_v62 }
 0x3b1   : > { %8275 = vpow2.f32 %v1914_v45  ;;  %7258 = vmatprep.subr.bf16.mxu0 %v10792_v32  ;;  %v1812_v45 = vsub.f32 %v10334_v47, %v1722_v0  ;;  %v1886_v32 = vmul.f32 1.442695, %v1813_v13  ;;  %v1817_v13 = vsub.f32 %v10352_v27, %v10693_v10 }
 0x3b2   : > { %v10794_v23 = vpop.f32.mrb[112].mxu1  ;;  %7259 = vmatpush3.bf16.msra.mxu0 %v10646_v4  ;;  %v1888_v7 = vmul.f32 1.442695, %v1814_v37  ;;  %v1734_v37 = vpop.xlane.xlu0 %1733  ;;  %v1896_v27 = vmul.f32 1.442695, %v1818_v11 }
 0x3b3   : > { %v10796_v57 = vpop.f32.mrb[113].mxu1  ;;  %v1884_v36 = vmul.f32 1.442695, %v1812_v45  ;;  %v1816_v45 = vsub.f32 %v10350_v21, %v10693_v10  ;;  %v1819_v21 = vsub.f32 %v10362_v56, %v10724_v62  ;;  %v1820_v10 = vsub.f32 %v10366_v54, %v1734_v37  ;;  %v14942_v54 = vld [vmem:[#allocation41_spill] sm:$0xff] }
 0x3b4   : > { %v10799_v44 = vpop.f32.mrb[114].mxu1  ;;  %v1821_v6 = vsub.f32 %v10368_v9, %v1734_v37  ;;  %v1822_v62 = vsub.f32 %v10372_v2, %v10744_v14  ;;  %v1823_v11 = vsub.f32 %v14942_v54, %v10744_v14 }
 0x3b5   : > { %v10802_v59 = vpop.f32.mrb[115].mxu1  ;;  %8277 = vpow2.f32 %v1884_v36  ;;  %v1892_v39 = vmul.f32 1.442695, %v1816_v45  ;;  %v1894_v36 = vmul.f32 1.442695, %v1817_v13 }
 0x3b6   : > { %v10804_v1 = vpop.eup %8269  ;;  %8279 = vpow2.f32 %v1886_v32  ;;  %v1900_v56 = vmul.f32 1.442695, %v1820_v10  ;;  %v1904_v2 = vmul.f32 1.442695, %v1822_v62  ;;  %v1746_v62 = vpop.xlane.xlu0 %1745 }
 0x3b7   : > { %14934 = vst [vmem:[#allocation89_spill] sm:$0xff] %v10804_v1  ;;  %v10806_v34 = vpop.eup %8271  ;;  %7563 = vmatmul.mubr.msk.bf16.gmra.mrb[220].mxu1 %vm1418_vm0, %v10592_v28  ;;  %8281 = vpow2.f32 %v1888_v7  ;;  %v1898_v7 = vmul.f32 1.442695, %v1819_v21  ;;  %v1749_v21 = vpop.xlane.xlu1 %1748 }
 0x3b8   : > { %14935 = vst [vmem:[#allocation90_spill] sm:$0xff] %v10806_v34  ;;  %v2026_v35 = vadd.f32 %v10806_v34, %v10804_v1  ;;  %8283 = vpow2.f32 %v1890_v8 }
 0x3b9   : > { %8285 = vpow2.f32 %v1892_v39  ;;  %v1902_v39 = vmul.f32 1.442695, %v1821_v6  ;;  %v14945_v6 = vld [vmem:[#allocation23_spill] sm:$0xff] }
 0x3ba   : > { %v10814_v46 = vpop.eup %8273  ;;  %2027 = vadd.xlane.f32.xlu1 %v2026_v35  ;;  %v10816_v24 = vpop.f32.mrb[116].mxu1  ;;  %8287 = vpow2.f32 %v1894_v36 }
 0x3bb   : > { %14936 = vst [vmem:[#allocation91_spill] sm:$0xff] %v10814_v46  ;;  %v10818_v58 = vpop.eup %8275  ;;  %v10822_v47 = vpop.f32.mrb[117].mxu1  ;;  %8289 = vpow2.f32 %v1896_v27 }
 0x3bc   : > { %14937 = vst [vmem:[#allocation92_spill] sm:$0xff] %v10818_v58  ;;  %v10826_v28 = vpop.f32.mrb[118].mxu1  ;;  %v2029_v35 = vadd.f32 %v10818_v58, %v10814_v46  ;;  %8291 = vpow2.f32 %v1898_v7  ;;  %v1906_v7 = vmul.f32 1.442695, %v1823_v11  ;;  %v10876_v54 = vpop.xlane.xlu1 %1754 }
 0x3bd   : > { %v10828_v0 = vpop.f32.mrb[119].mxu1  ;;  %8293 = vpow2.f32 %v1900_v56 }
 0x3be   : > { %2030 = vadd.xlane.f32.xlu1 %v2029_v35  ;;  %8295 = vpow2.f32 %v1902_v39 }
 0x3bf   : > { %v10850_v35 = vpop.eup %8277  ;;  %8297 = vpow2.f32 %v1904_v2 }
 0x3c0   : > { %v10852_v45 = vpop.eup %8279  ;;  %8299 = vpow2.f32 %v1906_v7 }
 0x3c1   : > { %v10864_v9 = vpop.eup %8281  ;;  %v2008_v27 = vadd.f32 %v10852_v45, %v10850_v35 }
 0x3c2   : > { %v10836_v4 = vpop.f32.mrb[120].mxu1  ;;  %v10870_v10 = vpop.eup %8283 }
 0x3c3   : > { %14938 = vst [vmem:[#allocation93_spill] sm:$0xff] %v10836_v4  ;;  %v10840_v60 = vpop.f32.mrb[121].mxu1  ;;  %v10874_v14 = vpop.eup %8285  ;;  %v2011_v51 = vadd.f32 %v10870_v10, %v10864_v9  ;;  %v14958_v4 = vld [vmem:[#allocation44_spill] sm:$0xff] }
 0x3c4   : > { %14939 = vst [vmem:[#allocation94_spill] sm:$0xff] %v10840_v60  ;;  %v10844_v32 = vpop.f32.mrb[122].mxu1  ;;  %14946 = vst [vmem:[#allocation23_spill] sm:$0xff] %v10874_v14  ;;  %v10880_v15 = vpop.eup %8287  ;;  %v1830_v1 = vsub.f32 %v14958_v4, %v1749_v21 }
 0x3c5   : > { %v10846_v49 = vpop.f32.mrb[123].mxu1  ;;  %14947 = vst [vmem:[#allocation98_spill] sm:$0xff] %v10880_v15  ;;  %v10888_v11 = vpop.eup %8289  ;;  %v2014_v26 = vadd.f32 %v10880_v15, %v10874_v14  ;;  %v2400_v14 = vld [vmem:[#allocation5 + $0x110] sm:$0xff] }
 0x3c6   : > { %14951 = vst [vmem:[#allocation102_spill] sm:$0xff] %v10888_v11 }
 0x3ca   : > { %v10854_v8 = vpop.f32.mrb[124].mxu1 }
 0x3cb   : > { %14940 = vst [vmem:[#allocation95_spill] sm:$0xff] %v10854_v8  ;;  %v10858_v13 = vpop.f32.mrb[125].mxu1 }
 0x3cc   : > { %14941 = vst [vmem:[#allocation96_spill] sm:$0xff] %v10858_v13  ;;  %v10862_v36 = vpop.f32.mrb[126].mxu1 }
 0x3cd   : > { %14943 = vst [vmem:[#allocation41_spill] sm:$0xff] %v10862_v36  ;;  %v10866_v37 = vpop.f32.mrb[127].mxu1 }
 0x3ce   : > { %14944 = vst [vmem:[#allocation97_spill] sm:$0xff] %v10866_v37  ;;  %v10896_v37 = vpop.eup %8291 }
 0x3cf   : > { %2009 = vadd.xlane.f32.xlu0 %v2008_v27  ;;  %4922 = vrot.lane.b32.xlu1 %v14945_v6, %s9302_s19  ;;  %v10890_v27 = vpop.xlane.xlu1 %1760  ;;  %14953 = vst [vmem:[#allocation104_spill] sm:$0xff] %v10896_v37  ;;  %v10900_v7 = vpop.eup %8293 }
 0x3d0   : > { %v10906_v13 = vpop.eup %8295 }
 0x3d1   : > { %v10916_v34 = vpop.eup %8297  ;;  %v2020_v4 = vadd.f32 %v10906_v13, %v10900_v7 }
 0x3d2   : > { %v10882_v20 = vpop.f32.mrb[128].mxu1 }
 0x3d3   : > { %14948 = vst [vmem:[#allocation99_spill] sm:$0xff] %v10882_v20  ;;  %2012 = vadd.xlane.f32.xlu0 %v2011_v51  ;;  %v10884_v56 = vpop.f32.mrb[129].mxu1  ;;  %v14954_v20 = vld [vmem:[#allocation42_spill] sm:$0xff]  ;;  %v14955_v51 = vld [vmem:[#allocation43_spill] sm:$0xff]  ;;  %v10902_v36 = vpop.xlane.xlu1 %1766 }
 0x3d4   : > { %14949 = vst [vmem:[#allocation100_spill] sm:$0xff] %v10884_v56  ;;  %v10886_v39 = vpop.f32.mrb[130].mxu1  ;;  %v1828_v2 = vsub.f32 %v14954_v20, %v1746_v62  ;;  %v1829_v56 = vsub.f32 %v14955_v51, %v1746_v62  ;;  %14956 = vst [vmem:[#allocation42_spill] sm:$0xff] %v10900_v7  ;;  %v14960_v62 = vld [vmem:[#allocation45_spill] sm:$0xff] }
 0x3d5   : > { %14950 = vst [vmem:[#allocation101_spill] sm:$0xff] %v10886_v39  ;;  %v10892_v6 = vpop.f32.mrb[131].mxu1  ;;  %v2017_v39 = vadd.f32 %v10896_v37, %v10888_v11  ;;  %v1831_v51 = vsub.f32 %v14960_v62, %v1749_v21  ;;  %v2434_v21 = vunpack.c.l.bf16 %v2400_v14 }
 0x3d6   : > { %14952 = vst [vmem:[#allocation103_spill] sm:$0xff] %v10892_v6  ;;  %v2398_v6 = vld [vmem:[#allocation5 + $0x100] sm:$0xff]  ;;  %v1916_v60 = vmul.f32 1.442695, %v1828_v2 }
 0x3d7   : > { %2015 = vadd.xlane.f32.xlu0 %v2014_v26  ;;  %v1918_v26 = vmul.f32 1.442695, %v1829_v56  ;;  %v2430_v58 = vunpack.c.l.bf16 %v2398_v6  ;;  %v2431_v11 = vunpack.c.h.bf16 %v2398_v6  ;;  %v10918_v37 = vpop.xlane.xlu1 %1769  ;;  %v1920_v56 = vmul.f32 1.442695, %v1830_v1  ;;  %v14967_v1 = vld [vmem:[#allocation46_spill] sm:$0xff] }
 0x3d8   : > { %8301 = vpow2.f32 %v1916_v60  ;;  %v1922_v2 = vmul.f32 1.442695, %v1831_v51 }
 0x3d9   : > { %8303 = vpow2.f32 %v1918_v26  ;;  %v10927_v62 = vadd.f32 %v10666_v61, %v2430_v58  ;;  %v10930_v6 = vadd.f32 %v10668_v12, %v2431_v11  ;;  %v14971_v26 = vld [vmem:[#allocation47_spill] sm:$0xff] }
 0x3da   : > { %v10908_v8 = vpop.f32.mrb[132].mxu1  ;;  %8305 = vpow2.f32 %v1920_v56  ;;  %v2401_v56 = vld [vmem:[#allocation5 + $0x118] sm:$0xff] }
 0x3db   : > { %14957 = vst [vmem:[#allocation43_spill] sm:$0xff] %v10908_v8  ;;  %2018 = vadd.xlane.f32.xlu0 %v2017_v39  ;;  %v10911_v20 = vpop.f32.mrb[133].mxu1  ;;  %v10924_v39 = vpop.eup %8299  ;;  %14963 = vst [vmem:[#allocation106_spill] sm:$0xff] %v10927_v62  ;;  %8307 = vpow2.f32 %v1922_v2  ;;  %v2879_v12 = vmax.f32 %v10927_v62, %v10930_v6  ;;  %v2437_v62 = vunpack.c.h.bf16 %v2401_v56 }
 0x3dc   : > { %14959 = vst [vmem:[#allocation44_spill] sm:$0xff] %v10911_v20  ;;  %v10914_v46 = vpop.f32.mrb[134].mxu1  ;;  %14964 = vst [vmem:[#allocation107_spill] sm:$0xff] %v10930_v6  ;;  %v1752_v20 = vpop.xlane.xlu0 %1751  ;;  %v2023_v8 = vadd.f32 %v10924_v39, %v10916_v34  ;;  %v2436_v6 = vunpack.c.l.bf16 %v2401_v56 }
 0x3dd   : > { %14961 = vst [vmem:[#allocation45_spill] sm:$0xff] %v10914_v46  ;;  %v10920_v15 = vpop.f32.mrb[135].mxu1  ;;  %v2435_v46 = vunpack.c.h.bf16 %v2400_v14  ;;  %v1832_v61 = vsub.f32 %v14967_v1, %v1752_v20  ;;  %v10946_v14 = vadd.f32 %v10699_v41, %v2434_v21  ;;  %v1833_v51 = vsub.f32 %v14971_v26, %v1752_v20  ;;  %v14974_v1 = vld [vmem:[#allocation48_spill] sm:$0xff] }
 0x3de   : > { %14962 = vst [vmem:[#allocation105_spill] sm:$0xff] %v10920_v15  ;;  %v10932_v15 = vpop.xlane.xlu1 %1778 }
 0x3df   : > { %2021 = vadd.xlane.f32.xlu0 %v2020_v4  ;;  %14969 = vst [vmem:[#allocation110_spill] sm:$0xff] %v10946_v14  ;;  %v10949_v11 = vadd.f32 %v10704_v16, %v2435_v46  ;;  %v1924_v2 = vmul.f32 1.442695, %v1832_v61  ;;  %v1926_v21 = vmul.f32 1.442695, %v1833_v51  ;;  %v14975_v16 = vld [vmem:[#allocation49_spill] sm:$0xff] }
 0x3e0   : > { %v1835_v46 = vsub.f32 %v14975_v16, %v10876_v54  ;;  %v2403_v61 = vld [vmem:[#allocation5 + $0x128] sm:$0xff] }
 0x3e1   : > { %14970 = vst [vmem:[#allocation111_spill] sm:$0xff] %v10949_v11  ;;  %v2885_v41 = vmax.f32 %v10946_v14, %v10949_v11  ;;  %8309 = vpow2.f32 %v1924_v2  ;;  %v10986_v2 = vadd.f32 %v10718_v43, %v2437_v62 }
 0x3e2   : > { %v10936_v7 = vpop.f32.mrb[136].mxu1  ;;  %v10952_v4 = vpop.xlane.xlu1 %1781  ;;  %8311 = vpow2.f32 %v1926_v21 }
 0x3e3   : > { %14965 = vst [vmem:[#allocation108_spill] sm:$0xff] %v10936_v7  ;;  %2024 = vadd.xlane.f32.xlu0 %v2023_v8  ;;  %v10938_v60 = vpop.f32.mrb[137].mxu1  ;;  %14972 = vst [vmem:[#allocation47_spill] sm:$0xff] %v10952_v4  ;;  %v10958_v7 = vpop.eup %8301 }
 0x3e4   : > { %14966 = vst [vmem:[#allocation109_spill] sm:$0xff] %v10938_v60  ;;  %v10941_v58 = vpop.f32.mrb[138].mxu1  ;;  %v1834_v60 = vsub.f32 %v14974_v1, %v10876_v54  ;;  %v10966_v26 = vpop.eup %8303  ;;  %v1930_v54 = vmul.f32 1.442695, %v1835_v46  ;;  %14982 = vst [vmem:[#allocation117_spill] sm:$0xff] %v10986_v2 }
 0x3e5   : > { %14968 = vst [vmem:[#allocation46_spill] sm:$0xff] %v10941_v58  ;;  %v10954_v8 = vpop.f32.mrb[139].mxu1  ;;  %v10974_v51 = vpop.eup %8305  ;;  %v2032_v56 = vadd.f32 %v10966_v26, %v10958_v7 }
 0x3e6   : > { %14973 = vst [vmem:[#allocation112_spill] sm:$0xff] %v10954_v8  ;;  %v1928_v8 = vmul.f32 1.442695, %v1834_v60  ;;  %v10980_v14 = vpop.eup %8307  ;;  %v2440_v60 = vunpack.c.l.bf16 %v2403_v61 }
 0x3e7   : > { %2880 = vmax.xlane.f32.xlu0 %v2879_v12  ;;  %v2035_v46 = vadd.f32 %v10980_v14, %v10974_v51 }
 0x3e8   : > { %8313 = vpow2.f32 %v1928_v8 }
 0x3e9   : > { %v10964_v20 = vpop.xlane.xlu1 %1790  ;;  %8315 = vpow2.f32 %v1930_v54 }
 0x3ea   : > { %14976 = vst [vmem:[#allocation48_spill] sm:$0xff] %v10964_v20  ;;  %v10968_v12 = vpop.f32.mrb[140].mxu1 }
 0x3eb   : > { %14977 = vst [vmem:[#allocation49_spill] sm:$0xff] %v10968_v12  ;;  %2886 = vmax.xlane.f32.xlu0 %v2885_v41  ;;  %v10970_v1 = vpop.f32.mrb[141].mxu1  ;;  %v10983_v41 = vadd.f32 %v10716_v22, %v2436_v6  ;;  %v10995_v6 = vadd.f32 %v10752_v30, %v2440_v60  ;;  %v11009_v54 = vpop.eup %8309 }
 0x3ec   : > { %14978 = vst [vmem:[#allocation113_spill] sm:$0xff] %v10970_v1  ;;  %v10972_v58 = vpop.f32.mrb[142].mxu1  ;;  %14989 = vst [vmem:[#allocation124_spill] sm:$0xff] %v11009_v54 }
 0x3ed   : > { %14979 = vst [vmem:[#allocation114_spill] sm:$0xff] %v10972_v58  ;;  %v10976_v16 = vpop.f32.mrb[143].mxu1  ;;  %v4917_v11 = vpop.permute.xlu1 %4916  ;;  %14981 = vst [vmem:[#allocation116_spill] sm:$0xff] %v10983_v41  ;;  %v2441_v58 = vunpack.c.h.bf16 %v2403_v61  ;;  %v2888_v22 = vmax.f32 %v10983_v41, %v10986_v2 }
 0x3ee   : > { %14980 = vst [vmem:[#allocation115_spill] sm:$0xff] %v10976_v16  ;;  %7692 = vmatprep.mubr.msk.bf16.mxu1 %vm1418_vm0, %v4917_v11  ;;  %14983 = vst [vmem:[#allocation118_spill] sm:$0xff] %v10995_v6 }
 0x3ef   : > { %2033 = vadd.xlane.f32.xlu0 %v2032_v56  ;;  %7693 = vmatmul.mubr.msk.bf16.vlgmr.msra.gmra.mrb[224].mxu1 %vm1418_vm0, %v4917_v11  ;;  %v10998_v43 = vadd.f32 %v10756_v17, %v2441_v58  ;;  %v11013_v56 = vpop.eup %8311  ;;  %v1758_v17 = vpop.xlane.xlu0 %1757 }
 0x3f1   : > { %v4919_v21 = vpop.permute.xlu1 %4918  ;;  %14984 = vst [vmem:[#allocation119_spill] sm:$0xff] %v10998_v43  ;;  %v2894_v30 = vmax.f32 %v10995_v6, %v10998_v43 }
 0x3f2   : > { %v11000_v62 = vpop.f32.mrb[144].mxu1  ;;  %7694 = vmatprep.mubr.msk.bf16.mxu1 %vm1418_vm0, %v4919_v21  ;;  %v11016_v58 = vpop.eup %8313 }
 0x3f3   : > { %14985 = vst [vmem:[#allocation120_spill] sm:$0xff] %v11000_v62  ;;  %2036 = vadd.xlane.f32.xlu0 %v2035_v46  ;;  %v11003_v11 = vpop.f32.mrb[145].mxu1  ;;  %2889 = vmax.xlane.f32.xlu1 %v2888_v22  ;;  %14990 = vst [vmem:[#allocation125_spill] sm:$0xff] %v11016_v58  ;;  %v2038_v46 = vadd.f32 %v11013_v56, %v11009_v54  ;;  %v11022_v22 = vpop.eup %8315 }
 0x3f4   : > { %14986 = vst [vmem:[#allocation121_spill] sm:$0xff] %v11003_v11  ;;  %v11005_v8 = vpop.f32.mrb[146].mxu1  ;;  %v11024_v11 = vpop.xlane.xlu0 %1763 }
 0x3f5   : > { %14987 = vst [vmem:[#allocation122_spill] sm:$0xff] %v11005_v8  ;;  %v11007_v61 = vpop.f32.mrb[147].mxu1 }
 0x3f6   : > { %14988 = vst [vmem:[#allocation123_spill] sm:$0xff] %v11007_v61 }
 0x3f7   : > { %7695 = vmatmul.mubr.msk.bf16.gmra.mrb[228].mxu1 %vm1418_vm0, %v4919_v21  ;;  %2895 = vmax.xlane.f32.xlu1 %v2894_v30  ;;  %v2041_v21 = vadd.f32 %v11022_v22, %v11016_v58 }
 0x3f8   : > { %v11034_v30 = vpop.xlane.xlu0 %1772 }
 0x3fa   : > { %v11018_v60 = vpop.f32.mrb[148].mxu1 }
 0x3fb   : > { %14991 = vst [vmem:[#allocation126_spill] sm:$0xff] %v11018_v60  ;;  %v11026_v62 = vpop.f32.mrb[149].mxu1  ;;  %2039 = vadd.xlane.f32.xlu1 %v2038_v46 }
 0x3fc   : > { %14992 = vst [vmem:[#allocation127_spill] sm:$0xff] %v11026_v62  ;;  %v11028_v43 = vpop.f32.mrb[150].mxu1  ;;  %v11038_v2 = vpop.xlane.xlu0 %1775 }
 0x3fd   : > { %14993 = vst [vmem:[#allocation128_spill] sm:$0xff] %v11028_v43  ;;  %v11030_v6 = vpop.f32.mrb[151].mxu1 }
 0x3fe   : > { %14994 = vst [vmem:[#allocation129_spill] sm:$0xff] %v11030_v6  ;;  %v15000_v6 = vld [vmem:[#allocation26_spill] sm:$0xff] }
 0x3ff   : > { %2042 = vadd.xlane.f32.xlu1 %v2041_v21 }
 0x400   : > { %v11046_v46 = vpop.xlane.xlu0 %1784 }
 0x401   : > { %14999 = vst [vmem:[#allocation134_spill] sm:$0xff] %v11046_v46 }
 0x402   : > { %v11036_v60 = vpop.f32.mrb[152].mxu1 }
 0x403   : > { %14995 = vst [vmem:[#allocation130_spill] sm:$0xff] %v11036_v60  ;;  %v11040_v41 = vpop.f32.mrb[153].mxu1 }
 0x404   : > { %14996 = vst [vmem:[#allocation131_spill] sm:$0xff] %v11040_v41  ;;  %v11042_v61 = vpop.f32.mrb[154].mxu1  ;;  %v11052_v8 = vpop.xlane.xlu0 %1787 }
 0x405   : > { %14997 = vst [vmem:[#allocation132_spill] sm:$0xff] %v11042_v61  ;;  %v11044_v62 = vpop.f32.mrb[155].mxu1  ;;  %15002 = vst [vmem:[#allocation135_spill] sm:$0xff] %v11052_v8  ;;  %v15007_v61 = vld [vmem:[#allocation25_spill] sm:$0xff] }
 0x406   : > { %14998 = vst [vmem:[#allocation133_spill] sm:$0xff] %v11044_v62 }
 0x408   : > { %v11060_v41 = vpop.xlane.xlu0 %1793 }
 0x409   : > { %4924 = vrot.lane.b32.xlu0 %v15000_v6, %s9302_s19  ;;  %15006 = vst [vmem:[#allocation139_spill] sm:$0xff] %v11060_v41  ;;  %v2402_v41 = vld [vmem:[#allocation5 + $0x120] sm:$0xff] }
 0x40a   : > { %v11050_v43 = vpop.f32.mrb[156].mxu1 }
 0x40b   : > { %15001 = vst [vmem:[#allocation26_spill] sm:$0xff] %v11050_v43  ;;  %v11054_v21 = vpop.f32.mrb[157].mxu1 }
 0x40c   : > { %15003 = vst [vmem:[#allocation136_spill] sm:$0xff] %v11054_v21  ;;  %v11056_v60 = vpop.f32.mrb[158].mxu1  ;;  %v11070_v43 = vpop.xlane.xlu0 %1796  ;;  %v15013_v21 = vld [vmem:[#allocation50_spill] sm:$0xff] }
 0x40d   : > { %15004 = vst [vmem:[#allocation137_spill] sm:$0xff] %v11056_v60  ;;  %v11058_v16 = vpop.f32.mrb[159].mxu1  ;;  %15011 = vst [vmem:[#allocation142_spill] sm:$0xff] %v11070_v43  ;;  %v1836_v20 = vsub.f32 %v15013_v21, %v1758_v17  ;;  %v15014_v60 = vld [vmem:[#allocation51_spill] sm:$0xff] }
 0x40e   : > { %15005 = vst [vmem:[#allocation138_spill] sm:$0xff] %v11058_v16  ;;  %v1837_v8 = vsub.f32 %v15014_v60, %v1758_v17  ;;  %v2438_v17 = vunpack.c.l.bf16 %v2402_v41  ;;  %v2439_v60 = vunpack.c.h.bf16 %v2402_v41 }
 0x410   : > { %4926 = vrot.lane.b32.xlu1 %v15007_v61, %s9302_s19  ;;  %v1838_v61 = vsub.f32 %v10433_v19, %v10890_v27  ;;  %v11080_v46 = vpop.xlane.xlu0 %1799  ;;  %v1934_v43 = vmul.f32 1.442695, %v1837_v8 }
 0x411   : > { %15016 = vst [vmem:[#allocation51_spill] sm:$0xff] %v11080_v46 }
 0x412   : > { %v11064_v62 = vpop.f32.mrb[160].mxu1  ;;  %v1936_v58 = vmul.f32 1.442695, %v1838_v61  ;;  %v15023_v61 = vld [vmem:[#allocation53_spill] sm:$0xff] }
 0x413   : > { %15008 = vst [vmem:[#allocation25_spill] sm:$0xff] %v11064_v62  ;;  %v11066_v1 = vpop.f32.mrb[161].mxu1 }
 0x414   : > { %15009 = vst [vmem:[#allocation140_spill] sm:$0xff] %v11066_v1  ;;  %v11068_v6 = vpop.f32.mrb[162].mxu1  ;;  %v1932_v1 = vmul.f32 1.442695, %v1836_v20  ;;  %v11094_v20 = vadd.f32 %v10746_v25, %v2439_v60 }
 0x415   : > { %15010 = vst [vmem:[#allocation141_spill] sm:$0xff] %v11068_v6  ;;  %v11072_v12 = vpop.f32.mrb[163].mxu1 }
 0x416   : > { %15012 = vst [vmem:[#allocation143_spill] sm:$0xff] %v11072_v12  ;;  %v15019_v12 = vld [vmem:[#allocation52_spill] sm:$0xff]  ;;  %8317 = vpow2.f32 %v1932_v1  ;;  %v1840_v1 = vsub.f32 %v15023_v61, %v11024_v11 }
 0x417   : > { %v1839_v4 = vsub.f32 %v15019_v12, %v10890_v27  ;;  %8319 = vpow2.f32 %v1934_v43 }
 0x419   : > { %v1938_v46 = vmul.f32 1.442695, %v1839_v4 }
 0x41a   : > { %v11076_v16 = vpop.f32.mrb[164].mxu1 }
 0x41b   : > { %15015 = vst [vmem:[#allocation50_spill] sm:$0xff] %v11076_v16  ;;  %v11082_v62 = vpop.f32.mrb[165].mxu1  ;;  %v2404_v16 = vld [vmem:[#allocation5 + $0x130] sm:$0xff] }
 0x41c   : > { %15017 = vst [vmem:[#allocation144_spill] sm:$0xff] %v11082_v62  ;;  %v11084_v6 = vpop.f32.mrb[166].mxu1  ;;  %v2442_v19 = vunpack.c.l.bf16 %v2404_v16  ;;  %v11091_v62 = vadd.f32 %v10741_v38, %v2438_v17  ;;  %v2443_v8 = vunpack.c.h.bf16 %v2404_v16 }
 0x41d   : > { %15018 = vst [vmem:[#allocation145_spill] sm:$0xff] %v11084_v6  ;;  %v11088_v21 = vpop.f32.mrb[167].mxu1 }
 0x41e   : > { %15020 = vst [vmem:[#allocation52_spill] sm:$0xff] %v11088_v21  ;;  %v2891_v25 = vmax.f32 %v11091_v62, %v11094_v20  ;;  %v11109_v4 = vadd.f32 %v10769_v50, %v2442_v19  ;;  %v11112_v16 = vadd.f32 %v10772_v29, %v2443_v8  ;;  %v1843_v8 = vsub.f32 %v10450_v55, %v10902_v36 }
 0x41f   : > { %v1998_v54 = vpop.xlane.xlu0 %1997 }
 0x420   : > { %8321 = vrcp.f32 %v1998_v54  ;;  %v2405_v54 = vld [vmem:[#allocation5 + $0x138] sm:$0xff]  ;;  %v2897_v50 = vmax.f32 %v11109_v4, %v11112_v16 }
 0x421   : > { %8323 = vpow2.f32 %v1936_v58  ;;  %v15026_v58 = vld [vmem:[#allocation54_spill] sm:$0xff]  ;;  %v2444_v61 = vunpack.c.l.bf16 %v2405_v54  ;;  %v2445_v19 = vunpack.c.h.bf16 %v2405_v54 }
 0x422   : > { %v11096_v27 = vpop.f32.mrb[168].mxu1  ;;  %v1841_v17 = vsub.f32 %v15026_v58, %v11024_v11 }
 0x423   : > { %15021 = vst [vmem:[#allocation146_spill] sm:$0xff] %v11096_v27  ;;  %v2001_v12 = vpop.xlane.xlu0 %2000  ;;  %v11098_v41 = vpop.f32.mrb[169].mxu1  ;;  %v11136_v55 = vadd.f32 %v10778_v52, %v2444_v61 }
 0x424   : > { %15022 = vst [vmem:[#allocation147_spill] sm:$0xff] %v11098_v41  ;;  %8325 = vrcp.f32 %v2001_v12  ;;  %v11102_v43 = vpop.f32.mrb[170].mxu1  ;;  %v1940_v12 = vmul.f32 1.442695, %v1840_v1  ;;  %v1842_v41 = vsub.f32 %v10447_v33, %v10902_v36  ;;  %v11118_v27 = vpop.eup %8317  ;;  %v1942_v29 = vmul.f32 1.442695, %v1841_v17 }
 0x425   : > { %15024 = vst [vmem:[#allocation53_spill] sm:$0xff] %v11102_v43  ;;  %8327 = vpow2.f32 %v1938_v46  ;;  %v11104_v38 = vpop.f32.mrb[171].mxu1  ;;  %v2407_v46 = vld [vmem:[#allocation5 + $0x148] sm:$0xff]  ;;  %v11126_v11 = vpop.eup %8319 }
 0x426   : > { %15025 = vst [vmem:[#allocation148_spill] sm:$0xff] %v11104_v38  ;;  %v2448_v33 = vunpack.c.l.bf16 %v2407_v46  ;;  %v2449_v36 = vunpack.c.h.bf16 %v2407_v46 }
 0x427   : > { %v2004_v60 = vpop.xlane.xlu0 %2003 }
 0x428   : > { %2892 = vmax.xlane.f32.xlu0 %v2891_v25  ;;  %8329 = vrcp.f32 %v2004_v60 }
 0x429   : > { %8331 = vpow2.f32 %v1940_v12  ;;  %v11142_v12 = vadd.f32 %v10780_v31, %v2445_v19 }
 0x42a   : > { %v11124_v38 = vpop.f32.mrb[172].mxu1  ;;  %v8322_v58 = vpop.eup %8321 }
 0x42b   : > { %15027 = vst [vmem:[#allocation54_spill] sm:$0xff] %v11124_v38  ;;  %v4921_v1 = vpop.permute.xlu0 %4920  ;;  %v11128_v25 = vpop.f32.mrb[173].mxu1  ;;  %v1944_v38 = vmul.f32 1.442695, %v1842_v41  ;;  %v2124_v52 = vmul.f32 %v8322_v58, %v10644_v3  ;;  %v11159_v3 = vadd.f32 %v10799_v44, %v2448_v33 }
 0x42c   : > { %15028 = vst [vmem:[#allocation149_spill] sm:$0xff] %v11128_v25  ;;  %v2007_v43 = vpop.xlane.xlu1 %2006  ;;  %2898 = vmax.xlane.f32.xlu0 %v2897_v50  ;;  %7696 = vmatprep.mubr.msk.bf16.mxu1 %vm1418_vm0, %v4921_v1  ;;  %v11131_v54 = vpop.f32.mrb[174].mxu1  ;;  %v1946_v50 = vmul.f32 1.442695, %v1843_v8  ;;  %v2900_v8 = vmax.f32 %v11136_v55, %v11142_v12 }
 0x42d   : > { %15029 = vst [vmem:[#allocation150_spill] sm:$0xff] %v11131_v54  ;;  %v11133_v17 = vpop.eup %8323  ;;  %8333 = vrcp.f32 %v2007_v43  ;;  %7697 = vmatmul.mubr.msk.bf16.gmra.mrb[232].mxu1 %vm1418_vm0, %v4921_v1  ;;  %v11139_v60 = vpop.f32.mrb[175].mxu1  ;;  %v2044_v54 = vadd.f32 %v11126_v11, %v11118_v27  ;;  %v2125_v43 = vmul.f32 %v8322_v58, %v10648_v18  ;;  %15032 = vst [vmem:[#allocation153_spill] sm:$0xff] %v11159_v3 }
 0x42e   : > { %15030 = vst [vmem:[#allocation151_spill] sm:$0xff] %v11139_v60  ;;  %v8326_v25 = vpop.eup %8325  ;;  %8335 = vpow2.f32 %v1942_v29  ;;  %v11162_v18 = vadd.f32 %v10802_v59, %v2449_v36 }
 0x42f   : > { %v11146_v21 = vpop.eup %8327  ;;  %v2126_v41 = vmul.f32 %v8326_v25, %v10656_v53  ;;  %v2127_v61 = vmul.f32 %v8326_v25, %v10662_v48  ;;  %8337 = vpow2.f32 %v1944_v38 }
 0x430   : > { %2045 = vadd.xlane.f32.xlu0 %v2044_v54  ;;  %8339 = vpow2.f32 %v1946_v50  ;;  %v2047_v29 = vadd.f32 %v11146_v21, %v11133_v17  ;;  %15033 = vst [vmem:[#allocation154_spill] sm:$0xff] %v11162_v18  ;;  %v2906_v44 = vmax.f32 %v11159_v3, %v11162_v18 }
 0x431   : > { %v2189_v46 = vpack.c.bf16 %v2127_v61, %v2125_v43  ;;  %v2188_v31 = vpack.c.bf16 %v2126_v41, %v2124_v52 }
 0x432   : > { %v11152_v19 = vpop.f32.mrb[176].mxu1  ;;  %v8330_v38 = vpop.eup %8329 }
 0x433   : > { %15031 = vst [vmem:[#allocation152_spill] sm:$0xff] %v11152_v19  ;;  %2252 = vmatprep.mubr.bf16.mxu0 %v2189_v46  ;;  %v11164_v53 = vpop.f32.mrb[177].mxu1  ;;  %v11170_v25 = vpop.eup %8331  ;;  %v2129_v59 = vmul.f32 %v8330_v38, %v10682_v5  ;;  %v2128_v36 = vmul.f32 %v8330_v38, %v10679_v63 }
 0x434   : > { %15034 = vst [vmem:[#allocation155_spill] sm:$0xff] %v11164_v53  ;;  %2253 = vmatmul.mubr.bf16.vlgmr.msra.gmra.mrb[64].mxu0 %v2188_v31  ;;  %2048 = vadd.xlane.f32.xlu0 %v2047_v29  ;;  %v11166_v48 = vpop.f32.mrb[178].mxu1  ;;  %v11192_v63 = vpop.xlane.xlu1 %1802 }
 0x435   : > { %15035 = vst [vmem:[#allocation156_spill] sm:$0xff] %v11166_v48  ;;  %2901 = vmax.xlane.f32.xlu1 %v2900_v8  ;;  %v11168_v1 = vpop.f32.mrb[179].mxu1 }
 0x436   : > { %15036 = vst [vmem:[#allocation157_spill] sm:$0xff] %v11168_v1  ;;  %v15062_v1 = vld [vmem:[#allocation58_spill] sm:$0xff] }
 0x437   : > { %v8334_v58 = vpop.eup %8333 }
 0x438   : > { %v11174_v33 = vpop.eup %8335  ;;  %v2131_v54 = vmul.f32 %v8334_v58, %v10702_v42  ;;  %v2130_v50 = vmul.f32 %v8334_v58, %v10697_v40  ;;  %v11200_v38 = vpop.xlane.xlu1 %2883 }
 0x439   : > { %2907 = vmax.xlane.f32.xlu1 %v2906_v44  ;;  %v11182_v61 = vpop.eup %8337  ;;  %v2050_v31 = vadd.f32 %v11174_v33, %v11170_v25 }
 0x43a   : > { %v2191_v52 = vpack.c.bf16 %v2131_v54, %v2129_v59  ;;  %v11180_v41 = vpop.f32.mrb[180].mxu1  ;;  %v2190_v43 = vpack.c.bf16 %v2130_v50, %v2128_v36  ;;  %v11188_v29 = vpop.eup %8339  ;;  %v15045_v36 = vld [vmem:[#allocation28_spill] sm:$0xff] }
 0x43b   : > { %15037 = vst [vmem:[#allocation158_spill] sm:$0xff] %v11180_v41  ;;  %v11184_v46 = vpop.f32.mrb[181].mxu1  ;;  %v2053_v42 = vadd.f32 %v11188_v29, %v11182_v61  ;;  %v15055_v41 = vld [vmem:[#allocation55_spill] sm:$0xff] }
 0x43c   : > { %15038 = vst [vmem:[#allocation159_spill] sm:$0xff] %v11184_v46  ;;  %2260 = vmatprep.mubr.bf16.mxu0 %v2191_v52  ;;  %v11190_v5 = vpop.f32.mrb[182].mxu1 }
 0x43d   : > { %15039 = vst [vmem:[#allocation160_spill] sm:$0xff] %v11190_v5  ;;  %2051 = vadd.xlane.f32.xlu1 %v2050_v31  ;;  %2261 = vmatmul.mubr.bf16.gmra.mrb[68].mxu0 %v2190_v43  ;;  %v11194_v40 = vpop.f32.mrb[183].mxu1 }
 0x43e   : > { %15040 = vst [vmem:[#allocation161_spill] sm:$0xff] %v11194_v40 }
 0x441   : > { %2054 = vadd.xlane.f32.xlu1 %v2053_v42 }
 0x442   : > { %v11198_v8 = vpop.f32.mrb[184].mxu1 }
 0x443   : > { %15041 = vst [vmem:[#allocation162_spill] sm:$0xff] %v11198_v8  ;;  %v11202_v58 = vpop.f32.mrb[185].mxu1  ;;  %v15050_v8 = vld [vmem:[#allocation27_spill] sm:$0xff] }
 0x444   : > { %15042 = vst [vmem:[#allocation163_spill] sm:$0xff] %v11202_v58  ;;  %v11204_v44 = vpop.f32.mrb[186].mxu1 }
 0x445   : > { %15043 = vst [vmem:[#allocation164_spill] sm:$0xff] %v11204_v44  ;;  %v11206_v59 = vpop.f32.mrb[187].mxu1 }
 0x446   : > { %15044 = vst [vmem:[#allocation165_spill] sm:$0xff] %v11206_v59  ;;  %v2406_v59 = vld [vmem:[#allocation5 + $0x140] sm:$0xff] }
 0x447   : > { %v11208_v54 = vpop.xlane.xlu1 %2027  ;;  %v2447_v5 = vunpack.c.h.bf16 %v2406_v59 }
 0x44a   : > { %4928 = vrot.lane.b32.xlu0 %v15045_v36, %s9302_s19  ;;  %v11212_v50 = vpop.f32.mrb[188].mxu1 }
 0x44b   : > { %15046 = vst [vmem:[#allocation28_spill] sm:$0xff] %v11212_v50  ;;  %v11214_v52 = vpop.f32.mrb[189].mxu1  ;;  %v11216_v43 = vpop.xlane.xlu1 %2030 }
 0x44c   : > { %15047 = vst [vmem:[#allocation166_spill] sm:$0xff] %v11214_v52  ;;  %v11218_v31 = vpop.f32.mrb[190].mxu1 }
 0x44d   : > { %15048 = vst [vmem:[#allocation167_spill] sm:$0xff] %v11218_v31  ;;  %v11220_v42 = vpop.f32.mrb[191].mxu1  ;;  %v1844_v31 = vsub.f32 %v15055_v41, %v10918_v37 }
 0x44e   : > { %15049 = vst [vmem:[#allocation168_spill] sm:$0xff] %v11220_v42  ;;  %v15056_v42 = vld [vmem:[#allocation56_spill] sm:$0xff] }
 0x44f   : > { %v4923_v58 = vpop.permute.xlu1 %4922  ;;  %v1845_v53 = vsub.f32 %v15056_v42, %v10918_v37  ;;  %v1847_v37 = vsub.f32 %v15062_v1, %v11034_v30  ;;  %v2408_v42 = vld [vmem:[#allocation5 + $0x150] sm:$0xff] }
 0x450   : > { %7698 = vmatprep.mubr.msk.bf16.mxu1 %vm1418_vm0, %v4923_v58 }
 0x451   : > { %7699 = vmatmul.mubr.msk.bf16.gmra.mrb[236].mxu1 %vm1418_vm0, %v4923_v58  ;;  %v1948_v58 = vmul.f32 1.442695, %v1844_v31  ;;  %v1950_v41 = vmul.f32 1.442695, %v1845_v53  ;;  %v2450_v53 = vunpack.c.l.bf16 %v2408_v42 }
 0x452   : > { %4930 = vrot.lane.b32.xlu1 %v15050_v8, %s9302_s19  ;;  %v11226_v46 = vpop.f32.mrb[192].mxu1 }
 0x453   : > { %15051 = vst [vmem:[#allocation27_spill] sm:$0xff] %v11226_v46  ;;  %v11228_v36 = vpop.f32.mrb[193].mxu1 }
 0x454   : > { %15052 = vst [vmem:[#allocation169_spill] sm:$0xff] %v11228_v36  ;;  %v11230_v50 = vpop.f32.mrb[194].mxu1  ;;  %v15060_v36 = vld [vmem:[#allocation57_spill] sm:$0xff] }
 0x455   : > { %15053 = vst [vmem:[#allocation170_spill] sm:$0xff] %v11230_v50  ;;  %v11232_v52 = vpop.f32.mrb[195].mxu1  ;;  %v1846_v50 = vsub.f32 %v15060_v36, %v11034_v30  ;;  %v1954_v36 = vmul.f32 1.442695, %v1847_v37  ;;  %v15064_v30 = vld [vmem:[#allocation59_spill] sm:$0xff] }
 0x456   : > { %15054 = vst [vmem:[#allocation171_spill] sm:$0xff] %v11232_v52  ;;  %v2446_v52 = vunpack.c.l.bf16 %v2406_v59  ;;  %v2451_v59 = vunpack.c.h.bf16 %v2408_v42  ;;  %v1848_v1 = vsub.f32 %v15064_v30, %v11038_v2 }
 0x458   : > { %v11251_v31 = vadd.f32 %v10794_v23, %v2446_v52  ;;  %v15067_v23 = vld [vmem:[#allocation60_spill] sm:$0xff]  ;;  %v2409_v52 = vld [vmem:[#allocation5 + $0x158] sm:$0xff]  ;;  %v11274_v37 = vadd.f32 %v10822_v47, %v2451_v59  ;;  %v1956_v42 = vmul.f32 1.442695, %v1848_v1  ;;  %v15073_v59 = vld [vmem:[#allocation62_spill] sm:$0xff] }
 0x459   : > { %v1851_v1 = vsub.f32 %v15073_v59, %v10932_v15 }
 0x45a   : > { %v11238_v19 = vpop.f32.mrb[196].mxu1  ;;  %15070 = vst [vmem:[#allocation175_spill] sm:$0xff] %v11274_v37 }
 0x45b   : > { %15057 = vst [vmem:[#allocation55_spill] sm:$0xff] %v11238_v19  ;;  %v11240_v8 = vpop.f32.mrb[197].mxu1 }
 0x45c   : > { %15058 = vst [vmem:[#allocation56_spill] sm:$0xff] %v11240_v8  ;;  %v2010_v44 = vpop.xlane.xlu0 %2009  ;;  %v11242_v46 = vpop.f32.mrb[198].mxu1  ;;  %v1952_v8 = vmul.f32 1.442695, %v1846_v50 }
 0x45d   : > { %15059 = vst [vmem:[#allocation172_spill] sm:$0xff] %v11242_v46  ;;  %v11246_v40 = vpop.f32.mrb[199].mxu1  ;;  %8341 = vrcp.f32 %v2010_v44  ;;  %v11254_v46 = vadd.f32 %v10796_v57, %v2447_v5 }
 0x45e   : > { %15061 = vst [vmem:[#allocation57_spill] sm:$0xff] %v11246_v40  ;;  %8343 = vpow2.f32 %v1948_v58 }
 0x45f   : > { %v2903_v5 = vmax.f32 %v11251_v31, %v11254_v46 }
 0x460   : > { %v2013_v19 = vpop.xlane.xlu0 %2012 }
 0x461   : > { %8345 = vrcp.f32 %v2013_v19  ;;  %v1849_v19 = vsub.f32 %v15067_v23, %v11038_v2 }
 0x462   : > { %8347 = vpow2.f32 %v1950_v41  ;;  %v11256_v40 = vpop.f32.mrb[200].mxu1  ;;  %v11271_v41 = vadd.f32 %v10816_v24, %v2450_v53 }
 0x463   : > { %15063 = vst [vmem:[#allocation58_spill] sm:$0xff] %v11256_v40  ;;  %v11260_v44 = vpop.f32.mrb[201].mxu1  ;;  %8349 = vpow2.f32 %v1952_v8  ;;  %v2453_v40 = vunpack.c.h.bf16 %v2409_v52  ;;  %v1958_v2 = vmul.f32 1.442695, %v1849_v19 }
 0x464   : > { %15065 = vst [vmem:[#allocation59_spill] sm:$0xff] %v11260_v44  ;;  %v2016_v58 = vpop.xlane.xlu0 %2015  ;;  %v11262_v50 = vpop.f32.mrb[202].mxu1  ;;  %8351 = vpow2.f32 %v1954_v36  ;;  %15069 = vst [vmem:[#allocation174_spill] sm:$0xff] %v11271_v41  ;;  %v2452_v44 = vunpack.c.l.bf16 %v2409_v52  ;;  %v15071_v36 = vld [vmem:[#allocation61_spill] sm:$0xff]  ;;  %v2909_v47 = vmax.f32 %v11271_v41, %v11274_v37 }
 0x465   : > { %15066 = vst [vmem:[#allocation173_spill] sm:$0xff] %v11262_v50  ;;  %v11266_v57 = vpop.f32.mrb[203].mxu1  ;;  %8353 = vrcp.f32 %v2016_v58  ;;  %v1850_v50 = vsub.f32 %v15071_v36, %v10932_v15  ;;  %v11300_v15 = vadd.f32 %v10828_v0, %v2453_v40 }
 0x466   : > { %15068 = vst [vmem:[#allocation60_spill] sm:$0xff] %v11266_v57  ;;  %v2411_v57 = vld [vmem:[#allocation5 + $0x168] sm:$0xff] }
 0x467   : > { %v8342_v8 = vpop.eup %8341  ;;  %v2456_v59 = vunpack.c.l.bf16 %v2411_v57 }
 0x468   : > { %v2019_v30 = vpop.xlane.xlu0 %2018  ;;  %v11276_v23 = vpop.eup %8343 }
 0x469   : > { %8355 = vrcp.f32 %v2019_v30  ;;  %2904 = vmax.xlane.f32.xlu0 %v2903_v5  ;;  %v2133_v30 = vmul.f32 %v8342_v8, %v10852_v45 }
 0x46a   : > { %v11280_v24 = vpop.f32.mrb[204].mxu1  ;;  %8357 = vpow2.f32 %v1956_v42  ;;  %v11297_v42 = vadd.f32 %v10826_v28, %v2452_v44 }
 0x46b   : > { %15072 = vst [vmem:[#allocation61_spill] sm:$0xff] %v11280_v24  ;;  %v8346_v53 = vpop.eup %8345  ;;  %v11286_v58 = vpop.f32.mrb[205].mxu1  ;;  %v2132_v24 = vmul.f32 %v8342_v8, %v10850_v35  ;;  %8359 = vpow2.f32 %v1958_v2  ;;  %v2457_v35 = vunpack.c.h.bf16 %v2411_v57  ;;  %v11317_v57 = vadd.f32 %v10844_v32, %v2456_v59 }
 0x46c   : > { %15074 = vst [vmem:[#allocation62_spill] sm:$0xff] %v11286_v58  ;;  %v11288_v19 = vpop.eup %8347  ;;  %v2022_v5 = vpop.xlane.xlu0 %2021  ;;  %v2135_v36 = vmul.f32 %v8346_v53, %v10870_v10  ;;  %v2134_v48 = vmul.f32 %v8346_v53, %v10864_v9  ;;  %8361 = vrcp.f32 %v11216_v43  ;;  %v1962_v9 = vmul.f32 1.442695, %v1851_v1 }
 0x46d   : > { %v11290_v52 = vpop.f32.mrb[206].mxu1  ;;  %2910 = vmax.xlane.f32.xlu0 %v2909_v47  ;;  %v11305_v60 = vpop.eup %8349  ;;  %8363 = vrcp.f32 %v2022_v5  ;;  %v2056_v28 = vadd.f32 %v11288_v19, %v11276_v23  ;;  %v11320_v8 = vadd.f32 %v10846_v49, %v2457_v35  ;;  %v15080_v47 = vld [vmem:[#allocation98_spill] sm:$0xff]  ;;  %v15081_v5 = vld [vmem:[#allocation104_spill] sm:$0xff] }
 0x46e   : > { %15075 = vst [vmem:[#allocation176_spill] sm:$0xff] %v11290_v52  ;;  %v11302_v58 = vpop.f32.mrb[207].mxu1  ;;  %v1960_v52 = vmul.f32 1.442695, %v1850_v50  ;;  %v2193_v45 = vpack.c.bf16 %v2135_v36, %v2133_v30  ;;  %v2192_v10 = vpack.c.bf16 %v2134_v48, %v2132_v24  ;;  %v11309_v0 = vpop.eup %8351  ;;  %8365 = vrcp.f32 %v11208_v54  ;;  %v15082_v30 = vld [vmem:[#allocation23_spill] sm:$0xff]  ;;  %v15083_v36 = vld [vmem:[#allocation102_spill] sm:$0xff] }
 0x46f   : > { %15076 = vst [vmem:[#allocation177_spill] sm:$0xff] %v11302_v58  ;;  %v8354_v44 = vpop.eup %8353  ;;  %v2912_v48 = vmax.f32 %v11297_v42, %v11300_v15  ;;  %v2059_v2 = vadd.f32 %v11309_v0, %v11305_v60 }
 0x470   : > { %v2025_v40 = vpop.xlane.xlu0 %2024  ;;  %2268 = vmatprep.mubr.bf16.mxu0 %v2193_v45  ;;  %v2137_v1 = vmul.f32 %v8354_v44, %v15080_v47  ;;  %v2136_v32 = vmul.f32 %v8354_v44, %v15082_v30 }
 0x471   : > { %8367 = vrcp.f32 %v2025_v40  ;;  %2057 = vadd.xlane.f32.xlu0 %v2056_v28  ;;  %2269 = vmatmul.mubr.bf16.gmra.mrb[72].mxu0 %v2192_v10  ;;  %v2918_v40 = vmax.f32 %v11317_v57, %v11320_v8 }
 0x472   : > { %8369 = vpow2.f32 %v1960_v52  ;;  %v11314_v43 = vpop.f32.mrb[208].mxu1 }
 0x473   : > { %15077 = vst [vmem:[#allocation178_spill] sm:$0xff] %v11314_v43  ;;  %v8356_v50 = vpop.eup %8355  ;;  %8371 = vpow2.f32 %v1962_v9  ;;  %v11322_v54 = vpop.f32.mrb[209].mxu1 }
 0x474   : > { %15078 = vst [vmem:[#allocation179_spill] sm:$0xff] %v11322_v54  ;;  %v11326_v24 = vpop.xlane.xlu0 %2880  ;;  %v11328_v53 = vpop.f32.mrb[210].mxu1  ;;  %v2139_v52 = vmul.f32 %v8356_v50, %v15081_v5  ;;  %v2138_v59 = vmul.f32 %v8356_v50, %v15083_v36 }
 0x475   : > { %15079 = vst [vmem:[#allocation180_spill] sm:$0xff] %v11328_v53  ;;  %v11334_v49 = vpop.eup %8357  ;;  %2060 = vadd.xlane.f32.xlu0 %v2059_v2  ;;  %v11336_v45 = vpop.f32.mrb[211].mxu1  ;;  %v15091_v53 = vld [vmem:[#allocation90_spill] sm:$0xff] }
 0x476   : > { %15084 = vst [vmem:[#allocation98_spill] sm:$0xff] %v11336_v45  ;;  %2913 = vmax.xlane.f32.xlu1 %v2912_v48  ;;  %v2195_v10 = vpack.c.bf16 %v2139_v52, %v2137_v1  ;;  %v2194_v35 = vpack.c.bf16 %v2138_v59, %v2136_v32  ;;  %v11338_v9 = vpop.eup %8359 }
 0x477   : > { %v8362_v28 = vpop.eup %8361  ;;  %v2062_v48 = vadd.f32 %v11338_v9, %v11334_v49 }
 0x478   : > { %v11342_v47 = vpop.xlane.xlu0 %2886  ;;  %2276 = vmatprep.mubr.bf16.mxu0 %v2195_v10  ;;  %v8364_v44 = vpop.eup %8363 }
 0x479   : > { %2277 = vmatmul.mubr.bf16.gmra.mrb[76].mxu0 %v2194_v35  ;;  %v8366_v50 = vpop.eup %8365  ;;  %v2141_v36 = vmul.f32 %v8364_v44, %v10906_v13  ;;  %v15088_v35 = vld [vmem:[#allocation92_spill] sm:$0xff] }
 0x47a   : > { %2919 = vmax.xlane.f32.xlu1 %v2918_v40  ;;  %v11344_v5 = vpop.f32.mrb[212].mxu1  ;;  %v2147_v40 = vmul.f32 %v8362_v28, %v15088_v35  ;;  %v2145_v58 = vmul.f32 %v8366_v50, %v15091_v53  ;;  %v15099_v35 = vld [vmem:[#allocation30_spill] sm:$0xff] }
 0x47b   : > { %15085 = vst [vmem:[#allocation104_spill] sm:$0xff] %v11344_v5  ;;  %v8368_v2 = vpop.eup %8367  ;;  %v11346_v30 = vpop.f32.mrb[213].mxu1 }
 0x47c   : > { %15086 = vst [vmem:[#allocation23_spill] sm:$0xff] %v11346_v30  ;;  %v11350_v1 = vpop.eup %8369  ;;  %v2034_v52 = vpop.xlane.xlu0 %2033  ;;  %v2143_v59 = vmul.f32 %v8368_v2, %v10924_v39  ;;  %v2142_v10 = vmul.f32 %v8368_v2, %v10916_v34  ;;  %v15090_v30 = vld [vmem:[#allocation42_spill] sm:$0xff]  ;;  %v2199_v34 = vpack.c.bf16 %v2147_v40, %v2145_v58 }
 0x47d   : > { %v11352_v32 = vpop.f32.mrb[214].mxu1  ;;  %v11358_v5 = vpop.eup %8371  ;;  %v2140_v43 = vmul.f32 %v8364_v44, %v15090_v30  ;;  %8373 = vrcp.f32 %v2034_v52  ;;  %v15094_v30 = vld [vmem:[#allocation91_spill] sm:$0xff] }
 0x47e   : > { %15087 = vst [vmem:[#allocation102_spill] sm:$0xff] %v11352_v32  ;;  %v11360_v54 = vpop.f32.mrb[215].mxu1  ;;  %2063 = vadd.xlane.f32.xlu1 %v2062_v48  ;;  %v2197_v45 = vpack.c.bf16 %v2143_v59, %v2141_v36  ;;  %v2065_v13 = vadd.f32 %v11358_v5, %v11350_v1  ;;  %v2146_v53 = vmul.f32 %v8362_v28, %v15094_v30 }
 0x47f   : > { %15089 = vst [vmem:[#allocation92_spill] sm:$0xff] %v11360_v54  ;;  %v2196_v32 = vpack.c.bf16 %v2142_v10, %v2140_v43 }
 0x480   : > { %v2037_v37 = vpop.xlane.xlu0 %2036  ;;  %2284 = vmatprep.mubr.bf16.mxu0 %v2197_v45  ;;  %v11366_v39 = vpop.xlane.xlu1 %2889 }
 0x481   : > { %8375 = vrcp.f32 %v2037_v37  ;;  %2285 = vmatmul.mubr.bf16.gmra.mrb[80].mxu0 %v2196_v32  ;;  %v15097_v37 = vld [vmem:[#allocation89_spill] sm:$0xff] }
 0x482   : > { %2066 = vadd.xlane.f32.xlu1 %v2065_v13  ;;  %2292 = vmatprep.mubr.bf16.mxu0 %v2199_v34  ;;  %v11368_v2 = vpop.f32.mrb[216].mxu1  ;;  %v2144_v52 = vmul.f32 %v8366_v50, %v15097_v37 }
 0x483   : > { %15092 = vst [vmem:[#allocation42_spill] sm:$0xff] %v11368_v2  ;;  %v11370_v44 = vpop.f32.mrb[217].mxu1 }
 0x484   : > { %15093 = vst [vmem:[#allocation90_spill] sm:$0xff] %v11370_v44  ;;  %v4925_v48 = vpop.permute.xlu0 %4924  ;;  %v11373_v43 = vpop.f32.mrb[218].mxu1  ;;  %v2198_v32 = vpack.c.bf16 %v2146_v53, %v2144_v52  ;;  %v2412_v44 = vld [vmem:[#allocation5 + $0x170] sm:$0xff] }
 0x485   : > { %15095 = vst [vmem:[#allocation91_spill] sm:$0xff] %v11373_v43  ;;  %v11375_v45 = vpop.xlane.xlu1 %2895  ;;  %7700 = vmatprep.mubr.msk.bf16.mxu1 %vm1418_vm0, %v4925_v48  ;;  %v11378_v58 = vpop.f32.mrb[219].mxu1 }
 0x486   : > { %15096 = vst [vmem:[#allocation181_spill] sm:$0xff] %v11378_v58  ;;  %7701 = vmatmul.mubr.msk.bf16.gmra.mrb[240].mxu1 %vm1418_vm0, %v4925_v48 }
 0x487   : > { %v8374_v36 = vpop.eup %8373 }
 0x488   : > { %v2149_v34 = vmul.f32 %v8374_v36, %v10966_v26  ;;  %v2148_v37 = vmul.f32 %v8374_v36, %v10958_v7  ;;  %v15104_v7 = vld [vmem:[#allocation124_spill] sm:$0xff] }
 0x489   : > { %v2040_v59 = vpop.xlane.xlu1 %2039  ;;  %2293 = vmatmul.mubr.bf16.gmra.mrb[84].mxu0 %v2198_v32 }
 0x48a   : > { %v11382_v10 = vpop.f32.mrb[220].mxu1  ;;  %8377 = vrcp.f32 %v2040_v59  ;;  %v15103_v59 = vld [vmem:[#allocation29_spill] sm:$0xff] }
 0x48b   : > { %15098 = vst [vmem:[#allocation89_spill] sm:$0xff] %v11382_v10  ;;  %v8376_v28 = vpop.eup %8375  ;;  %4932 = vrot.lane.b32.xlu0 %v15099_v35, %s9302_s19  ;;  %v11386_v40 = vpop.f32.mrb[221].mxu1  ;;  %v15110_v10 = vld [vmem:[#allocation65_spill] sm:$0xff] }
 0x48c   : > { %15100 = vst [vmem:[#allocation30_spill] sm:$0xff] %v11386_v40  ;;  %v11388_v13 = vpop.f32.mrb[222].mxu1  ;;  %v2151_v50 = vmul.f32 %v8376_v28, %v10980_v14  ;;  %v2150_v30 = vmul.f32 %v8376_v28, %v10974_v51  ;;  %v15109_v40 = vld [vmem:[#allocation134_spill] sm:$0xff] }
 0x48d   : > { %15101 = vst [vmem:[#allocation182_spill] sm:$0xff] %v11388_v13  ;;  %v2043_v53 = vpop.xlane.xlu1 %2042  ;;  %v11393_v48 = vpop.f32.mrb[223].mxu1  ;;  %v2410_v13 = vld [vmem:[#allocation5 + $0x160] sm:$0xff] }
 0x48e   : > { %15102 = vst [vmem:[#allocation183_spill] sm:$0xff] %v11393_v48  ;;  %8379 = vrcp.f32 %v2043_v53  ;;  %v2201_v52 = vpack.c.bf16 %v2151_v50, %v2149_v34  ;;  %v2200_v32 = vpack.c.bf16 %v2150_v30, %v2148_v37  ;;  %v15105_v34 = vld [vmem:[#allocation125_spill] sm:$0xff]  ;;  %v15106_v30 = vld [vmem:[#allocation47_spill] sm:$0xff] }
 0x48f   : > { %v15107_v53 = vld [vmem:[#allocation63_spill] sm:$0xff] }
 0x490   : > { %2300 = vmatprep.mubr.bf16.mxu0 %v2201_v52  ;;  %v1852_v37 = vsub.f32 %v15107_v53, %v15106_v30  ;;  %v15108_v52 = vld [vmem:[#allocation64_spill] sm:$0xff] }
 0x491   : > { %v4927_v35 = vpop.permute.xlu1 %4926  ;;  %2301 = vmatmul.mubr.bf16.gmra.mrb[88].mxu0 %v2200_v32  ;;  %v1853_v32 = vsub.f32 %v15108_v52, %v15106_v30  ;;  %v15117_v52 = vld [vmem:[#allocation67_spill] sm:$0xff] }
 0x492   : > { %7702 = vmatprep.mubr.msk.bf16.mxu1 %vm1418_vm0, %v4927_v35 }
 0x493   : > { %4934 = vrot.lane.b32.xlu1 %v15103_v59, %s9302_s19  ;;  %7703 = vmatmul.mubr.msk.bf16.gmra.mrb[244].mxu1 %vm1418_vm0, %v4927_v35  ;;  %v1964_v35 = vmul.f32 1.442695, %v1852_v37  ;;  %v15116_v37 = vld [vmem:[#allocation135_spill] sm:$0xff] }
 0x494   : > { %v8378_v14 = vpop.eup %8377 }
 0x495   : > { %v2153_v51 = vmul.f32 %v8378_v14, %v11013_v56  ;;  %v2152_v36 = vmul.f32 %v8378_v14, %v15104_v7  ;;  %v1854_v56 = vsub.f32 %v15110_v10, %v15109_v40  ;;  %v15111_v14 = vld [vmem:[#allocation66_spill] sm:$0xff]  ;;  %8381 = vpow2.f32 %v1964_v35  ;;  %v15120_v35 = vld [vmem:[#allocation96_spill] sm:$0xff] }
 0x496   : > { %v1855_v7 = vsub.f32 %v15111_v14, %v15109_v40  ;;  %v2459_v10 = vunpack.c.h.bf16 %v2412_v44  ;;  %v1856_v40 = vsub.f32 %v15117_v52, %v15116_v37 }
 0x497   : > { %v1968_v53 = vmul.f32 1.442695, %v1854_v56 }
 0x498   : > { %v8380_v26 = vpop.eup %8379  ;;  %v1970_v30 = vmul.f32 1.442695, %v1855_v7  ;;  %v11426_v56 = vadd.f32 %v15120_v35, %v2459_v10  ;;  %v2413_v7 = vld [vmem:[#allocation5 + $0x178] sm:$0xff] }
 0x499   : > { %v2155_v28 = vmul.f32 %v8380_v26, %v11022_v22  ;;  %v2154_v50 = vmul.f32 %v8380_v26, %v15105_v34  ;;  %v1966_v22 = vmul.f32 1.442695, %v1853_v32  ;;  %v2454_v26 = vunpack.c.l.bf16 %v2410_v13  ;;  %v15118_v32 = vld [vmem:[#allocation95_spill] sm:$0xff] }
 0x49a   : > { %v2455_v34 = vunpack.c.h.bf16 %v2410_v13  ;;  %15121 = vst [vmem:[#allocation47_spill] sm:$0xff] %v11426_v56  ;;  %v2461_v35 = vunpack.c.h.bf16 %v2413_v7 }
 0x49b   : > { %v2203_v48 = vpack.c.bf16 %v2155_v28, %v2153_v51  ;;  %v2202_v59 = vpack.c.bf16 %v2154_v50, %v2152_v36  ;;  %8383 = vpow2.f32 %v1966_v22  ;;  %v15112_v51 = vld [vmem:[#allocation93_spill] sm:$0xff]  ;;  %v2458_v50 = vunpack.c.l.bf16 %v2412_v44  ;;  %v15122_v22 = vld [vmem:[#allocation68_spill] sm:$0xff] }
 0x49c   : > { %v11413_v28 = vadd.f32 %v15112_v51, %v2454_v26  ;;  %8385 = vpow2.f32 %v1968_v53  ;;  %v1857_v14 = vsub.f32 %v15122_v22, %v15116_v37  ;;  %v1972_v44 = vmul.f32 1.442695, %v1856_v40  ;;  %v15123_v26 = vld [vmem:[#allocation48_spill] sm:$0xff]  ;;  %v2415_v37 = vld [vmem:[#allocation5 + $0x188] sm:$0xff] }
 0x49d   : > { %2308 = vmatprep.mubr.bf16.mxu0 %v2203_v48  ;;  %v15114_v48 = vld [vmem:[#allocation94_spill] sm:$0xff]  ;;  %8387 = vpow2.f32 %v1970_v30  ;;  %v2465_v43 = vunpack.c.h.bf16 %v2415_v37 }
 0x49e   : > { %2309 = vmatmul.mubr.bf16.gmra.mrb[92].mxu0 %v2202_v59  ;;  %15113 = vst [vmem:[#allocation29_spill] sm:$0xff] %v11413_v28  ;;  %v11416_v36 = vadd.f32 %v15114_v48, %v2455_v34  ;;  %v11423_v59 = vadd.f32 %v15118_v32, %v2458_v50  ;;  %v15124_v34 = vld [vmem:[#allocation69_spill] sm:$0xff]  ;;  %v1974_v48 = vmul.f32 1.442695, %v1857_v14  ;;  %v15125_v50 = vld [vmem:[#allocation70_spill] sm:$0xff]  ;;  %v2460_v32 = vunpack.c.l.bf16 %v2413_v7 }
 0x49f   : > { %v1858_v53 = vsub.f32 %v15124_v34, %v15123_v26  ;;  %v11432_v30 = vpop.eup %8381  ;;  %v1859_v52 = vsub.f32 %v15125_v50, %v15123_v26  ;;  %8389 = vpow2.f32 %v1972_v44  ;;  %v15126_v14 = vld [vmem:[#allocation41_spill] sm:$0xff]  ;;  %v2464_v7 = vunpack.c.l.bf16 %v2415_v37 }
 0x4a0   : > { %15115 = vst [vmem:[#allocation124_spill] sm:$0xff] %v11416_v36  ;;  %v2915_v13 = vmax.f32 %v11413_v28, %v11416_v36  ;;  %15119 = vst [vmem:[#allocation125_spill] sm:$0xff] %v11423_v59  ;;  %v2921_v51 = vmax.f32 %v11423_v59, %v11426_v56  ;;  %8391 = vpow2.f32 %v1974_v48  ;;  %v11447_v58 = vadd.f32 %v15126_v14, %v2460_v32  ;;  %v15128_v26 = vld [vmem:[#allocation97_spill] sm:$0xff] }
 0x4a1   : > { %v1976_v40 = vmul.f32 1.442695, %v1858_v53  ;;  %v1978_v22 = vmul.f32 1.442695, %v1859_v52  ;;  %v11450_v50 = vadd.f32 %v15128_v26, %v2461_v35  ;;  %v15132_v52 = vld [vmem:[#allocation103_spill] sm:$0xff] }
 0x4a2   : > { %15127 = vst [vmem:[#allocation63_spill] sm:$0xff] %v11447_v58  ;;  %v11460_v32 = vadd.f32 %v15132_v52, %v2465_v43 }
 0x4a3   : > { %15129 = vst [vmem:[#allocation64_spill] sm:$0xff] %v11450_v50  ;;  %8393 = vpow2.f32 %v1976_v40  ;;  %v2924_v53 = vmax.f32 %v11447_v58, %v11450_v50 }
 0x4a4   : > { %8395 = vpow2.f32 %v1978_v22  ;;  %15133 = vst [vmem:[#allocation65_spill] sm:$0xff] %v11460_v32 }
 0x4a5   : > { %v11438_v10 = vpop.eup %8383 }
 0x4a6   : > { %v2068_v34 = vadd.f32 %v11438_v10, %v11432_v30 }
 0x4aa   : > { %2916 = vmax.xlane.f32.xlu0 %v2915_v13  ;;  %v11440_v13 = vpop.eup %8385 }
 0x4ab   : > { %v11444_v2 = vpop.eup %8387 }
 0x4ac   : > { %v2071_v44 = vadd.f32 %v11444_v2, %v11440_v13  ;;  %v11464_v35 = vpop.eup %8389 }
 0x4ad   : > { %v11470_v22 = vpop.eup %8391 }
 0x4ae   : > { %2922 = vmax.xlane.f32.xlu0 %v2921_v51  ;;  %v15130_v51 = vld [vmem:[#allocation101_spill] sm:$0xff]  ;;  %v2074_v43 = vadd.f32 %v11470_v22, %v11464_v35 }
 0x4af   : > { %v11457_v48 = vadd.f32 %v15130_v51, %v2464_v7 }
 0x4b1   : > { %15131 = vst [vmem:[#allocation134_spill] sm:$0xff] %v11457_v48  ;;  %v2930_v37 = vmax.f32 %v11457_v48, %v11460_v32 }
 0x4b2   : > { %2069 = vadd.xlane.f32.xlu0 %v2068_v34  ;;  %v11472_v34 = vpop.eup %8393 }
 0x4b3   : > { %v11476_v7 = vpop.eup %8395 }
 0x4b5   : > { %v11462_v14 = vpop.xlane.xlu0 %2892 }
 0x4b6   : > { %2072 = vadd.xlane.f32.xlu0 %v2071_v44 }
 0x4b7   : > { %2925 = vmax.xlane.f32.xlu1 %v2924_v53  ;;  %v2077_v53 = vadd.f32 %v11476_v7, %v11472_v34 }
 0x4b9   : > { %v11468_v40 = vpop.xlane.xlu0 %2898 }
 0x4bb   : > { %2931 = vmax.xlane.f32.xlu1 %v2930_v37 }
 0x4bd   : > { %v2046_v26 = vpop.xlane.xlu0 %2045 }
 0x4be   : > { %8397 = vrcp.f32 %v2046_v26 }
 0x4bf   : > { %2075 = vadd.xlane.f32.xlu1 %v2074_v43 }
 0x4c1   : > { %v2049_v44 = vpop.xlane.xlu0 %2048 }
 0x4c2   : > { %8399 = vrcp.f32 %v2049_v44  ;;  %v11480_v51 = vpop.xlane.xlu1 %2901  ;;  %v11482_v52 = vpop.f32.mrb[224].mxu1 }
 0x4c3   : > { %15134 = vst [vmem:[#allocation66_spill] sm:$0xff] %v11482_v52  ;;  %2078 = vadd.xlane.f32.xlu1 %v2077_v53  ;;  %v11484_v37 = vpop.f32.mrb[225].mxu1 }
 0x4c4   : > { %15135 = vst [vmem:[#allocation93_spill] sm:$0xff] %v11484_v37  ;;  %v11486_v54 = vpop.f32.mrb[226].mxu1  ;;  %v15141_v37 = vld [vmem:[#allocation32_spill] sm:$0xff] }
 0x4c5   : > { %15136 = vst [vmem:[#allocation94_spill] sm:$0xff] %v11486_v54  ;;  %v4929_v56 = vpop.permute.xlu0 %4928  ;;  %v11488_v59 = vpop.f32.mrb[227].mxu1 }
 0x4c6   : > { %15137 = vst [vmem:[#allocation135_spill] sm:$0xff] %v11488_v59  ;;  %v11490_v36 = vpop.xlane.xlu1 %2907  ;;  %7704 = vmatprep.mubr.msk.bf16.mxu1 %vm1418_vm0, %v4929_v56 }
 0x4c7   : > { %15138 = vst [vmem:[#allocation67_spill] sm:$0xff] %v11490_v36  ;;  %7705 = vmatmul.mubr.msk.bf16.gmra.mrb[248].mxu1 %vm1418_vm0, %v4929_v56 }
 0x4c8   : > { %v8398_v26 = vpop.eup %8397 }
 0x4c9   : > { %v2157_v59 = vmul.f32 %v8398_v26, %v11126_v11  ;;  %v2156_v56 = vmul.f32 %v8398_v26, %v11118_v27  ;;  %v15144_v11 = vld [vmem:[#allocation31_spill] sm:$0xff] }
 0x4ca   : > { %v2052_v43 = vpop.xlane.xlu1 %2051  ;;  %v11494_v44 = vpop.f32.mrb[228].mxu1 }
 0x4cb   : > { %15139 = vst [vmem:[#allocation95_spill] sm:$0xff] %v11494_v44  ;;  %v11496_v28 = vpop.f32.mrb[229].mxu1  ;;  %8401 = vrcp.f32 %v2052_v43 }
 0x4cc   : > { %15140 = vst [vmem:[#allocation96_spill] sm:$0xff] %v11496_v28  ;;  %v8400_v53 = vpop.eup %8399  ;;  %4936 = vrot.lane.b32.xlu0 %v15141_v37, %s9302_s19  ;;  %v11500_v52 = vpop.f32.mrb[230].mxu1 }
 0x4cd   : > { %15142 = vst [vmem:[#allocation68_spill] sm:$0xff] %v11500_v52  ;;  %v11503_v54 = vpop.f32.mrb[231].mxu1  ;;  %v2159_v32 = vmul.f32 %v8400_v53, %v11146_v21  ;;  %v2158_v48 = vmul.f32 %v8400_v53, %v11133_v17  ;;  %v2416_v52 = vld [vmem:[#allocation5 + $0x190] sm:$0xff] }
 0x4ce   : > { %15143 = vst [vmem:[#allocation48_spill] sm:$0xff] %v11503_v54  ;;  %v2055_v44 = vpop.xlane.xlu1 %2054  ;;  %v15149_v54 = vld [vmem:[#allocation73_spill] sm:$0xff] }
 0x4cf   : > { %8403 = vrcp.f32 %v2055_v44  ;;  %v2205_v28 = vpack.c.bf16 %v2159_v32, %v2157_v59  ;;  %v2204_v41 = vpack.c.bf16 %v2158_v48, %v2156_v56  ;;  %v15146_v48 = vld [vmem:[#allocation71_spill] sm:$0xff]  ;;  %v15147_v32 = vld [vmem:[#allocation72_spill] sm:$0xff] }
 0x4d0   : > { %v2414_v56 = vld [vmem:[#allocation5 + $0x180] sm:$0xff] }
 0x4d1   : > { %2316 = vmatprep.mubr.bf16.mxu0 %v2205_v28  ;;  %v15145_v28 = vld [vmem:[#allocation139_spill] sm:$0xff] }
 0x4d2   : > { %v4931_v6 = vpop.permute.xlu1 %4930  ;;  %2317 = vmatmul.mubr.bf16.gmra.mrb[96].mxu0 %v2204_v41  ;;  %v1860_v41 = vsub.f32 %v15146_v48, %v15145_v28  ;;  %v1861_v43 = vsub.f32 %v15147_v32, %v15145_v28  ;;  %v15155_v32 = vld [vmem:[#allocation51_spill] sm:$0xff] }
 0x4d3   : > { %7706 = vmatprep.mubr.msk.bf16.mxu1 %vm1418_vm0, %v4931_v6 }
 0x4d4   : > { %4938 = vrot.lane.b32.xlu1 %v15144_v11, %s9302_s19  ;;  %7707 = vmatmul.mubr.msk.bf16.gmra.mrb[252].mxu1 %vm1418_vm0, %v4931_v6  ;;  %v1980_v6 = vmul.f32 1.442695, %v1860_v41  ;;  %v15148_v11 = vld [vmem:[#allocation142_spill] sm:$0xff]  ;;  %v2466_v41 = vunpack.c.l.bf16 %v2416_v52 }
 0x4d5   : > { %v8402_v37 = vpop.eup %8401 }
 0x4d6   : > { %v2161_v27 = vmul.f32 %v8402_v37, %v11174_v33  ;;  %v2160_v26 = vmul.f32 %v8402_v37, %v11170_v25  ;;  %v1862_v33 = vsub.f32 %v15149_v54, %v15148_v11  ;;  %v15150_v25 = vld [vmem:[#allocation74_spill] sm:$0xff]  ;;  %8405 = vpow2.f32 %v1980_v6 }
 0x4d7   : > { %v1863_v37 = vsub.f32 %v15150_v25, %v15148_v11  ;;  %v2467_v54 = vunpack.c.h.bf16 %v2416_v52  ;;  %v15159_v11 = vld [vmem:[#allocation44_spill] sm:$0xff] }
 0x4d8   : > { %v1984_v48 = vmul.f32 1.442695, %v1862_v33 }
 0x4d9   : > { %v8404_v21 = vpop.eup %8403  ;;  %v1986_v28 = vmul.f32 1.442695, %v1863_v37  ;;  %v11538_v33 = vadd.f32 %v15159_v11, %v2467_v54  ;;  %v2417_v37 = vld [vmem:[#allocation5 + $0x198] sm:$0xff] }
 0x4da   : > { %v2163_v17 = vmul.f32 %v8404_v21, %v11188_v29  ;;  %v2162_v59 = vmul.f32 %v8404_v21, %v11182_v61  ;;  %v1982_v29 = vmul.f32 1.442695, %v1861_v43  ;;  %v2462_v61 = vunpack.c.l.bf16 %v2414_v56  ;;  %v15156_v43 = vld [vmem:[#allocation75_spill] sm:$0xff] }
 0x4db   : > { %v2463_v21 = vunpack.c.h.bf16 %v2414_v56  ;;  %v15157_v56 = vld [vmem:[#allocation43_spill] sm:$0xff]  ;;  %15160 = vst [vmem:[#allocation97_spill] sm:$0xff] %v11538_v33 }
 0x4dc   : > { %v2207_v44 = vpack.c.bf16 %v2163_v17, %v2161_v27  ;;  %v2206_v53 = vpack.c.bf16 %v2162_v59, %v2160_v26  ;;  %8407 = vpow2.f32 %v1982_v29  ;;  %v15151_v27 = vld [vmem:[#allocation99_spill] sm:$0xff]  ;;  %v15153_v26 = vld [vmem:[#allocation100_spill] sm:$0xff]  ;;  %v11535_v6 = vadd.f32 %v15157_v56, %v2466_v41 }
 0x4dd   : > { %v11525_v17 = vadd.f32 %v15151_v27, %v2462_v61  ;;  %v11528_v59 = vadd.f32 %v15153_v26, %v2463_v21  ;;  %8409 = vpow2.f32 %v1984_v48  ;;  %v15161_v29 = vld [vmem:[#allocation76_spill] sm:$0xff]  ;;  %v15162_v61 = vld [vmem:[#allocation82_spill] sm:$0xff]  ;;  %v15163_v26 = vld [vmem:[#allocation83_spill] sm:$0xff]  ;;  %v2469_v56 = vunpack.c.h.bf16 %v2417_v37 }
 0x4de   : > { %2324 = vmatprep.mubr.bf16.mxu0 %v2207_v44  ;;  %8411 = vpow2.f32 %v1986_v28  ;;  %v1864_v44 = vsub.f32 %v15156_v43, %v15155_v32  ;;  %15158 = vst [vmem:[#allocation41_spill] sm:$0xff] %v11535_v6  ;;  %v1865_v25 = vsub.f32 %v15161_v29, %v15155_v32  ;;  %v1866_v21 = vsub.f32 %v15162_v61, %v11192_v63  ;;  %v2419_v32 = vld [vmem:[#allocation5 + $0x1a8] sm:$0xff] }
 0x4df   : > { %2325 = vmatmul.mubr.bf16.gmra.mrb[100].mxu0 %v2206_v53  ;;  %15152 = vst [vmem:[#allocation69_spill] sm:$0xff] %v11525_v17  ;;  %15154 = vst [vmem:[#allocation70_spill] sm:$0xff] %v11528_v59  ;;  %v2927_v53 = vmax.f32 %v11525_v17, %v11528_v59  ;;  %v2933_v28 = vmax.f32 %v11535_v6, %v11538_v33  ;;  %v1867_v41 = vsub.f32 %v15163_v26, %v11192_v63  ;;  %v15166_v63 = vld [vmem:[#allocation105_spill] sm:$0xff] }
 0x4e0   : > { %v1988_v52 = vmul.f32 1.442695, %v1864_v44  ;;  %v11544_v48 = vpop.eup %8405  ;;  %v1990_v27 = vmul.f32 1.442695, %v1865_v25  ;;  %v2468_v43 = vunpack.c.l.bf16 %v2417_v37  ;;  %v1992_v44 = vmul.f32 1.442695, %v1866_v21 }
 0x4e1   : > { %v1994_v11 = vmul.f32 1.442695, %v1867_v41  ;;  %v15164_v25 = vld [vmem:[#allocation45_spill] sm:$0xff]  ;;  %v11562_v26 = vadd.f32 %v15166_v63, %v2469_v56  ;;  %v2472_v37 = vunpack.c.l.bf16 %v2419_v32  ;;  %v2473_v6 = vunpack.c.h.bf16 %v2419_v32  ;;  %v15170_v41 = vld [vmem:[#allocation112_spill] sm:$0xff] }
 0x4e2   : > { %8413 = vpow2.f32 %v1988_v52  ;;  %v11559_v33 = vadd.f32 %v15164_v25, %v2468_v43 }
 0x4e3   : > { %8415 = vpow2.f32 %v1990_v27  ;;  %15167 = vst [vmem:[#allocation103_spill] sm:$0xff] %v11562_v26  ;;  %v11572_v43 = vadd.f32 %v15170_v41, %v2473_v6 }
 0x4e4   : > { %15165 = vst [vmem:[#allocation101_spill] sm:$0xff] %v11559_v33  ;;  %8417 = vpow2.f32 %v1992_v44  ;;  %v2936_v21 = vmax.f32 %v11559_v33, %v11562_v26 }
 0x4e5   : > { %8419 = vpow2.f32 %v1994_v11  ;;  %15171 = vst [vmem:[#allocation31_spill] sm:$0xff] %v11572_v43 }
 0x4e6   : > { %v11550_v54 = vpop.eup %8407 }
 0x4e7   : > { %v2080_v29 = vadd.f32 %v11550_v54, %v11544_v48 }
 0x4eb   : > { %2928 = vmax.xlane.f32.xlu0 %v2927_v53  ;;  %v11552_v53 = vpop.eup %8409 }
 0x4ec   : > { %v11556_v61 = vpop.eup %8411 }
 0x4ed   : > { %v2083_v52 = vadd.f32 %v11556_v61, %v11552_v53  ;;  %v11576_v56 = vpop.eup %8413 }
 0x4ee   : > { %v11582_v11 = vpop.eup %8415 }
 0x4ef   : > { %2934 = vmax.xlane.f32.xlu0 %v2933_v28  ;;  %v15168_v28 = vld [vmem:[#allocation46_spill] sm:$0xff]  ;;  %v2086_v6 = vadd.f32 %v11582_v11, %v11576_v56 }
 0x4f0   : > { %v11569_v27 = vadd.f32 %v15168_v28, %v2472_v37 }
 0x4f2   : > { %15169 = vst [vmem:[#allocation32_spill] sm:$0xff] %v11569_v27  ;;  %v2942_v32 = vmax.f32 %v11569_v27, %v11572_v43 }
 0x4f3   : > { %2081 = vadd.xlane.f32.xlu0 %v2080_v29  ;;  %v11584_v29 = vpop.eup %8417 }
 0x4f4   : > { %v11588_v37 = vpop.eup %8419 }
 0x4f6   : > { %v11574_v25 = vpop.xlane.xlu0 %2904 }
 0x4f7   : > { %2084 = vadd.xlane.f32.xlu0 %v2083_v52 }
 0x4f8   : > { %2937 = vmax.xlane.f32.xlu1 %v2936_v21 }
 0x4fa   : > { %v11580_v44 = vpop.xlane.xlu0 %2910 }
 0x4fb   : > { %15172 = vst [vmem:[#allocation139_spill] sm:$0xff] %v11580_v44 }
 0x4fc   : > { %2943 = vmax.xlane.f32.xlu1 %v2942_v32  ;;  %v2089_v32 = vadd.f32 %v11588_v37, %v11584_v29 }
 0x4fe   : > { %v2058_v63 = vpop.xlane.xlu0 %2057 }
 0x4ff   : > { %8421 = vrcp.f32 %v2058_v63 }
 0x500   : > { %2087 = vadd.xlane.f32.xlu1 %v2086_v6  ;;  %v11590_v52 = vpop.f32.mrb[232].mxu1 }
 0x501   : > { %15173 = vst [vmem:[#allocation71_spill] sm:$0xff] %v11590_v52  ;;  %v11592_v21 = vpop.f32.mrb[233].mxu1 }
 0x502   : > { %15174 = vst [vmem:[#allocation72_spill] sm:$0xff] %v11592_v21  ;;  %v2061_v28 = vpop.xlane.xlu0 %2060  ;;  %v11594_v41 = vpop.f32.mrb[234].mxu1 }
 0x503   : > { %15175 = vst [vmem:[#allocation142_spill] sm:$0xff] %v11594_v41  ;;  %8423 = vrcp.f32 %v2061_v28  ;;  %v11598_v59 = vpop.xlane.xlu1 %2913  ;;  %v11600_v17 = vpop.f32.mrb[235].mxu1 }
 0x504   : > { %15176 = vst [vmem:[#allocation73_spill] sm:$0xff] %v11600_v17  ;;  %2090 = vadd.xlane.f32.xlu1 %v2089_v32  ;;  %v15179_v17 = vld [vmem:[#allocation34_spill] sm:$0xff] }
 0x506   : > { %v4933_v43 = vpop.permute.xlu0 %4932 }
 0x507   : > { %v11602_v27 = vpop.xlane.xlu1 %2919  ;;  %v7260_v6 = vpop.f32.mrb[64].mxu0  ;;  %7708 = vmatprep.mubr.msk.bf16.mxu1 %vm1418_vm0, %v4933_v43 }
 0x508   : > { %v7261_v63 = vpop.f32.mrb[65].mxu0  ;;  %7709 = vmatmul.mubr.msk.bf16.gmra.mrb[0].mxu1 %vm1418_vm0, %v4933_v43 }
 0x509   : > { %v11606_v21 = vadd.f32 %v7261_v63, %v7260_v6  ;;  %v7263_v52 = vpop.f32.mrb[66].mxu0  ;;  %v8422_v26 = vpop.eup %8421 }
 0x50a   : > { %v7264_v41 = vpop.f32.mrb[67].mxu0  ;;  %v2165_v50 = vmul.f32 %v8422_v26, %v11288_v19  ;;  %v2164_v6 = vmul.f32 %v8422_v26, %v11276_v23  ;;  %v15182_v23 = vld [vmem:[#allocation33_spill] sm:$0xff] }
 0x50b   : > { %15177 = vst [vmem:[#allocation74_spill] sm:$0xff] %v11606_v21  ;;  %v11608_v28 = vadd.f32 %v7264_v41, %v7263_v52  ;;  %v2064_v33 = vpop.xlane.xlu1 %2063 }
 0x50c   : > { %8425 = vrcp.f32 %v2064_v33 }
 0x50d   : > { %15178 = vst [vmem:[#allocation99_spill] sm:$0xff] %v11608_v28  ;;  %v8424_v44 = vpop.eup %8423  ;;  %4940 = vrot.lane.b32.xlu0 %v15179_v17, %s9302_s19 }
 0x50e   : > { %v2167_v43 = vmul.f32 %v8424_v44, %v11309_v0  ;;  %v2166_v63 = vmul.f32 %v8424_v44, %v11305_v60 }
 0x50f   : > { %v2067_v58 = vpop.xlane.xlu1 %2066 }
 0x510   : > { %8427 = vrcp.f32 %v2067_v58  ;;  %v7266_v52 = vpop.f32.mrb[68].mxu0  ;;  %v2209_v41 = vpack.c.bf16 %v2167_v43, %v2165_v50  ;;  %v2208_v18 = vpack.c.bf16 %v2166_v63, %v2164_v6  ;;  %v15184_v63 = vld [vmem:[#allocation108_spill] sm:$0xff] }
 0x511   : > { %v7267_v3 = vpop.f32.mrb[69].mxu0 }
 0x512   : > { %v11618_v36 = vadd.f32 %v7267_v3, %v7266_v52  ;;  %v7269_v32 = vpop.f32.mrb[70].mxu0  ;;  %2332 = vmatprep.mubr.bf16.mxu0 %v2209_v41  ;;  %v15185_v41 = vld [vmem:[#allocation109_spill] sm:$0xff] }
 0x513   : > { %v7270_v17 = vpop.f32.mrb[71].mxu0  ;;  %v4935_v21 = vpop.permute.xlu1 %4934  ;;  %2333 = vmatmul.mubr.bf16.gmra.mrb[104].mxu0 %v2208_v18 }
 0x514   : > { %15180 = vst [vmem:[#allocation100_spill] sm:$0xff] %v11618_v36  ;;  %v11620_v19 = vadd.f32 %v7270_v17, %v7269_v32  ;;  %7710 = vmatprep.mubr.msk.bf16.mxu1 %vm1418_vm0, %v4935_v21  ;;  %v2418_v32 = vld [vmem:[#allocation5 + $0x1a0] sm:$0xff] }
 0x515   : > { %4942 = vrot.lane.b32.xlu1 %v15182_v23, %s9302_s19  ;;  %7711 = vmatmul.mubr.msk.bf16.gmra.mrb[4].mxu1 %vm1418_vm0, %v4935_v21  ;;  %v2470_v43 = vunpack.c.l.bf16 %v2418_v32  ;;  %v2471_v21 = vunpack.c.h.bf16 %v2418_v32  ;;  %v2420_v23 = vld [vmem:[#allocation5 + $0x1b0] sm:$0xff] }
 0x516   : > { %15181 = vst [vmem:[#allocation51_spill] sm:$0xff] %v11620_v19  ;;  %v8426_v0 = vpop.eup %8425  ;;  %v15197_v19 = vld [vmem:[#allocation106_spill] sm:$0xff] }
 0x517   : > { %v2169_v58 = vmul.f32 %v8426_v0, %v11338_v9  ;;  %v2168_v18 = vmul.f32 %v8426_v0, %v11334_v49  ;;  %v11635_v52 = vadd.f32 %v15184_v63, %v2470_v43  ;;  %v11638_v9 = vadd.f32 %v15185_v41, %v2471_v21  ;;  %v15193_v21 = vld [vmem:[#allocation79_spill] sm:$0xff] }
 0x518   : > { %v2474_v0 = vunpack.c.l.bf16 %v2420_v23  ;;  %v2975_v28 = vsub.f32 %v15197_v19, %v11326_v24 }
 0x519   : > { %v2939_v17 = vmax.f32 %v11635_v52, %v11638_v9 }
 0x51a   : > { %v8428_v3 = vpop.eup %8427 }
 0x51b   : > { %v2171_v50 = vmul.f32 %v8428_v3, %v11358_v5  ;;  %v2170_v33 = vmul.f32 %v8428_v3, %v11350_v1  ;;  %v2475_v3 = vunpack.c.h.bf16 %v2420_v23 }
 0x51d   : > { %v2211_v26 = vpack.c.bf16 %v2171_v50, %v2169_v58  ;;  %v2210_v44 = vpack.c.bf16 %v2170_v33, %v2168_v18  ;;  %v15189_v58 = vld [vmem:[#allocation49_spill] sm:$0xff] }
 0x51e   : > { %v11649_v50 = vadd.f32 %v15189_v58, %v2474_v0  ;;  %v15191_v18 = vld [vmem:[#allocation113_spill] sm:$0xff] }
 0x51f   : > { %2340 = vmatprep.mubr.bf16.mxu0 %v2211_v26  ;;  %v11652_v33 = vadd.f32 %v15191_v18, %v2475_v3 }
 0x520   : > { %2341 = vmatmul.mubr.bf16.gmra.mrb[108].mxu0 %v2210_v44  ;;  %15190 = vst [vmem:[#allocation82_spill] sm:$0xff] %v11649_v50 }
 0x521   : > { %15192 = vst [vmem:[#allocation83_spill] sm:$0xff] %v11652_v33  ;;  %v2945_v26 = vmax.f32 %v11649_v50, %v11652_v33  ;;  %v3039_v33 = vmul.f32 1.442695, %v2975_v28 }
 0x524   : > { %v11632_v6 = vpop.f32.mrb[236].mxu1 }
 0x525   : > { %15183 = vst [vmem:[#allocation75_spill] sm:$0xff] %v11632_v6  ;;  %v11640_v5 = vpop.f32.mrb[237].mxu1 }
 0x526   : > { %15186 = vst [vmem:[#allocation43_spill] sm:$0xff] %v11640_v5  ;;  %v11642_v49 = vpop.f32.mrb[238].mxu1  ;;  %v15198_v5 = vld [vmem:[#allocation107_spill] sm:$0xff] }
 0x527   : > { %15187 = vst [vmem:[#allocation44_spill] sm:$0xff] %v11642_v49  ;;  %v11644_v1 = vpop.f32.mrb[239].mxu1  ;;  %v2976_v6 = vsub.f32 %v15198_v5, %v11326_v24 }
 0x528   : > { %15188 = vst [vmem:[#allocation76_spill] sm:$0xff] %v11644_v1 }
 0x529   : > { %v3041_v5 = vmul.f32 1.442695, %v2976_v6 }
 0x52c   : > { %2940 = vmax.xlane.f32.xlu0 %v2939_v17 }
 0x537   : > { %v11656_v44 = vpop.xlane.xlu0 %2916 }
 0x539   : > { %2946 = vmax.xlane.f32.xlu1 %v2945_v26 }
 0x53b   : > { %v11658_v32 = vpop.xlane.xlu0 %2922 }
 0x53f   : > { %v2070_v43 = vpop.xlane.xlu0 %2069 }
 0x540   : > { %8429 = vrcp.f32 %v2070_v43 }
 0x542   : > { %3423 = vrot.lane.b32.xlu0 %v15193_v21, %s9301_s17 }
 0x543   : > { %v2073_v63 = vpop.xlane.xlu0 %2072 }
 0x544   : > { %8431 = vrcp.f32 %v2073_v63  ;;  %v11662_v41 = vpop.xlane.xlu1 %2925  ;;  %v7272_v17 = vpop.f32.mrb[72].mxu0  ;;  %v15196_v63 = vld [vmem:[#allocation38_spill] sm:$0xff] }
 0x545   : > { %v7273_v23 = vpop.f32.mrb[73].mxu0 }
 0x546   : > { %v11664_v0 = vadd.f32 %v7273_v23, %v7272_v17  ;;  %v7275_v3 = vpop.f32.mrb[74].mxu0 }
 0x547   : > { %v4937_v58 = vpop.permute.xlu0 %4936  ;;  %v7276_v18 = vpop.f32.mrb[75].mxu0 }
 0x548   : > { %15194 = vst [vmem:[#allocation45_spill] sm:$0xff] %v11664_v0  ;;  %v11666_v60 = vadd.f32 %v7276_v18, %v7275_v3  ;;  %v11668_v26 = vpop.xlane.xlu1 %2931  ;;  %7712 = vmatprep.mubr.msk.bf16.mxu1 %vm1418_vm0, %v4937_v58 }
 0x549   : > { %7713 = vmatmul.mubr.msk.bf16.gmra.mrb[8].mxu1 %vm1418_vm0, %v4937_v58 }
 0x54a   : > { %15195 = vst [vmem:[#allocation105_spill] sm:$0xff] %v11666_v60  ;;  %3407 = vrot.lane.b32.xlu1 %v15196_v63, %s9301_s17  ;;  %v8430_v36 = vpop.eup %8429 }
 0x54b   : > { %v2173_v49 = vmul.f32 %v8430_v36, %v11438_v10  ;;  %v2172_v60 = vmul.f32 %v8430_v36, %v11432_v30  ;;  %v2421_v10 = vld [vmem:[#allocation5 + $0x1b8] sm:$0xff]  ;;  %v15201_v36 = vld [vmem:[#allocation84_spill] sm:$0xff] }
 0x54c   : > { %v2076_v17 = vpop.xlane.xlu1 %2075  ;;  %v7278_v23 = vpop.f32.mrb[76].mxu0  ;;  %v2977_v30 = vsub.f32 %v15201_v36, %v11200_v38  ;;  %v2477_v6 = vunpack.c.h.bf16 %v2421_v10 }
 0x54d   : > { %v7279_v3 = vpop.f32.mrb[77].mxu0  ;;  %8433 = vrcp.f32 %v2076_v17 }
 0x54e   : > { %v8432_v18 = vpop.eup %8431  ;;  %v11680_v1 = vadd.f32 %v7279_v3, %v7278_v23  ;;  %v7281_v58 = vpop.f32.mrb[78].mxu0 }
 0x54f   : > { %v7282_v43 = vpop.f32.mrb[79].mxu0  ;;  %v2175_v0 = vmul.f32 %v8432_v18, %v11444_v2  ;;  %v2174_v21 = vmul.f32 %v8432_v18, %v11440_v13  ;;  %v3043_v18 = vmul.f32 1.442695, %v2977_v30 }
 0x550   : > { %15199 = vst [vmem:[#allocation46_spill] sm:$0xff] %v11680_v1  ;;  %v11686_v63 = vadd.f32 %v7282_v43, %v7281_v58  ;;  %v2079_v19 = vpop.xlane.xlu1 %2078 }
 0x551   : > { %8435 = vrcp.f32 %v2079_v19  ;;  %v2213_v50 = vpack.c.bf16 %v2175_v0, %v2173_v49  ;;  %v2212_v24 = vpack.c.bf16 %v2174_v21, %v2172_v60  ;;  %v2476_v60 = vunpack.c.l.bf16 %v2421_v10  ;;  %v15203_v49 = vld [vmem:[#allocation85_spill] sm:$0xff]  ;;  %v15208_v10 = vld [vmem:[#allocation115_spill] sm:$0xff] }
 0x552   : > { %15200 = vst [vmem:[#allocation112_spill] sm:$0xff] %v11686_v63  ;;  %8437 = vpow2.f32 %v3039_v33 }
 0x553   : > { %2348 = vmatprep.mubr.bf16.mxu0 %v2213_v50  ;;  %8439 = vpow2.f32 %v3041_v5  ;;  %v2978_v50 = vsub.f32 %v15203_v49, %v11200_v38  ;;  %v15207_v5 = vld [vmem:[#allocation114_spill] sm:$0xff] }
 0x554   : > { %v4939_v17 = vpop.permute.xlu1 %4938  ;;  %v7284_v3 = vpop.f32.mrb[80].mxu0  ;;  %2349 = vmatmul.mubr.bf16.gmra.mrb[112].mxu0 %v2212_v24  ;;  %8441 = vpow2.f32 %v3043_v18 }
 0x555   : > { %7714 = vmatprep.mubr.msk.bf16.mxu1 %vm1418_vm0, %v4939_v17  ;;  %v7285_v2 = vpop.f32.mrb[81].mxu0  ;;  %v3045_v38 = vmul.f32 1.442695, %v2978_v50 }
 0x556   : > { %v11693_v13 = vadd.f32 %v7285_v2, %v7284_v3  ;;  %7715 = vmatmul.mubr.msk.bf16.gmra.mrb[12].mxu1 %vm1418_vm0, %v4939_v17  ;;  %v7287_v28 = vpop.f32.mrb[82].mxu0  ;;  %v11707_v17 = vadd.f32 %v15207_v5, %v2476_v60  ;;  %v11710_v3 = vadd.f32 %v15208_v10, %v2477_v6 }
 0x557   : > { %v7288_v21 = vpop.f32.mrb[83].mxu0  ;;  %v8434_v33 = vpop.eup %8433  ;;  %8443 = vpow2.f32 %v3045_v38 }
 0x558   : > { %15202 = vst [vmem:[#allocation34_spill] sm:$0xff] %v11693_v13  ;;  %v11698_v0 = vadd.f32 %v7288_v21, %v7287_v28  ;;  %v2177_v30 = vmul.f32 %v8434_v33, %v11470_v22  ;;  %v2176_v21 = vmul.f32 %v8434_v33, %v11464_v35  ;;  %v2948_v13 = vmax.f32 %v11707_v17, %v11710_v3  ;;  %v2423_v33 = vld [vmem:[#allocation5 + $0x1c8] sm:$0xff]  ;;  %v15220_v35 = vld [vmem:[#allocation123_spill] sm:$0xff] }
 0x559   : > { %v11700_v43 = vpop.f32.mrb[240].mxu1 }
 0x55a   : > { %15204 = vst [vmem:[#allocation33_spill] sm:$0xff] %v11698_v0  ;;  %15205 = vst [vmem:[#allocation108_spill] sm:$0xff] %v11700_v43  ;;  %v11704_v19 = vpop.f32.mrb[241].mxu1 }
 0x55b   : > { %15206 = vst [vmem:[#allocation109_spill] sm:$0xff] %v11704_v19  ;;  %v8436_v24 = vpop.eup %8435  ;;  %v11712_v2 = vpop.f32.mrb[242].mxu1 }
 0x55c   : > { %15209 = vst [vmem:[#allocation49_spill] sm:$0xff] %v11712_v2  ;;  %v7290_v36 = vpop.f32.mrb[84].mxu0  ;;  %v11714_v28 = vpop.f32.mrb[243].mxu1  ;;  %v2179_v49 = vmul.f32 %v8436_v24, %v11476_v7  ;;  %v2178_v58 = vmul.f32 %v8436_v24, %v11472_v34 }
 0x55d   : > { %15210 = vst [vmem:[#allocation113_spill] sm:$0xff] %v11714_v28  ;;  %v7291_v23 = vpop.f32.mrb[85].mxu0  ;;  %v11722_v10 = vpop.eup %8437 }
 0x55e   : > { %v11720_v60 = vadd.f32 %v7291_v23, %v7290_v36  ;;  %v7293_v6 = vpop.f32.mrb[86].mxu0  ;;  %v2215_v5 = vpack.c.bf16 %v2179_v49, %v2177_v30  ;;  %v2214_v50 = vpack.c.bf16 %v2178_v58, %v2176_v21  ;;  %v11726_v0 = vpop.eup %8439  ;;  %v2481_v21 = vunpack.c.h.bf16 %v2423_v33 }
 0x55f   : > { %v7294_v22 = vpop.f32.mrb[87].mxu0  ;;  %v3167_v34 = vadd.f32 %v11726_v0, %v11722_v10  ;;  %v11740_v49 = vpop.eup %8441 }
 0x560   : > { %15211 = vst [vmem:[#allocation106_spill] sm:$0xff] %v11720_v60  ;;  %v11728_v7 = vadd.f32 %v7294_v22, %v7293_v6  ;;  %2356 = vmatprep.mubr.bf16.mxu0 %v2215_v5  ;;  %v11756_v60 = vadd.f32 %v15220_v35, %v2481_v21  ;;  %v15223_v21 = vld [vmem:[#allocation36_spill] sm:$0xff]  ;;  %v15227_v35 = vld [vmem:[#allocation81_spill] sm:$0xff] }
 0x561   : > { %2357 = vmatmul.mubr.bf16.gmra.mrb[116].mxu0 %v2214_v50  ;;  %2949 = vmax.xlane.f32.xlu0 %v2948_v13  ;;  %v2480_v13 = vunpack.c.l.bf16 %v2423_v33  ;;  %v11746_v50 = vpop.eup %8443 }
 0x562   : > { %15212 = vst [vmem:[#allocation107_spill] sm:$0xff] %v11728_v7  ;;  %v3170_v33 = vadd.f32 %v11746_v50, %v11740_v49 }
 0x564   : > { %v7296_v23 = vpop.f32.mrb[88].mxu0 }
 0x565   : > { %3168 = vadd.xlane.f32.xlu0 %v3167_v34  ;;  %v7297_v18 = vpop.f32.mrb[89].mxu0 }
 0x566   : > { %v11734_v58 = vadd.f32 %v7297_v18, %v7296_v23  ;;  %v11736_v24 = vpop.f32.mrb[244].mxu1  ;;  %v7299_v38 = vpop.f32.mrb[90].mxu0  ;;  %v15219_v23 = vld [vmem:[#allocation122_spill] sm:$0xff] }
 0x567   : > { %15214 = vst [vmem:[#allocation85_spill] sm:$0xff] %v11736_v24  ;;  %v11738_v36 = vpop.f32.mrb[245].mxu1  ;;  %v7300_v30 = vpop.f32.mrb[91].mxu0  ;;  %v11753_v18 = vadd.f32 %v15219_v23, %v2480_v13 }
 0x568   : > { %15213 = vst [vmem:[#allocation84_spill] sm:$0xff] %v11734_v58  ;;  %15215 = vst [vmem:[#allocation114_spill] sm:$0xff] %v11738_v36  ;;  %v11742_v6 = vadd.f32 %v7300_v30, %v7299_v38  ;;  %v11744_v5 = vpop.f32.mrb[246].mxu1  ;;  %v15228_v36 = vld [vmem:[#allocation110_spill] sm:$0xff] }
 0x569   : > { %15217 = vst [vmem:[#allocation184_spill] sm:$0xff] %v11744_v5  ;;  %v11748_v22 = vpop.f32.mrb[247].mxu1  ;;  %v2954_v38 = vmax.f32 %v11753_v18, %v11756_v60  ;;  %v2979_v24 = vsub.f32 %v15228_v36, %v11342_v47 }
 0x56a   : > { %15216 = vst [vmem:[#allocation115_spill] sm:$0xff] %v11742_v6  ;;  %15218 = vst [vmem:[#allocation185_spill] sm:$0xff] %v11748_v22 }
 0x56b   : > { %v3047_v36 = vmul.f32 1.442695, %v2979_v24 }
 0x56e   : > { %3171 = vadd.xlane.f32.xlu1 %v3170_v33  ;;  %v15224_v33 = vld [vmem:[#allocation78_spill] sm:$0xff] }
 0x571   : > { %v7302_v30 = vpop.f32.mrb[92].mxu0 }
 0x572   : > { %2955 = vmax.xlane.f32.xlu1 %v2954_v38  ;;  %v7303_v7 = vpop.f32.mrb[93].mxu0 }
 0x573   : > { %v11762_v1 = vadd.f32 %v7303_v7, %v7302_v30  ;;  %v7305_v63 = vpop.f32.mrb[94].mxu0  ;;  %v15225_v7 = vld [vmem:[#allocation39_spill] sm:$0xff] }
 0x574   : > { %v7306_v34 = vpop.f32.mrb[95].mxu0 }
 0x575   : > { %15221 = vst [vmem:[#allocation122_spill] sm:$0xff] %v11762_v1  ;;  %v11764_v58 = vadd.f32 %v7306_v34, %v7305_v63  ;;  %v15226_v63 = vld [vmem:[#allocation37_spill] sm:$0xff] }
 0x577   : > { %15222 = vst [vmem:[#allocation123_spill] sm:$0xff] %v11764_v58 }
 0x578   : > { %v11768_v13 = vpop.xlane.xlu0 %2928 }
 0x57b   : > { %4944 = vrot.lane.b32.xlu0 %v15223_v21, %s9302_s19 }
 0x57c   : > { %v11772_v23 = vpop.xlane.xlu0 %2934 }
 0x57f   : > { %3425 = vrot.lane.b32.xlu0 %v15224_v33, %s9301_s17 }
 0x580   : > { %v2082_v38 = vpop.xlane.xlu0 %2081 }
 0x581   : > { %8445 = vrcp.f32 %v2082_v38 }
 0x583   : > { %3411 = vrot.lane.b32.xlu1 %v15225_v7, %s9301_s17  ;;  %3409 = vrot.lane.b32.xlu0 %v15226_v63, %s9301_s17  ;;  %v15231_v63 = vld [vmem:[#allocation117_spill] sm:$0xff] }
 0x584   : > { %v2085_v34 = vpop.xlane.xlu0 %2084 }
 0x585   : > { %8447 = vrcp.f32 %v2085_v34  ;;  %v11780_v30 = vpop.xlane.xlu1 %2937  ;;  %v15229_v34 = vld [vmem:[#allocation111_spill] sm:$0xff] }
 0x586   : > { %v2980_v22 = vsub.f32 %v15229_v34, %v11342_v47  ;;  %v2982_v47 = vsub.f32 %v15231_v63, %v11366_v39 }
 0x587   : > { %3427 = vrot.lane.b32.xlu0 %v15227_v35, %s9301_s17 }
 0x588   : > { %v4941_v21 = vpop.permute.xlu0 %4940  ;;  %v3049_v34 = vmul.f32 1.442695, %v2980_v22 }
 0x589   : > { %v11784_v1 = vpop.xlane.xlu1 %2943  ;;  %7716 = vmatprep.mubr.msk.bf16.mxu1 %vm1418_vm0, %v4941_v21 }
 0x58a   : > { %7717 = vmatmul.mubr.msk.bf16.gmra.mrb[16].mxu1 %vm1418_vm0, %v4941_v21  ;;  %v15230_v21 = vld [vmem:[#allocation116_spill] sm:$0xff] }
 0x58b   : > { %v8446_v38 = vpop.eup %8445  ;;  %v2981_v7 = vsub.f32 %v15230_v21, %v11366_v39 }
 0x58c   : > { %v2181_v5 = vmul.f32 %v8446_v38, %v11550_v54  ;;  %v2180_v43 = vmul.f32 %v8446_v38, %v11544_v48  ;;  %v3053_v48 = vmul.f32 1.442695, %v2982_v47  ;;  %v15236_v38 = vld [vmem:[#allocation120_spill] sm:$0xff] }
 0x58d   : > { %v2088_v58 = vpop.xlane.xlu1 %2087 }
 0x58e   : > { %8449 = vrcp.f32 %v2088_v58 }
 0x58f   : > { %v8448_v6 = vpop.eup %8447 }
 0x590   : > { %v2183_v19 = vmul.f32 %v8448_v6, %v11556_v61  ;;  %v2182_v28 = vmul.f32 %v8448_v6, %v11552_v53  ;;  %v3051_v61 = vmul.f32 1.442695, %v2981_v7  ;;  %v2422_v53 = vld [vmem:[#allocation5 + $0x1c0] sm:$0xff] }
 0x591   : > { %v2091_v2 = vpop.xlane.xlu1 %2090  ;;  %v2479_v58 = vunpack.c.h.bf16 %v2422_v53 }
 0x592   : > { %8451 = vrcp.f32 %v2091_v2  ;;  %v2217_v35 = vpack.c.bf16 %v2183_v19, %v2181_v5  ;;  %v2216_v33 = vpack.c.bf16 %v2182_v28, %v2180_v43  ;;  %v2478_v28 = vunpack.c.l.bf16 %v2422_v53 }
 0x593   : > { %8453 = vpow2.f32 %v3047_v36  ;;  %v15237_v36 = vld [vmem:[#allocation121_spill] sm:$0xff] }
 0x594   : > { %2364 = vmatprep.mubr.bf16.mxu0 %v2217_v35  ;;  %8455 = vpow2.f32 %v3049_v34  ;;  %v11815_v21 = vadd.f32 %v15236_v38, %v2478_v28  ;;  %v11818_v47 = vadd.f32 %v15237_v36, %v2479_v58 }
 0x595   : > { %v4943_v54 = vpop.permute.xlu1 %4942  ;;  %2365 = vmatmul.mubr.bf16.gmra.mrb[120].mxu0 %v2216_v33  ;;  %8457 = vpow2.f32 %v3051_v61 }
 0x596   : > { %7718 = vmatprep.mubr.msk.bf16.mxu1 %vm1418_vm0, %v4943_v54  ;;  %8459 = vpow2.f32 %v3053_v48 }
 0x597   : > { %7719 = vmatmul.mubr.msk.bf16.gmra.mrb[20].mxu1 %vm1418_vm0, %v4943_v54 }
 0x598   : > { %v8450_v2 = vpop.eup %8449 }
 0x599   : > { %v2185_v5 = vmul.f32 %v8450_v2, %v11582_v11  ;;  %v2184_v35 = vmul.f32 %v8450_v2, %v11576_v56  ;;  %v2951_v56 = vmax.f32 %v11815_v21, %v11818_v47 }
 0x59a   : > { %v11802_v43 = vpop.f32.mrb[248].mxu1 }
 0x59b   : > { %15232 = vst [vmem:[#allocation36_spill] sm:$0xff] %v11802_v43  ;;  %v11804_v19 = vpop.f32.mrb[249].mxu1 }
 0x59c   : > { %15233 = vst [vmem:[#allocation110_spill] sm:$0xff] %v11804_v19  ;;  %v8452_v39 = vpop.eup %8451  ;;  %v11806_v24 = vpop.f32.mrb[250].mxu1 }
 0x59d   : > { %15234 = vst [vmem:[#allocation111_spill] sm:$0xff] %v11806_v24  ;;  %v11808_v6 = vpop.f32.mrb[251].mxu1  ;;  %v2187_v22 = vmul.f32 %v8452_v39, %v11588_v37  ;;  %v2186_v33 = vmul.f32 %v8452_v39, %v11584_v29  ;;  %v11820_v34 = vpop.eup %8453 }
 0x59e   : > { %15235 = vst [vmem:[#allocation116_spill] sm:$0xff] %v11808_v6  ;;  %v11822_v54 = vpop.eup %8455 }
 0x59f   : > { %v2219_v7 = vpack.c.bf16 %v2187_v22, %v2185_v5  ;;  %v2218_v63 = vpack.c.bf16 %v2186_v33, %v2184_v35  ;;  %v11824_v11 = vpop.eup %8457  ;;  %v3173_v61 = vadd.f32 %v11822_v54, %v11820_v34 }
 0x5a0   : > { %v11828_v29 = vpop.eup %8459 }
 0x5a1   : > { %2372 = vmatprep.mubr.bf16.mxu0 %v2219_v7  ;;  %v3176_v5 = vadd.f32 %v11828_v29, %v11824_v11  ;;  %v15247_v7 = vld [vmem:[#allocation35_spill] sm:$0xff] }
 0x5a2   : > { %2373 = vmatmul.mubr.bf16.gmra.mrb[124].mxu0 %v2218_v63 }
 0x5a5   : > { %v7308_v37 = vpop.f32.mrb[96].mxu0 }
 0x5a6   : > { %2952 = vmax.xlane.f32.xlu0 %v2951_v56  ;;  %v7309_v48 = vpop.f32.mrb[97].mxu0 }
 0x5a7   : > { %3174 = vadd.xlane.f32.xlu1 %v3173_v61  ;;  %v11832_v53 = vadd.f32 %v7309_v48, %v7308_v37  ;;  %v11834_v2 = vpop.f32.mrb[252].mxu1  ;;  %v7311_v39 = vpop.f32.mrb[98].mxu0  ;;  %v2984_v48 = vsub.f32 %v11094_v20, %v11462_v14  ;;  %v15252_v20 = vld [vmem:[#allocation128_spill] sm:$0xff] }
 0x5a8   : > { %15239 = vst [vmem:[#allocation120_spill] sm:$0xff] %v11834_v2  ;;  %v11836_v28 = vpop.f32.mrb[253].mxu1  ;;  %v7312_v58 = vpop.f32.mrb[99].mxu0  ;;  %v2425_v2 = vld [vmem:[#allocation5 + $0x1d8] sm:$0xff] }
 0x5a9   : > { %15238 = vst [vmem:[#allocation117_spill] sm:$0xff] %v11832_v53  ;;  %15240 = vst [vmem:[#allocation121_spill] sm:$0xff] %v11836_v28  ;;  %v11840_v22 = vadd.f32 %v7312_v58, %v7311_v39  ;;  %v11842_v35 = vpop.f32.mrb[254].mxu1  ;;  %v15246_v39 = vld [vmem:[#allocation22_spill] sm:$0xff]  ;;  %v15251_v53 = vld [vmem:[#allocation119_spill] sm:$0xff]  ;;  %v2485_v19 = vunpack.c.h.bf16 %v2425_v2 }
 0x5aa   : > { %15242 = vst [vmem:[#allocation187_spill] sm:$0xff] %v11842_v35  ;;  %v11844_v33 = vpop.f32.mrb[255].mxu1  ;;  %3177 = vadd.xlane.f32.xlu0 %v3176_v5  ;;  %v3057_v28 = vmul.f32 1.442695, %v2984_v48  ;;  %v2484_v35 = vunpack.c.l.bf16 %v2425_v2 }
 0x5ab   : > { %15241 = vst [vmem:[#allocation186_spill] sm:$0xff] %v11840_v22  ;;  %15243 = vst [vmem:[#allocation188_spill] sm:$0xff] %v11844_v33  ;;  %v2986_v22 = vsub.f32 %v15251_v53, %v11375_v45 }
 0x5b2   : > { %v7314_v63 = vpop.f32.mrb[100].mxu0 }
 0x5b3   : > { %v7315_v38 = vpop.f32.mrb[101].mxu0 }
 0x5b4   : > { %v11848_v36 = vadd.f32 %v7315_v38, %v7314_v63  ;;  %v7317_v56 = vpop.f32.mrb[102].mxu0  ;;  %v15248_v63 = vld [vmem:[#allocation80_spill] sm:$0xff] }
 0x5b5   : > { %v7318_v37 = vpop.f32.mrb[103].mxu0 }
 0x5b6   : > { %15244 = vst [vmem:[#allocation189_spill] sm:$0xff] %v11848_v36  ;;  %v11850_v61 = vadd.f32 %v7318_v37, %v7317_v56  ;;  %v2983_v56 = vsub.f32 %v11091_v62, %v11462_v14  ;;  %v15249_v37 = vld [vmem:[#allocation87_spill] sm:$0xff]  ;;  %v3061_v62 = vmul.f32 1.442695, %v2986_v22  ;;  %v11875_v14 = vadd.f32 %v15252_v20, %v2484_v35 }
 0x5b8   : > { %15245 = vst [vmem:[#allocation190_spill] sm:$0xff] %v11850_v61  ;;  %3413 = vrot.lane.b32.xlu1 %v15246_v39, %s9301_s17 }
 0x5b9   : > { %v11856_v58 = vpop.xlane.xlu0 %2940 }
 0x5bd   : > { %v3424_v5 = vpop.permute.xlu0 %3423 }
 0x5be   : > { %7404 = vmatprep.subr.bf16.mxu0 %v3424_v5  ;;  %v15250_v5 = vld [vmem:[#allocation118_spill] sm:$0xff] }
 0x5bf   : > { %v2985_v61 = vsub.f32 %v15250_v5, %v11375_v45  ;;  %v2424_v5 = vld [vmem:[#allocation5 + $0x1d0] sm:$0xff] }
 0x5c0   : > { %4946 = vrot.lane.b32.xlu0 %v15247_v7, %s9302_s19  ;;  %v3055_v7 = vmul.f32 1.442695, %v2983_v56 }
 0x5c1   : > { %v3059_v33 = vmul.f32 1.442695, %v2985_v61 }
 0x5c2   : > { %8461 = vpow2.f32 %v3055_v7 }
 0x5c3   : > { %8463 = vpow2.f32 %v3057_v28  ;;  %v2482_v28 = vunpack.c.l.bf16 %v2424_v5 }
 0x5c4   : > { %3429 = vrot.lane.b32.xlu0 %v15248_v63, %s9301_s17  ;;  %8465 = vpow2.f32 %v3059_v33  ;;  %v2483_v33 = vunpack.c.h.bf16 %v2424_v5 }
 0x5c5   : > { %8467 = vpow2.f32 %v3061_v62  ;;  %v15260_v62 = vld [vmem:[#allocation126_spill] sm:$0xff] }
 0x5c6   : > { %v11862_v38 = vpop.xlane.xlu1 %2946  ;;  %v11901_v20 = vadd.f32 %v15260_v62, %v2482_v28 }
 0x5c8   : > { %3431 = vrot.lane.b32.xlu0 %v15249_v37, %s9301_s17 }
 0x5ca   : > { %v3408_v36 = vpop.permute.xlu1 %3407 }
 0x5cb   : > { %7405 = vmatpush3.bf16.msra.mxu0 %v3408_v36  ;;  %v15253_v36 = vld [vmem:[#allocation129_spill] sm:$0xff] }
 0x5cc   : > { %v11878_v43 = vadd.f32 %v15253_v36, %v2485_v19  ;;  %v11880_v56 = vpop.eup %8461  ;;  %v15261_v36 = vld [vmem:[#allocation127_spill] sm:$0xff] }
 0x5cd   : > { %15254 = vst [vmem:[#allocation35_spill] sm:$0xff] %v11880_v56  ;;  %v11884_v53 = vpop.eup %8463 }
 0x5ce   : > { %v2960_v45 = vmax.f32 %v11875_v14, %v11878_v43  ;;  %v11892_v61 = vpop.eup %8465  ;;  %v3179_v48 = vadd.f32 %v11884_v53, %v11880_v56 }
 0x5cf   : > { %15258 = vst [vmem:[#allocation129_spill] sm:$0xff] %v11892_v61  ;;  %v11898_v7 = vpop.eup %8467 }
 0x5d0   : > { %v3182_v5 = vadd.f32 %v11898_v7, %v11892_v61 }
 0x5db   : > { %v11886_v22 = vpop.f32.mrb[0].mxu1 }
 0x5dc   : > { %15255 = vst [vmem:[#allocation118_spill] sm:$0xff] %v11886_v22  ;;  %2961 = vmax.xlane.f32.xlu1 %v2960_v45  ;;  %v11888_v2 = vpop.f32.mrb[1].mxu1  ;;  %v11904_v45 = vadd.f32 %v15261_v36, %v2483_v33 }
 0x5dd   : > { %15256 = vst [vmem:[#allocation119_spill] sm:$0xff] %v11888_v2  ;;  %v11890_v35 = vpop.f32.mrb[2].mxu1 }
 0x5de   : > { %15257 = vst [vmem:[#allocation128_spill] sm:$0xff] %v11890_v35  ;;  %v11894_v19 = vpop.f32.mrb[3].mxu1  ;;  %v2957_v2 = vmax.f32 %v11901_v20, %v11904_v45 }
 0x5df   : > { %15259 = vst [vmem:[#allocation191_spill] sm:$0xff] %v11894_v19 }
 0x5e0   : > { %3180 = vadd.xlane.f32.xlu1 %v3179_v48 }
 0x5e4   : > { %3183 = vadd.xlane.f32.xlu1 %v3182_v5  ;;  %v2988_v5 = vsub.f32 %v11112_v16, %v11468_v40  ;;  %v2990_v16 = vsub.f32 %v11142_v12, %v11480_v51 }
 0x5e6   : > { %v7320_v22 = vpop.f32.mrb[104].mxu0 }
 0x5e7   : > { %2958 = vmax.xlane.f32.xlu0 %v2957_v2  ;;  %v7321_v19 = vpop.f32.mrb[105].mxu0 }
 0x5e8   : > { %v11910_v35 = vadd.f32 %v7321_v19, %v7320_v22  ;;  %v11912_v6 = vpop.f32.mrb[4].mxu1  ;;  %v7323_v48 = vpop.f32.mrb[106].mxu0 }
 0x5e9   : > { %15263 = vst [vmem:[#allocation127_spill] sm:$0xff] %v11912_v6  ;;  %v11914_v28 = vpop.f32.mrb[5].mxu1  ;;  %v7324_v62 = vpop.f32.mrb[107].mxu0  ;;  %v15269_v6 = vld [vmem:[#allocation21_spill] sm:$0xff] }
 0x5ea   : > { %15262 = vst [vmem:[#allocation126_spill] sm:$0xff] %v11910_v35  ;;  %15264 = vst [vmem:[#allocation192_spill] sm:$0xff] %v11914_v28  ;;  %v11916_v33 = vadd.f32 %v7324_v62, %v7323_v48  ;;  %v11918_v36 = vpop.f32.mrb[6].mxu1 }
 0x5eb   : > { %15266 = vst [vmem:[#allocation194_spill] sm:$0xff] %v11918_v36  ;;  %v11920_v24 = vpop.f32.mrb[7].mxu1 }
 0x5ec   : > { %15265 = vst [vmem:[#allocation193_spill] sm:$0xff] %v11916_v33  ;;  %15267 = vst [vmem:[#allocation195_spill] sm:$0xff] %v11920_v24 }
 0x5ee   : > { %v11924_v37 = vpop.xlane.xlu0 %2949 }
 0x5f2   : > { %v3169_v2 = vpop.xlane.xlu0 %3168 }
 0x5f3   : > { %v7326_v22 = vpop.f32.mrb[108].mxu0  ;;  %8469 = vrcp.f32 %v3169_v2  ;;  %v2987_v2 = vsub.f32 %v11109_v4, %v11468_v40  ;;  %v2989_v4 = vsub.f32 %v11136_v55, %v11480_v51  ;;  %v2427_v40 = vld [vmem:[#allocation5 + $0x1e8] sm:$0xff] }
 0x5f4   : > { %v7327_v19 = vpop.f32.mrb[109].mxu0 }
 0x5f5   : > { %v11926_v39 = vadd.f32 %v7327_v19, %v7326_v22  ;;  %3417 = vrot.lane.b32.xlu1 %v15269_v6, %s9301_s17  ;;  %v7329_v28 = vpop.f32.mrb[110].mxu0  ;;  %v15271_v22 = vld [vmem:[#allocation20_spill] sm:$0xff] }
 0x5f6   : > { %v7330_v48 = vpop.f32.mrb[111].mxu0  ;;  %v4945_v62 = vpop.permute.xlu0 %4944 }
 0x5f7   : > { %15268 = vst [vmem:[#allocation196_spill] sm:$0xff] %v11926_v39  ;;  %v11930_v63 = vadd.f32 %v7330_v48, %v7329_v28  ;;  %7720 = vmatprep.mubr.msk.bf16.mxu1 %vm1418_vm0, %v4945_v62  ;;  %v15272_v28 = vld [vmem:[#allocation86_spill] sm:$0xff] }
 0x5f8   : > { %7721 = vmatmul.mubr.msk.bf16.gmra.mrb[24].mxu1 %vm1418_vm0, %v4945_v62 }
 0x5f9   : > { %15270 = vst [vmem:[#allocation197_spill] sm:$0xff] %v11930_v63  ;;  %v3063_v63 = vmul.f32 1.442695, %v2987_v2  ;;  %v15275_v2 = vld [vmem:[#allocation133_spill] sm:$0xff] }
 0x5fa   : > { %v3426_v35 = vpop.permute.xlu0 %3425 }
 0x5fb   : > { %v3172_v33 = vpop.xlane.xlu1 %3171  ;;  %7406 = vmatprep.subr.bf16.mxu0 %v3426_v35  ;;  %v15273_v35 = vld [vmem:[#allocation88_spill] sm:$0xff] }
 0x5fc   : > { %8471 = vrcp.f32 %v3172_v33 }
 0x5fd   : > { %3415 = vrot.lane.b32.xlu0 %v15271_v22, %s9301_s17  ;;  %v8470_v36 = vpop.eup %8469  ;;  %v3065_v22 = vmul.f32 1.442695, %v2988_v5  ;;  %8473 = vpow2.f32 %v3063_v63 }
 0x5fe   : > { %v3410_v19 = vpop.permute.xlu0 %3409 }
 0x5ff   : > { %v11938_v24 = vpop.xlane.xlu1 %2955  ;;  %7407 = vmatpush3.bf16.msra.mxu0 %v3410_v19  ;;  %v11949_v19 = vmul.f32 %v8470_v36, %v11722_v10  ;;  %v3067_v10 = vmul.f32 1.442695, %v2989_v4  ;;  %8475 = vpow2.f32 %v3065_v22 }
 0x601   : > { %3433 = vrot.lane.b32.xlu0 %v15272_v28, %s9301_s17  ;;  %8477 = vpow2.f32 %v3067_v10  ;;  %v15282_v10 = vld [vmem:[#allocation130_spill] sm:$0xff] }
 0x602   : > { %v3428_v48 = vpop.permute.xlu0 %3427 }
 0x603   : > { %v3412_v62 = vpop.permute.xlu1 %3411  ;;  %7408 = vmatprep.subr.bf16.mxu0 %v3428_v48  ;;  %v3296_v48 = vmul.f32 %v8470_v36, %v11726_v0  ;;  %v3069_v0 = vmul.f32 1.442695, %v2990_v16  ;;  %v15274_v36 = vld [vmem:[#allocation132_spill] sm:$0xff] }
 0x604   : > { %7409 = vmatpush3.bf16.msra.mxu0 %v3412_v62 }
 0x605   : > { %3435 = vrot.lane.b32.xlu0 %v15273_v35, %s9301_s17  ;;  %8479 = vpow2.f32 %v3069_v0 }
 0x606   : > { %v8472_v33 = vpop.eup %8471 }
 0x607   : > { %v11952_v39 = vmul.f32 %v8472_v33, %v11740_v49  ;;  %v3298_v62 = vmul.f32 %v8472_v33, %v11746_v50  ;;  %v2488_v49 = vunpack.c.l.bf16 %v2427_v40  ;;  %v2489_v50 = vunpack.c.h.bf16 %v2427_v40  ;;  %v11968_v5 = vpop.eup %8473 }
 0x608   : > { %15276 = vst [vmem:[#allocation132_spill] sm:$0xff] %v11968_v5 }
 0x609   : > { %v3360_v6 = vpack.c.bf16 %v3298_v62, %v3296_v48  ;;  %v11963_v55 = vadd.f32 %v15274_v36, %v2488_v49  ;;  %v11966_v33 = vadd.f32 %v15275_v2, %v2489_v50  ;;  %v2426_v48 = vld [vmem:[#allocation5 + $0x1e0] sm:$0xff]  ;;  %v11972_v51 = vpop.eup %8475  ;;  %v15283_v49 = vld [vmem:[#allocation131_spill] sm:$0xff] }
 0x60a   : > { %15277 = vst [vmem:[#allocation133_spill] sm:$0xff] %v11972_v51  ;;  %v2487_v63 = vunpack.c.h.bf16 %v2426_v48  ;;  %v3185_v62 = vadd.f32 %v11972_v51, %v11968_v5 }
 0x60b   : > { %3487 = vmatprep.mubr.bf16.mxu0 %v3360_v6  ;;  %v2966_v12 = vmax.f32 %v11963_v55, %v11966_v33  ;;  %v2486_v6 = vunpack.c.l.bf16 %v2426_v48  ;;  %v11974_v22 = vpop.eup %8477 }
 0x60c   : > { %15278 = vst [vmem:[#allocation198_spill] sm:$0xff] %v11974_v22  ;;  %v11988_v50 = vadd.f32 %v15283_v49, %v2487_v63 }
 0x60d   : > { %v11985_v0 = vadd.f32 %v15282_v10, %v2486_v6 }
 0x60f   : > { %v11978_v4 = vpop.eup %8479 }
 0x610   : > { %15279 = vst [vmem:[#allocation199_spill] sm:$0xff] %v11978_v4  ;;  %v3188_v48 = vadd.f32 %v11978_v4, %v11974_v22  ;;  %v15328_v4 = vld [vmem:[#allocation53_spill] sm:$0xff] }
 0x619   : > { %2967 = vmax.xlane.f32.xlu1 %v2966_v12  ;;  %v2963_v12 = vmax.f32 %v11985_v0, %v11988_v50 }
 0x61c   : > { %v11980_v16 = vpop.f32.mrb[8].mxu1 }
 0x61d   : > { %15280 = vst [vmem:[#allocation200_spill] sm:$0xff] %v11980_v16  ;;  %3186 = vadd.xlane.f32.xlu1 %v3185_v62  ;;  %v11982_v40 = vpop.f32.mrb[9].mxu1 }
 0x61e   : > { %15281 = vst [vmem:[#allocation201_spill] sm:$0xff] %v11982_v40  ;;  %v11990_v36 = vpop.f32.mrb[10].mxu1 }
 0x61f   : > { %15284 = vst [vmem:[#allocation130_spill] sm:$0xff] %v11990_v36  ;;  %v11992_v2 = vpop.f32.mrb[11].mxu1 }
 0x620   : > { %15285 = vst [vmem:[#allocation131_spill] sm:$0xff] %v11992_v2 }
 0x621   : > { %3189 = vadd.xlane.f32.xlu1 %v3188_v48 }
 0x624   : > { %2964 = vmax.xlane.f32.xlu0 %v2963_v12  ;;  %v15292_v12 = vld [vmem:[#allocation40_spill] sm:$0xff] }
 0x627   : > { %v7332_v62 = vpop.f32.mrb[112].mxu0 }
 0x628   : > { %v7333_v35 = vpop.f32.mrb[113].mxu0 }
 0x629   : > { %v11998_v40 = vadd.f32 %v7333_v35, %v7332_v62  ;;  %v12000_v6 = vpop.f32.mrb[12].mxu1  ;;  %v7335_v63 = vpop.f32.mrb[114].mxu0 }
 0x62a   : > { %15287 = vst [vmem:[#allocation203_spill] sm:$0xff] %v12000_v6  ;;  %v12002_v10 = vpop.f32.mrb[13].mxu1  ;;  %v7336_v49 = vpop.f32.mrb[115].mxu0 }
 0x62b   : > { %15286 = vst [vmem:[#allocation202_spill] sm:$0xff] %v11998_v40  ;;  %15288 = vst [vmem:[#allocation204_spill] sm:$0xff] %v12002_v10  ;;  %v12004_v16 = vadd.f32 %v7336_v49, %v7335_v63  ;;  %v12006_v2 = vpop.f32.mrb[14].mxu1  ;;  %v15295_v40 = vld [vmem:[#allocation77_spill] sm:$0xff] }
 0x62c   : > { %15290 = vst [vmem:[#allocation206_spill] sm:$0xff] %v12006_v2  ;;  %v12008_v36 = vpop.f32.mrb[15].mxu1 }
 0x62d   : > { %15289 = vst [vmem:[#allocation205_spill] sm:$0xff] %v12004_v16  ;;  %15291 = vst [vmem:[#allocation207_spill] sm:$0xff] %v12008_v36 }
 0x632   : > { %3421 = vrot.lane.b32.xlu1 %v15292_v12, %s9301_s17  ;;  %v2429_v12 = vld [vmem:[#allocation5 + $0x1f8] sm:$0xff] }
 0x633   : > { %v12014_v35 = vpop.xlane.xlu0 %2952 }
 0x634   : > { %v7338_v62 = vpop.f32.mrb[116].mxu0  ;;  %v12022_v2 = vpop.xlane.xlu1 %3174 }
 0x635   : > { %v7339_v6 = vpop.f32.mrb[117].mxu0 }
 0x636   : > { %v12016_v28 = vadd.f32 %v7339_v6, %v7338_v62  ;;  %v7341_v10 = vpop.f32.mrb[118].mxu0  ;;  %v15296_v6 = vld [vmem:[#allocation24_spill] sm:$0xff] }
 0x637   : > { %v7342_v5 = vpop.f32.mrb[119].mxu0  ;;  %v12018_v63 = vpop.xlane.xlu0 %3177 }
 0x638   : > { %15293 = vst [vmem:[#allocation208_spill] sm:$0xff] %v12016_v28  ;;  %v12020_v49 = vadd.f32 %v7342_v5, %v7341_v10  ;;  %v3414_v36 = vpop.permute.xlu1 %3413  ;;  %v2997_v5 = vsub.f32 %v11297_v42, %v11598_v59  ;;  %v2998_v10 = vsub.f32 %v11300_v15, %v11598_v59  ;;  %v3002_v42 = vsub.f32 %v11320_v8, %v11602_v27  ;;  %v3636_v8 = vld [vmem:[#allocation5 + $0x218] sm:$0xff] }
 0x639   : > { %v2492_v15 = vunpack.c.l.bf16 %v2429_v12  ;;  %v2493_v59 = vunpack.c.h.bf16 %v2429_v12 }
 0x63a   : > { %15294 = vst [vmem:[#allocation209_spill] sm:$0xff] %v12020_v49  ;;  %3419 = vrot.lane.b32.xlu0 %v15295_v40, %s9301_s17  ;;  %v3083_v28 = vmul.f32 1.442695, %v2997_v5  ;;  %v3085_v49 = vmul.f32 1.442695, %v2998_v10  ;;  %v2992_v40 = vsub.f32 %v11254_v46, %v11574_v25  ;;  %v15298_v5 = vld [vmem:[#allocation153_spill] sm:$0xff] }
 0x63b   : > { %v4947_v16 = vpop.permute.xlu0 %4946  ;;  %v3093_v46 = vmul.f32 1.442695, %v3002_v42 }
 0x63c   : > { %7722 = vmatprep.mubr.msk.bf16.mxu1 %vm1418_vm0, %v4947_v16  ;;  %8481 = vpow2.f32 %v3083_v28  ;;  %v15300_v28 = vld [vmem:[#allocation137_spill] sm:$0xff] }
 0x63d   : > { %7723 = vmatmul.mubr.msk.bf16.gmra.mrb[28].mxu1 %vm1418_vm0, %v4947_v16  ;;  %v2991_v16 = vsub.f32 %v11251_v31, %v11574_v25  ;;  %8483 = vpow2.f32 %v3085_v49  ;;  %v15299_v31 = vld [vmem:[#allocation154_spill] sm:$0xff]  ;;  %v12049_v56 = vadd.f32 %v15300_v28, %v2492_v15  ;;  %v15312_v28 = vld [vmem:[#allocation145_spill] sm:$0xff] }
 0x63e   : > { %3437 = vrot.lane.b32.xlu0 %v15296_v6, %s9301_s17  ;;  %v3073_v6 = vmul.f32 1.442695, %v2992_v40  ;;  %v2428_v25 = vld [vmem:[#allocation5 + $0x1f0] sm:$0xff]  ;;  %v15304_v40 = vld [vmem:[#allocation63_spill] sm:$0xff] }
 0x63f   : > { %v3430_v62 = vpop.permute.xlu0 %3429 }
 0x640   : > { %7410 = vmatprep.subr.bf16.mxu0 %v3430_v62  ;;  %v15297_v62 = vld [vmem:[#allocation67_spill] sm:$0xff] }
 0x641   : > { %7411 = vmatpush3.bf16.msra.mxu0 %v3414_v36  ;;  %v3001_v36 = vsub.f32 %v11317_v57, %v11602_v27  ;;  %v2993_v10 = vsub.f32 %v15298_v5, %v15297_v62  ;;  %v2994_v22 = vsub.f32 %v15299_v31, %v15297_v62  ;;  %15301 = vst [vmem:[#allocation67_spill] sm:$0xff] %v12049_v56  ;;  %v15302_v57 = vld [vmem:[#allocation138_spill] sm:$0xff]  ;;  %v2490_v5 = vunpack.c.l.bf16 %v2428_v25 }
 0x642   : > { %v12052_v49 = vadd.f32 %v15302_v57, %v2493_v59  ;;  %v2491_v62 = vunpack.c.h.bf16 %v2428_v25  ;;  %v3672_v31 = vunpack.c.h.bf16 %v3636_v8 }
 0x643   : > { %v3432_v48 = vpop.permute.xlu0 %3431  ;;  %v3091_v51 = vmul.f32 1.442695, %v3001_v36  ;;  %v3075_v27 = vmul.f32 1.442695, %v2993_v10  ;;  %v3077_v12 = vmul.f32 1.442695, %v2994_v22 }
 0x644   : > { %7412 = vmatprep.subr.bf16.mxu0 %v3432_v48  ;;  %v3071_v48 = vmul.f32 1.442695, %v2991_v16  ;;  %15303 = vst [vmem:[#allocation153_spill] sm:$0xff] %v12052_v49  ;;  %v3005_v16 = vsub.f32 %v15304_v40, %v11662_v41  ;;  %v15305_v36 = vld [vmem:[#allocation64_spill] sm:$0xff]  ;;  %v2972_v59 = vmax.f32 %v12049_v56, %v12052_v49  ;;  %v15308_v22 = vld [vmem:[#allocation26_spill] sm:$0xff]  ;;  %v15316_v49 = vld [vmem:[#allocation139_spill] sm:$0xff] }
 0x645   : > { %v3006_v42 = vsub.f32 %v15305_v36, %v11662_v41  ;;  %v15314_v40 = vld [vmem:[#allocation52_spill] sm:$0xff]  ;;  %v15317_v56 = vld [vmem:[#allocation174_spill] sm:$0xff] }
 0x646   : > { %8485 = vpow2.f32 %v3071_v48  ;;  %v12058_v15 = vpop.eup %8481  ;;  %v3671_v48 = vunpack.c.l.bf16 %v3636_v8  ;;  %v12074_v36 = vadd.f32 %v15314_v40, %v3672_v31  ;;  %v3638_v8 = vld [vmem:[#allocation5 + $0x228] sm:$0xff] }
 0x647   : > { %8487 = vpow2.f32 %v3073_v6  ;;  %15306 = vst [vmem:[#allocation154_spill] sm:$0xff] %v12058_v15  ;;  %v12062_v10 = vpop.eup %8483  ;;  %v12065_v6 = vadd.f32 %v15308_v22, %v2490_v5  ;;  %v3101_v41 = vmul.f32 1.442695, %v3006_v42  ;;  %v3633_v22 = vld [vmem:[#allocation5 + $0x200] sm:$0xff] }
 0x648   : > { %8489 = vpow2.f32 %v3091_v51  ;;  %15307 = vst [vmem:[#allocation137_spill] sm:$0xff] %v12062_v10  ;;  %v3099_v51 = vmul.f32 1.442695, %v3005_v16  ;;  %v12071_v57 = vadd.f32 %v15312_v28, %v3671_v48  ;;  %15315 = vst [vmem:[#allocation26_spill] sm:$0xff] %v12074_v36  ;;  %v15318_v16 = vld [vmem:[#allocation175_spill] sm:$0xff] }
 0x649   : > { %8491 = vpow2.f32 %v3093_v46  ;;  %15309 = vst [vmem:[#allocation138_spill] sm:$0xff] %v12065_v6  ;;  %v15310_v46 = vld [vmem:[#allocation136_spill] sm:$0xff]  ;;  %v2996_v5 = vsub.f32 %v15318_v16, %v15316_v49 }
 0x64a   : > { %8493 = vpow2.f32 %v3075_v27  ;;  %v12068_v25 = vadd.f32 %v15310_v46, %v2491_v62  ;;  %15313 = vst [vmem:[#allocation64_spill] sm:$0xff] %v12071_v57  ;;  %v2995_v27 = vsub.f32 %v15317_v56, %v15316_v49  ;;  %v15320_v62 = vld [vmem:[#allocation134_spill] sm:$0xff]  ;;  %v3675_v56 = vunpack.c.l.bf16 %v3638_v8  ;;  %v15322_v46 = vld [vmem:[#allocation65_spill] sm:$0xff] }
 0x64b   : > { %8495 = vpow2.f32 %v3077_v12  ;;  %v3200_v12 = vadd.f32 %v12062_v10, %v12058_v15  ;;  %v3009_v42 = vsub.f32 %v15320_v62, %v11668_v26  ;;  %v3010_v28 = vsub.f32 %v15322_v46, %v11668_v26 }
 0x64c   : > { %15311 = vst [vmem:[#allocation63_spill] sm:$0xff] %v12068_v25  ;;  %8497 = vpow2.f32 %v3099_v51  ;;  %v2969_v31 = vmax.f32 %v12065_v6, %v12068_v25  ;;  %v4091_v49 = vmax.f32 %v12071_v57, %v12074_v36  ;;  %v3676_v51 = vunpack.c.h.bf16 %v3638_v8  ;;  %v3634_v25 = vld [vmem:[#allocation5 + $0x208] sm:$0xff]  ;;  %v3640_v8 = vld [vmem:[#allocation5 + $0x238] sm:$0xff] }
 0x64d   : > { %8499 = vpow2.f32 %v3101_v41  ;;  %v3079_v16 = vmul.f32 1.442695, %v2995_v27  ;;  %v3665_v10 = vunpack.c.l.bf16 %v3633_v22  ;;  %v3107_v6 = vmul.f32 1.442695, %v3009_v42 }
 0x64e   : > { %v3666_v46 = vunpack.c.h.bf16 %v3633_v22  ;;  %v12105_v61 = vadd.f32 %v15328_v4, %v3675_v56  ;;  %v3109_v27 = vmul.f32 1.442695, %v3010_v28  ;;  %v3667_v56 = vunpack.c.l.bf16 %v3634_v25 }
 0x64f   : > { %8501 = vpow2.f32 %v3079_v16  ;;  %v3668_v28 = vunpack.c.h.bf16 %v3634_v25  ;;  %v15341_v25 = vld [vmem:[#allocation103_spill] sm:$0xff] }
 0x650   : > { %15329 = vst [vmem:[#allocation65_spill] sm:$0xff] %v12105_v61 }
 0x656   : > { %2973 = vmax.xlane.f32.xlu1 %v2972_v59  ;;  %v12082_v59 = vpop.eup %8485 }
 0x657   : > { %15319 = vst [vmem:[#allocation136_spill] sm:$0xff] %v12082_v59  ;;  %v12086_v48 = vpop.eup %8487 }
 0x658   : > { %15321 = vst [vmem:[#allocation145_spill] sm:$0xff] %v12086_v48  ;;  %v12092_v40 = vpop.eup %8489 }
 0x659   : > { %15323 = vst [vmem:[#allocation52_spill] sm:$0xff] %v12092_v40  ;;  %v12096_v62 = vpop.eup %8491 }
 0x65a   : > { %3201 = vadd.xlane.f32.xlu1 %v3200_v12  ;;  %15324 = vst [vmem:[#allocation139_spill] sm:$0xff] %v12096_v62  ;;  %v3081_v12 = vmul.f32 1.442695, %v2996_v5  ;;  %v12102_v26 = vpop.eup %8493  ;;  %v3191_v5 = vadd.f32 %v12086_v48, %v12082_v59  ;;  %v3206_v4 = vadd.f32 %v12096_v62, %v12092_v40  ;;  %v15336_v59 = vld [vmem:[#allocation25_spill] sm:$0xff]  ;;  %v15348_v62 = vld [vmem:[#allocation150_spill] sm:$0xff] }
 0x65b   : > { %15327 = vst [vmem:[#allocation134_spill] sm:$0xff] %v12102_v26  ;;  %v12125_v48 = vadd.f32 %v15336_v59, %v3665_v10 }
 0x65c   : > { %8503 = vpow2.f32 %v3081_v12  ;;  %v3014_v12 = vsub.f32 %v15341_v25, %v11780_v30  ;;  %v15346_v25 = vld [vmem:[#allocation143_spill] sm:$0xff] }
 0x65d   : > { %2970 = vmax.xlane.f32.xlu0 %v2969_v31  ;;  %v12098_v15 = vpop.f32.mrb[16].mxu1  ;;  %v12111_v31 = vpop.eup %8495  ;;  %8505 = vpow2.f32 %v3107_v6  ;;  %v3680_v6 = vunpack.c.h.bf16 %v3640_v8  ;;  %v12148_v40 = vadd.f32 %v15346_v25, %v3668_v28  ;;  %v15353_v28 = vld [vmem:[#allocation47_spill] sm:$0xff] }
 0x65e   : > { %15325 = vst [vmem:[#allocation174_spill] sm:$0xff] %v12098_v15  ;;  %4092 = vmax.xlane.f32.xlu1 %v4091_v49  ;;  %v12100_v41 = vpop.f32.mrb[17].mxu1  ;;  %v15331_v15 = vld [vmem:[#allocation148_spill] sm:$0xff]  ;;  %v15333_v49 = vld [vmem:[#allocation29_spill] sm:$0xff]  ;;  %8507 = vpow2.f32 %v3109_v27  ;;  %v3635_v27 = vld [vmem:[#allocation5 + $0x210] sm:$0xff]  ;;  %v3004_v25 = vsub.f32 %v15353_v28, %v11658_v32 }
 0x65f   : > { %15326 = vst [vmem:[#allocation175_spill] sm:$0xff] %v12100_v41  ;;  %v12107_v36 = vpop.f32.mrb[18].mxu1  ;;  %v12114_v42 = vadd.f32 %v15331_v15, %v3676_v51  ;;  %v2999_v41 = vsub.f32 %v15333_v49, %v11656_v44  ;;  %v3679_v15 = vunpack.c.l.bf16 %v3640_v8  ;;  %v15338_v51 = vld [vmem:[#allocation101_spill] sm:$0xff]  ;;  %v15339_v49 = vld [vmem:[#allocation140_spill] sm:$0xff]  ;;  %v15350_v8 = vld [vmem:[#allocation151_spill] sm:$0xff] }
 0x660   : > { %15330 = vst [vmem:[#allocation53_spill] sm:$0xff] %v12107_v36  ;;  %v12118_v22 = vpop.f32.mrb[19].mxu1  ;;  %v15335_v36 = vld [vmem:[#allocation124_spill] sm:$0xff]  ;;  %v3013_v16 = vsub.f32 %v15338_v51, %v11780_v30  ;;  %v15357_v28 = vld [vmem:[#allocation31_spill] sm:$0xff] }
 0x661   : > { %15332 = vst [vmem:[#allocation148_spill] sm:$0xff] %v12114_v42  ;;  %15334 = vst [vmem:[#allocation29_spill] sm:$0xff] %v12118_v22  ;;  %v3000_v57 = vsub.f32 %v15335_v36, %v11656_v44  ;;  %3192 = vadd.xlane.f32.xlu0 %v3191_v5  ;;  %v12130_v22 = vadd.f32 %v15339_v49, %v3666_v46  ;;  %v3194_v44 = vadd.f32 %v12111_v31, %v12102_v26  ;;  %v12136_v36 = vpop.eup %8497  ;;  %v15344_v46 = vld [vmem:[#allocation141_spill] sm:$0xff] }
 0x662   : > { %15337 = vst [vmem:[#allocation124_spill] sm:$0xff] %v12125_v48  ;;  %3207 = vadd.xlane.f32.xlu1 %v3206_v4  ;;  %15342 = vst [vmem:[#allocation101_spill] sm:$0xff] %v12136_v36  ;;  %v4097_v10 = vmax.f32 %v12105_v61, %v12114_v42  ;;  %v3087_v59 = vmul.f32 1.442695, %v2999_v41  ;;  %v12140_v5 = vpop.eup %8499  ;;  %v12143_v51 = vadd.f32 %v15344_v46, %v3667_v56  ;;  %v3115_v49 = vmul.f32 1.442695, %v3013_v16 }
 0x663   : > { %15340 = vst [vmem:[#allocation25_spill] sm:$0xff] %v12130_v22  ;;  %15343 = vst [vmem:[#allocation140_spill] sm:$0xff] %v12140_v5  ;;  %v3089_v4 = vmul.f32 1.442695, %v3000_v57  ;;  %v4082_v30 = vmax.f32 %v12125_v48, %v12130_v22  ;;  %v12151_v42 = vadd.f32 %v15348_v62, %v3679_v15  ;;  %v3117_v41 = vmul.f32 1.442695, %v3014_v12  ;;  %v12164_v12 = vpop.eup %8501 }
 0x664   : > { %15345 = vst [vmem:[#allocation103_spill] sm:$0xff] %v12143_v51  ;;  %15347 = vst [vmem:[#allocation141_spill] sm:$0xff] %v12148_v40  ;;  %v12154_v61 = vadd.f32 %v15350_v8, %v3680_v6  ;;  %v3642_v57 = vld [vmem:[#allocation5 + $0x248] sm:$0xff]  ;;  %8509 = vpow2.f32 %v3087_v59  ;;  %v3669_v46 = vunpack.c.l.bf16 %v3635_v27  ;;  %v3670_v6 = vunpack.c.h.bf16 %v3635_v27  ;;  %v15354_v59 = vld [vmem:[#allocation32_spill] sm:$0xff] }
 0x665   : > { %3195 = vadd.xlane.f32.xlu0 %v3194_v44  ;;  %15349 = vst [vmem:[#allocation143_spill] sm:$0xff] %v12151_v42  ;;  %v15352_v56 = vld [vmem:[#allocation125_spill] sm:$0xff]  ;;  %8511 = vpow2.f32 %v3089_v4  ;;  %v3017_v8 = vsub.f32 %v15354_v59, %v11784_v1  ;;  %v3018_v27 = vsub.f32 %v15357_v28, %v11784_v1  ;;  %v15364_v1 = vld [vmem:[#allocation50_spill] sm:$0xff] }
 0x666   : > { %4098 = vmax.xlane.f32.xlu1 %v4097_v10  ;;  %15351 = vst [vmem:[#allocation150_spill] sm:$0xff] %v12154_v61  ;;  %v3003_v44 = vsub.f32 %v15352_v56, %v11658_v32  ;;  %v3212_v10 = vadd.f32 %v12140_v5, %v12136_v36  ;;  %8513 = vpow2.f32 %v3115_v49  ;;  %v12172_v5 = vpop.eup %8503  ;;  %v4085_v32 = vmax.f32 %v12143_v51, %v12148_v40 }
 0x667   : > { %8515 = vpow2.f32 %v3117_v41  ;;  %v12180_v59 = vpop.eup %8505  ;;  %v3097_v41 = vmul.f32 1.442695, %v3004_v25  ;;  %v12193_v28 = vadd.f32 %v15364_v1, %v3669_v46  ;;  %v3197_v25 = vadd.f32 %v12172_v5, %v12164_v12  ;;  %v3644_v46 = vld [vmem:[#allocation5 + $0x258] sm:$0xff] }
 0x668   : > { %v7344_v16 = vpop.f32.mrb[120].mxu0  ;;  %15359 = vst [vmem:[#allocation32_spill] sm:$0xff] %v12180_v59  ;;  %v12188_v40 = vpop.eup %8507 }
 0x669   : > { %v12162_v62 = vpop.xlane.xlu1 %2961  ;;  %4083 = vmax.xlane.f32.xlu0 %v4082_v30  ;;  %v7345_v15 = vpop.f32.mrb[121].mxu0  ;;  %v3683_v30 = vunpack.c.l.bf16 %v3642_v57  ;;  %15362 = vst [vmem:[#allocation211_spill] sm:$0xff] %v12188_v40  ;;  %15365 = vst [vmem:[#allocation50_spill] sm:$0xff] %v12193_v28 }
 0x66a   : > { %3213 = vadd.xlane.f32.xlu1 %v3212_v10  ;;  %v12168_v56 = vadd.f32 %v7345_v15, %v7344_v16  ;;  %v12170_v36 = vpop.f32.mrb[20].mxu1  ;;  %v7347_v4 = vpop.f32.mrb[122].mxu0  ;;  %v4103_v16 = vmax.f32 %v12151_v42, %v12154_v61  ;;  %v3684_v10 = vunpack.c.h.bf16 %v3642_v57  ;;  %v3095_v15 = vmul.f32 1.442695, %v3003_v44  ;;  %v15366_v57 = vld [vmem:[#allocation144_spill] sm:$0xff] }
 0x66b   : > { %15356 = vst [vmem:[#allocation125_spill] sm:$0xff] %v12170_v36  ;;  %v12178_v49 = vpop.f32.mrb[21].mxu1  ;;  %v7348_v22 = vpop.f32.mrb[123].mxu0  ;;  %v12198_v44 = vadd.f32 %v15366_v57, %v3670_v6  ;;  %v3125_v61 = vmul.f32 1.442695, %v3018_v27  ;;  %v3218_v6 = vadd.f32 %v12188_v40, %v12180_v59 }
 0x66c   : > { %15355 = vst [vmem:[#allocation151_spill] sm:$0xff] %v12168_v56  ;;  %15358 = vst [vmem:[#allocation47_spill] sm:$0xff] %v12178_v49  ;;  %v12184_v36 = vadd.f32 %v7348_v22, %v7347_v4  ;;  %v12186_v48 = vpop.f32.mrb[22].mxu1  ;;  %v3123_v49 = vmul.f32 1.442695, %v3017_v8  ;;  %v3637_v22 = vld [vmem:[#allocation5 + $0x220] sm:$0xff]  ;;  %8517 = vpow2.f32 %v3095_v15  ;;  %v3021_v15 = vsub.f32 %v11707_v17, %v11924_v37 }
 0x66d   : > { %15361 = vst [vmem:[#allocation210_spill] sm:$0xff] %v12186_v48  ;;  %v12190_v51 = vpop.f32.mrb[23].mxu1  ;;  %4086 = vmax.xlane.f32.xlu0 %v4085_v32  ;;  %15367 = vst [vmem:[#allocation144_spill] sm:$0xff] %v12198_v44  ;;  %v15368_v4 = vld [vmem:[#allocation156_spill] sm:$0xff]  ;;  %v15370_v32 = vld [vmem:[#allocation157_spill] sm:$0xff]  ;;  %8519 = vpow2.f32 %v3097_v41  ;;  %v12214_v57 = vpop.xlane.xlu1 %3180  ;;  %v4088_v41 = vmax.f32 %v12193_v28, %v12198_v44 }
 0x66e   : > { %15360 = vst [vmem:[#allocation31_spill] sm:$0xff] %v12184_v36  ;;  %15363 = vst [vmem:[#allocation212_spill] sm:$0xff] %v12190_v51  ;;  %4104 = vmax.xlane.f32.xlu1 %v4103_v16  ;;  %v12201_v48 = vadd.f32 %v15368_v4, %v3683_v30  ;;  %v12206_v51 = vadd.f32 %v15370_v32, %v3684_v10  ;;  %v15372_v8 = vld [vmem:[#allocation69_spill] sm:$0xff]  ;;  %v15373_v16 = vld [vmem:[#allocation70_spill] sm:$0xff]  ;;  %v12216_v27 = vpop.eup %8509  ;;  %v3673_v4 = vunpack.c.l.bf16 %v3637_v22  ;;  %v3674_v10 = vunpack.c.h.bf16 %v3637_v22 }
 0x66f   : > { %v3007_v1 = vsub.f32 %v15372_v8, %v11768_v13  ;;  %v3008_v30 = vsub.f32 %v15373_v16, %v11768_v13  ;;  %15374 = vst [vmem:[#allocation69_spill] sm:$0xff] %v12216_v27  ;;  %8521 = vpow2.f32 %v3123_v49  ;;  %v12220_v32 = vpop.eup %8511  ;;  %v3687_v8 = vunpack.c.l.bf16 %v3644_v46  ;;  %v15375_v36 = vld [vmem:[#allocation146_spill] sm:$0xff] }
 0x670   : > { %15369 = vst [vmem:[#allocation156_spill] sm:$0xff] %v12201_v48  ;;  %15371 = vst [vmem:[#allocation157_spill] sm:$0xff] %v12206_v51  ;;  %8523 = vpow2.f32 %v3125_v61  ;;  %v3022_v13 = vsub.f32 %v11710_v3, %v11924_v37  ;;  %v4109_v22 = vmax.f32 %v12201_v48, %v12206_v51  ;;  %v3688_v49 = vunpack.c.h.bf16 %v3644_v46  ;;  %v15376_v61 = vld [vmem:[#allocation147_spill] sm:$0xff]  ;;  %v3639_v3 = vld [vmem:[#allocation5 + $0x230] sm:$0xff] }
 0x671   : > { %3198 = vadd.xlane.f32.xlu0 %v3197_v25  ;;  %v12226_v25 = vpop.eup %8513  ;;  %v3103_v16 = vmul.f32 1.442695, %v3007_v1  ;;  %v12235_v42 = vadd.f32 %v15375_v36, %v3673_v4  ;;  %v12238_v44 = vadd.f32 %v15376_v61, %v3674_v10  ;;  %v3131_v37 = vmul.f32 1.442695, %v3021_v15  ;;  %v15378_v51 = vld [vmem:[#allocation160_spill] sm:$0xff]  ;;  %v3646_v1 = vld [vmem:[#allocation5 + $0x268] sm:$0xff]  ;;  %v12243_v59 = vpop.xlane.xlu1 %3183 }
 0x672   : > { %3219 = vadd.xlane.f32.xlu1 %v3218_v6  ;;  %v12232_v17 = vpop.eup %8515  ;;  %v3105_v6 = vmul.f32 1.442695, %v3008_v30  ;;  %v12241_v46 = vadd.f32 %v15378_v51, %v3687_v8  ;;  %v3133_v48 = vmul.f32 1.442695, %v3022_v13  ;;  %v3203_v36 = vadd.f32 %v12220_v32, %v12216_v27  ;;  %v15381_v4 = vld [vmem:[#allocation161_spill] sm:$0xff] }
 0x673   : > { %15377 = vst [vmem:[#allocation70_spill] sm:$0xff] %v12238_v44  ;;  %v12250_v10 = vadd.f32 %v15381_v4, %v3688_v49  ;;  %8525 = vpow2.f32 %v3103_v16  ;;  %v15383_v15 = vld [vmem:[#allocation41_spill] sm:$0xff]  ;;  %v3224_v8 = vadd.f32 %v12232_v17, %v12226_v25  ;;  %v3677_v13 = vunpack.c.l.bf16 %v3639_v3 }
 0x674   : > { %v12230_v26 = vpop.xlane.xlu0 %2958  ;;  %15379 = vst [vmem:[#allocation146_spill] sm:$0xff] %v12241_v46  ;;  %8527 = vpow2.f32 %v3105_v6  ;;  %v3678_v16 = vunpack.c.h.bf16 %v3639_v3  ;;  %v3691_v4 = vunpack.c.l.bf16 %v3646_v1  ;;  %v4094_v6 = vmax.f32 %v12235_v42, %v12238_v44 }
 0x675   : > { %v7350_v56 = vpop.f32.mrb[124].mxu0  ;;  %4089 = vmax.xlane.f32.xlu0 %v4088_v41  ;;  %15382 = vst [vmem:[#allocation160_spill] sm:$0xff] %v12250_v10  ;;  %8529 = vpow2.f32 %v3131_v37  ;;  %v4115_v3 = vmax.f32 %v12241_v46, %v12250_v10  ;;  %v3692_v37 = vunpack.c.h.bf16 %v3646_v1  ;;  %v15390_v10 = vld [vmem:[#allocation165_spill] sm:$0xff] }
 0x676   : > { %4110 = vmax.xlane.f32.xlu1 %v4109_v22  ;;  %v7351_v28 = vpop.f32.mrb[125].mxu0  ;;  %v3011_v22 = vsub.f32 %v15383_v15, %v11772_v23  ;;  %v12260_v49 = vpop.eup %8517  ;;  %v3025_v15 = vsub.f32 %v11753_v18, %v11938_v24  ;;  %8531 = vpow2.f32 %v3133_v48  ;;  %v15386_v48 = vld [vmem:[#allocation54_spill] sm:$0xff] }
 0x677   : > { %v12245_v30 = vadd.f32 %v7351_v28, %v7350_v56  ;;  %v7353_v41 = vpop.f32.mrb[126].mxu0  ;;  %v15384_v56 = vld [vmem:[#allocation97_spill] sm:$0xff]  ;;  %v12264_v27 = vpop.eup %8519  ;;  %v12279_v44 = vadd.f32 %v15386_v48, %v3677_v13  ;;  %v3015_v13 = vsub.f32 %v11635_v52, %v11856_v58 }
 0x678   : > { %v7354_v61 = vpop.f32.mrb[127].mxu0  ;;  %v3416_v51 = vpop.permute.xlu0 %3415  ;;  %v3012_v28 = vsub.f32 %v15384_v56, %v11772_v23  ;;  %v3026_v23 = vsub.f32 %v11756_v60, %v11938_v24  ;;  %v3111_v18 = vmul.f32 1.442695, %v3011_v22  ;;  %v3139_v60 = vmul.f32 1.442695, %v3025_v15  ;;  %v15387_v24 = vld [vmem:[#allocation149_spill] sm:$0xff] }
 0x679   : > { %15380 = vst [vmem:[#allocation147_spill] sm:$0xff] %v12245_v30  ;;  %v12258_v40 = vadd.f32 %v7354_v61, %v7353_v41  ;;  %3204 = vadd.xlane.f32.xlu0 %v3203_v36  ;;  %7413 = vmatpush3.bf16.msra.mxu0 %v3416_v51  ;;  %v12272_v36 = vpop.eup %8521  ;;  %v3418_v56 = vpop.permute.xlu1 %3417  ;;  %v12282_v41 = vadd.f32 %v15387_v24, %v3678_v16  ;;  %v3641_v30 = vld [vmem:[#allocation5 + $0x240] sm:$0xff]  ;;  %v3119_v48 = vmul.f32 1.442695, %v3015_v13 }
 0x67a   : > { %3225 = vadd.xlane.f32.xlu1 %v3224_v8  ;;  %v12276_v51 = vpop.eup %8523  ;;  %v3113_v8 = vmul.f32 1.442695, %v3012_v28  ;;  %v3141_v22 = vmul.f32 1.442695, %v3026_v23  ;;  %v3209_v28 = vadd.f32 %v12264_v27, %v12260_v49  ;;  %8533 = vpow2.f32 %v3111_v18  ;;  %v15398_v13 = vld [vmem:[#allocation168_spill] sm:$0xff] }
 0x67b   : > { %15385 = vst [vmem:[#allocation161_spill] sm:$0xff] %v12258_v40  ;;  %v15388_v40 = vld [vmem:[#allocation164_spill] sm:$0xff]  ;;  %v3230_v15 = vadd.f32 %v12276_v51, %v12272_v36  ;;  %v3681_v23 = vunpack.c.l.bf16 %v3641_v30  ;;  %v3682_v18 = vunpack.c.h.bf16 %v3641_v30 }
 0x67c   : > { %v3434_v61 = vpop.permute.xlu0 %3433  ;;  %v12285_v1 = vadd.f32 %v15388_v40, %v3691_v4  ;;  %8535 = vpow2.f32 %v3113_v8  ;;  %v3016_v40 = vsub.f32 %v11638_v9, %v11856_v58  ;;  %v3030_v9 = vsub.f32 %v11878_v43, %v12162_v62 }
 0x67d   : > { %4095 = vmax.xlane.f32.xlu0 %v4094_v6  ;;  %7414 = vmatprep.subr.bf16.mxu0 %v3434_v61  ;;  %v12290_v6 = vadd.f32 %v15390_v10, %v3692_v37  ;;  %v12298_v4 = vpop.eup %8525  ;;  %8537 = vpow2.f32 %v3139_v60  ;;  %v3029_v10 = vsub.f32 %v11875_v14, %v12162_v62  ;;  %v4100_v37 = vmax.f32 %v12279_v44, %v12282_v41 }
 0x67e   : > { %4116 = vmax.xlane.f32.xlu1 %v4115_v3  ;;  %7415 = vmatpush3.bf16.msra.mxu0 %v3418_v56  ;;  %15389 = vst [vmem:[#allocation41_spill] sm:$0xff] %v12285_v1  ;;  %v3648_v3 = vld [vmem:[#allocation5 + $0x278] sm:$0xff]  ;;  %v12302_v52 = vpop.eup %8527  ;;  %8539 = vpow2.f32 %v3141_v22  ;;  %v3121_v60 = vmul.f32 1.442695, %v3016_v40  ;;  %v3149_v43 = vmul.f32 1.442695, %v3030_v9 }
 0x67f   : > { %15391 = vst [vmem:[#allocation97_spill] sm:$0xff] %v12290_v6  ;;  %v12308_v58 = vpop.eup %8529  ;;  %v4121_v61 = vmax.f32 %v12285_v1, %v12290_v6  ;;  %v3695_v8 = vunpack.c.l.bf16 %v3648_v3  ;;  %v3696_v56 = vunpack.c.h.bf16 %v3648_v3  ;;  %v3147_v24 = vmul.f32 1.442695, %v3029_v10  ;;  %v15394_v22 = vld [vmem:[#allocation155_spill] sm:$0xff]  ;;  %v15400_v10 = vld [vmem:[#allocation82_spill] sm:$0xff] }
 0x680   : > { %v3436_v16 = vpop.permute.xlu0 %3435  ;;  %v12312_v14 = vpop.eup %8531  ;;  %v3215_v62 = vadd.f32 %v12302_v52, %v12298_v4  ;;  %v15396_v6 = vld [vmem:[#allocation167_spill] sm:$0xff]  ;;  %8541 = vpow2.f32 %v3119_v48 }
 0x681   : > { %3210 = vadd.xlane.f32.xlu0 %v3209_v28  ;;  %7416 = vmatprep.subr.bf16.mxu0 %v3436_v16  ;;  %v15392_v28 = vld [vmem:[#allocation152_spill] sm:$0xff]  ;;  %v3643_v16 = vld [vmem:[#allocation5 + $0x250] sm:$0xff]  ;;  %v12323_v3 = vadd.f32 %v15396_v6, %v3695_v8  ;;  %v12326_v1 = vadd.f32 %v15398_v13, %v3696_v56  ;;  %v3236_v40 = vadd.f32 %v12312_v14, %v12308_v58  ;;  %8543 = vpow2.f32 %v3121_v60  ;;  %v15401_v9 = vld [vmem:[#allocation83_spill] sm:$0xff] }
 0x682   : > { %3231 = vadd.xlane.f32.xlu1 %v3230_v15  ;;  %v12315_v30 = vadd.f32 %v15392_v28, %v3681_v23  ;;  %v12318_v15 = vadd.f32 %v15394_v22, %v3682_v18  ;;  %v3650_v23 = vld [vmem:[#allocation5 + $0x288] sm:$0xff]  ;;  %8545 = vpow2.f32 %v3147_v24  ;;  %v3685_v56 = vunpack.c.l.bf16 %v3643_v16 }
 0x683   : > { %15397 = vst [vmem:[#allocation164_spill] sm:$0xff] %v12323_v3  ;;  %15399 = vst [vmem:[#allocation165_spill] sm:$0xff] %v12326_v1  ;;  %v3686_v48 = vunpack.c.h.bf16 %v3643_v16  ;;  %8547 = vpow2.f32 %v3149_v43  ;;  %v4127_v28 = vmax.f32 %v12323_v3, %v12326_v1  ;;  %v3699_v22 = vunpack.c.l.bf16 %v3650_v23  ;;  %v3645_v16 = vld [vmem:[#allocation5 + $0x260] sm:$0xff] }
 0x684   : > { %15393 = vst [vmem:[#allocation54_spill] sm:$0xff] %v12315_v30  ;;  %15395 = vst [vmem:[#allocation149_spill] sm:$0xff] %v12318_v15  ;;  %v12332_v18 = vpop.eup %8533  ;;  %v4106_v8 = vmax.f32 %v12315_v30, %v12318_v15  ;;  %v15406_v15 = vld [vmem:[#allocation170_spill] sm:$0xff]  ;;  %v15414_v30 = vld [vmem:[#allocation172_spill] sm:$0xff] }
 0x685   : > { %4101 = vmax.xlane.f32.xlu0 %v4100_v37  ;;  %v3019_v37 = vsub.f32 %v15400_v10, %v11862_v38  ;;  %v12355_v1 = vadd.f32 %v15406_v15, %v3699_v22  ;;  %v3689_v22 = vunpack.c.l.bf16 %v3645_v16 }
 0x686   : > { %4122 = vmax.xlane.f32.xlu1 %v4121_v61  ;;  %v3020_v61 = vsub.f32 %v15401_v9, %v11862_v38  ;;  %v12336_v6 = vpop.eup %8535  ;;  %v15404_v9 = vld [vmem:[#allocation159_spill] sm:$0xff] }
 0x687   : > { %v12340_v60 = vpop.eup %8537  ;;  %v3127_v38 = vmul.f32 1.442695, %v3019_v37  ;;  %v12350_v46 = vadd.f32 %v15404_v9, %v3686_v48  ;;  %v3221_v43 = vadd.f32 %v12336_v6, %v12332_v18  ;;  %15407 = vst [vmem:[#allocation167_spill] sm:$0xff] %v12355_v1  ;;  %v3024_v48 = vsub.f32 %v11818_v47, %v12014_v35 }
 0x688   : > { %v12344_v13 = vpop.eup %8539  ;;  %v3129_v24 = vmul.f32 1.442695, %v3020_v61  ;;  %v3652_v61 = vld [vmem:[#allocation5 + $0x298] sm:$0xff] }
 0x689   : > { %3216 = vadd.xlane.f32.xlu0 %v3215_v62  ;;  %v3700_v62 = vunpack.c.h.bf16 %v3650_v23  ;;  %15405 = vst [vmem:[#allocation155_spill] sm:$0xff] %v12350_v46  ;;  %v15408_v23 = vld [vmem:[#allocation171_spill] sm:$0xff]  ;;  %v3242_v37 = vadd.f32 %v12344_v13, %v12340_v60  ;;  %8549 = vpow2.f32 %v3127_v38  ;;  %v3703_v38 = vunpack.c.l.bf16 %v3652_v61 }
 0x68a   : > { %3237 = vadd.xlane.f32.xlu1 %v3236_v40  ;;  %v15402_v40 = vld [vmem:[#allocation158_spill] sm:$0xff]  ;;  %8551 = vpow2.f32 %v3129_v24  ;;  %v3704_v9 = vunpack.c.h.bf16 %v3652_v61  ;;  %v3137_v47 = vmul.f32 1.442695, %v3024_v48  ;;  %v15416_v61 = vld [vmem:[#allocation57_spill] sm:$0xff]  ;;  %v3027_v48 = vsub.f32 %v11901_v20, %v12230_v26 }
 0x68b   : > { %v12347_v10 = vadd.f32 %v15402_v40, %v3685_v56  ;;  %v12358_v3 = vadd.f32 %v15408_v23, %v3700_v62  ;;  %v12364_v56 = vpop.eup %8541  ;;  %v3690_v62 = vunpack.c.h.bf16 %v3645_v16 }
 0x68c   : > { %v12368_v15 = vpop.eup %8543 }
 0x68d   : > { %4107 = vmax.xlane.f32.xlu0 %v4106_v8  ;;  %15403 = vst [vmem:[#allocation152_spill] sm:$0xff] %v12347_v10  ;;  %15409 = vst [vmem:[#allocation168_spill] sm:$0xff] %v12358_v3  ;;  %v3023_v8 = vsub.f32 %v11815_v21, %v12014_v35  ;;  %v12372_v40 = vpop.eup %8545  ;;  %v4133_v21 = vmax.f32 %v12355_v1, %v12358_v3  ;;  %v15410_v35 = vld [vmem:[#allocation162_spill] sm:$0xff]  ;;  %v3227_v16 = vadd.f32 %v12368_v15, %v12364_v56 }
 0x68e   : > { %4128 = vmax.xlane.f32.xlu1 %v4127_v28  ;;  %v4112_v28 = vmax.f32 %v12347_v10, %v12350_v46  ;;  %v12379_v23 = vadd.f32 %v15410_v35, %v3689_v22  ;;  %v3647_v10 = vld [vmem:[#allocation5 + $0x270] sm:$0xff]  ;;  %v12387_v3 = vadd.f32 %v15414_v30, %v3703_v38  ;;  %v12390_v1 = vadd.f32 %v15416_v61, %v3704_v9 }
 0x68f   : > { %v3135_v24 = vmul.f32 1.442695, %v3023_v8 }
 0x690   : > { %15411 = vst [vmem:[#allocation82_spill] sm:$0xff] %v12379_v23  ;;  %15415 = vst [vmem:[#allocation158_spill] sm:$0xff] %v12387_v3  ;;  %v4139_v9 = vmax.f32 %v12387_v3, %v12390_v1 }
 0x691   : > { %3222 = vadd.xlane.f32.xlu0 %v3221_v43  ;;  %v12376_v43 = vpop.eup %8547  ;;  %15417 = vst [vmem:[#allocation159_spill] sm:$0xff] %v12390_v1  ;;  %8553 = vpow2.f32 %v3135_v24  ;;  %v3143_v24 = vmul.f32 1.442695, %v3027_v48 }
 0x692   : > { %3243 = vadd.xlane.f32.xlu1 %v3242_v37  ;;  %v15412_v37 = vld [vmem:[#allocation163_spill] sm:$0xff]  ;;  %v3248_v8 = vadd.f32 %v12376_v43, %v12372_v40  ;;  %8555 = vpow2.f32 %v3137_v47  ;;  %v15418_v47 = vld [vmem:[#allocation28_spill] sm:$0xff] }
 0x693   : > { %v12382_v46 = vadd.f32 %v15412_v37, %v3690_v62  ;;  %v12398_v22 = vpop.eup %8549  ;;  %v3693_v62 = vunpack.c.l.bf16 %v3647_v10  ;;  %v3649_v37 = vld [vmem:[#allocation5 + $0x280] sm:$0xff]  ;;  %8557 = vpow2.f32 %v3143_v24 }
 0x694   : > { %v12402_v38 = vpop.eup %8551  ;;  %v3698_v48 = vunpack.c.h.bf16 %v3649_v37 }
 0x695   : > { %4113 = vmax.xlane.f32.xlu0 %v4112_v28  ;;  %15413 = vst [vmem:[#allocation83_spill] sm:$0xff] %v12382_v46  ;;  %v3028_v28 = vsub.f32 %v11904_v45, %v12230_v26  ;;  %v4118_v30 = vmax.f32 %v12379_v23, %v12382_v46  ;;  %v12407_v35 = vadd.f32 %v15418_v47, %v3693_v62  ;;  %v15420_v45 = vld [vmem:[#allocation166_spill] sm:$0xff] }
 0x696   : > { %4134 = vmax.xlane.f32.xlu1 %v4133_v21  ;;  %v3694_v21 = vunpack.c.h.bf16 %v3647_v10  ;;  %v3697_v10 = vunpack.c.l.bf16 %v3649_v37 }
 0x697   : > { %v3145_v20 = vmul.f32 1.442695, %v3028_v28  ;;  %15419 = vst [vmem:[#allocation170_spill] sm:$0xff] %v12407_v35 }
 0x698   : > { %v12410_v26 = vadd.f32 %v15420_v45, %v3694_v21 }
 0x699   : > { %3228 = vadd.xlane.f32.xlu0 %v3227_v16  ;;  %v3233_v16 = vadd.f32 %v12402_v38, %v12398_v22  ;;  %8559 = vpow2.f32 %v3145_v20 }
 0x69a   : > { %3249 = vadd.xlane.f32.xlu1 %v3248_v8  ;;  %15421 = vst [vmem:[#allocation171_spill] sm:$0xff] %v12410_v26  ;;  %v4124_v8 = vmax.f32 %v12407_v35, %v12410_v26  ;;  %8561 = vrcp.f32 %v12018_v63  ;;  %v15464_v26 = vld [vmem:[#allocation134_spill] sm:$0xff] }
 0x69b   : > { %v12414_v61 = vpop.eup %8553 }
 0x69c   : > { %v12418_v28 = vpop.eup %8555 }
 0x69d   : > { %4119 = vmax.xlane.f32.xlu0 %v4118_v30  ;;  %v15422_v30 = vld [vmem:[#allocation27_spill] sm:$0xff]  ;;  %v3239_v45 = vadd.f32 %v12418_v28, %v12414_v61 }
 0x69e   : > { %4140 = vmax.xlane.f32.xlu1 %v4139_v9  ;;  %v12421_v62 = vadd.f32 %v15422_v30, %v3697_v10  ;;  %v15424_v9 = vld [vmem:[#allocation169_spill] sm:$0xff] }
 0x69f   : > { %v12424_v47 = vadd.f32 %v15424_v9, %v3698_v48 }
 0x6a0   : > { %15423 = vst [vmem:[#allocation162_spill] sm:$0xff] %v12421_v62 }
 0x6a1   : > { %3234 = vadd.xlane.f32.xlu0 %v3233_v16  ;;  %15425 = vst [vmem:[#allocation163_spill] sm:$0xff] %v12424_v47  ;;  %v3651_v16 = vld [vmem:[#allocation5 + $0x290] sm:$0xff]  ;;  %v4130_v10 = vmax.f32 %v12421_v62, %v12424_v47 }
 0x6a2   : > { %v3701_v48 = vunpack.c.l.bf16 %v3651_v16  ;;  %v3702_v30 = vunpack.c.h.bf16 %v3651_v16 }
 0x6a5   : > { %4125 = vmax.xlane.f32.xlu0 %v4124_v8  ;;  %v12431_v8 = vpop.eup %8557 }
 0x6a6   : > { %v2968_v21 = vpop.xlane.xlu1 %2967 }
 0x6a7   : > { %v3033_v24 = vsub.f32 %v11963_v55, %v2968_v21  ;;  %v3034_v20 = vsub.f32 %v11966_v33, %v2968_v21  ;;  %v12435_v55 = vpop.eup %8559  ;;  %v15426_v21 = vld [vmem:[#allocation55_spill] sm:$0xff] }
 0x6a8   : > { %v12439_v9 = vadd.f32 %v15426_v21, %v3701_v48  ;;  %v8562_v48 = vpop.eup %8561 }
 0x6a9   : > { %v3155_v1 = vmul.f32 1.442695, %v3033_v24  ;;  %v3157_v37 = vmul.f32 1.442695, %v3034_v20  ;;  %3240 = vadd.xlane.f32.xlu0 %v3239_v45  ;;  %v15428_v24 = vld [vmem:[#allocation56_spill] sm:$0xff]  ;;  %v3245_v20 = vadd.f32 %v12435_v55, %v12431_v8  ;;  %v3654_v45 = vld [vmem:[#allocation5 + $0x2a8] sm:$0xff] }
 0x6aa   : > { %v3187_v33 = vpop.xlane.xlu1 %3186  ;;  %15427 = vst [vmem:[#allocation172_spill] sm:$0xff] %v12439_v9  ;;  %v12442_v63 = vadd.f32 %v15428_v24, %v3702_v30 }
 0x6ab   : > { %8563 = vpow2.f32 %v3155_v1 }
 0x6ac   : > { %8565 = vpow2.f32 %v3157_v37  ;;  %15429 = vst [vmem:[#allocation57_spill] sm:$0xff] %v12442_v63  ;;  %v3707_v37 = vunpack.c.l.bf16 %v3654_v45 }
 0x6ad   : > { %4131 = vmax.xlane.f32.xlu0 %v4130_v10  ;;  %8567 = vrcp.f32 %v12022_v2  ;;  %v4136_v2 = vmax.f32 %v12439_v9, %v12442_v63  ;;  %v3708_v10 = vunpack.c.h.bf16 %v3654_v45  ;;  %v15432_v45 = vld [vmem:[#allocation60_spill] sm:$0xff] }
 0x6ae   : > { %8569 = vrcp.f32 %v12243_v59  ;;  %v3190_v30 = vpop.xlane.xlu1 %3189  ;;  %v3653_v9 = vld [vmem:[#allocation5 + $0x2a0] sm:$0xff] }
 0x6af   : > { %8571 = vrcp.f32 %v12214_v57  ;;  %v12460_v63 = vadd.f32 %v15432_v45, %v3708_v10  ;;  %v3302_v57 = vmul.f32 %v8562_v48, %v11828_v29  ;;  %v15434_v45 = vpack.c.bf16 %v11952_v39, %v11949_v19 }
 0x6b1   : > { %v2965_v47 = vpop.xlane.xlu0 %2964  ;;  %3246 = vadd.xlane.f32.xlu0 %v3245_v20  ;;  %15433 = vst [vmem:[#allocation166_spill] sm:$0xff] %v12460_v63 }
 0x6b2   : > { %v3031_v1 = vsub.f32 %v11985_v0, %v2965_v47  ;;  %v3032_v16 = vsub.f32 %v11988_v50, %v2965_v47  ;;  %v15430_v50 = vld [vmem:[#allocation173_spill] sm:$0xff] }
 0x6b3   : > { %v12457_v47 = vadd.f32 %v15430_v50, %v3707_v37  ;;  %v3706_v50 = vunpack.c.h.bf16 %v3653_v9 }
 0x6b4   : > { %v3151_v21 = vmul.f32 1.442695, %v3031_v1  ;;  %v3153_v24 = vmul.f32 1.442695, %v3032_v16 }
 0x6b5   : > { %v12451_v62 = vpop.eup %8563  ;;  %v3420_v20 = vpop.permute.xlu0 %3419  ;;  %4137 = vmax.xlane.f32.xlu0 %v4136_v2  ;;  %15431 = vst [vmem:[#allocation28_spill] sm:$0xff] %v12457_v47 }
 0x6b6   : > { %v12454_v0 = vpop.eup %8565  ;;  %8573 = vpow2.f32 %v3151_v21  ;;  %7417 = vmatpush3.bf16.msra.mxu0 %v3420_v20  ;;  %v3422_v2 = vpop.permute.xlu1 %3421  ;;  %v4145_v21 = vmax.f32 %v12457_v47, %v12460_v63  ;;  %v3705_v20 = vunpack.c.l.bf16 %v3653_v9  ;;  %v15463_v47 = vld [vmem:[#allocation136_spill] sm:$0xff] }
 0x6b7   : > { %8575 = vpow2.f32 %v3153_v24  ;;  %v3254_v59 = vadd.f32 %v12454_v0, %v12451_v62  ;;  %v8568_v1 = vpop.eup %8567 }
 0x6b8   : > { %v3300_v37 = vmul.f32 %v8568_v1, %v11822_v54  ;;  %8577 = vrcp.f32 %v3190_v30  ;;  %v8570_v24 = vpop.eup %8569  ;;  %v15435_v30 = vld [vmem:[#allocation58_spill] sm:$0xff]  ;;  %v3299_v19 = vmul.f32 %v8568_v1, %v11820_v34 }
 0x6b9   : > { %3255 = vadd.xlane.f32.xlu1 %v3254_v59  ;;  %v3438_v16 = vpop.permute.xlu0 %3437  ;;  %8579 = vrcp.f32 %v3187_v33  ;;  %v8572_v29 = vpop.eup %8571  ;;  %v3306_v54 = vmul.f32 %v8570_v24, %v11898_v7 }
 0x6ba   : > { %7418 = vmatprep.subr.bf16.mxu0 %v3438_v16  ;;  %v3362_v10 = vpack.c.bf16 %v3302_v57, %v3300_v37  ;;  %v3301_v16 = vmul.f32 %v8562_v48, %v11824_v11  ;;  %v12478_v57 = vadd.f32 %v15435_v30, %v3705_v20  ;;  %v3304_v33 = vmul.f32 %v8572_v29, %v11884_v53  ;;  %v15439_v20 = vld [vmem:[#allocation129_spill] sm:$0xff] }
 0x6bb   : > { %7419 = vmatpush3.bf16.msra.mxu0 %v3422_v2  ;;  %v15443_v53 = vld [vmem:[#allocation133_spill] sm:$0xff] }
 0x6bc   : > { %15436 = vst [vmem:[#allocation27_spill] sm:$0xff] %v12478_v57  ;;  %v3361_v37 = vpack.c.bf16 %v3301_v16, %v3299_v19  ;;  %v3364_v11 = vpack.c.bf16 %v3306_v54, %v3304_v33 }
 0x6bd   : > { %4146 = vmax.xlane.f32.xlu1 %v4145_v21  ;;  %v15437_v21 = vld [vmem:[#allocation59_spill] sm:$0xff] }
 0x6be   : > { %3488 = vmatmul.mubr.bf16.vlgmr.msra.gmra.mrb[128].mxu0 %v15434_v45  ;;  %v12481_v9 = vadd.f32 %v15437_v21, %v3706_v50  ;;  %v3305_v50 = vmul.f32 %v8570_v24, %v15439_v20  ;;  %v15440_v45 = vld [vmem:[#allocation199_spill] sm:$0xff] }
 0x6bf   : > { %3495 = vmatprep.mubr.bf16.mxu0 %v3362_v10  ;;  %v15441_v21 = vld [vmem:[#allocation35_spill] sm:$0xff] }
 0x6c0   : > { %v12471_v59 = vpop.eup %8573  ;;  %15438 = vst [vmem:[#allocation169_spill] sm:$0xff] %v12481_v9  ;;  %v4142_v7 = vmax.f32 %v12478_v57, %v12481_v9  ;;  %v3303_v63 = vmul.f32 %v8572_v29, %v15441_v21 }
 0x6c1   : > { %v12474_v2 = vpop.eup %8575 }
 0x6c2   : > { %v3251_v39 = vadd.f32 %v12474_v2, %v12471_v59  ;;  %v8578_v48 = vpop.eup %8577  ;;  %v3363_v54 = vpack.c.bf16 %v3305_v50, %v3303_v63 }
 0x6c3   : > { %v8580_v10 = vpop.eup %8579  ;;  %v3310_v30 = vmul.f32 %v8578_v48, %v15440_v45  ;;  %v15449_v45 = vld [vmem:[#allocation67_spill] sm:$0xff] }
 0x6c4   : > { %3252 = vadd.xlane.f32.xlu0 %v3251_v39  ;;  %v3308_v1 = vmul.f32 %v8580_v10, %v15443_v53  ;;  %v15450_v53 = vld [vmem:[#allocation153_spill] sm:$0xff] }
 0x6c6   : > { %3496 = vmatmul.mubr.bf16.gmra.mrb[132].mxu0 %v3361_v37  ;;  %v3366_v19 = vpack.c.bf16 %v3310_v30, %v3308_v1  ;;  %v15447_v37 = vld [vmem:[#allocation198_spill] sm:$0xff] }
 0x6c7   : > { %3503 = vmatprep.mubr.bf16.mxu0 %v3364_v11  ;;  %v3309_v24 = vmul.f32 %v8578_v48, %v15447_v37  ;;  %v15448_v11 = vld [vmem:[#allocation132_spill] sm:$0xff]  ;;  %v15451_v1 = vld [vmem:[#allocation138_spill] sm:$0xff] }
 0x6c8   : > { %4143 = vmax.xlane.f32.xlu0 %v4142_v7  ;;  %v3307_v7 = vmul.f32 %v8580_v10, %v15448_v11  ;;  %v3655_v10 = vld [vmem:[#allocation5 + $0x2b0] sm:$0xff] }
 0x6ca   : > { %v3365_v20 = vpack.c.bf16 %v3309_v24, %v3307_v7 }
 0x6cb   : > { %v12492_v34 = vpop.f32.mrb[24].mxu1 }
 0x6cc   : > { %15442 = vst [vmem:[#allocation55_spill] sm:$0xff] %v12492_v34  ;;  %v12495_v16 = vpop.f32.mrb[25].mxu1 }
 0x6cd   : > { %15444 = vst [vmem:[#allocation56_spill] sm:$0xff] %v12495_v16  ;;  %v12497_v39 = vpop.f32.mrb[26].mxu1 }
 0x6ce   : > { %15445 = vst [vmem:[#allocation173_spill] sm:$0xff] %v12497_v39  ;;  %3504 = vmatmul.mubr.bf16.gmra.mrb[136].mxu0 %v3363_v54  ;;  %v12499_v33 = vpop.f32.mrb[27].mxu1  ;;  %v15457_v39 = vld [vmem:[#allocation176_spill] sm:$0xff] }
 0x6cf   : > { %15446 = vst [vmem:[#allocation60_spill] sm:$0xff] %v12499_v33  ;;  %3511 = vmatprep.mubr.bf16.mxu0 %v3366_v19  ;;  %v15452_v19 = vld [vmem:[#allocation63_spill] sm:$0xff] }
 0x6d6   : > { %3512 = vmatmul.mubr.bf16.gmra.mrb[140].mxu0 %v3365_v20  ;;  %v3709_v20 = vunpack.c.l.bf16 %v3655_v10 }
 0x6e3   : > { %v2974_v29 = vpop.xlane.xlu1 %2973 }
 0x6e4   : > { %v3037_v21 = vsub.f32 %v15449_v45, %v2974_v29  ;;  %v3038_v34 = vsub.f32 %v15450_v53, %v2974_v29  ;;  %v3710_v29 = vunpack.c.h.bf16 %v3655_v10  ;;  %v3656_v45 = vld [vmem:[#allocation5 + $0x2b8] sm:$0xff] }
 0x6e5   : > { %v3711_v53 = vunpack.c.l.bf16 %v3656_v45 }
 0x6e6   : > { %v3163_v16 = vmul.f32 1.442695, %v3037_v21  ;;  %v3165_v63 = vmul.f32 1.442695, %v3038_v34 }
 0x6e7   : > { %v3202_v50 = vpop.xlane.xlu1 %3201  ;;  %v12528_v9 = vadd.f32 %v15457_v39, %v3711_v53 }
 0x6e8   : > { %8581 = vpow2.f32 %v3163_v16 }
 0x6e9   : > { %8583 = vpow2.f32 %v3165_v63  ;;  %15458 = vst [vmem:[#allocation129_spill] sm:$0xff] %v12528_v9 }
 0x6ea   : > { %v2971_v30 = vpop.xlane.xlu0 %2970 }
 0x6eb   : > { %v3035_v54 = vsub.f32 %v15451_v1, %v2971_v30  ;;  %v3036_v33 = vsub.f32 %v15452_v19, %v2971_v30  ;;  %v12507_v48 = vpop.xlane.xlu1 %4092  ;;  %v15453_v30 = vld [vmem:[#allocation61_spill] sm:$0xff]  ;;  %v3712_v19 = vunpack.c.h.bf16 %v3656_v45 }
 0x6ec   : > { %v12516_v1 = vadd.f32 %v15453_v30, %v3709_v20  ;;  %v15459_v20 = vld [vmem:[#allocation177_spill] sm:$0xff] }
 0x6ed   : > { %v3159_v37 = vmul.f32 1.442695, %v3035_v54  ;;  %v3161_v24 = vmul.f32 1.442695, %v3036_v33  ;;  %v15455_v33 = vld [vmem:[#allocation62_spill] sm:$0xff]  ;;  %v12531_v30 = vadd.f32 %v15459_v20, %v3712_v19 }
 0x6ee   : > { %v3193_v11 = vpop.xlane.xlu0 %3192  ;;  %15454 = vst [vmem:[#allocation58_spill] sm:$0xff] %v12516_v1  ;;  %v12519_v54 = vadd.f32 %v15455_v33, %v3710_v29 }
 0x6ef   : > { %8585 = vpow2.f32 %v3159_v37  ;;  %v3208_v7 = vpop.xlane.xlu1 %3207  ;;  %15460 = vst [vmem:[#allocation199_spill] sm:$0xff] %v12531_v30 }
 0x6f0   : > { %8587 = vpow2.f32 %v3161_v24  ;;  %15456 = vst [vmem:[#allocation59_spill] sm:$0xff] %v12519_v54 }
 0x6f1   : > { %8589 = vrcp.f32 %v3193_v11  ;;  %v4148_v11 = vmax.f32 %v12516_v1, %v12519_v54  ;;  %v4151_v54 = vmax.f32 %v12528_v9, %v12531_v30  ;;  %v15462_v1 = vld [vmem:[#allocation145_spill] sm:$0xff] }
 0x6f2   : > { %v12509_v34 = vpop.eup %8581  ;;  %v3196_v16 = vpop.xlane.xlu0 %3195 }
 0x6f3   : > { %v12511_v21 = vpop.eup %8583  ;;  %v12513_v63 = vpop.xlane.xlu1 %4098  ;;  %8591 = vrcp.f32 %v3196_v16 }
 0x6f4   : > { %v3260_v10 = vadd.f32 %v12511_v21, %v12509_v34  ;;  %8593 = vrcp.f32 %v3202_v50  ;;  %v15466_v50 = vld [vmem:[#allocation137_spill] sm:$0xff] }
 0x6f6   : > { %3261 = vadd.xlane.f32.xlu1 %v3260_v10  ;;  %v12523_v37 = vpop.xlane.xlu0 %4083 }
 0x6f7   : > { %v3214_v24 = vpop.xlane.xlu1 %3213 }
 0x6f9   : > { %v12533_v29 = vpop.eup %8585 }
 0x6fa   : > { %v12535_v45 = vpop.eup %8587  ;;  %4149 = vmax.xlane.f32.xlu1 %v4148_v11  ;;  %v12537_v33 = vpop.xlane.xlu0 %4086 }
 0x6fb   : > { %v12539_v16 = vpop.xlane.xlu1 %4104  ;;  %v3257_v10 = vadd.f32 %v12535_v45, %v12533_v29  ;;  %v8590_v39 = vpop.eup %8589 }
 0x6fc   : > { %15461 = vst [vmem:[#allocation35_spill] sm:$0xff] %v12539_v16  ;;  %v3312_v57 = vmul.f32 %v8590_v39, %v15462_v1  ;;  %v3311_v3 = vmul.f32 %v8590_v39, %v15463_v47 }
 0x6fd   : > { %3258 = vadd.xlane.f32.xlu0 %v3257_v10  ;;  %v8592_v19 = vpop.eup %8591 }
 0x6fe   : > { %4152 = vmax.xlane.f32.xlu1 %v4151_v54  ;;  %v3199_v53 = vpop.xlane.xlu0 %3198  ;;  %v3314_v11 = vmul.f32 %v8592_v19, %v12111_v31  ;;  %v3313_v35 = vmul.f32 %v8592_v19, %v15464_v26  ;;  %v8594_v1 = vpop.eup %8593 }
 0x6ff   : > { %v3220_v20 = vpop.xlane.xlu1 %3219  ;;  %8595 = vrcp.f32 %v3199_v53  ;;  %v3318_v19 = vmul.f32 %v8594_v1, %v15466_v50 }
 0x700   : > { %v3368_v23 = vpack.c.bf16 %v3314_v11, %v3312_v57  ;;  %v3367_v16 = vpack.c.bf16 %v3313_v35, %v3311_v3  ;;  %8597 = vrcp.f32 %v3208_v7  ;;  %v15467_v35 = vld [vmem:[#allocation154_spill] sm:$0xff] }
 0x701   : > { %v15468_v57 = vld [vmem:[#allocation38_spill] sm:$0xff] }
 0x702   : > { %v12549_v46 = vpop.xlane.xlu0 %4089  ;;  %3519 = vmatprep.mubr.bf16.mxu0 %v3368_v23  ;;  %v3317_v23 = vmul.f32 %v8594_v1, %v15467_v35  ;;  %v15473_v1 = vld [vmem:[#allocation79_spill] sm:$0xff] }
 0x703   : > { %v12551_v10 = vpop.xlane.xlu1 %4110  ;;  %3520 = vmatmul.mubr.bf16.gmra.mrb[144].mxu0 %v3367_v16 }
 0x704   : > { %15465 = vst [vmem:[#allocation133_spill] sm:$0xff] %v12551_v10 }
 0x706   : > { %v3205_v54 = vpop.xlane.xlu0 %3204 }
 0x707   : > { %8599 = vrcp.f32 %v3205_v54  ;;  %v3226_v31 = vpop.xlane.xlu1 %3225 }
 0x708   : > { %8601 = vrcp.f32 %v3214_v24 }
 0x709   : > { %v8596_v47 = vpop.eup %8595 }
 0x70a   : > { %v12553_v30 = vpop.xlane.xlu0 %4095  ;;  %v3316_v26 = vmul.f32 %v8596_v47, %v12172_v5  ;;  %v3315_v3 = vmul.f32 %v8596_v47, %v12164_v12  ;;  %v8598_v12 = vpop.eup %8597 }
 0x70b   : > { %v12563_v11 = vpop.xlane.xlu1 %4116 }
 0x70c   : > { %v3370_v16 = vpack.c.bf16 %v3318_v19, %v3316_v26  ;;  %v3369_v7 = vpack.c.bf16 %v3317_v23, %v3315_v3  ;;  %15470 = vst [vmem:[#allocation132_spill] sm:$0xff] %v12563_v11  ;;  %v15475_v3 = vld [vmem:[#allocation139_spill] sm:$0xff]  ;;  %v15476_v23 = vld [vmem:[#allocation69_spill] sm:$0xff] }
 0x70d   : > { %v3322_v35 = vmul.f32 %v8598_v12, %v15475_v3 }
 0x70e   : > { %v3211_v39 = vpop.xlane.xlu0 %3210  ;;  %3527 = vmatprep.mubr.bf16.mxu0 %v3370_v16 }
 0x70f   : > { %4594 = vrot.lane.b32.xlu1 %v15468_v57, %s9300_s8  ;;  %8603 = vrcp.f32 %v3211_v39  ;;  %3528 = vmatmul.mubr.bf16.gmra.mrb[148].mxu0 %v3369_v7  ;;  %v15479_v39 = vld [vmem:[#allocation25_spill] sm:$0xff]  ;;  %v3232_v9 = vpop.xlane.xlu1 %3231 }
 0x710   : > { %v12561_v53 = vpop.f32.mrb[28].mxu1  ;;  %v4179_v7 = vsub.f32 %v15479_v39, %v12523_v37  ;;  %8605 = vrcp.f32 %v3220_v20 }
 0x711   : > { %15469 = vst [vmem:[#allocation198_spill] sm:$0xff] %v12561_v53  ;;  %v12565_v54 = vpop.f32.mrb[29].mxu1  ;;  %v8600_v26 = vpop.eup %8599 }
 0x712   : > { %15471 = vst [vmem:[#allocation67_spill] sm:$0xff] %v12565_v54  ;;  %v12567_v5 = vpop.xlane.xlu0 %4101  ;;  %v12569_v50 = vpop.f32.mrb[30].mxu1  ;;  %v3320_v24 = vmul.f32 %v8600_v26, %v12220_v32  ;;  %v3319_v16 = vmul.f32 %v8600_v26, %v15476_v23  ;;  %v15477_v54 = vld [vmem:[#allocation52_spill] sm:$0xff] }
 0x713   : > { %15472 = vst [vmem:[#allocation153_spill] sm:$0xff] %v12569_v50  ;;  %4610 = vrot.lane.b32.xlu0 %v15473_v1, %s9300_s8  ;;  %v12573_v47 = vpop.f32.mrb[31].mxu1  ;;  %v3321_v53 = vmul.f32 %v8598_v12, %v15477_v54  ;;  %v15478_v50 = vld [vmem:[#allocation124_spill] sm:$0xff]  ;;  %v8602_v3 = vpop.eup %8601  ;;  %v4244_v54 = vmul.f32 1.442695, %v4179_v7 }
 0x714   : > { %15474 = vst [vmem:[#allocation138_spill] sm:$0xff] %v12573_v47  ;;  %v4178_v57 = vsub.f32 %v15478_v50, %v12523_v37  ;;  %v3372_v1 = vpack.c.bf16 %v3322_v35, %v3320_v24  ;;  %v15480_v47 = vld [vmem:[#allocation103_spill] sm:$0xff]  ;;  %v15481_v50 = vld [vmem:[#allocation141_spill] sm:$0xff]  ;;  %v12589_v39 = vpop.xlane.xlu1 %4122 }
 0x715   : > { %v3371_v11 = vpack.c.bf16 %v3321_v53, %v3319_v16  ;;  %v4180_v10 = vsub.f32 %v15480_v47, %v12537_v33  ;;  %v4181_v12 = vsub.f32 %v15481_v50, %v12537_v33  ;;  %v15482_v47 = vld [vmem:[#allocation140_spill] sm:$0xff]  ;;  %v15483_v35 = vld [vmem:[#allocation101_spill] sm:$0xff] }
 0x716   : > { %v3217_v19 = vpop.xlane.xlu0 %3216  ;;  %3535 = vmatprep.mubr.bf16.mxu0 %v3372_v1  ;;  %v4242_v26 = vmul.f32 1.442695, %v4178_v57  ;;  %v3326_v20 = vmul.f32 %v8602_v3, %v15482_v47  ;;  %v3325_v16 = vmul.f32 %v8602_v3, %v15483_v35  ;;  %v15484_v3 = vld [vmem:[#allocation211_spill] sm:$0xff] }
 0x717   : > { %8607 = vrcp.f32 %v3217_v19  ;;  %3536 = vmatmul.mubr.bf16.gmra.mrb[152].mxu0 %v3371_v11  ;;  %v4246_v37 = vmul.f32 1.442695, %v4180_v10  ;;  %v4248_v57 = vmul.f32 1.442695, %v4181_v12  ;;  %v15485_v12 = vld [vmem:[#allocation32_spill] sm:$0xff] }
 0x718   : > { %8609 = vpow2.f32 %v4242_v26 }
 0x719   : > { %v8604_v23 = vpop.eup %8603  ;;  %8611 = vpow2.f32 %v4244_v54 }
 0x71a   : > { %v12585_v32 = vpop.xlane.xlu0 %4107  ;;  %v3324_v24 = vmul.f32 %v8604_v23, %v12264_v27  ;;  %v3323_v1 = vmul.f32 %v8604_v23, %v12260_v49  ;;  %8613 = vrcp.f32 %v3226_v31  ;;  %v8606_v10 = vpop.eup %8605 }
 0x71b   : > { %8615 = vpow2.f32 %v4246_v37  ;;  %v3238_v27 = vpop.xlane.xlu1 %3237  ;;  %v3330_v26 = vmul.f32 %v8606_v10, %v15484_v3  ;;  %v3329_v23 = vmul.f32 %v8606_v10, %v15485_v12 }
 0x71c   : > { %v3374_v11 = vpack.c.bf16 %v3326_v20, %v3324_v24  ;;  %v3373_v19 = vpack.c.bf16 %v3325_v16, %v3323_v1 }
 0x71e   : > { %v3223_v53 = vpop.xlane.xlu0 %3222  ;;  %3543 = vmatprep.mubr.bf16.mxu0 %v3374_v11 }
 0x71f   : > { %8617 = vrcp.f32 %v3223_v53  ;;  %3544 = vmatmul.mubr.bf16.gmra.mrb[156].mxu0 %v3373_v19  ;;  %v12605_v53 = vpop.xlane.xlu1 %4128 }
 0x720   : > { %8619 = vpow2.f32 %v4248_v57 }
 0x721   : > { %v8608_v7 = vpop.eup %8607  ;;  %8621 = vrcp.f32 %v3232_v9 }
 0x722   : > { %v12595_v33 = vpop.xlane.xlu0 %4113  ;;  %v3328_v49 = vmul.f32 %v8608_v7, %v12302_v52  ;;  %v3327_v54 = vmul.f32 %v8608_v7, %v12298_v4  ;;  %v12601_v24 = vpop.eup %8609 }
 0x723   : > { %v12603_v47 = vpop.eup %8611  ;;  %v3244_v10 = vpop.xlane.xlu1 %3243 }
 0x724   : > { %v3376_v31 = vpack.c.bf16 %v3330_v26, %v3328_v49  ;;  %v3375_v37 = vpack.c.bf16 %v3329_v23, %v3327_v54  ;;  %v8614_v1 = vpop.eup %8613 }
 0x725   : > { %v12609_v52 = vpop.eup %8615  ;;  %v3334_v9 = vmul.f32 %v8614_v1, %v12232_v17  ;;  %v3333_v19 = vmul.f32 %v8614_v1, %v12226_v25 }
 0x726   : > { %v3229_v50 = vpop.xlane.xlu0 %3228  ;;  %3551 = vmatprep.mubr.bf16.mxu0 %v3376_v31 }
 0x727   : > { %8623 = vrcp.f32 %v3229_v50  ;;  %3552 = vmatmul.mubr.bf16.gmra.mrb[160].mxu0 %v3375_v37  ;;  %v4370_v50 = vadd.f32 %v12603_v47, %v12601_v24  ;;  %v12623_v25 = vpop.xlane.xlu1 %4134 }
 0x728   : > { %8625 = vrcp.f32 %v3238_v27 }
 0x729   : > { %v8618_v4 = vpop.eup %8617 }
 0x72a   : > { %v12607_v20 = vpop.xlane.xlu0 %4119  ;;  %v12611_v35 = vpop.eup %8619  ;;  %v3332_v57 = vmul.f32 %v8618_v4, %v12336_v6  ;;  %v3331_v11 = vmul.f32 %v8618_v4, %v12332_v18 }
 0x72b   : > { %v4373_v3 = vadd.f32 %v12611_v35, %v12609_v52  ;;  %v8622_v6 = vpop.eup %8621 }
 0x72c   : > { %v3378_v7 = vpack.c.bf16 %v3334_v9, %v3332_v57  ;;  %v3377_v49 = vpack.c.bf16 %v3333_v19, %v3331_v11  ;;  %v3338_v12 = vmul.f32 %v8622_v6, %v12276_v51  ;;  %v3337_v23 = vmul.f32 %v8622_v6, %v12272_v36  ;;  %v15487_v6 = vld [vmem:[#allocation78_spill] sm:$0xff] }
 0x72e   : > { %v3235_v16 = vpop.xlane.xlu0 %3234  ;;  %3559 = vmatprep.mubr.bf16.mxu0 %v3378_v7 }
 0x72f   : > { %8627 = vrcp.f32 %v3235_v16  ;;  %3560 = vmatmul.mubr.bf16.gmra.mrb[164].mxu0 %v3377_v49  ;;  %v3250_v16 = vpop.xlane.xlu1 %3249  ;;  %v15486_v49 = vld [vmem:[#allocation37_spill] sm:$0xff] }
 0x730   : > { %8629 = vrcp.f32 %v3244_v10 }
 0x731   : > { %v8624_v17 = vpop.eup %8623 }
 0x732   : > { %4371 = vadd.xlane.f32.xlu0 %v4370_v50  ;;  %v12621_v26 = vpop.xlane.xlu0 %4125  ;;  %v3336_v54 = vmul.f32 %v8624_v17, %v12368_v15  ;;  %v3335_v27 = vmul.f32 %v8624_v17, %v12364_v56  ;;  %v8626_v4 = vpop.eup %8625 }
 0x733   : > { %4374 = vadd.xlane.f32.xlu1 %v4373_v3  ;;  %v3342_v51 = vmul.f32 %v8626_v4, %v12312_v14  ;;  %v3341_v36 = vmul.f32 %v8626_v4, %v12308_v58 }
 0x734   : > { %v3380_v31 = vpack.c.bf16 %v3338_v12, %v3336_v54  ;;  %v3379_v37 = vpack.c.bf16 %v3337_v23, %v3335_v27  ;;  %v15488_v12 = vld [vmem:[#allocation81_spill] sm:$0xff] }
 0x736   : > { %v3241_v18 = vpop.xlane.xlu0 %3240  ;;  %3567 = vmatprep.mubr.bf16.mxu0 %v3380_v31 }
 0x737   : > { %8631 = vrcp.f32 %v3241_v18  ;;  %3568 = vmatmul.mubr.bf16.gmra.mrb[168].mxu0 %v3379_v37  ;;  %v12643_v18 = vpop.xlane.xlu1 %4140 }
 0x738   : > { %8633 = vrcp.f32 %v3250_v16  ;;  %v15489_v16 = vld [vmem:[#allocation50_spill] sm:$0xff] }
 0x739   : > { %v8628_v57 = vpop.eup %8627 }
 0x73a   : > { %v12629_v1 = vpop.xlane.xlu0 %4131  ;;  %v3340_v15 = vmul.f32 %v8628_v57, %v12402_v38  ;;  %v3339_v56 = vmul.f32 %v8628_v57, %v12398_v22  ;;  %v8630_v10 = vpop.eup %8629  ;;  %v4182_v57 = vsub.f32 %v15489_v16, %v12549_v46 }
 0x73b   : > { %v3346_v38 = vmul.f32 %v8630_v10, %v12344_v13  ;;  %v3345_v22 = vmul.f32 %v8630_v10, %v12340_v60 }
 0x73c   : > { %v3382_v11 = vpack.c.bf16 %v3342_v51, %v3340_v15  ;;  %v3381_v19 = vpack.c.bf16 %v3341_v36, %v3339_v56  ;;  %v15492_v51 = vld [vmem:[#allocation26_spill] sm:$0xff] }
 0x73e   : > { %v3247_v9 = vpop.xlane.xlu0 %3246  ;;  %3575 = vmatprep.mubr.bf16.mxu0 %v3382_v11  ;;  %v3658_v11 = vld [vmem:[#allocation5 + $0x2c8] sm:$0xff] }
 0x73f   : > { %8635 = vrcp.f32 %v3247_v9  ;;  %3576 = vmatmul.mubr.bf16.gmra.mrb[172].mxu0 %v3381_v19  ;;  %v4250_v9 = vmul.f32 1.442695, %v4182_v57 }
 0x741   : > { %v8632_v7 = vpop.eup %8631 }
 0x742   : > { %v3344_v50 = vmul.f32 %v8632_v7, %v12418_v28  ;;  %v3343_v14 = vmul.f32 %v8632_v7, %v12414_v61  ;;  %v8634_v17 = vpop.eup %8633  ;;  %v12650_v28 = vpop.xlane.xlu0 %4137 }
 0x743   : > { %v3350_v61 = vmul.f32 %v8634_v17, %v12376_v43  ;;  %v3349_v23 = vmul.f32 %v8634_v17, %v12372_v40  ;;  %v4185_v40 = vsub.f32 %v15492_v51, %v12507_v48  ;;  %v15498_v51 = vld [vmem:[#allocation39_spill] sm:$0xff] }
 0x744   : > { %4596 = vrot.lane.b32.xlu1 %v15486_v49, %s9300_s8  ;;  %v3384_v58 = vpack.c.bf16 %v3346_v38, %v3344_v50  ;;  %v3383_v3 = vpack.c.bf16 %v3345_v22, %v3343_v14  ;;  %v3657_v22 = vld [vmem:[#allocation5 + $0x2c0] sm:$0xff] }
 0x745   : > { %v4256_v7 = vmul.f32 1.442695, %v4185_v40  ;;  %v15552_v49 = vld [vmem:[#allocation132_spill] sm:$0xff] }
 0x746   : > { %3583 = vmatprep.mubr.bf16.mxu0 %v3384_v58  ;;  %v3256_v27 = vpop.xlane.xlu1 %3255  ;;  %v3715_v58 = vunpack.c.l.bf16 %v3658_v11 }
 0x747   : > { %3584 = vmatmul.mubr.bf16.gmra.mrb[176].mxu0 %v3383_v3  ;;  %8637 = vrcp.f32 %v3256_v27  ;;  %v3716_v3 = vunpack.c.h.bf16 %v3658_v11 }
 0x748   : > { %4612 = vrot.lane.b32.xlu0 %v15487_v6, %s9300_s8  ;;  %v3664_v6 = vld [vmem:[#allocation5 + $0x2f8] sm:$0xff] }
 0x749   : > { %v8636_v54 = vpop.eup %8635 }
 0x74a   : > { %v3348_v13 = vmul.f32 %v8636_v54, %v12435_v55  ;;  %v3347_v60 = vmul.f32 %v8636_v54, %v12431_v8  ;;  %v15490_v55 = vld [vmem:[#allocation144_spill] sm:$0xff]  ;;  %v3713_v54 = vunpack.c.l.bf16 %v3657_v22 }
 0x74b   : > { %v4183_v43 = vsub.f32 %v15490_v55, %v12549_v46  ;;  %v15491_v8 = vld [vmem:[#allocation64_spill] sm:$0xff] }
 0x74c   : > { %4614 = vrot.lane.b32.xlu0 %v15488_v12, %s9300_s8  ;;  %v3386_v31 = vpack.c.bf16 %v3350_v61, %v3348_v13  ;;  %v3385_v37 = vpack.c.bf16 %v3349_v23, %v3347_v60  ;;  %v4184_v15 = vsub.f32 %v15491_v8, %v12507_v48  ;;  %v3714_v13 = vunpack.c.h.bf16 %v3657_v22  ;;  %v15493_v61 = vld [vmem:[#allocation180_spill] sm:$0xff]  ;;  %v15496_v23 = vld [vmem:[#allocation179_spill] sm:$0xff]  ;;  %v12693_v8 = vpop.xlane.xlu1 %4146  ;;  %v15553_v12 = vld [vmem:[#allocation146_spill] sm:$0xff] }
 0x74d   : > { %v4252_v56 = vmul.f32 1.442695, %v4183_v43  ;;  %v12666_v60 = vadd.f32 %v15493_v61, %v3715_v58 }
 0x74e   : > { %3591 = vmatprep.mubr.bf16.mxu0 %v3386_v31  ;;  %v4254_v10 = vmul.f32 1.442695, %v4184_v15  ;;  %v12677_v31 = vadd.f32 %v15496_v23, %v3714_v13  ;;  %v15497_v15 = vld [vmem:[#allocation80_spill] sm:$0xff]  ;;  %v15503_v13 = vld [vmem:[#allocation65_spill] sm:$0xff] }
 0x74f   : > { %3592 = vmatmul.mubr.bf16.gmra.mrb[180].mxu0 %v3385_v37  ;;  %v4188_v61 = vsub.f32 %v15503_v13, %v12513_v63  ;;  %v15504_v23 = vld [vmem:[#allocation148_spill] sm:$0xff] }
 0x751   : > { %v3253_v4 = vpop.xlane.xlu0 %3252  ;;  %v8638_v36 = vpop.eup %8637 }
 0x752   : > { %8639 = vrcp.f32 %v3253_v4  ;;  %v3354_v38 = vmul.f32 %v8638_v36, %v12454_v0  ;;  %v3353_v14 = vmul.f32 %v8638_v36, %v12451_v62  ;;  %v15495_v62 = vld [vmem:[#allocation178_spill] sm:$0xff] }
 0x753   : > { %8641 = vpow2.f32 %v4250_v9 }
 0x754   : > { %8643 = vpow2.f32 %v4252_v56  ;;  %v15499_v56 = vld [vmem:[#allocation22_spill] sm:$0xff] }
 0x755   : > { %8645 = vpow2.f32 %v4254_v10  ;;  %v12701_v36 = vpop.xlane.xlu0 %4143 }
 0x756   : > { %8647 = vpow2.f32 %v4256_v7 }
 0x75c   : > { %v8640_v19 = vpop.eup %8639 }
 0x75d   : > { %v3352_v50 = vmul.f32 %v8640_v19, %v12474_v2  ;;  %v3351_v46 = vmul.f32 %v8640_v19, %v12471_v59  ;;  %v15494_v2 = vld [vmem:[#allocation98_spill] sm:$0xff]  ;;  %v12671_v0 = vpop.eup %8641  ;;  %v12674_v59 = vadd.f32 %v15495_v62, %v3713_v54  ;;  %v15500_v19 = vld [vmem:[#allocation87_spill] sm:$0xff] }
 0x75e   : > { %v12669_v27 = vadd.f32 %v15494_v2, %v3716_v3  ;;  %v12679_v37 = vpop.eup %8643 }
 0x75f   : > { %v3388_v48 = vpack.c.bf16 %v3354_v38, %v3352_v50  ;;  %v3387_v17 = vpack.c.bf16 %v3353_v14, %v3351_v46  ;;  %v4154_v16 = vmax.f32 %v12674_v59, %v12677_v31  ;;  %v12685_v57 = vpop.eup %8645  ;;  %v4376_v55 = vadd.f32 %v12679_v37, %v12671_v0  ;;  %v15501_v14 = vld [vmem:[#allocation70_spill] sm:$0xff] }
 0x760   : > { %v4157_v4 = vmax.f32 %v12666_v60, %v12669_v27  ;;  %v12689_v43 = vpop.eup %8647  ;;  %v4186_v46 = vsub.f32 %v12235_v42, %v12553_v30  ;;  %v4187_v22 = vsub.f32 %v15501_v14, %v12553_v30 }
 0x761   : > { %3599 = vmatprep.mubr.bf16.mxu0 %v3388_v48  ;;  %v4379_v9 = vadd.f32 %v12689_v43, %v12685_v57 }
 0x762   : > { %3600 = vmatmul.mubr.bf16.gmra.mrb[184].mxu0 %v3387_v17 }
 0x768   : > { %4158 = vmax.xlane.f32.xlu1 %v4157_v4  ;;  %v4189_v4 = vsub.f32 %v15504_v23, %v12513_v63 }
 0x76b   : > { %4155 = vmax.xlane.f32.xlu0 %v4154_v16  ;;  %v4258_v16 = vmul.f32 1.442695, %v4186_v46  ;;  %v4264_v46 = vmul.f32 1.442695, %v4189_v4  ;;  %v15509_v4 = vld [vmem:[#allocation92_spill] sm:$0xff] }
 0x76c   : > { %4377 = vadd.xlane.f32.xlu1 %v4376_v55  ;;  %v4260_v55 = vmul.f32 1.442695, %v4187_v22 }
 0x770   : > { %4380 = vadd.xlane.f32.xlu1 %v4379_v9 }
 0x781   : > { %4616 = vrot.lane.b32.xlu1 %v15497_v15, %s9300_s8  ;;  %4598 = vrot.lane.b32.xlu0 %v15498_v51, %s9300_s8  ;;  %v3663_v51 = vld [vmem:[#allocation5 + $0x2f0] sm:$0xff] }
 0x783   : > { %v3262_v40 = vpop.xlane.xlu1 %3261 }
 0x784   : > { %8649 = vrcp.f32 %v3262_v40 }
 0x785   : > { %4600 = vrot.lane.b32.xlu0 %v15499_v56, %s9300_s8 }
 0x787   : > { %v12703_v11 = vpop.xlane.xlu1 %4149 }
 0x789   : > { %4618 = vrot.lane.b32.xlu0 %v15500_v19, %s9300_s8 }
 0x78a   : > { %v3259_v10 = vpop.xlane.xlu0 %3258 }
 0x78b   : > { %8651 = vrcp.f32 %v3259_v10  ;;  %v12707_v7 = vpop.xlane.xlu1 %4152 }
 0x78c   : > { %8653 = vpow2.f32 %v4258_v16 }
 0x78d   : > { %8655 = vpow2.f32 %v4260_v55 }
 0x78e   : > { %v4611_v50 = vpop.permute.xlu0 %4610  ;;  %v8650_v48 = vpop.eup %8649 }
 0x78f   : > { %v4595_v38 = vpop.permute.xlu1 %4594  ;;  %7564 = vmatprep.subr.bf16.mxu0 %v4611_v50  ;;  %v3358_v9 = vmul.f32 %v8650_v48, %v12511_v21  ;;  %v3357_v10 = vmul.f32 %v8650_v48, %v12509_v34 }
 0x790   : > { %7565 = vmatpush3.bf16.msra.mxu0 %v4595_v38  ;;  %v3660_v38 = vld [vmem:[#allocation5 + $0x2d8] sm:$0xff] }
 0x791   : > { %v7420_v58 = vpop.f32.mrb[128].mxu0  ;;  %v3720_v21 = vunpack.c.h.bf16 %v3660_v38 }
 0x792   : > { %v7421_v3 = vpop.f32.mrb[129].mxu0 }
 0x793   : > { %v12713_v17 = vadd.f32 %v7421_v3, %v7420_v58  ;;  %v7423_v54 = vpop.f32.mrb[130].mxu0  ;;  %v4262_v3 = vmul.f32 1.442695, %v4188_v61  ;;  %v15508_v61 = vld [vmem:[#allocation102_spill] sm:$0xff]  ;;  %v12735_v16 = vadd.f32 %v15509_v4, %v3720_v21 }
 0x794   : > { %v7424_v2 = vpop.f32.mrb[131].mxu0 }
 0x795   : > { %15502 = vst [vmem:[#allocation63_spill] sm:$0xff] %v12713_v17  ;;  %v8652_v62 = vpop.eup %8651  ;;  %v12719_v42 = vadd.f32 %v7424_v2, %v7423_v54  ;;  %v3719_v54 = vunpack.c.l.bf16 %v3660_v38  ;;  %8657 = vpow2.f32 %v4262_v3 }
 0x796   : > { %v3356_v30 = vmul.f32 %v8652_v62, %v12535_v45  ;;  %v3355_v40 = vmul.f32 %v8652_v62, %v12533_v29  ;;  %v3659_v45 = vld [vmem:[#allocation5 + $0x2d0] sm:$0xff]  ;;  %8659 = vpow2.f32 %v4264_v46 }
 0x797   : > { %15505 = vst [vmem:[#allocation61_spill] sm:$0xff] %v12719_v42  ;;  %v3717_v2 = vunpack.c.l.bf16 %v3659_v45  ;;  %v3718_v62 = vunpack.c.h.bf16 %v3659_v45  ;;  %v12732_v23 = vadd.f32 %v15508_v61, %v3719_v54 }
 0x798   : > { %v3390_v14 = vpack.c.bf16 %v3358_v9, %v3356_v30  ;;  %v3389_v58 = vpack.c.bf16 %v3357_v10, %v3355_v40  ;;  %v15510_v9 = vld [vmem:[#allocation104_spill] sm:$0xff]  ;;  %v15511_v10 = vld [vmem:[#allocation23_spill] sm:$0xff] }
 0x799   : > { %v7426_v63 = vpop.f32.mrb[132].mxu0  ;;  %v12740_v40 = vadd.f32 %v15510_v9, %v3717_v2  ;;  %v12743_v38 = vadd.f32 %v15511_v10, %v3718_v62  ;;  %v4163_v3 = vmax.f32 %v12732_v23, %v12735_v16 }
 0x79a   : > { %3607 = vmatprep.mubr.bf16.mxu0 %v3390_v14  ;;  %v7427_v22 = vpop.f32.mrb[133].mxu0 }
 0x79b   : > { %v12727_v13 = vadd.f32 %v7427_v22, %v7426_v63  ;;  %3608 = vmatmul.mubr.bf16.gmra.mrb[188].mxu0 %v3389_v58  ;;  %v7429_v34 = vpop.f32.mrb[134].mxu0  ;;  %v12745_v58 = vpop.eup %8653  ;;  %v4160_v21 = vmax.f32 %v12740_v40, %v12743_v38 }
 0x79c   : > { %v7430_v29 = vpop.f32.mrb[135].mxu0  ;;  %15512 = vst [vmem:[#allocation177_spill] sm:$0xff] %v12745_v58  ;;  %v12751_v22 = vpop.eup %8655 }
 0x79d   : > { %15506 = vst [vmem:[#allocation62_spill] sm:$0xff] %v12727_v13  ;;  %v12729_v48 = vadd.f32 %v7430_v29, %v7429_v34  ;;  %v4382_v2 = vadd.f32 %v12751_v22, %v12745_v58 }
 0x79f   : > { %15507 = vst [vmem:[#allocation176_spill] sm:$0xff] %v12729_v48  ;;  %v12757_v34 = vpop.eup %8657 }
 0x7a0   : > { %v12763_v62 = vpop.eup %8659 }
 0x7a1   : > { %v7432_v30 = vpop.f32.mrb[136].mxu0  ;;  %v4385_v10 = vadd.f32 %v12763_v62, %v12757_v34 }
 0x7a2   : > { %v7433_v14 = vpop.f32.mrb[137].mxu0 }
 0x7a3   : > { %v12749_v63 = vadd.f32 %v7433_v14, %v7432_v30  ;;  %v7435_v46 = vpop.f32.mrb[138].mxu0 }
 0x7a4   : > { %v7436_v45 = vpop.f32.mrb[139].mxu0 }
 0x7a5   : > { %15513 = vst [vmem:[#allocation145_spill] sm:$0xff] %v12749_v63  ;;  %4164 = vmax.xlane.f32.xlu1 %v4163_v3  ;;  %v12753_v54 = vadd.f32 %v7436_v45, %v7435_v46  ;;  %v15517_v45 = vld [vmem:[#allocation86_spill] sm:$0xff]  ;;  %v15522_v63 = vld [vmem:[#allocation143_spill] sm:$0xff] }
 0x7a7   : > { %15514 = vst [vmem:[#allocation136_spill] sm:$0xff] %v12753_v54 }
 0x7a8   : > { %4161 = vmax.xlane.f32.xlu0 %v4160_v21  ;;  %v15518_v21 = vld [vmem:[#allocation20_spill] sm:$0xff] }
 0x7a9   : > { %4383 = vadd.xlane.f32.xlu1 %v4382_v2  ;;  %v7438_v61 = vpop.f32.mrb[140].mxu0 }
 0x7aa   : > { %v7439_v4 = vpop.f32.mrb[141].mxu0 }
 0x7ab   : > { %v12765_v30 = vadd.f32 %v7439_v4, %v7438_v61  ;;  %v7441_v9 = vpop.f32.mrb[142].mxu0  ;;  %v15519_v4 = vld [vmem:[#allocation21_spill] sm:$0xff] }
 0x7ac   : > { %v7442_v14 = vpop.f32.mrb[143].mxu0 }
 0x7ad   : > { %15515 = vst [vmem:[#allocation134_spill] sm:$0xff] %v12765_v30  ;;  %4386 = vadd.xlane.f32.xlu1 %v4385_v10  ;;  %v12769_v3 = vadd.f32 %v7442_v14, %v7441_v9  ;;  %v15520_v9 = vld [vmem:[#allocation88_spill] sm:$0xff] }
 0x7af   : > { %15516 = vst [vmem:[#allocation137_spill] sm:$0xff] %v12769_v3 }
 0x7be   : > { %4620 = vrot.lane.b32.xlu1 %v15517_v45, %s9300_s8  ;;  %4602 = vrot.lane.b32.xlu0 %v15518_v21, %s9300_s8 }
 0x7bf   : > { %v4372_v2 = vpop.xlane.xlu0 %4371 }
 0x7c0   : > { %8661 = vrcp.f32 %v4372_v2  ;;  %v4375_v61 = vpop.xlane.xlu1 %4374 }
 0x7c1   : > { %8663 = vrcp.f32 %v4375_v61 }
 0x7c2   : > { %4604 = vrot.lane.b32.xlu0 %v15519_v4, %s9300_s8 }
 0x7c3   : > { %v4613_v29 = vpop.permute.xlu0 %4612 }
 0x7c4   : > { %v4597_v10 = vpop.permute.xlu1 %4596  ;;  %7566 = vmatprep.subr.bf16.mxu0 %v4613_v29  ;;  %v4190_v29 = vsub.f32 %v12279_v44, %v12567_v5 }
 0x7c5   : > { %7567 = vmatpush3.bf16.msra.mxu0 %v4597_v10 }
 0x7c6   : > { %4622 = vrot.lane.b32.xlu0 %v15520_v9, %s9300_s8 }
 0x7c7   : > { %v4615_v14 = vpop.permute.xlu0 %4614 }
 0x7c8   : > { %7568 = vmatprep.subr.bf16.mxu0 %v4615_v14  ;;  %v4191_v14 = vsub.f32 %v12282_v41, %v12567_v5 }
 0x7ca   : > { %v8662_v46 = vpop.eup %8661  ;;  %v4268_v13 = vmul.f32 1.442695, %v4191_v14 }
 0x7cb   : > { %v8664_v55 = vpop.eup %8663  ;;  %v12782_v50 = vmul.f32 %v8662_v46, %v12601_v24  ;;  %v4499_v2 = vmul.f32 %v8662_v46, %v12603_v47  ;;  %v15521_v24 = vld [vmem:[#allocation35_spill] sm:$0xff]  ;;  %v4266_v47 = vmul.f32 1.442695, %v4190_v29 }
 0x7cc   : > { %v12786_v61 = vmul.f32 %v8664_v55, %v12609_v52  ;;  %v4501_v30 = vmul.f32 %v8664_v55, %v12611_v35  ;;  %v4192_v54 = vsub.f32 %v15522_v63, %v15521_v24  ;;  %v15523_v52 = vld [vmem:[#allocation150_spill] sm:$0xff]  ;;  %v3662_v35 = vld [vmem:[#allocation5 + $0x2e8] sm:$0xff] }
 0x7cd   : > { %v4193_v46 = vsub.f32 %v15523_v52, %v15521_v24  ;;  %8665 = vpow2.f32 %v4266_v47  ;;  %v3724_v3 = vunpack.c.h.bf16 %v3662_v35  ;;  %v15525_v24 = vld [vmem:[#allocation91_spill] sm:$0xff] }
 0x7ce   : > { %v4563_v10 = vpack.c.bf16 %v4501_v30, %v4499_v2  ;;  %v4270_v55 = vmul.f32 1.442695, %v4192_v54  ;;  %8667 = vpow2.f32 %v4268_v13  ;;  %v3661_v30 = vld [vmem:[#allocation5 + $0x2e0] sm:$0xff]  ;;  %v3723_v2 = vunpack.c.l.bf16 %v3662_v35  ;;  %v15526_v54 = vld [vmem:[#allocation181_spill] sm:$0xff] }
 0x7cf   : > { %v4272_v44 = vmul.f32 1.442695, %v4193_v46  ;;  %v3721_v63 = vunpack.c.l.bf16 %v3661_v30  ;;  %v3722_v29 = vunpack.c.h.bf16 %v3661_v30  ;;  %v12805_v47 = vadd.f32 %v15526_v54, %v3724_v3  ;;  %v15528_v46 = vld [vmem:[#allocation42_spill] sm:$0xff] }
 0x7d0   : > { %4674 = vmatprep.mubr.bf16.mxu0 %v4563_v10  ;;  %8669 = vpow2.f32 %v4270_v55  ;;  %v12802_v14 = vadd.f32 %v15525_v24, %v3723_v2 }
 0x7d1   : > { %8671 = vpow2.f32 %v4272_v44  ;;  %v12812_v35 = vadd.f32 %v15528_v46, %v3721_v63 }
 0x7d2   : > { %v4169_v44 = vmax.f32 %v12802_v14, %v12805_v47 }
 0x7d6   : > { %v7444_v48 = vpop.f32.mrb[144].mxu0 }
 0x7d7   : > { %v7445_v17 = vpop.f32.mrb[145].mxu0  ;;  %v12817_v55 = vpop.eup %8665 }
 0x7d8   : > { %v12799_v41 = vadd.f32 %v7445_v17, %v7444_v48  ;;  %v7447_v5 = vpop.f32.mrb[146].mxu0  ;;  %v15529_v17 = vld [vmem:[#allocation90_spill] sm:$0xff]  ;;  %15530 = vst [vmem:[#allocation69_spill] sm:$0xff] %v12817_v55  ;;  %v12821_v30 = vpop.eup %8667 }
 0x7d9   : > { %v7448_v10 = vpop.f32.mrb[147].mxu0  ;;  %v12815_v48 = vadd.f32 %v15529_v17, %v3722_v29  ;;  %15531 = vst [vmem:[#allocation52_spill] sm:$0xff] %v12821_v30 }
 0x7da   : > { %15524 = vst [vmem:[#allocation154_spill] sm:$0xff] %v12799_v41  ;;  %v12807_v13 = vadd.f32 %v7448_v10, %v7447_v5  ;;  %v12825_v2 = vpop.eup %8669  ;;  %v4388_v5 = vadd.f32 %v12821_v30, %v12817_v55 }
 0x7db   : > { %v4166_v3 = vmax.f32 %v12812_v35, %v12815_v48  ;;  %15532 = vst [vmem:[#allocation124_spill] sm:$0xff] %v12825_v2  ;;  %v12829_v63 = vpop.eup %8671 }
 0x7dc   : > { %15527 = vst [vmem:[#allocation139_spill] sm:$0xff] %v12807_v13  ;;  %15533 = vst [vmem:[#allocation25_spill] sm:$0xff] %v12829_v63  ;;  %v4391_v46 = vadd.f32 %v12829_v63, %v12825_v2  ;;  %v15589_v63 = vld [vmem:[#allocation68_spill] sm:$0xff] }
 0x7e2   : > { %4170 = vmax.xlane.f32.xlu1 %v4169_v44  ;;  %v7450_v29 = vpop.f32.mrb[148].mxu0 }
 0x7e3   : > { %v7451_v10 = vpop.f32.mrb[149].mxu0 }
 0x7e4   : > { %v12831_v24 = vadd.f32 %v7451_v10, %v7450_v29  ;;  %v7453_v54 = vpop.f32.mrb[150].mxu0 }
 0x7e5   : > { %4167 = vmax.xlane.f32.xlu0 %v4166_v3  ;;  %v7454_v17 = vpop.f32.mrb[151].mxu0 }
 0x7e6   : > { %4389 = vadd.xlane.f32.xlu1 %v4388_v5  ;;  %15534 = vst [vmem:[#allocation103_spill] sm:$0xff] %v12831_v24  ;;  %v12835_v44 = vadd.f32 %v7454_v17, %v7453_v54 }
 0x7e8   : > { %15535 = vst [vmem:[#allocation141_spill] sm:$0xff] %v12835_v44 }
 0x7ea   : > { %4392 = vadd.xlane.f32.xlu1 %v4391_v46  ;;  %v7456_v41 = vpop.f32.mrb[152].mxu0 }
 0x7eb   : > { %v7457_v13 = vpop.f32.mrb[153].mxu0 }
 0x7ec   : > { %v12839_v42 = vadd.f32 %v7457_v13, %v7456_v41  ;;  %v7459_v3 = vpop.f32.mrb[154].mxu0  ;;  %v15540_v13 = vld [vmem:[#allocation24_spill] sm:$0xff] }
 0x7ed   : > { %v7460_v5 = vpop.f32.mrb[155].mxu0 }
 0x7ee   : > { %15536 = vst [vmem:[#allocation140_spill] sm:$0xff] %v12839_v42  ;;  %v12841_v45 = vadd.f32 %v7460_v5, %v7459_v3  ;;  %v15541_v3 = vld [vmem:[#allocation77_spill] sm:$0xff]  ;;  %v15550_v5 = vld [vmem:[#allocation156_spill] sm:$0xff] }
 0x7f0   : > { %15537 = vst [vmem:[#allocation101_spill] sm:$0xff] %v12841_v45  ;;  %v15542_v45 = vld [vmem:[#allocation40_spill] sm:$0xff] }
 0x7f2   : > { %v7462_v9 = vpop.f32.mrb[156].mxu0 }
 0x7f3   : > { %v7463_v54 = vpop.f32.mrb[157].mxu0 }
 0x7f4   : > { %v12847_v17 = vadd.f32 %v7463_v54, %v7462_v9  ;;  %v7465_v46 = vpop.f32.mrb[158].mxu0 }
 0x7f5   : > { %v12845_v10 = vpop.xlane.xlu1 %4158  ;;  %v7466_v52 = vpop.f32.mrb[159].mxu0 }
 0x7f6   : > { %15538 = vst [vmem:[#allocation211_spill] sm:$0xff] %v12847_v17  ;;  %v12853_v41 = vadd.f32 %v7466_v52, %v7465_v46 }
 0x7f8   : > { %v12849_v4 = vpop.xlane.xlu0 %4155  ;;  %15539 = vst [vmem:[#allocation32_spill] sm:$0xff] %v12853_v41 }
 0x7f9   : > { %v12851_v24 = vpop.xlane.xlu1 %4377 }
 0x7fa   : > { %v7468_v54 = vpop.f32.mrb[160].mxu0 }
 0x7fb   : > { %4624 = vrot.lane.b32.xlu1 %v15540_v13, %s9300_s8  ;;  %4606 = vrot.lane.b32.xlu0 %v15541_v3, %s9300_s8  ;;  %v7469_v42 = vpop.f32.mrb[161].mxu0 }
 0x7fc   : > { %v4599_v29 = vpop.permute.xlu0 %4598  ;;  %v12865_v52 = vadd.f32 %v7469_v42, %v7468_v54  ;;  %v7471_v46 = vpop.f32.mrb[162].mxu0  ;;  %v15546_v54 = vld [vmem:[#allocation54_spill] sm:$0xff] }
 0x7fd   : > { %v12861_v9 = vpop.xlane.xlu1 %4380  ;;  %7569 = vmatpush3.bf16.msra.mxu0 %v4599_v29  ;;  %v7472_v13 = vpop.f32.mrb[163].mxu0  ;;  %v4194_v19 = vsub.f32 %v15546_v54, %v12585_v32  ;;  %v4200_v54 = vsub.f32 %v15553_v12, %v15552_v49  ;;  %v3728_v12 = vunpack.c.h.bf16 %v3664_v6 }
 0x7fe   : > { %15543 = vst [vmem:[#allocation50_spill] sm:$0xff] %v12865_v52  ;;  %v12867_v15 = vadd.f32 %v7472_v13, %v7471_v46  ;;  %v15548_v13 = vld [vmem:[#allocation149_spill] sm:$0xff] }
 0x7ff   : > { %4608 = vrot.lane.b32.xlu0 %v15542_v45, %s9300_s8  ;;  %v15549_v46 = vld [vmem:[#allocation133_spill] sm:$0xff]  ;;  %v4286_v30 = vmul.f32 1.442695, %v4200_v54  ;;  %v15561_v54 = vld [vmem:[#allocation30_spill] sm:$0xff] }
 0x800   : > { %v4601_v44 = vpop.permute.xlu0 %4600  ;;  %15544 = vst [vmem:[#allocation144_spill] sm:$0xff] %v12867_v15  ;;  %v15551_v52 = vld [vmem:[#allocation157_spill] sm:$0xff] }
 0x801   : > { %v4617_v21 = vpop.permute.xlu1 %4616 }
 0x802   : > { %7570 = vmatprep.subr.bf16.mxu0 %v4617_v21  ;;  %v7474_v29 = vpop.f32.mrb[164].mxu0  ;;  %v4195_v21 = vsub.f32 %v15548_v13, %v12585_v32  ;;  %v15554_v32 = vld [vmem:[#allocation160_spill] sm:$0xff] }
 0x803   : > { %7571 = vmatpush3.bf16.msra.mxu0 %v4601_v44  ;;  %v7475_v41 = vpop.f32.mrb[165].mxu0  ;;  %v4201_v13 = vsub.f32 %v15554_v32, %v15552_v49  ;;  %v15557_v49 = vld [vmem:[#allocation41_spill] sm:$0xff] }
 0x804   : > { %v4619_v17 = vpop.permute.xlu0 %4618  ;;  %v12871_v3 = vadd.f32 %v7475_v41, %v7474_v29  ;;  %v7477_v45 = vpop.f32.mrb[166].mxu0  ;;  %v4197_v41 = vsub.f32 %v15551_v52, %v15549_v46  ;;  %v4274_v29 = vmul.f32 1.442695, %v4194_v19  ;;  %v3726_v52 = vunpack.c.h.bf16 %v3663_v51 }
 0x805   : > { %7572 = vmatprep.subr.bf16.mxu0 %v4619_v17  ;;  %v7478_v42 = vpop.f32.mrb[167].mxu0  ;;  %v4196_v17 = vsub.f32 %v15550_v5, %v15549_v46  ;;  %v3727_v46 = vunpack.c.l.bf16 %v3664_v6  ;;  %v15563_v6 = vld [vmem:[#allocation182_spill] sm:$0xff] }
 0x806   : > { %15545 = vst [vmem:[#allocation64_spill] sm:$0xff] %v12871_v3  ;;  %v12875_v56 = vadd.f32 %v7478_v42, %v7477_v45  ;;  %v4276_v45 = vmul.f32 1.442695, %v4195_v21  ;;  %v4280_v2 = vmul.f32 1.442695, %v4197_v41  ;;  %8673 = vpow2.f32 %v4274_v29  ;;  %v4821_v41 = vld [vmem:[#allocation5 + $0x308] sm:$0xff] }
 0x807   : > { %v4278_v3 = vmul.f32 1.442695, %v4196_v17  ;;  %v4288_v21 = vmul.f32 1.442695, %v4201_v13  ;;  %v15558_v17 = vld [vmem:[#allocation89_spill] sm:$0xff]  ;;  %v12906_v32 = vadd.f32 %v15563_v6, %v3727_v46 }
 0x808   : > { %15547 = vst [vmem:[#allocation26_spill] sm:$0xff] %v12875_v56  ;;  %v3725_v56 = vunpack.c.l.bf16 %v3663_v51  ;;  %8675 = vpow2.f32 %v4276_v45  ;;  %v12903_v45 = vadd.f32 %v15561_v54, %v3726_v52  ;;  %v4854_v52 = vunpack.c.l.bf16 %v4821_v41 }
 0x809   : > { %8677 = vpow2.f32 %v4278_v3  ;;  %15564 = vst [vmem:[#allocation70_spill] sm:$0xff] %v12906_v32  ;;  %v15565_v3 = vld [vmem:[#allocation155_spill] sm:$0xff]  ;;  %v4855_v54 = vunpack.c.h.bf16 %v4821_v41 }
 0x80a   : > { %v7480_v15 = vpop.f32.mrb[168].mxu0  ;;  %8679 = vpow2.f32 %v4280_v2  ;;  %15562 = vst [vmem:[#allocation179_spill] sm:$0xff] %v12903_v45  ;;  %v4199_v13 = vsub.f32 %v15565_v3, %v12595_v33  ;;  %v15568_v2 = vld [vmem:[#allocation97_spill] sm:$0xff] }
 0x80b   : > { %v7481_v42 = vpop.f32.mrb[169].mxu0  ;;  %8681 = vpow2.f32 %v4286_v30 }
 0x80c   : > { %v12889_v55 = vadd.f32 %v7481_v42, %v7480_v15  ;;  %v7483_v44 = vpop.f32.mrb[170].mxu0  ;;  %v4204_v15 = vsub.f32 %v15557_v49, %v12589_v39  ;;  %v12898_v42 = vadd.f32 %v15558_v17, %v3725_v56  ;;  %v15566_v49 = vld [vmem:[#allocation183_spill] sm:$0xff]  ;;  %8683 = vpow2.f32 %v4288_v21 }
 0x80d   : > { %v7484_v5 = vpop.f32.mrb[171].mxu0  ;;  %v12911_v56 = vadd.f32 %v15566_v49, %v3728_v12  ;;  %v4205_v17 = vsub.f32 %v15568_v2, %v12589_v39  ;;  %v4823_v21 = vld [vmem:[#allocation5 + $0x318] sm:$0xff]  ;;  %v15577_v49 = vld [vmem:[#allocation164_spill] sm:$0xff] }
 0x80e   : > { %15555 = vst [vmem:[#allocation180_spill] sm:$0xff] %v12889_v55  ;;  %v12891_v19 = vadd.f32 %v7484_v5, %v7483_v44  ;;  %15559 = vst [vmem:[#allocation178_spill] sm:$0xff] %v12898_v42  ;;  %v15560_v44 = vld [vmem:[#allocation152_spill] sm:$0xff]  ;;  %v4294_v55 = vmul.f32 1.442695, %v4204_v15  ;;  %v4172_v12 = vmax.f32 %v12898_v42, %v12903_v45  ;;  %v4208_v2 = vsub.f32 %v15577_v49, %v12605_v53 }
 0x80f   : > { %v4198_v51 = vsub.f32 %v15560_v44, %v12595_v33  ;;  %15567 = vst [vmem:[#allocation65_spill] sm:$0xff] %v12911_v56  ;;  %v4284_v33 = vmul.f32 1.442695, %v4199_v13  ;;  %v4175_v39 = vmax.f32 %v12906_v32, %v12911_v56  ;;  %v15578_v56 = vld [vmem:[#allocation82_spill] sm:$0xff] }
 0x810   : > { %15556 = vst [vmem:[#allocation98_spill] sm:$0xff] %v12891_v19  ;;  %v4820_v19 = vld [vmem:[#allocation5 + $0x300] sm:$0xff]  ;;  %v12919_v3 = vpop.eup %8673  ;;  %8685 = vpow2.f32 %v4294_v55 }
 0x811   : > { %v4282_v6 = vmul.f32 1.442695, %v4198_v51  ;;  %15571 = vst [vmem:[#allocation92_spill] sm:$0xff] %v12919_v3  ;;  %v15573_v51 = vld [vmem:[#allocation94_spill] sm:$0xff] }
 0x812   : > { %v7486_v29 = vpop.f32.mrb[172].mxu0  ;;  %v12927_v15 = vpop.eup %8675 }
 0x813   : > { %v7487_v5 = vpop.f32.mrb[173].mxu0  ;;  %15572 = vst [vmem:[#allocation104_spill] sm:$0xff] %v12927_v15  ;;  %8687 = vpow2.f32 %v4282_v6  ;;  %v12939_v41 = vpop.eup %8677  ;;  %v15580_v6 = vld [vmem:[#allocation165_spill] sm:$0xff] }
 0x814   : > { %v12915_v44 = vadd.f32 %v7487_v5, %v7486_v29  ;;  %v7489_v58 = vpop.f32.mrb[174].mxu0  ;;  %v4296_v29 = vmul.f32 1.442695, %v4205_v17  ;;  %v15575_v5 = vld [vmem:[#allocation135_spill] sm:$0xff]  ;;  %v4202_v17 = vsub.f32 %v15578_v56, %v12607_v20  ;;  %8689 = vpow2.f32 %v4284_v33  ;;  %v12943_v55 = vpop.eup %8679 }
 0x815   : > { %v7490_v46 = vpop.f32.mrb[175].mxu0  ;;  %v12933_v13 = vadd.f32 %v15575_v5, %v4855_v54  ;;  %v4209_v5 = vsub.f32 %v15580_v6, %v12605_v53  ;;  %v15585_v53 = vld [vmem:[#allocation66_spill] sm:$0xff] }
 0x816   : > { %15569 = vst [vmem:[#allocation148_spill] sm:$0xff] %v12915_v44  ;;  %v12917_v30 = vadd.f32 %v7490_v46, %v7489_v58  ;;  %v12930_v58 = vadd.f32 %v15573_v51, %v4854_v52  ;;  %v4852_v46 = vunpack.c.l.bf16 %v4820_v19  ;;  %v4853_v44 = vunpack.c.h.bf16 %v4820_v19  ;;  %v15579_v52 = vld [vmem:[#allocation83_spill] sm:$0xff]  ;;  %v12951_v19 = vpop.eup %8681 }
 0x817   : > { %15576 = vst [vmem:[#allocation35_spill] sm:$0xff] %v12933_v13  ;;  %v4203_v54 = vsub.f32 %v15579_v52, %v12607_v20  ;;  %8691 = vpow2.f32 %v4296_v29  ;;  %15582 = vst [vmem:[#allocation150_spill] sm:$0xff] %v12951_v19  ;;  %v4859_v20 = vunpack.c.h.bf16 %v4823_v21  ;;  %v4302_v52 = vmul.f32 1.442695, %v4208_v2  ;;  %v12955_v45 = vpop.eup %8683 }
 0x818   : > { %15570 = vst [vmem:[#allocation102_spill] sm:$0xff] %v12917_v30  ;;  %15574 = vst [vmem:[#allocation23_spill] sm:$0xff] %v12930_v58  ;;  %v4858_v30 = vunpack.c.l.bf16 %v4823_v21  ;;  %v5272_v33 = vmax.f32 %v12930_v58, %v12933_v13  ;;  %v4290_v29 = vmul.f32 1.442695, %v4202_v17  ;;  %v4825_v21 = vld [vmem:[#allocation5 + $0x328] sm:$0xff] }
 0x819   : > { %15583 = vst [vmem:[#allocation91_spill] sm:$0xff] %v12955_v45  ;;  %v4304_v2 = vmul.f32 1.442695, %v4209_v5  ;;  %8693 = vpow2.f32 %v4302_v52  ;;  %v4862_v17 = vunpack.c.l.bf16 %v4825_v21 }
 0x81a   : > { %v7492_v32 = vpop.f32.mrb[176].mxu0  ;;  %v12966_v13 = vadd.f32 %v15589_v63, %v4858_v30  ;;  %8695 = vpow2.f32 %v4290_v29  ;;  %v15594_v30 = vld [vmem:[#allocation170_spill] sm:$0xff] }
 0x81b   : > { %v7493_v51 = vpop.f32.mrb[177].mxu0  ;;  %v4206_v5 = vsub.f32 %v15594_v30, %v12621_v26  ;;  %v15597_v30 = vld [vmem:[#allocation168_spill] sm:$0xff] }
 0x81c   : > { %v12947_v49 = vadd.f32 %v7493_v51, %v7492_v32  ;;  %v7495_v56 = vpop.f32.mrb[178].mxu0  ;;  %v12960_v32 = vadd.f32 %v15585_v53, %v4852_v46  ;;  %v15587_v51 = vld [vmem:[#allocation93_spill] sm:$0xff]  ;;  %15590 = vst [vmem:[#allocation54_spill] sm:$0xff] %v12966_v13  ;;  %v12981_v53 = vpop.eup %8685 }
 0x81d   : > { %v12963_v6 = vadd.f32 %v15587_v51, %v4853_v44  ;;  %v15593_v44 = vld [vmem:[#allocation167_spill] sm:$0xff]  ;;  %15595 = vst [vmem:[#allocation133_spill] sm:$0xff] %v12981_v53 }
 0x81e   : > { %4173 = vmax.xlane.f32.xlu0 %v4172_v12  ;;  %15581 = vst [vmem:[#allocation143_spill] sm:$0xff] %v12947_v49  ;;  %v4394_v12 = vadd.f32 %v12927_v15, %v12919_v3  ;;  %15586 = vst [vmem:[#allocation42_spill] sm:$0xff] %v12960_v32  ;;  %v4822_v3 = vld [vmem:[#allocation5 + $0x310] sm:$0xff]  ;;  %v4292_v15 = vmul.f32 1.442695, %v4203_v54  ;;  %v4403_v54 = vadd.f32 %v12955_v45, %v12951_v19 }
 0x81f   : > { %4176 = vmax.xlane.f32.xlu1 %v4175_v39  ;;  %v7496_v39 = vpop.f32.mrb[179].mxu0  ;;  %15588 = vst [vmem:[#allocation90_spill] sm:$0xff] %v12963_v6  ;;  %v4856_v63 = vunpack.c.l.bf16 %v4822_v3  ;;  %v4857_v51 = vunpack.c.h.bf16 %v4822_v3  ;;  %v5269_v29 = vmax.f32 %v12960_v32, %v12963_v6  ;;  %v4213_v49 = vsub.f32 %v15597_v30, %v12623_v25  ;;  %v4824_v30 = vld [vmem:[#allocation5 + $0x320] sm:$0xff]  ;;  %v15605_v32 = vld [vmem:[#allocation142_spill] sm:$0xff] }
 0x820   : > { %v12957_v42 = vadd.f32 %v7496_v39, %v7495_v56  ;;  %v4397_v56 = vadd.f32 %v12943_v55, %v12939_v41  ;;  %v4212_v39 = vsub.f32 %v15593_v44, %v12623_v25  ;;  %8697 = vpow2.f32 %v4292_v15  ;;  %v12985_v44 = vpop.eup %8687  ;;  %v15603_v25 = vld [vmem:[#allocation96_spill] sm:$0xff] }
 0x821   : > { %8699 = vpow2.f32 %v4304_v2  ;;  %v12993_v3 = vpop.eup %8689  ;;  %v4298_v19 = vmul.f32 1.442695, %v4206_v5  ;;  %v15601_v2 = vld [vmem:[#allocation95_spill] sm:$0xff]  ;;  %v15607_v5 = vld [vmem:[#allocation73_spill] sm:$0xff] }
 0x822   : > { %15584 = vst [vmem:[#allocation181_spill] sm:$0xff] %v12957_v42  ;;  %4395 = vadd.xlane.f32.xlu0 %v4394_v12  ;;  %v15591_v12 = vld [vmem:[#allocation48_spill] sm:$0xff]  ;;  %v12997_v58 = vpop.eup %8691  ;;  %v13002_v6 = vadd.f32 %v15601_v2, %v4856_v63  ;;  %v4827_v63 = vld [vmem:[#allocation5 + $0x338] sm:$0xff]  ;;  %v4861_v2 = vunpack.c.h.bf16 %v4824_v30 }
 0x823   : > { %5273 = vmax.xlane.f32.xlu1 %v5272_v33  ;;  %v12973_v46 = vadd.f32 %v15591_v12, %v4859_v20  ;;  %v7498_v33 = vpop.f32.mrb[180].mxu0  ;;  %v15596_v20 = vld [vmem:[#allocation171_spill] sm:$0xff]  ;;  %15599 = vst [vmem:[#allocation157_spill] sm:$0xff] %v12997_v58 }
 0x824   : > { %v4207_v52 = vsub.f32 %v15596_v20, %v12621_v26  ;;  %v7499_v12 = vpop.f32.mrb[181].mxu0  ;;  %v4863_v26 = vunpack.c.h.bf16 %v4825_v21  ;;  %v4310_v20 = vmul.f32 1.442695, %v4212_v39  ;;  %15602 = vst [vmem:[#allocation146_spill] sm:$0xff] %v13002_v6  ;;  %v4312_v21 = vmul.f32 1.442695, %v4213_v49 }
 0x825   : > { %15592 = vst [vmem:[#allocation149_spill] sm:$0xff] %v12973_v46  ;;  %v7501_v42 = vpop.f32.mrb[182].mxu0  ;;  %v5278_v15 = vmax.f32 %v12966_v13, %v12973_v46  ;;  %v13008_v46 = vadd.f32 %v15605_v32, %v4862_v17  ;;  %v15610_v49 = vld [vmem:[#allocation162_spill] sm:$0xff]  ;;  %v13023_v17 = vpop.eup %8693 }
 0x826   : > { %4398 = vadd.xlane.f32.xlu0 %v4397_v56  ;;  %v12991_v56 = vadd.f32 %v7499_v12, %v7498_v33  ;;  %v13005_v33 = vadd.f32 %v15603_v25, %v4857_v51  ;;  %v4300_v12 = vmul.f32 1.442695, %v4207_v52  ;;  %8701 = vpow2.f32 %v4310_v20  ;;  %v15609_v51 = vld [vmem:[#allocation158_spill] sm:$0xff]  ;;  %15611 = vst [vmem:[#allocation152_spill] sm:$0xff] %v13023_v17  ;;  %v13027_v20 = vpop.eup %8695 }
 0x827   : > { %4404 = vadd.xlane.f32.xlu1 %v4403_v54  ;;  %v7502_v54 = vpop.f32.mrb[183].mxu0  ;;  %15606 = vst [vmem:[#allocation41_spill] sm:$0xff] %v13008_v46  ;;  %v4216_v52 = vsub.f32 %v15609_v51, %v12643_v18  ;;  %8703 = vpow2.f32 %v4298_v19  ;;  %v4210_v32 = vsub.f32 %v15610_v49, %v12629_v1  ;;  %15613 = vst [vmem:[#allocation30_spill] sm:$0xff] %v13027_v20  ;;  %v4866_v51 = vunpack.c.l.bf16 %v4827_v63  ;;  %v15614_v19 = vld [vmem:[#allocation159_spill] sm:$0xff] }
 0x828   : > { %15598 = vst [vmem:[#allocation156_spill] sm:$0xff] %v12991_v56  ;;  %v12999_v45 = vadd.f32 %v7502_v54, %v7501_v42  ;;  %15604 = vst [vmem:[#allocation160_spill] sm:$0xff] %v13005_v33  ;;  %v4400_v42 = vadd.f32 %v12993_v3, %v12985_v44  ;;  %v4860_v54 = vunpack.c.l.bf16 %v4824_v30  ;;  %8705 = vpow2.f32 %v4300_v12 }
 0x829   : > { %8707 = vpow2.f32 %v4312_v21  ;;  %v4217_v49 = vsub.f32 %v15614_v19, %v12643_v18  ;;  %v4867_v12 = vunpack.c.h.bf16 %v4827_v63  ;;  %v4318_v39 = vmul.f32 1.442695, %v4216_v52  ;;  %v4826_v21 = vld [vmem:[#allocation5 + $0x330] sm:$0xff]  ;;  %v15619_v18 = vld [vmem:[#allocation72_spill] sm:$0xff] }
 0x82a   : > { %15600 = vst [vmem:[#allocation132_spill] sm:$0xff] %v12999_v45  ;;  %5270 = vmax.xlane.f32.xlu0 %v5269_v29  ;;  %v13015_v29 = vadd.f32 %v15607_v5, %v4863_v26  ;;  %v15612_v26 = vld [vmem:[#allocation163_spill] sm:$0xff]  ;;  %v5275_v5 = vmax.f32 %v13002_v6, %v13005_v33  ;;  %v13045_v19 = vadd.f32 %v15619_v18, %v4861_v2  ;;  %v15621_v33 = vld [vmem:[#allocation44_spill] sm:$0xff] }
 0x82b   : > { %5279 = vmax.xlane.f32.xlu1 %v5278_v15  ;;  %v4409_v15 = vadd.f32 %v12997_v58, %v12981_v53  ;;  %v4211_v25 = vsub.f32 %v15612_v26, %v12629_v1  ;;  %v4306_v1 = vmul.f32 1.442695, %v4210_v32  ;;  %v15617_v26 = vld [vmem:[#allocation71_spill] sm:$0xff]  ;;  %v13048_v6 = vadd.f32 %v15621_v33, %v4866_v51  ;;  %v15623_v32 = vld [vmem:[#allocation76_spill] sm:$0xff]  ;;  %v15626_v51 = vld [vmem:[#allocation57_spill] sm:$0xff] }
 0x82c   : > { %15608 = vst [vmem:[#allocation89_spill] sm:$0xff] %v13015_v29  ;;  %v5284_v30 = vmax.f32 %v13008_v46, %v13015_v29  ;;  %v13042_v45 = vadd.f32 %v15617_v26, %v4860_v54  ;;  %15620 = vst [vmem:[#allocation97_spill] sm:$0xff] %v13045_v19  ;;  %v4320_v63 = vmul.f32 1.442695, %v4217_v49  ;;  %v13053_v29 = vadd.f32 %v15623_v32, %v4867_v12  ;;  %v15625_v54 = vld [vmem:[#allocation172_spill] sm:$0xff] }
 0x82d   : > { %v4308_v13 = vmul.f32 1.442695, %v4211_v25  ;;  %15622 = vst [vmem:[#allocation94_spill] sm:$0xff] %v13048_v6  ;;  %8709 = vpow2.f32 %v4318_v39  ;;  %v4214_v26 = vsub.f32 %v15625_v54, %v12650_v28  ;;  %v4864_v33 = vunpack.c.l.bf16 %v4826_v21  ;;  %v15628_v54 = vld [vmem:[#allocation28_spill] sm:$0xff] }
 0x82e   : > { %4401 = vadd.xlane.f32.xlu0 %v4400_v42  ;;  %v13033_v42 = vpop.eup %8697  ;;  %15618 = vst [vmem:[#allocation183_spill] sm:$0xff] %v13042_v45  ;;  %15624 = vst [vmem:[#allocation135_spill] sm:$0xff] %v13053_v29  ;;  %8711 = vpow2.f32 %v4306_v1  ;;  %v4215_v49 = vsub.f32 %v15626_v51, %v12650_v28  ;;  %v4865_v39 = vunpack.c.h.bf16 %v4826_v21  ;;  %v4220_v46 = vsub.f32 %v15628_v54, %v12693_v8 }
 0x82f   : > { %4410 = vadd.xlane.f32.xlu1 %v4409_v15  ;;  %15615 = vst [vmem:[#allocation182_spill] sm:$0xff] %v13033_v42  ;;  %v13037_v56 = vpop.eup %8699  ;;  %v4406_v52 = vadd.f32 %v13033_v42, %v13027_v20  ;;  %8713 = vpow2.f32 %v4308_v13  ;;  %v5281_v28 = vmax.f32 %v13042_v45, %v13045_v19  ;;  %v5290_v13 = vmax.f32 %v13048_v6, %v13053_v29 }
 0x830   : > { %15616 = vst [vmem:[#allocation155_spill] sm:$0xff] %v13037_v56  ;;  %v4415_v2 = vadd.f32 %v13037_v56, %v13023_v17  ;;  %v13065_v32 = vpop.eup %8701  ;;  %8715 = vpow2.f32 %v4320_v63  ;;  %v4316_v42 = vmul.f32 1.442695, %v4215_v49  ;;  %v15633_v63 = vld [vmem:[#allocation75_spill] sm:$0xff] }
 0x831   : > { %15627 = vst [vmem:[#allocation164_spill] sm:$0xff] %v13065_v32  ;;  %v13071_v56 = vpop.eup %8703 }
 0x832   : > { %v13039_v15 = vpop.xlane.xlu1 %4164  ;;  %5276 = vmax.xlane.f32.xlu0 %v5275_v5  ;;  %v4829_v5 = vld [vmem:[#allocation5 + $0x348] sm:$0xff]  ;;  %v13077_v21 = vpop.eup %8705 }
 0x833   : > { %5285 = vmax.xlane.f32.xlu1 %v5284_v30  ;;  %v4870_v1 = vunpack.c.l.bf16 %v4829_v5  ;;  %v13083_v58 = vpop.eup %8707 }
 0x834   : > { %15632 = vst [vmem:[#allocation165_spill] sm:$0xff] %v13083_v58 }
 0x835   : > { %v13057_v25 = vpop.xlane.xlu0 %4161  ;;  %v7504_v30 = vpop.f32.mrb[184].mxu0 }
 0x836   : > { %v13063_v18 = vpop.xlane.xlu1 %4383  ;;  %4407 = vadd.xlane.f32.xlu0 %v4406_v52  ;;  %v7505_v12 = vpop.f32.mrb[185].mxu0  ;;  %v15630_v52 = vld [vmem:[#allocation166_spill] sm:$0xff] }
 0x837   : > { %4416 = vadd.xlane.f32.xlu1 %v4415_v2  ;;  %v13069_v53 = vadd.f32 %v7505_v12, %v7504_v30  ;;  %v7507_v17 = vpop.f32.mrb[186].mxu0  ;;  %v4221_v51 = vsub.f32 %v15630_v52, %v12693_v8  ;;  %v4871_v2 = vunpack.c.h.bf16 %v4829_v5  ;;  %v4314_v30 = vmul.f32 1.442695, %v4214_v26  ;;  %v15635_v5 = vld [vmem:[#allocation43_spill] sm:$0xff] }
 0x838   : > { %v7508_v20 = vpop.f32.mrb[187].mxu0  ;;  %v13088_v8 = vadd.f32 %v15633_v63, %v4864_v33  ;;  %v4326_v52 = vmul.f32 1.442695, %v4220_v46  ;;  %v13093_v26 = vadd.f32 %v15635_v5, %v4865_v39  ;;  %v4831_v33 = vld [vmem:[#allocation5 + $0x358] sm:$0xff]  ;;  %v4421_v39 = vadd.f32 %v13083_v58, %v13065_v32  ;;  %v15649_v32 = vld [vmem:[#allocation184_spill] sm:$0xff] }
 0x839   : > { %15629 = vst [vmem:[#allocation82_spill] sm:$0xff] %v13069_v53  ;;  %v13081_v12 = vadd.f32 %v7508_v20, %v7507_v17  ;;  %v4603_v54 = vpop.permute.xlu0 %4602  ;;  %v4828_v17 = vld [vmem:[#allocation5 + $0x340] sm:$0xff]  ;;  %v15637_v20 = vld [vmem:[#allocation49_spill] sm:$0xff]  ;;  %v4328_v49 = vmul.f32 1.442695, %v4221_v51  ;;  %8717 = vpow2.f32 %v4314_v30  ;;  %v15641_v46 = vld [vmem:[#allocation27_spill] sm:$0xff]  ;;  %v4874_v53 = vunpack.c.l.bf16 %v4831_v33 }
 0x83a   : > { %v13085_v19 = vpop.xlane.xlu1 %4386  ;;  %5282 = vmax.xlane.f32.xlu0 %v5281_v28  ;;  %7573 = vmatpush3.bf16.msra.mxu0 %v4603_v54  ;;  %15634 = vst [vmem:[#allocation66_spill] sm:$0xff] %v13088_v8  ;;  %15636 = vst [vmem:[#allocation93_spill] sm:$0xff] %v13093_v26  ;;  %v13096_v29 = vadd.f32 %v15637_v20, %v4870_v1  ;;  %v4412_v28 = vadd.f32 %v13077_v21, %v13071_v56  ;;  %v15639_v54 = vld [vmem:[#allocation113_spill] sm:$0xff]  ;;  %8719 = vpow2.f32 %v4316_v42  ;;  %v13109_v20 = vpop.eup %8709 }
 0x83b   : > { %15631 = vst [vmem:[#allocation83_spill] sm:$0xff] %v13081_v12  ;;  %5291 = vmax.xlane.f32.xlu1 %v5290_v13  ;;  %v13101_v6 = vadd.f32 %v15639_v54, %v4871_v2  ;;  %v4218_v63 = vsub.f32 %v15641_v46, %v12701_v36  ;;  %v15642_v1 = vld [vmem:[#allocation169_spill] sm:$0xff]  ;;  %v4868_v45 = vunpack.c.l.bf16 %v4828_v17  ;;  %v4869_v2 = vunpack.c.h.bf16 %v4828_v17  ;;  %v13113_v46 = vpop.eup %8711 }
 0x83c   : > { %15638 = vst [vmem:[#allocation68_spill] sm:$0xff] %v13096_v29  ;;  %v4219_v5 = vsub.f32 %v15642_v1, %v12701_v36  ;;  %8721 = vpow2.f32 %v4326_v52  ;;  %v15643_v30 = vld [vmem:[#allocation129_spill] sm:$0xff]  ;;  %v5287_v42 = vmax.f32 %v13088_v8, %v13093_v26  ;;  %v15644_v36 = vld [vmem:[#allocation199_spill] sm:$0xff]  ;;  %v13119_v1 = vpop.eup %8713  ;;  %v4875_v17 = vunpack.c.h.bf16 %v4831_v33  ;;  %v15645_v26 = vld [vmem:[#allocation108_spill] sm:$0xff] }
 0x83d   : > { %15640 = vst [vmem:[#allocation48_spill] sm:$0xff] %v13101_v6  ;;  %v4605_v13 = vpop.permute.xlu0 %4604  ;;  %v4224_v54 = vsub.f32 %v15643_v30, %v12707_v7  ;;  %8723 = vpow2.f32 %v4328_v49  ;;  %v5296_v52 = vmax.f32 %v13096_v29, %v13101_v6  ;;  %v4322_v30 = vmul.f32 1.442695, %v4218_v63  ;;  %v15651_v6 = vld [vmem:[#allocation185_spill] sm:$0xff] }
 0x83e   : > { %v4621_v51 = vpop.permute.xlu1 %4620  ;;  %4413 = vadd.xlane.f32.xlu0 %v4412_v28  ;;  %v4225_v28 = vsub.f32 %v15644_v36, %v12707_v7  ;;  %v4324_v12 = vmul.f32 1.442695, %v4219_v5  ;;  %v13126_v8 = vadd.f32 %v15645_v26, %v4868_v45  ;;  %v15647_v7 = vld [vmem:[#allocation109_spill] sm:$0xff]  ;;  %v4830_v36 = vld [vmem:[#allocation5 + $0x350] sm:$0xff]  ;;  %v13132_v58 = vadd.f32 %v15649_v32, %v4874_v53 }
 0x83f   : > { %4422 = vadd.xlane.f32.xlu1 %v4421_v39  ;;  %7574 = vmatprep.subr.bf16.mxu0 %v4621_v51  ;;  %v13123_v51 = vpop.eup %8715  ;;  %v4334_v49 = vmul.f32 1.442695, %v4224_v54  ;;  %v4418_v63 = vadd.f32 %v13119_v1, %v13113_v46  ;;  %v13137_v5 = vadd.f32 %v15651_v6, %v4875_v17  ;;  %8725 = vpow2.f32 %v4322_v30  ;;  %v15653_v45 = vld [vmem:[#allocation58_spill] sm:$0xff]  ;;  %v15654_v54 = vld [vmem:[#allocation59_spill] sm:$0xff] }
 0x840   : > { %7575 = vmatpush3.bf16.msra.mxu0 %v4605_v13  ;;  %15646 = vst [vmem:[#allocation167_spill] sm:$0xff] %v13126_v8  ;;  %v13129_v13 = vadd.f32 %v15647_v7, %v4869_v2  ;;  %15650 = vst [vmem:[#allocation171_spill] sm:$0xff] %v13132_v58  ;;  %v4336_v33 = vmul.f32 1.442695, %v4225_v28  ;;  %v4222_v26 = vsub.f32 %v15653_v45, %v12703_v11  ;;  %8727 = vpow2.f32 %v4324_v12  ;;  %v15655_v45 = vld [vmem:[#allocation85_spill] sm:$0xff] }
 0x841   : > { %v4623_v39 = vpop.permute.xlu0 %4622  ;;  %15652 = vst [vmem:[#allocation168_spill] sm:$0xff] %v13137_v5  ;;  %v4427_v2 = vadd.f32 %v13123_v51, %v13109_v20  ;;  %v4223_v53 = vsub.f32 %v15654_v54, %v12703_v11  ;;  %v4872_v28 = vunpack.c.l.bf16 %v4830_v36  ;;  %8729 = vpow2.f32 %v4334_v49 }
 0x842   : > { %5288 = vmax.xlane.f32.xlu0 %v5287_v42  ;;  %7576 = vmatprep.subr.bf16.mxu0 %v4623_v39  ;;  %15648 = vst [vmem:[#allocation170_spill] sm:$0xff] %v13129_v13  ;;  %v4833_v42 = vld [vmem:[#allocation5 + $0x368] sm:$0xff]  ;;  %v4228_v6 = vsub.f32 %v12666_v60, %v12845_v10  ;;  %v5293_v30 = vmax.f32 %v13126_v8, %v13129_v13  ;;  %8731 = vpow2.f32 %v4336_v33  ;;  %v15656_v33 = vld [vmem:[#allocation114_spill] sm:$0xff] }
 0x843   : > { %5297 = vmax.xlane.f32.xlu1 %v5296_v52  ;;  %v13145_v32 = vpop.eup %8717  ;;  %v4873_v52 = vunpack.c.h.bf16 %v4830_v36  ;;  %v4878_v39 = vunpack.c.l.bf16 %v4833_v42  ;;  %v4229_v11 = vsub.f32 %v12669_v27, %v12845_v10  ;;  %v5302_v7 = vmax.f32 %v13132_v58, %v13137_v5  ;;  %v4832_v27 = vld [vmem:[#allocation5 + $0x360] sm:$0xff]  ;;  %v15658_v10 = vld [vmem:[#allocation111_spill] sm:$0xff] }
 0x844   : > { %v13149_v17 = vpop.eup %8719  ;;  %v4879_v49 = vunpack.c.h.bf16 %v4833_v42  ;;  %v4330_v36 = vmul.f32 1.442695, %v4222_v26  ;;  %v4332_v60 = vmul.f32 1.442695, %v4223_v53  ;;  %v4342_v54 = vmul.f32 1.442695, %v4228_v6 }
 0x845   : > { %v13165_v29 = vadd.f32 %v15656_v33, %v4873_v52  ;;  %v13168_v13 = vadd.f32 %v15658_v10, %v4878_v39  ;;  %v4344_v8 = vmul.f32 1.442695, %v4229_v11  ;;  %v4424_v42 = vadd.f32 %v13149_v17, %v13145_v32  ;;  %v15660_v26 = vld [vmem:[#allocation116_spill] sm:$0xff]  ;;  %v4835_v52 = vld [vmem:[#allocation5 + $0x378] sm:$0xff] }
 0x846   : > { %4419 = vadd.xlane.f32.xlu0 %v4418_v63  ;;  %v13155_v12 = vpop.eup %8721  ;;  %v13173_v5 = vadd.f32 %v15660_v26, %v4879_v49  ;;  %8733 = vpow2.f32 %v4330_v36  ;;  %v4226_v53 = vsub.f32 %v12674_v59, %v12849_v4  ;;  %v4227_v6 = vsub.f32 %v12677_v31, %v12849_v4 }
 0x847   : > { %4428 = vadd.xlane.f32.xlu1 %v4427_v2  ;;  %v13159_v63 = vpop.eup %8723  ;;  %v13162_v2 = vadd.f32 %v15655_v45, %v4872_v28  ;;  %15657 = vst [vmem:[#allocation95_spill] sm:$0xff] %v13165_v29  ;;  %15659 = vst [vmem:[#allocation96_spill] sm:$0xff] %v13168_v13  ;;  %8735 = vpow2.f32 %v4332_v60  ;;  %v4876_v39 = vunpack.c.l.bf16 %v4832_v27  ;;  %v4232_v11 = vsub.f32 %v12732_v23, %v13039_v15 }
 0x848   : > { %15661 = vst [vmem:[#allocation142_spill] sm:$0xff] %v13173_v5  ;;  %v4433_v28 = vadd.f32 %v13159_v63, %v13155_v12  ;;  %8737 = vpow2.f32 %v4342_v54  ;;  %v4877_v49 = vunpack.c.h.bf16 %v4832_v27  ;;  %v4233_v36 = vsub.f32 %v12735_v16, %v13039_v15 }
 0x849   : > { %v5299_v59 = vmax.f32 %v13162_v2, %v13165_v29  ;;  %8739 = vpow2.f32 %v4344_v8  ;;  %v5308_v4 = vmax.f32 %v13168_v13, %v13173_v5  ;;  %v4882_v60 = vunpack.c.l.bf16 %v4835_v52  ;;  %v15664_v8 = vld [vmem:[#allocation110_spill] sm:$0xff]  ;;  %v15666_v5 = vld [vmem:[#allocation187_spill] sm:$0xff] }
 0x84a   : > { %5294 = vmax.xlane.f32.xlu0 %v5293_v30  ;;  %v13181_v30 = vpop.eup %8725  ;;  %v4883_v45 = vunpack.c.h.bf16 %v4835_v52  ;;  %v4338_v54 = vmul.f32 1.442695, %v4226_v53  ;;  %v4340_v33 = vmul.f32 1.442695, %v4227_v6  ;;  %v4350_v10 = vmul.f32 1.442695, %v4232_v11 }
 0x84b   : > { %5303 = vmax.xlane.f32.xlu1 %v5302_v7  ;;  %v13185_v7 = vpop.eup %8727  ;;  %v13201_v26 = vadd.f32 %v15664_v8, %v4877_v49  ;;  %v4352_v16 = vmul.f32 1.442695, %v4233_v36  ;;  %v13206_v52 = vadd.f32 %v15666_v5, %v4882_v60  ;;  %v15668_v53 = vld [vmem:[#allocation188_spill] sm:$0xff]  ;;  %v4230_v11 = vsub.f32 %v12740_v40, %v13057_v25 }
 0x84c   : > { %v13191_v31 = vpop.eup %8729  ;;  %v4430_v15 = vadd.f32 %v13185_v7, %v13181_v30  ;;  %v13209_v13 = vadd.f32 %v15668_v53, %v4883_v45  ;;  %8741 = vpow2.f32 %v4338_v54  ;;  %v4231_v5 = vsub.f32 %v12743_v38, %v13057_v25  ;;  %v15670_v25 = vld [vmem:[#allocation120_spill] sm:$0xff] }
 0x84d   : > { %v13195_v23 = vpop.eup %8731  ;;  %15665 = vst [vmem:[#allocation158_spill] sm:$0xff] %v13201_v26  ;;  %15667 = vst [vmem:[#allocation162_spill] sm:$0xff] %v13206_v52  ;;  %8743 = vpow2.f32 %v4340_v33 }
 0x84e   : > { %4425 = vadd.xlane.f32.xlu0 %v4424_v42  ;;  %v15662_v42 = vld [vmem:[#allocation36_spill] sm:$0xff]  ;;  %15669 = vst [vmem:[#allocation163_spill] sm:$0xff] %v13209_v13  ;;  %v4439_v6 = vadd.f32 %v13195_v23, %v13191_v31  ;;  %8745 = vpow2.f32 %v4350_v10  ;;  %v5314_v40 = vmax.f32 %v13206_v52, %v13209_v13  ;;  %v4348_v38 = vmul.f32 1.442695, %v4231_v5  ;;  %v4839_v5 = vld [vmem:[#allocation5 + $0x398] sm:$0xff] }
 0x84f   : > { %4434 = vadd.xlane.f32.xlu1 %v4433_v28  ;;  %v13198_v27 = vadd.f32 %v15662_v42, %v4876_v39  ;;  %v4834_v28 = vld [vmem:[#allocation5 + $0x370] sm:$0xff]  ;;  %v4837_v39 = vld [vmem:[#allocation5 + $0x388] sm:$0xff]  ;;  %8747 = vpow2.f32 %v4352_v16  ;;  %v4346_v42 = vmul.f32 1.442695, %v4230_v11 }
 0x850   : > { %v4881_v60 = vunpack.c.h.bf16 %v4834_v28  ;;  %v4886_v54 = vunpack.c.l.bf16 %v4837_v39  ;;  %v4887_v33 = vunpack.c.h.bf16 %v4837_v39  ;;  %v15676_v39 = vld [vmem:[#allocation191_spill] sm:$0xff] }
 0x851   : > { %15663 = vst [vmem:[#allocation73_spill] sm:$0xff] %v13198_v27  ;;  %v5305_v36 = vmax.f32 %v13198_v27, %v13201_v26  ;;  %8749 = vpow2.f32 %v4346_v42 }
 0x852   : > { %5300 = vmax.xlane.f32.xlu0 %v5299_v59  ;;  %v13215_v59 = vpop.eup %8733  ;;  %v13241_v52 = vadd.f32 %v15676_v39, %v4887_v33  ;;  %8751 = vpow2.f32 %v4348_v38  ;;  %v15678_v38 = vld [vmem:[#allocation118_spill] sm:$0xff]  ;;  %v15680_v39 = vld [vmem:[#allocation119_spill] sm:$0xff] }
 0x853   : > { %5309 = vmax.xlane.f32.xlu1 %v5308_v4  ;;  %v13219_v49 = vpop.eup %8735  ;;  %v4880_v4 = vunpack.c.l.bf16 %v4834_v28  ;;  %v4836_v28 = vld [vmem:[#allocation5 + $0x380] sm:$0xff]  ;;  %8753 = vrcp.f32 %v12861_v9 }
 0x854   : > { %v13223_v45 = vpop.eup %8737  ;;  %v4436_v16 = vadd.f32 %v13219_v49, %v13215_v59  ;;  %15677 = vst [vmem:[#allocation44_spill] sm:$0xff] %v13241_v52  ;;  %8755 = vrcp.f32 %v12851_v24 }
 0x855   : > { %v13227_v10 = vpop.eup %8739  ;;  %v13230_v8 = vadd.f32 %v15670_v25, %v4880_v4  ;;  %8757 = vrcp.f32 %v13063_v18  ;;  %v4841_v18 = vld [vmem:[#allocation5 + $0x3a8] sm:$0xff] }
 0x856   : > { %4431 = vadd.xlane.f32.xlu0 %v4430_v15  ;;  %v15672_v15 = vld [vmem:[#allocation121_spill] sm:$0xff]  ;;  %v4445_v11 = vadd.f32 %v13227_v10, %v13223_v45 }
 0x857   : > { %4440 = vadd.xlane.f32.xlu1 %v4439_v6  ;;  %15671 = vst [vmem:[#allocation159_spill] sm:$0xff] %v13230_v8  ;;  %v13233_v53 = vadd.f32 %v15672_v15, %v4881_v60  ;;  %v15674_v6 = vld [vmem:[#allocation128_spill] sm:$0xff]  ;;  %v4890_v15 = vunpack.c.l.bf16 %v4839_v5 }
 0x858   : > { %v13238_v13 = vadd.f32 %v15674_v6, %v4886_v54  ;;  %v4885_v54 = vunpack.c.h.bf16 %v4836_v28  ;;  %v4891_v6 = vunpack.c.h.bf16 %v4839_v5 }
 0x859   : > { %15673 = vst [vmem:[#allocation71_spill] sm:$0xff] %v13233_v53  ;;  %v5311_v60 = vmax.f32 %v13230_v8, %v13233_v53  ;;  %v4838_v53 = vld [vmem:[#allocation5 + $0x390] sm:$0xff] }
 0x85a   : > { %5306 = vmax.xlane.f32.xlu0 %v5305_v36  ;;  %15675 = vst [vmem:[#allocation72_spill] sm:$0xff] %v13238_v13  ;;  %v13245_v36 = vpop.eup %8741  ;;  %v5320_v33 = vmax.f32 %v13238_v13, %v13241_v52  ;;  %v15682_v8 = vld [vmem:[#allocation194_spill] sm:$0xff]  ;;  %v15684_v52 = vld [vmem:[#allocation195_spill] sm:$0xff] }
 0x85b   : > { %5315 = vmax.xlane.f32.xlu1 %v5314_v40  ;;  %v13247_v4 = vpop.eup %8743  ;;  %v4884_v40 = vunpack.c.l.bf16 %v4836_v28  ;;  %v13266_v26 = vadd.f32 %v15682_v8, %v4890_v15  ;;  %v13269_v13 = vadd.f32 %v15684_v52, %v4891_v6  ;;  %v15686_v52 = vld [vmem:[#allocation127_spill] sm:$0xff]  ;;  %v15688_v6 = vld [vmem:[#allocation192_spill] sm:$0xff] }
 0x85c   : > { %v13251_v25 = vpop.eup %8745  ;;  %v4442_v28 = vadd.f32 %v13247_v4, %v13245_v36 }
 0x85d   : > { %v13255_v42 = vpop.eup %8747  ;;  %15683 = vst [vmem:[#allocation57_spill] sm:$0xff] %v13266_v26  ;;  %15685 = vst [vmem:[#allocation28_spill] sm:$0xff] %v13269_v13  ;;  %v5326_v8 = vmax.f32 %v13266_v26, %v13269_v13 }
 0x85e   : > { %4437 = vadd.xlane.f32.xlu0 %v4436_v16  ;;  %v13258_v16 = vadd.f32 %v15678_v38, %v4884_v40  ;;  %v4451_v5 = vadd.f32 %v13255_v42, %v13251_v25  ;;  %v4889_v40 = vunpack.c.h.bf16 %v4838_v53 }
 0x85f   : > { %4446 = vadd.xlane.f32.xlu1 %v4445_v11  ;;  %v13261_v11 = vadd.f32 %v15680_v39, %v4885_v54 }
 0x860   : > { %15679 = vst [vmem:[#allocation76_spill] sm:$0xff] %v13258_v16  ;;  %v13285_v39 = vadd.f32 %v15688_v6, %v4889_v40 }
 0x861   : > { %15681 = vst [vmem:[#allocation172_spill] sm:$0xff] %v13261_v11  ;;  %v5317_v54 = vmax.f32 %v13258_v16, %v13261_v11 }
 0x862   : > { %5312 = vmax.xlane.f32.xlu0 %v5311_v60  ;;  %v4888_v60 = vunpack.c.l.bf16 %v4838_v53  ;;  %15689 = vst [vmem:[#allocation75_spill] sm:$0xff] %v13285_v39 }
 0x863   : > { %5321 = vmax.xlane.f32.xlu1 %v5320_v33  ;;  %v13273_v33 = vpop.eup %8749 }
 0x864   : > { %v13277_v38 = vpop.eup %8751  ;;  %v13282_v15 = vadd.f32 %v15686_v52, %v4888_v60 }
 0x865   : > { %v4448_v53 = vadd.f32 %v13277_v38, %v13273_v33 }
 0x866   : > { %4443 = vadd.xlane.f32.xlu0 %v4442_v28  ;;  %15687 = vst [vmem:[#allocation166_spill] sm:$0xff] %v13282_v15 }
 0x867   : > { %4452 = vadd.xlane.f32.xlu1 %v4451_v5  ;;  %v5323_v5 = vmax.f32 %v13282_v15, %v13285_v39 }
 0x86a   : > { %5318 = vmax.xlane.f32.xlu0 %v5317_v54 }
 0x86b   : > { %5327 = vmax.xlane.f32.xlu1 %v5326_v8 }
 0x86e   : > { %v7510_v28 = vpop.f32.mrb[188].mxu0  ;;  %4449 = vadd.xlane.f32.xlu0 %v4448_v53 }
 0x86f   : > { %v4171_v11 = vpop.xlane.xlu1 %4170  ;;  %v7511_v13 = vpop.f32.mrb[189].mxu0 }
 0x870   : > { %v4236_v60 = vsub.f32 %v12802_v14, %v4171_v11  ;;  %v4237_v40 = vsub.f32 %v12805_v47, %v4171_v11  ;;  %v13295_v54 = vadd.f32 %v7511_v13, %v7510_v28  ;;  %v7513_v8 = vpop.f32.mrb[190].mxu0  ;;  %v15692_v14 = vld [vmem:[#allocation130_spill] sm:$0xff] }
 0x871   : > { %v7514_v52 = vpop.f32.mrb[191].mxu0 }
 0x872   : > { %15690 = vst [vmem:[#allocation43_spill] sm:$0xff] %v13295_v54  ;;  %v4358_v6 = vmul.f32 1.442695, %v4236_v60  ;;  %v4360_v26 = vmul.f32 1.442695, %v4237_v40  ;;  %v13297_v9 = vadd.f32 %v7514_v52, %v7513_v8  ;;  %v4168_v53 = vpop.xlane.xlu0 %4167  ;;  %5324 = vmax.xlane.f32.xlu0 %v5323_v5  ;;  %v8754_v5 = vpop.eup %8753  ;;  %v4840_v8 = vld [vmem:[#allocation5 + $0x3a0] sm:$0xff]  ;;  %v4894_v52 = vunpack.c.l.bf16 %v4841_v18 }
 0x873   : > { %v4234_v39 = vsub.f32 %v12812_v35, %v4168_v53  ;;  %v4235_v24 = vsub.f32 %v12815_v48, %v4168_v53  ;;  %v4390_v15 = vpop.xlane.xlu1 %4389  ;;  %v8756_v35 = vpop.eup %8755  ;;  %v4505_v40 = vmul.f32 %v8754_v5, %v12689_v43  ;;  %v15694_v43 = vld [vmem:[#allocation131_spill] sm:$0xff] }
 0x874   : > { %15691 = vst [vmem:[#allocation49_spill] sm:$0xff] %v13297_v9  ;;  %8759 = vpow2.f32 %v4358_v6  ;;  %v4895_v6 = vunpack.c.h.bf16 %v4841_v18  ;;  %v13312_v54 = vadd.f32 %v15692_v14, %v4894_v52  ;;  %v15696_v18 = vpack.c.bf16 %v12786_v61, %v12782_v50 }
 0x875   : > { %8761 = vpow2.f32 %v4360_v26  ;;  %v4354_v47 = vmul.f32 1.442695, %v4234_v39  ;;  %v4356_v13 = vmul.f32 1.442695, %v4235_v24  ;;  %v8758_v26 = vpop.eup %8757  ;;  %v4892_v24 = vunpack.c.l.bf16 %v4840_v8 }
 0x876   : > { %8763 = vrcp.f32 %v13085_v19  ;;  %v4607_v11 = vpop.permute.xlu0 %4606  ;;  %v4503_v19 = vmul.f32 %v8756_v35, %v12679_v37  ;;  %15693 = vst [vmem:[#allocation113_spill] sm:$0xff] %v13312_v54  ;;  %v13315_v9 = vadd.f32 %v15694_v43, %v4895_v6  ;;  %v4504_v14 = vmul.f32 %v8754_v5, %v12685_v57  ;;  %v15701_v43 = vld [vmem:[#allocation25_spill] sm:$0xff] }
 0x877   : > { %8765 = vpow2.f32 %v4354_v47  ;;  %v4393_v28 = vpop.xlane.xlu1 %4392  ;;  %7577 = vmatpush3.bf16.msra.mxu0 %v4607_v11  ;;  %v4893_v47 = vunpack.c.h.bf16 %v4840_v8  ;;  %v15699_v8 = vld [vmem:[#allocation201_spill] sm:$0xff]  ;;  %v4502_v6 = vmul.f32 %v8756_v35, %v12671_v0  ;;  %v15703_v35 = vld [vmem:[#allocation52_spill] sm:$0xff] }
 0x878   : > { %8767 = vpow2.f32 %v4356_v13  ;;  %v4565_v13 = vpack.c.bf16 %v4505_v40, %v4503_v19  ;;  %15695 = vst [vmem:[#allocation27_spill] sm:$0xff] %v13315_v9  ;;  %v5332_v52 = vmax.f32 %v13312_v54, %v13315_v9  ;;  %v4507_v19 = vmul.f32 %v8758_v26, %v12751_v22 }
 0x879   : > { %8769 = vrcp.f32 %v4393_v28  ;;  %v4564_v57 = vpack.c.bf16 %v4504_v14, %v4502_v6  ;;  %v15704_v14 = vld [vmem:[#allocation124_spill] sm:$0xff] }
 0x87a   : > { %v4609_v60 = vpop.permute.xlu0 %4608  ;;  %8771 = vrcp.f32 %v4390_v15  ;;  %v13331_v15 = vadd.f32 %v15699_v8, %v4893_v47 }
 0x87b   : > { %v4625_v48 = vpop.permute.xlu1 %4624 }
 0x87c   : > { %7578 = vmatprep.subr.bf16.mxu0 %v4625_v48  ;;  %v15697_v48 = vld [vmem:[#allocation200_spill] sm:$0xff]  ;;  %15700 = vst [vmem:[#allocation129_spill] sm:$0xff] %v13331_v15 }
 0x87d   : > { %7579 = vmatpush3.bf16.msra.mxu0 %v4609_v60  ;;  %v13328_v40 = vadd.f32 %v15697_v48, %v4892_v24 }
 0x87e   : > { %v13307_v39 = vpop.eup %8759 }
 0x87f   : > { %v13309_v53 = vpop.eup %8761  ;;  %15698 = vst [vmem:[#allocation169_spill] sm:$0xff] %v13328_v40  ;;  %v5329_v5 = vmax.f32 %v13328_v40, %v13331_v15  ;;  %v15719_v40 = vld [vmem:[#allocation92_spill] sm:$0xff] }
 0x880   : > { %v8764_v11 = vpop.eup %8763  ;;  %4675 = vmatmul.mubr.bf16.vlgmr.msra.gmra.mrb[192].mxu0 %v15696_v18  ;;  %v4457_v37 = vadd.f32 %v13309_v53, %v13307_v39 }
 0x881   : > { %v13322_v28 = vpop.eup %8765  ;;  %4682 = vmatprep.mubr.bf16.mxu0 %v4565_v13  ;;  %v4509_v61 = vmul.f32 %v8764_v11, %v12763_v62  ;;  %v4508_v62 = vmul.f32 %v8764_v11, %v12757_v34  ;;  %v15707_v34 = vld [vmem:[#allocation179_spill] sm:$0xff] }
 0x882   : > { %v13324_v60 = vpop.eup %8767  ;;  %4458 = vadd.xlane.f32.xlu1 %v4457_v37  ;;  %v15702_v37 = vld [vmem:[#allocation177_spill] sm:$0xff] }
 0x883   : > { %v4454_v50 = vadd.f32 %v13324_v60, %v13322_v28  ;;  %v4567_v24 = vpack.c.bf16 %v4509_v61, %v4507_v19  ;;  %v8770_v47 = vpop.eup %8769  ;;  %v4506_v0 = vmul.f32 %v8758_v26, %v15702_v37  ;;  %v15705_v61 = vld [vmem:[#allocation69_spill] sm:$0xff] }
 0x884   : > { %v8772_v13 = vpop.eup %8771  ;;  %v4513_v18 = vmul.f32 %v8770_v47, %v15701_v43  ;;  %v15708_v43 = vld [vmem:[#allocation70_spill] sm:$0xff]  ;;  %v15709_v37 = vld [vmem:[#allocation65_spill] sm:$0xff] }
 0x885   : > { %4455 = vadd.xlane.f32.xlu0 %v4454_v50  ;;  %v4511_v48 = vmul.f32 %v8772_v13, %v15703_v35  ;;  %v4566_v22 = vpack.c.bf16 %v4508_v62, %v4506_v0  ;;  %v4512_v50 = vmul.f32 %v8770_v47, %v15704_v14  ;;  %v4842_v14 = vld [vmem:[#allocation5 + $0x3b0] sm:$0xff] }
 0x886   : > { %5333 = vmax.xlane.f32.xlu1 %v5332_v52  ;;  %v4510_v52 = vmul.f32 %v8772_v13, %v15705_v61 }
 0x887   : > { %v4569_v8 = vpack.c.bf16 %v4513_v18, %v4511_v48 }
 0x888   : > { %4683 = vmatmul.mubr.bf16.gmra.mrb[196].mxu0 %v4564_v57  ;;  %v4568_v6 = vpack.c.bf16 %v4512_v50, %v4510_v52  ;;  %v15706_v57 = vld [vmem:[#allocation178_spill] sm:$0xff]  ;;  %v4896_v52 = vunpack.c.l.bf16 %v4842_v14 }
 0x889   : > { %5330 = vmax.xlane.f32.xlu0 %v5329_v5  ;;  %4690 = vmatprep.mubr.bf16.mxu0 %v4567_v24 }
 0x890   : > { %4691 = vmatmul.mubr.bf16.gmra.mrb[200].mxu0 %v4566_v22 }
 0x891   : > { %4698 = vmatprep.mubr.bf16.mxu0 %v4569_v8 }
 0x898   : > { %4699 = vmatmul.mubr.bf16.gmra.mrb[204].mxu0 %v4568_v6  ;;  %v4897_v6 = vunpack.c.h.bf16 %v4842_v14 }
 0x8ab   : > { %v4174_v19 = vpop.xlane.xlu0 %4173 }
 0x8ac   : > { %v4238_v5 = vsub.f32 %v15706_v57, %v4174_v19  ;;  %v4239_v11 = vsub.f32 %v15707_v34, %v4174_v19  ;;  %v4177_v24 = vpop.xlane.xlu1 %4176  ;;  %v4843_v57 = vld [vmem:[#allocation5 + $0x3b8] sm:$0xff] }
 0x8ad   : > { %v4240_v26 = vsub.f32 %v15708_v43, %v4177_v24  ;;  %v4241_v35 = vsub.f32 %v15709_v37, %v4177_v24  ;;  %v15710_v37 = vld [vmem:[#allocation203_spill] sm:$0xff] }
 0x8ae   : > { %v4362_v62 = vmul.f32 1.442695, %v4238_v5  ;;  %v4364_v18 = vmul.f32 1.442695, %v4239_v11 }
 0x8af   : > { %v4366_v0 = vmul.f32 1.442695, %v4240_v26  ;;  %v4368_v48 = vmul.f32 1.442695, %v4241_v35  ;;  %v4396_v22 = vpop.xlane.xlu0 %4395  ;;  %v13369_v35 = vadd.f32 %v15710_v37, %v4896_v52 }
 0x8b0   : > { %8773 = vpow2.f32 %v4362_v62  ;;  %v13352_v47 = vpop.xlane.xlu1 %5273  ;;  %v15712_v62 = vld [vmem:[#allocation204_spill] sm:$0xff] }
 0x8b1   : > { %8775 = vpow2.f32 %v4364_v18  ;;  %15711 = vst [vmem:[#allocation199_spill] sm:$0xff] %v13369_v35  ;;  %v13372_v18 = vadd.f32 %v15712_v62, %v4897_v6  ;;  %v15714_v6 = vld [vmem:[#allocation206_spill] sm:$0xff] }
 0x8b2   : > { %8777 = vpow2.f32 %v4366_v0  ;;  %v4898_v0 = vunpack.c.l.bf16 %v4843_v57 }
 0x8b3   : > { %8779 = vpow2.f32 %v4368_v48  ;;  %v4399_v13 = vpop.xlane.xlu0 %4398  ;;  %15713 = vst [vmem:[#allocation108_spill] sm:$0xff] %v13372_v18  ;;  %v4899_v48 = vunpack.c.h.bf16 %v4843_v57  ;;  %v5335_v52 = vmax.f32 %v13369_v35, %v13372_v18  ;;  %v15716_v57 = vld [vmem:[#allocation207_spill] sm:$0xff] }
 0x8b4   : > { %v4405_v8 = vpop.xlane.xlu1 %4404  ;;  %8781 = vrcp.f32 %v4396_v22  ;;  %v13383_v37 = vadd.f32 %v15714_v6, %v4898_v0 }
 0x8b5   : > { %8783 = vrcp.f32 %v4399_v13 }
 0x8b6   : > { %8785 = vrcp.f32 %v4405_v8  ;;  %15715 = vst [vmem:[#allocation109_spill] sm:$0xff] %v13383_v37  ;;  %v13386_v8 = vadd.f32 %v15716_v57, %v4899_v48 }
 0x8b7   : > { %v13354_v50 = vpop.xlane.xlu0 %5270 }
 0x8b8   : > { %v13356_v61 = vpop.xlane.xlu1 %5279  ;;  %15717 = vst [vmem:[#allocation184_spill] sm:$0xff] %v13386_v8  ;;  %v5338_v0 = vmax.f32 %v13383_v37, %v13386_v8  ;;  %v15723_v8 = vld [vmem:[#allocation157_spill] sm:$0xff] }
 0x8ba   : > { %v13358_v19 = vpop.eup %8773 }
 0x8bb   : > { %v13360_v5 = vpop.eup %8775  ;;  %v4402_v34 = vpop.xlane.xlu0 %4401 }
 0x8bc   : > { %v13362_v11 = vpop.eup %8777  ;;  %v4411_v24 = vpop.xlane.xlu1 %4410  ;;  %v4460_v43 = vadd.f32 %v13360_v5, %v13358_v19  ;;  %8787 = vrcp.f32 %v4402_v34 }
 0x8bd   : > { %v13366_v26 = vpop.eup %8779  ;;  %8789 = vrcp.f32 %v4411_v24 }
 0x8be   : > { %4461 = vadd.xlane.f32.xlu0 %v4460_v43  ;;  %v4463_v22 = vadd.f32 %v13366_v26, %v13362_v11  ;;  %v8782_v13 = vpop.eup %8781  ;;  %v15718_v43 = vld [vmem:[#allocation104_spill] sm:$0xff] }
 0x8bf   : > { %v13376_v14 = vpop.xlane.xlu0 %5276  ;;  %v8784_v54 = vpop.eup %8783  ;;  %v4515_v62 = vmul.f32 %v8782_v13, %v15718_v43  ;;  %v4514_v16 = vmul.f32 %v8782_v13, %v15719_v40 }
 0x8c0   : > { %4464 = vadd.xlane.f32.xlu1 %v4463_v22  ;;  %v13378_v9 = vpop.xlane.xlu1 %5285  ;;  %v4517_v15 = vmul.f32 %v8784_v54, %v12943_v55  ;;  %v4516_v34 = vmul.f32 %v8784_v54, %v12939_v41  ;;  %v8786_v6 = vpop.eup %8785 }
 0x8c2   : > { %v4571_v27 = vpack.c.bf16 %v4517_v15, %v4515_v62  ;;  %v4570_v29 = vpack.c.bf16 %v4516_v34, %v4514_v16  ;;  %v15720_v15 = vld [vmem:[#allocation91_spill] sm:$0xff] }
 0x8c3   : > { %v4408_v22 = vpop.xlane.xlu0 %4407  ;;  %v4521_v13 = vmul.f32 %v8786_v6, %v15720_v15 }
 0x8c4   : > { %5336 = vmax.xlane.f32.xlu1 %v5335_v52  ;;  %v4417_v58 = vpop.xlane.xlu1 %4416  ;;  %4706 = vmatprep.mubr.bf16.mxu0 %v4571_v27  ;;  %8791 = vrcp.f32 %v4408_v22  ;;  %v15721_v52 = vld [vmem:[#allocation150_spill] sm:$0xff] }
 0x8c5   : > { %4707 = vmatmul.mubr.bf16.gmra.mrb[208].mxu0 %v4570_v29  ;;  %v4520_v57 = vmul.f32 %v8786_v6, %v15721_v52  ;;  %8793 = vrcp.f32 %v4417_v58  ;;  %v15725_v52 = vld [vmem:[#allocation133_spill] sm:$0xff]  ;;  %v15726_v58 = vld [vmem:[#allocation79_spill] sm:$0xff] }
 0x8c6   : > { %v8788_v40 = vpop.eup %8787 }
 0x8c7   : > { %v13394_v48 = vpop.xlane.xlu0 %5282  ;;  %v4519_v54 = vmul.f32 %v8788_v40, %v12993_v3  ;;  %v4518_v16 = vmul.f32 %v8788_v40, %v12985_v44  ;;  %v8790_v62 = vpop.eup %8789  ;;  %v15724_v40 = vld [vmem:[#allocation30_spill] sm:$0xff] }
 0x8c8   : > { %5339 = vmax.xlane.f32.xlu1 %v5338_v0  ;;  %v13396_v55 = vpop.xlane.xlu1 %5291  ;;  %v15722_v0 = vld [vmem:[#allocation182_spill] sm:$0xff]  ;;  %v4525_v44 = vmul.f32 %v8790_v62, %v15723_v8 }
 0x8c9   : > { %v4573_v27 = vpack.c.bf16 %v4521_v13, %v4519_v54  ;;  %v4572_v29 = vpack.c.bf16 %v4520_v57, %v4518_v16  ;;  %v4524_v54 = vmul.f32 %v8790_v62, %v15725_v52  ;;  %v15727_v8 = vld [vmem:[#allocation38_spill] sm:$0xff]  ;;  %v15730_v52 = vld [vmem:[#allocation152_spill] sm:$0xff] }
 0x8ca   : > { %v15728_v62 = vld [vmem:[#allocation42_spill] sm:$0xff] }
 0x8cb   : > { %v4414_v41 = vpop.xlane.xlu0 %4413  ;;  %4714 = vmatprep.mubr.bf16.mxu0 %v4573_v27 }
 0x8cc   : > { %v4423_v24 = vpop.xlane.xlu1 %4422  ;;  %8795 = vrcp.f32 %v4414_v41 }
 0x8cd   : > { %4715 = vmatmul.mubr.bf16.gmra.mrb[212].mxu0 %v4572_v29  ;;  %8797 = vrcp.f32 %v4423_v24 }
 0x8ce   : > { %v8792_v22 = vpop.eup %8791 }
 0x8cf   : > { %v13402_v43 = vpop.xlane.xlu0 %5288  ;;  %v4523_v15 = vmul.f32 %v8792_v22, %v15722_v0  ;;  %v4522_v6 = vmul.f32 %v8792_v22, %v15724_v40  ;;  %v8794_v27 = vpop.eup %8793  ;;  %v5365_v0 = vsub.f32 %v15728_v62, %v13354_v50 }
 0x8d0   : > { %v13404_v34 = vpop.xlane.xlu1 %5297 }
 0x8d1   : > { %v4575_v16 = vpack.c.bf16 %v4525_v44, %v4523_v15  ;;  %v4574_v57 = vpack.c.bf16 %v4524_v54, %v4522_v6  ;;  %v15729_v44 = vld [vmem:[#allocation155_spill] sm:$0xff]  ;;  %v4528_v54 = vmul.f32 %v8794_v27, %v15730_v52 }
 0x8d2   : > { %v4529_v24 = vmul.f32 %v8794_v27, %v15729_v44 }
 0x8d3   : > { %v4420_v3 = vpop.xlane.xlu0 %4419  ;;  %4722 = vmatprep.mubr.bf16.mxu0 %v4575_v16 }
 0x8d4   : > { %5797 = vrot.lane.b32.xlu0 %v15726_v58, %s9302_s19  ;;  %v4429_v13 = vpop.xlane.xlu1 %4428  ;;  %8799 = vrcp.f32 %v4420_v3  ;;  %v15731_v3 = vld [vmem:[#allocation90_spill] sm:$0xff] }
 0x8d5   : > { %4723 = vmatmul.mubr.bf16.gmra.mrb[216].mxu0 %v4574_v57  ;;  %v5366_v58 = vsub.f32 %v15731_v3, %v13354_v50  ;;  %8801 = vrcp.f32 %v4429_v13  ;;  %v15732_v50 = vld [vmem:[#allocation165_spill] sm:$0xff] }
 0x8d6   : > { %v8796_v22 = vpop.eup %8795 }
 0x8d7   : > { %v13412_v41 = vpop.xlane.xlu0 %5294  ;;  %v4527_v15 = vmul.f32 %v8796_v22, %v13077_v21  ;;  %v4526_v6 = vmul.f32 %v8796_v22, %v13071_v56  ;;  %v8798_v62 = vpop.eup %8797  ;;  %v5431_v35 = vmul.f32 1.442695, %v5366_v58 }
 0x8d8   : > { %v13414_v29 = vpop.xlane.xlu1 %5303  ;;  %v4533_v44 = vmul.f32 %v8798_v62, %v15732_v50 }
 0x8d9   : > { %5781 = vrot.lane.b32.xlu1 %v15727_v8, %s9302_s19  ;;  %v4577_v57 = vpack.c.bf16 %v4529_v24, %v4527_v15  ;;  %v4576_v37 = vpack.c.bf16 %v4528_v54, %v4526_v6  ;;  %v5429_v8 = vmul.f32 1.442695, %v5365_v0  ;;  %v15733_v0 = vld [vmem:[#allocation164_spill] sm:$0xff]  ;;  %v15734_v24 = vld [vmem:[#allocation23_spill] sm:$0xff] }
 0x8da   : > { %v4532_v13 = vmul.f32 %v8798_v62, %v15733_v0  ;;  %v5367_v6 = vsub.f32 %v15734_v24, %v13352_v47 }
 0x8db   : > { %v4426_v40 = vpop.xlane.xlu0 %4425  ;;  %4730 = vmatprep.mubr.bf16.mxu0 %v4577_v57 }
 0x8dc   : > { %v4435_v16 = vpop.xlane.xlu1 %4434  ;;  %8803 = vrcp.f32 %v4426_v40  ;;  %v5433_v57 = vmul.f32 1.442695, %v5367_v6 }
 0x8dd   : > { %4731 = vmatmul.mubr.bf16.gmra.mrb[220].mxu0 %v4576_v37  ;;  %8805 = vpow2.f32 %v5429_v8  ;;  %v15735_v37 = vld [vmem:[#allocation35_spill] sm:$0xff] }
 0x8de   : > { %v8800_v56 = vpop.eup %8799  ;;  %8807 = vpow2.f32 %v5431_v35  ;;  %v5368_v40 = vsub.f32 %v15735_v37, %v13352_v47 }
 0x8df   : > { %v13426_v18 = vpop.xlane.xlu0 %5300  ;;  %v4531_v22 = vmul.f32 %v8800_v56, %v13119_v1  ;;  %v4530_v15 = vmul.f32 %v8800_v56, %v13113_v46  ;;  %8809 = vrcp.f32 %v4435_v16  ;;  %v8802_v1 = vpop.eup %8801 }
 0x8e0   : > { %v13428_v21 = vpop.xlane.xlu1 %5309  ;;  %v5435_v46 = vmul.f32 1.442695, %v5368_v40  ;;  %v4537_v50 = vmul.f32 %v8802_v1, %v13123_v51  ;;  %v4536_v16 = vmul.f32 %v8802_v1, %v13109_v20 }
 0x8e1   : > { %v4579_v54 = vpack.c.bf16 %v4533_v44, %v4531_v22  ;;  %v4578_v3 = vpack.c.bf16 %v4532_v13, %v4530_v15 }
 0x8e3   : > { %v4432_v27 = vpop.xlane.xlu0 %4431  ;;  %4738 = vmatprep.mubr.bf16.mxu0 %v4579_v54 }
 0x8e4   : > { %v4441_v52 = vpop.xlane.xlu1 %4440  ;;  %8811 = vrcp.f32 %v4432_v27 }
 0x8e5   : > { %4739 = vmatmul.mubr.bf16.gmra.mrb[224].mxu0 %v4578_v3  ;;  %8813 = vpow2.f32 %v5433_v57 }
 0x8e6   : > { %v8804_v62 = vpop.eup %8803  ;;  %8815 = vpow2.f32 %v5435_v46 }
 0x8e7   : > { %v13438_v58 = vpop.xlane.xlu0 %5306  ;;  %v4535_v35 = vmul.f32 %v8804_v62, %v13149_v17  ;;  %v4534_v47 = vmul.f32 %v8804_v62, %v13145_v32  ;;  %v13446_v22 = vpop.eup %8805  ;;  %8817 = vrcp.f32 %v4441_v52 }
 0x8e8   : > { %v13440_v8 = vpop.xlane.xlu1 %5315  ;;  %v13448_v15 = vpop.eup %8807 }
 0x8e9   : > { %v4581_v44 = vpack.c.bf16 %v4537_v50, %v4535_v35  ;;  %v4580_v27 = vpack.c.bf16 %v4536_v16, %v4534_v47  ;;  %v8810_v17 = vpop.eup %8809  ;;  %v5557_v51 = vadd.f32 %v13448_v15, %v13446_v22 }
 0x8ea   : > { %v4541_v6 = vmul.f32 %v8810_v17, %v13159_v63  ;;  %v4540_v52 = vmul.f32 %v8810_v17, %v13155_v12 }
 0x8eb   : > { %v4438_v56 = vpop.xlane.xlu0 %4437  ;;  %4746 = vmatprep.mubr.bf16.mxu0 %v4581_v44 }
 0x8ec   : > { %v4447_v0 = vpop.xlane.xlu1 %4446  ;;  %8819 = vrcp.f32 %v4438_v56 }
 0x8ed   : > { %4747 = vmatmul.mubr.bf16.gmra.mrb[228].mxu0 %v4580_v27  ;;  %8821 = vrcp.f32 %v4447_v0 }
 0x8ee   : > { %v8812_v20 = vpop.eup %8811 }
 0x8ef   : > { %v13450_v13 = vpop.xlane.xlu0 %5312  ;;  %v4539_v24 = vmul.f32 %v8812_v20, %v13185_v7  ;;  %v4538_v37 = vmul.f32 %v8812_v20, %v13181_v30  ;;  %v13460_v1 = vpop.eup %8813 }
 0x8f0   : > { %v13458_v40 = vpop.xlane.xlu1 %5321  ;;  %v13462_v57 = vpop.eup %8815 }
 0x8f1   : > { %v4583_v54 = vpack.c.bf16 %v4541_v6, %v4539_v24  ;;  %v4582_v3 = vpack.c.bf16 %v4540_v52, %v4538_v37  ;;  %v8818_v62 = vpop.eup %8817  ;;  %v5560_v30 = vadd.f32 %v13462_v57, %v13460_v1  ;;  %v15737_v52 = vld [vmem:[#allocation81_spill] sm:$0xff] }
 0x8f2   : > { %v4545_v56 = vmul.f32 %v8818_v62, %v13195_v23  ;;  %v4544_v50 = vmul.f32 %v8818_v62, %v13191_v31  ;;  %v15738_v62 = vld [vmem:[#allocation37_spill] sm:$0xff] }
 0x8f3   : > { %5558 = vadd.xlane.f32.xlu0 %v5557_v51  ;;  %v4444_v32 = vpop.xlane.xlu0 %4443  ;;  %4754 = vmatprep.mubr.bf16.mxu0 %v4583_v54 }
 0x8f4   : > { %8823 = vrcp.f32 %v4444_v32  ;;  %v4453_v12 = vpop.xlane.xlu1 %4452  ;;  %v15736_v32 = vld [vmem:[#allocation78_spill] sm:$0xff] }
 0x8f5   : > { %4755 = vmatmul.mubr.bf16.gmra.mrb[232].mxu0 %v4582_v3  ;;  %8825 = vrcp.f32 %v4453_v12 }
 0x8f6   : > { %v8820_v63 = vpop.eup %8819 }
 0x8f7   : > { %v13464_v46 = vpop.xlane.xlu0 %5318  ;;  %v4543_v7 = vmul.f32 %v8820_v63, %v13219_v49  ;;  %v4542_v35 = vmul.f32 %v8820_v63, %v13215_v59  ;;  %v8822_v27 = vpop.eup %8821 }
 0x8f8   : > { %v4549_v49 = vmul.f32 %v8822_v27, %v13227_v10  ;;  %v4548_v59 = vmul.f32 %v8822_v27, %v13223_v45  ;;  %v13478_v6 = vpop.xlane.xlu1 %5327 }
 0x8f9   : > { %v4585_v16 = vpack.c.bf16 %v4545_v56, %v4543_v7  ;;  %v4584_v44 = vpack.c.bf16 %v4544_v50, %v4542_v35  ;;  %v4844_v50 = vld [vmem:[#allocation5 + $0x3c0] sm:$0xff] }
 0x8fb   : > { %v4450_v47 = vpop.xlane.xlu0 %4449  ;;  %4762 = vmatprep.mubr.bf16.mxu0 %v4585_v16 }
 0x8fc   : > { %8827 = vrcp.f32 %v4450_v47  ;;  %v15740_v47 = vld [vmem:[#allocation160_spill] sm:$0xff] }
 0x8fd   : > { %5561 = vadd.xlane.f32.xlu1 %v5560_v30  ;;  %4763 = vmatmul.mubr.bf16.gmra.mrb[236].mxu0 %v4584_v44  ;;  %v5370_v16 = vsub.f32 %v15740_v47, %v13376_v14 }
 0x8fe   : > { %v8824_v0 = vpop.eup %8823 }
 0x8ff   : > { %v4547_v17 = vmul.f32 %v8824_v0, %v13247_v4  ;;  %v4546_v23 = vmul.f32 %v8824_v0, %v13245_v36  ;;  %v8826_v20 = vpop.eup %8825  ;;  %v13486_v3 = vpop.xlane.xlu0 %5324  ;;  %v4900_v0 = vunpack.c.l.bf16 %v4844_v50 }
 0x900   : > { %v4553_v4 = vmul.f32 %v8826_v20, %v13255_v42  ;;  %v4552_v36 = vmul.f32 %v8826_v20, %v13251_v25  ;;  %v15739_v25 = vld [vmem:[#allocation146_spill] sm:$0xff]  ;;  %v15744_v20 = vld [vmem:[#allocation175_spill] sm:$0xff] }
 0x901   : > { %v4587_v51 = vpack.c.bf16 %v4549_v49, %v4547_v17  ;;  %v4586_v31 = vpack.c.bf16 %v4548_v59, %v4546_v23  ;;  %v5369_v30 = vsub.f32 %v15739_v25, %v13376_v14  ;;  %v4901_v17 = vunpack.c.h.bf16 %v4844_v50  ;;  %v15741_v49 = vld [vmem:[#allocation54_spill] sm:$0xff]  ;;  %v15750_v50 = vld [vmem:[#allocation80_spill] sm:$0xff] }
 0x902   : > { %v5371_v23 = vsub.f32 %v15741_v49, %v13356_v61 }
 0x903   : > { %4770 = vmatprep.mubr.bf16.mxu0 %v4587_v51  ;;  %v5437_v59 = vmul.f32 1.442695, %v5369_v30  ;;  %v5439_v51 = vmul.f32 1.442695, %v5370_v16  ;;  %v13506_v14 = vadd.f32 %v15744_v20, %v4901_v17  ;;  %v15747_v30 = vld [vmem:[#allocation39_spill] sm:$0xff] }
 0x905   : > { %4771 = vmatmul.mubr.bf16.gmra.mrb[240].mxu0 %v4586_v31 }
 0x906   : > { %v8828_v24 = vpop.eup %8827 }
 0x907   : > { %v4551_v37 = vmul.f32 %v8828_v24, %v13277_v38  ;;  %v4550_v10 = vmul.f32 %v8828_v24, %v13273_v33 }
 0x909   : > { %5799 = vrot.lane.b32.xlu0 %v15736_v32, %s9302_s19  ;;  %v4589_v45 = vpack.c.bf16 %v4553_v4, %v4551_v37  ;;  %v4588_v54 = vpack.c.bf16 %v4552_v36, %v4550_v10  ;;  %v5441_v32 = vmul.f32 1.442695, %v5371_v23 }
 0x90b   : > { %4778 = vmatprep.mubr.bf16.mxu0 %v4589_v45  ;;  %v15746_v45 = vld [vmem:[#allocation29_spill] sm:$0xff] }
 0x90d   : > { %5801 = vrot.lane.b32.xlu0 %v15737_v52, %s9302_s19  ;;  %4779 = vmatmul.mubr.bf16.gmra.mrb[244].mxu0 %v4588_v54 }
 0x90e   : > { %5783 = vrot.lane.b32.xlu1 %v15738_v62, %s9302_s19 }
 0x90f   : > { %v4459_v63 = vpop.xlane.xlu1 %4458 }
 0x910   : > { %8829 = vrcp.f32 %v4459_v63 }
 0x912   : > { %v4456_v38 = vpop.xlane.xlu0 %4455 }
 0x913   : > { %8831 = vrcp.f32 %v4456_v38 }
 0x914   : > { %8833 = vpow2.f32 %v5437_v59 }
 0x915   : > { %8835 = vpow2.f32 %v5439_v51 }
 0x916   : > { %8837 = vpow2.f32 %v5441_v32 }
 0x91a   : > { %v8830_v42 = vpop.eup %8829 }
 0x91b   : > { %v4557_v7 = vmul.f32 %v8830_v42, %v13309_v53  ;;  %v4556_v35 = vmul.f32 %v8830_v42, %v13307_v39  ;;  %v15743_v39 = vld [vmem:[#allocation174_spill] sm:$0xff] }
 0x91c   : > { %v13503_v31 = vadd.f32 %v15743_v39, %v4900_v0 }
 0x91d   : > { %v8832_v33 = vpop.eup %8831 }
 0x91e   : > { %v4555_v12 = vmul.f32 %v8832_v33, %v13324_v60  ;;  %v4554_v56 = vmul.f32 %v8832_v33, %v13322_v28  ;;  %v15742_v60 = vld [vmem:[#allocation149_spill] sm:$0xff]  ;;  %v5341_v10 = vmax.f32 %v13503_v31, %v13506_v14  ;;  %v13516_v54 = vpop.eup %8833 }
 0x91f   : > { %v5372_v53 = vsub.f32 %v15742_v60, %v13356_v61  ;;  %v4845_v28 = vld [vmem:[#allocation5 + $0x3c8] sm:$0xff]  ;;  %v13520_v63 = vpop.eup %8835 }
 0x920   : > { %v4591_v44 = vpack.c.bf16 %v4557_v7, %v4555_v12  ;;  %v4590_v27 = vpack.c.bf16 %v4556_v35, %v4554_v56  ;;  %v4902_v37 = vunpack.c.l.bf16 %v4845_v28  ;;  %v4903_v4 = vunpack.c.h.bf16 %v4845_v28  ;;  %v15745_v61 = vld [vmem:[#allocation53_spill] sm:$0xff]  ;;  %v13522_v38 = vpop.eup %8837  ;;  %v15748_v12 = vld [vmem:[#allocation22_spill] sm:$0xff]  ;;  %v13534_v7 = vpop.xlane.xlu0 %5330  ;;  %v15749_v35 = vld [vmem:[#allocation87_spill] sm:$0xff] }
 0x921   : > { %v5443_v24 = vmul.f32 1.442695, %v5372_v53  ;;  %v5563_v42 = vadd.f32 %v13520_v63, %v13516_v54  ;;  %v13536_v56 = vpop.xlane.xlu1 %5333 }
 0x922   : > { %4786 = vmatprep.mubr.bf16.mxu0 %v4591_v44  ;;  %v13511_v36 = vadd.f32 %v15745_v61, %v4902_v37  ;;  %v13514_v52 = vadd.f32 %v15746_v45, %v4903_v4  ;;  %v15753_v61 = vld [vmem:[#allocation183_spill] sm:$0xff] }
 0x923   : > { %4787 = vmatmul.mubr.bf16.gmra.mrb[248].mxu0 %v4590_v27  ;;  %8839 = vpow2.f32 %v5443_v24  ;;  %v5373_v45 = vsub.f32 %v15753_v61, %v13394_v48 }
 0x924   : > { %v5344_v62 = vmax.f32 %v13511_v36, %v13514_v52 }
 0x92c   : > { %5342 = vmax.xlane.f32.xlu0 %v5341_v10  ;;  %v4846_v10 = vld [vmem:[#allocation5 + $0x3d0] sm:$0xff] }
 0x92d   : > { %v13526_v33 = vpop.eup %8839 }
 0x92e   : > { %v5566_v25 = vadd.f32 %v13526_v33, %v13522_v38 }
 0x932   : > { %5345 = vmax.xlane.f32.xlu1 %v5344_v62 }
 0x936   : > { %5564 = vadd.xlane.f32.xlu1 %v5563_v42 }
 0x93a   : > { %5567 = vadd.xlane.f32.xlu1 %v5566_v25 }
 0x942   : > { %5785 = vrot.lane.b32.xlu0 %v15747_v30, %s9302_s19 }
 0x946   : > { %5787 = vrot.lane.b32.xlu0 %v15748_v12, %s9302_s19 }
 0x94a   : > { %5805 = vrot.lane.b32.xlu0 %v15749_v35, %s9302_s19 }
 0x94b   : > { %5803 = vrot.lane.b32.xlu1 %v15750_v50, %s9302_s19  ;;  %v4462_v47 = vpop.xlane.xlu0 %4461  ;;  %v4904_v50 = vunpack.c.l.bf16 %v4846_v10 }
 0x94c   : > { %8841 = vrcp.f32 %v4462_v47  ;;  %v15756_v47 = vld [vmem:[#allocation41_spill] sm:$0xff] }
 0x94d   : > { %v4465_v16 = vpop.xlane.xlu1 %4464 }
 0x94e   : > { %8843 = vrcp.f32 %v4465_v16  ;;  %v5375_v16 = vsub.f32 %v15756_v47, %v13378_v9 }
 0x94f   : > { %v5798_v44 = vpop.permute.xlu0 %5797 }
 0x950   : > { %7724 = vmatprep.subr.bf16.mxu0 %v5798_v44  ;;  %v5445_v44 = vmul.f32 1.442695, %v5373_v45 }
 0x951   : > { %v13542_v27 = vpop.xlane.xlu1 %5336 }
 0x952   : > { %8845 = vpow2.f32 %v5445_v44 }
 0x953   : > { %v7580_v0 = vpop.f32.mrb[192].mxu0 }
 0x954   : > { %v7581_v17 = vpop.f32.mrb[193].mxu0 }
 0x955   : > { %v13544_v49 = vpop.xlane.xlu1 %5339  ;;  %v13546_v23 = vadd.f32 %v7581_v17, %v7580_v0  ;;  %v7583_v59 = vpop.f32.mrb[194].mxu0  ;;  %v15758_v17 = vld [vmem:[#allocation89_spill] sm:$0xff] }
 0x956   : > { %v8842_v60 = vpop.eup %8841  ;;  %v7584_v53 = vpop.f32.mrb[195].mxu0 }
 0x957   : > { %15751 = vst [vmem:[#allocation185_spill] sm:$0xff] %v13546_v23  ;;  %v13548_v51 = vadd.f32 %v7584_v53, %v7583_v59  ;;  %v4559_v28 = vmul.f32 %v8842_v60, %v13360_v5  ;;  %v4558_v39 = vmul.f32 %v8842_v60, %v13358_v19  ;;  %v15754_v5 = vld [vmem:[#allocation97_spill] sm:$0xff]  ;;  %v5376_v59 = vsub.f32 %v15758_v17, %v13378_v9  ;;  %v4847_v53 = vld [vmem:[#allocation5 + $0x3d8] sm:$0xff] }
 0x958   : > { %v8844_v20 = vpop.eup %8843  ;;  %v5374_v19 = vsub.f32 %v15754_v5, %v13394_v48  ;;  %v4906_v45 = vunpack.c.l.bf16 %v4847_v53 }
 0x959   : > { %15752 = vst [vmem:[#allocation58_spill] sm:$0xff] %v13548_v51  ;;  %v5782_v24 = vpop.permute.xlu1 %5781  ;;  %v4561_v37 = vmul.f32 %v8844_v20, %v13366_v26  ;;  %v4560_v4 = vmul.f32 %v8844_v20, %v13362_v11  ;;  %v4905_v11 = vunpack.c.h.bf16 %v4846_v10  ;;  %v15760_v20 = vld [vmem:[#allocation47_spill] sm:$0xff]  ;;  %v5451_v10 = vmul.f32 1.442695, %v5376_v59 }
 0x95a   : > { %7725 = vmatpush3.bf16.msra.mxu0 %v5782_v24  ;;  %v5447_v60 = vmul.f32 1.442695, %v5374_v19 }
 0x95b   : > { %v7586_v62 = vpop.f32.mrb[196].mxu0  ;;  %v4593_v42 = vpack.c.bf16 %v4561_v37, %v4559_v28  ;;  %v4592_v25 = vpack.c.bf16 %v4560_v4, %v4558_v39  ;;  %v15759_v28 = vld [vmem:[#allocation125_spill] sm:$0xff]  ;;  %v13574_v24 = vadd.f32 %v15760_v20, %v4905_v11  ;;  %v5449_v37 = vmul.f32 1.442695, %v5375_v16 }
 0x95c   : > { %v7587_v30 = vpop.f32.mrb[197].mxu0  ;;  %v13571_v39 = vadd.f32 %v15759_v28, %v4904_v50  ;;  %8847 = vpow2.f32 %v5447_v60  ;;  %v15764_v50 = vld [vmem:[#allocation212_spill] sm:$0xff]  ;;  %v13590_v44 = vpop.eup %8845 }
 0x95d   : > { %4794 = vmatprep.mubr.bf16.mxu0 %v4593_v42  ;;  %v13560_v12 = vadd.f32 %v7587_v30, %v7586_v62  ;;  %v7589_v35 = vpop.f32.mrb[198].mxu0  ;;  %v4907_v62 = vunpack.c.h.bf16 %v4847_v53  ;;  %8849 = vpow2.f32 %v5449_v37  ;;  %v15763_v30 = vld [vmem:[#allocation210_spill] sm:$0xff] }
 0x95e   : > { %4795 = vmatmul.mubr.bf16.gmra.mrb[252].mxu0 %v4592_v25  ;;  %v7590_v26 = vpop.f32.mrb[199].mxu0  ;;  %v5347_v5 = vmax.f32 %v13571_v39, %v13574_v24  ;;  %8851 = vpow2.f32 %v5451_v10 }
 0x95f   : > { %15755 = vst [vmem:[#allocation59_spill] sm:$0xff] %v13560_v12  ;;  %v13564_v0 = vadd.f32 %v7590_v26, %v7589_v35  ;;  %v13583_v35 = vadd.f32 %v15763_v30, %v4906_v45  ;;  %v13586_v26 = vadd.f32 %v15764_v50, %v4907_v62  ;;  %v15767_v62 = vld [vmem:[#allocation20_spill] sm:$0xff]  ;;  %v15770_v50 = vld [vmem:[#allocation86_spill] sm:$0xff] }
 0x960   : > { %v15769_v30 = vld [vmem:[#allocation88_spill] sm:$0xff] }
 0x961   : > { %15757 = vst [vmem:[#allocation85_spill] sm:$0xff] %v13564_v0  ;;  %v5350_v17 = vmax.f32 %v13583_v35, %v13586_v26 }
 0x963   : > { %v7592_v4 = vpop.f32.mrb[200].mxu0 }
 0x964   : > { %v7593_v61 = vpop.f32.mrb[201].mxu0 }
 0x965   : > { %v13576_v9 = vadd.f32 %v7593_v61, %v7592_v4  ;;  %v7595_v42 = vpop.f32.mrb[202].mxu0 }
 0x966   : > { %v7596_v25 = vpop.f32.mrb[203].mxu0  ;;  %v13596_v53 = vpop.eup %8847 }
 0x967   : > { %15761 = vst [vmem:[#allocation114_spill] sm:$0xff] %v13576_v9  ;;  %v13580_v19 = vadd.f32 %v7596_v25, %v7595_v42  ;;  %v13600_v37 = vpop.eup %8849  ;;  %v5569_v10 = vadd.f32 %v13596_v53, %v13590_v44  ;;  %v15768_v25 = vld [vmem:[#allocation21_spill] sm:$0xff] }
 0x968   : > { %v13606_v61 = vpop.eup %8851 }
 0x969   : > { %15762 = vst [vmem:[#allocation111_spill] sm:$0xff] %v13580_v19  ;;  %5348 = vmax.xlane.f32.xlu0 %v5347_v5  ;;  %v5572_v45 = vadd.f32 %v13606_v61, %v13600_v37 }
 0x96b   : > { %v7598_v47 = vpop.f32.mrb[204].mxu0 }
 0x96c   : > { %v7599_v16 = vpop.f32.mrb[205].mxu0 }
 0x96d   : > { %v13594_v59 = vadd.f32 %v7599_v16, %v7598_v47  ;;  %v7601_v60 = vpop.f32.mrb[206].mxu0 }
 0x96e   : > { %v7602_v28 = vpop.f32.mrb[207].mxu0 }
 0x96f   : > { %15765 = vst [vmem:[#allocation116_spill] sm:$0xff] %v13594_v59  ;;  %5351 = vmax.xlane.f32.xlu1 %v5350_v17  ;;  %v13598_v20 = vadd.f32 %v7602_v28, %v7601_v60  ;;  %v15778_v59 = vld [vmem:[#allocation56_spill] sm:$0xff] }
 0x971   : > { %15766 = vst [vmem:[#allocation36_spill] sm:$0xff] %v13598_v20 }
 0x973   : > { %5570 = vadd.xlane.f32.xlu1 %v5569_v10 }
 0x977   : > { %5573 = vadd.xlane.f32.xlu1 %v5572_v45 }
 0x97f   : > { %5789 = vrot.lane.b32.xlu0 %v15767_v62, %s9302_s19 }
 0x980   : > { %v5559_v42 = vpop.xlane.xlu0 %5558 }
 0x981   : > { %8853 = vrcp.f32 %v5559_v42  ;;  %v15771_v42 = vld [vmem:[#allocation66_spill] sm:$0xff] }
 0x983   : > { %5791 = vrot.lane.b32.xlu0 %v15768_v25, %s9302_s19 }
 0x984   : > { %v5800_v5 = vpop.permute.xlu0 %5799 }
 0x985   : > { %7726 = vmatprep.subr.bf16.mxu0 %v5800_v5  ;;  %v4848_v5 = vld [vmem:[#allocation5 + $0x3e0] sm:$0xff] }
 0x986   : > { %v4908_v4 = vunpack.c.l.bf16 %v4848_v5  ;;  %v4909_v11 = vunpack.c.h.bf16 %v4848_v5 }
 0x987   : > { %5809 = vrot.lane.b32.xlu0 %v15769_v30, %s9302_s19  ;;  %v5377_v30 = vsub.f32 %v15771_v42, %v13402_v43  ;;  %v15775_v42 = vld [vmem:[#allocation135_spill] sm:$0xff] }
 0x988   : > { %5807 = vrot.lane.b32.xlu1 %v15770_v50, %s9302_s19  ;;  %v5802_v17 = vpop.permute.xlu0 %5801  ;;  %v5380_v48 = vsub.f32 %v15775_v42, %v13396_v55  ;;  %v13644_v5 = vadd.f32 %v15778_v59, %v4909_v11  ;;  %v15780_v59 = vld [vmem:[#allocation173_spill] sm:$0xff] }
 0x98a   : > { %v5562_v47 = vpop.xlane.xlu1 %5561 }
 0x98b   : > { %8855 = vrcp.f32 %v5562_v47  ;;  %v8854_v60 = vpop.eup %8853 }
 0x98c   : > { %v13619_v10 = vmul.f32 %v8854_v60, %v13446_v22  ;;  %v5686_v62 = vmul.f32 %v8854_v60, %v13448_v15  ;;  %v15773_v15 = vld [vmem:[#allocation94_spill] sm:$0xff] }
 0x98d   : > { %v5379_v60 = vsub.f32 %v15773_v15, %v13396_v55 }
 0x98e   : > { %v5784_v16 = vpop.permute.xlu1 %5783 }
 0x98f   : > { %7727 = vmatpush3.bf16.msra.mxu0 %v5784_v16  ;;  %v15772_v16 = vld [vmem:[#allocation93_spill] sm:$0xff]  ;;  %v5457_v20 = vmul.f32 1.442695, %v5379_v60 }
 0x990   : > { %7728 = vmatprep.subr.bf16.mxu0 %v5802_v17  ;;  %v5378_v17 = vsub.f32 %v15772_v16, %v13402_v43  ;;  %v15777_v43 = vld [vmem:[#allocation55_spill] sm:$0xff] }
 0x991   : > { %v13641_v16 = vadd.f32 %v15777_v43, %v4908_v4 }
 0x992   : > { %v5455_v50 = vmul.f32 1.442695, %v5378_v17 }
 0x995   : > { %v8856_v28 = vpop.eup %8855 }
 0x996   : > { %v13622_v45 = vmul.f32 %v8856_v28, %v13460_v1  ;;  %v5688_v25 = vmul.f32 %v8856_v28, %v13462_v57  ;;  %v5453_v57 = vmul.f32 1.442695, %v5377_v30 }
 0x998   : > { %v5750_v47 = vpack.c.bf16 %v5688_v25, %v5686_v62  ;;  %v7604_v22 = vpop.f32.mrb[208].mxu0  ;;  %8857 = vpow2.f32 %v5453_v57  ;;  %v15781_v57 = vld [vmem:[#allocation60_spill] sm:$0xff] }
 0x999   : > { %v7605_v1 = vpop.f32.mrb[209].mxu0  ;;  %8859 = vpow2.f32 %v5455_v50 }
 0x99a   : > { %5861 = vmatprep.mubr.bf16.mxu0 %v5750_v47  ;;  %v13634_v28 = vadd.f32 %v7605_v1, %v7604_v22  ;;  %v7607_v32 = vpop.f32.mrb[210].mxu0  ;;  %v4849_v47 = vld [vmem:[#allocation5 + $0x3e8] sm:$0xff]  ;;  %v5459_v22 = vmul.f32 1.442695, %v5380_v48  ;;  %8861 = vpow2.f32 %v5457_v20 }
 0x99b   : > { %v7608_v62 = vpop.f32.mrb[211].mxu0  ;;  %v4910_v1 = vunpack.c.l.bf16 %v4849_v47  ;;  %v4911_v55 = vunpack.c.h.bf16 %v4849_v47 }
 0x99c   : > { %15774 = vst [vmem:[#allocation110_spill] sm:$0xff] %v13634_v28  ;;  %v13638_v25 = vadd.f32 %v7608_v62, %v7607_v32  ;;  %v5353_v32 = vmax.f32 %v13641_v16, %v13644_v5  ;;  %8863 = vpow2.f32 %v5459_v22 }
 0x99d   : > { %v13653_v60 = vadd.f32 %v15780_v59, %v4910_v1  ;;  %v13656_v42 = vadd.f32 %v15781_v57, %v4911_v55 }
 0x99e   : > { %15776 = vst [vmem:[#allocation187_spill] sm:$0xff] %v13638_v25 }
 0x99f   : > { %v5356_v20 = vmax.f32 %v13653_v60, %v13656_v42 }
 0x9a0   : > { %v7610_v17 = vpop.f32.mrb[212].mxu0 }
 0x9a1   : > { %v7611_v4 = vpop.f32.mrb[213].mxu0 }
 0x9a2   : > { %v13650_v15 = vadd.f32 %v7611_v4, %v7610_v17  ;;  %v7613_v11 = vpop.f32.mrb[214].mxu0  ;;  %v13662_v43 = vpop.eup %8857 }
 0x9a3   : > { %v7614_v48 = vpop.f32.mrb[215].mxu0  ;;  %v13666_v47 = vpop.eup %8859 }
 0x9a4   : > { %15779 = vst [vmem:[#allocation188_spill] sm:$0xff] %v13650_v15  ;;  %v13658_v50 = vadd.f32 %v7614_v48, %v7613_v11  ;;  %v13670_v4 = vpop.eup %8861  ;;  %v5575_v11 = vadd.f32 %v13666_v47, %v13662_v43  ;;  %v15787_v48 = vld [vmem:[#allocation77_spill] sm:$0xff] }
 0x9a6   : > { %5354 = vmax.xlane.f32.xlu0 %v5353_v32  ;;  %15782 = vst [vmem:[#allocation120_spill] sm:$0xff] %v13658_v50  ;;  %v13674_v59 = vpop.eup %8863 }
 0x9a8   : > { %v7616_v22 = vpop.f32.mrb[216].mxu0 }
 0x9a9   : > { %v7617_v1 = vpop.f32.mrb[217].mxu0 }
 0x9aa   : > { %v13668_v17 = vadd.f32 %v7617_v1, %v7616_v22  ;;  %v7619_v55 = vpop.f32.mrb[218].mxu0 }
 0x9ab   : > { %v7620_v32 = vpop.f32.mrb[219].mxu0 }
 0x9ac   : > { %5357 = vmax.xlane.f32.xlu1 %v5356_v20  ;;  %15783 = vst [vmem:[#allocation121_spill] sm:$0xff] %v13668_v17  ;;  %v13676_v57 = vadd.f32 %v7620_v32, %v7619_v55  ;;  %v5578_v20 = vadd.f32 %v13674_v59, %v13670_v4  ;;  %v15794_v55 = vld [vmem:[#allocation167_spill] sm:$0xff] }
 0x9ae   : > { %15784 = vst [vmem:[#allocation128_spill] sm:$0xff] %v13676_v57 }
 0x9b0   : > { %5576 = vadd.xlane.f32.xlu1 %v5575_v11  ;;  %v7622_v22 = vpop.f32.mrb[220].mxu0 }
 0x9b1   : > { %v7623_v1 = vpop.f32.mrb[221].mxu0 }
 0x9b2   : > { %v13682_v62 = vadd.f32 %v7623_v1, %v7622_v22  ;;  %v7625_v30 = vpop.f32.mrb[222].mxu0 }
 0x9b3   : > { %v7626_v15 = vpop.f32.mrb[223].mxu0 }
 0x9b4   : > { %5579 = vadd.xlane.f32.xlu1 %v5578_v20  ;;  %15785 = vst [vmem:[#allocation191_spill] sm:$0xff] %v13682_v62  ;;  %v13684_v50 = vadd.f32 %v7626_v15, %v7625_v30  ;;  %v15790_v15 = vld [vmem:[#allocation40_spill] sm:$0xff] }
 0x9b6   : > { %15786 = vst [vmem:[#allocation118_spill] sm:$0xff] %v13684_v50 }
 0x9b8   : > { %v7628_v11 = vpop.f32.mrb[224].mxu0 }
 0x9b9   : > { %v13688_v32 = vpop.xlane.xlu0 %5342  ;;  %v7629_v28 = vpop.f32.mrb[225].mxu0 }
 0x9ba   : > { %v13692_v17 = vadd.f32 %v7629_v28, %v7628_v11  ;;  %v7631_v57 = vpop.f32.mrb[226].mxu0  ;;  %v15792_v11 = vld [vmem:[#allocation24_spill] sm:$0xff] }
 0x9bb   : > { %v7632_v22 = vpop.f32.mrb[227].mxu0 }
 0x9bc   : > { %5793 = vrot.lane.b32.xlu0 %v15787_v48, %s9302_s19  ;;  %15788 = vst [vmem:[#allocation119_spill] sm:$0xff] %v13692_v17  ;;  %v13694_v1 = vadd.f32 %v7632_v22, %v7631_v57  ;;  %v5381_v17 = vsub.f32 %v15794_v55, %v13412_v41 }
 0x9bd   : > { %v5786_v20 = vpop.permute.xlu0 %5785 }
 0x9be   : > { %7729 = vmatpush3.bf16.msra.mxu0 %v5786_v20  ;;  %15789 = vst [vmem:[#allocation194_spill] sm:$0xff] %v13694_v1 }
 0x9bf   : > { %v13696_v30 = vpop.xlane.xlu1 %5345 }
 0x9c0   : > { %5795 = vrot.lane.b32.xlu0 %v15790_v15, %s9302_s19  ;;  %v7634_v62 = vpop.f32.mrb[228].mxu0  ;;  %v15798_v15 = vld [vmem:[#allocation48_spill] sm:$0xff] }
 0x9c1   : > { %v7635_v25 = vpop.f32.mrb[229].mxu0  ;;  %v5788_v20 = vpop.permute.xlu0 %5787 }
 0x9c2   : > { %v13702_v48 = vadd.f32 %v7635_v25, %v7634_v62  ;;  %v7637_v28 = vpop.f32.mrb[230].mxu0  ;;  %v15795_v62 = vld [vmem:[#allocation170_spill] sm:$0xff] }
 0x9c3   : > { %v5565_v50 = vpop.xlane.xlu1 %5564  ;;  %v7638_v57 = vpop.f32.mrb[231].mxu0  ;;  %v5382_v19 = vsub.f32 %v15795_v62, %v13412_v41  ;;  %v4850_v62 = vld [vmem:[#allocation5 + $0x3f0] sm:$0xff] }
 0x9c4   : > { %15791 = vst [vmem:[#allocation195_spill] sm:$0xff] %v13702_v48  ;;  %8865 = vrcp.f32 %v5565_v50  ;;  %v13706_v22 = vadd.f32 %v7638_v57, %v7637_v28  ;;  %v15796_v50 = vld [vmem:[#allocation68_spill] sm:$0xff]  ;;  %v5384_v48 = vsub.f32 %v15798_v15, %v13404_v34 }
 0x9c5   : > { %5811 = vrot.lane.b32.xlu1 %v15792_v11, %s9302_s19  ;;  %v5383_v11 = vsub.f32 %v15796_v50, %v13404_v34  ;;  %v5806_v28 = vpop.permute.xlu0 %5805  ;;  %v5463_v41 = vmul.f32 1.442695, %v5382_v19  ;;  %v15800_v34 = vld [vmem:[#allocation95_spill] sm:$0xff]  ;;  %v15805_v50 = vld [vmem:[#allocation73_spill] sm:$0xff] }
 0x9c6   : > { %15793 = vst [vmem:[#allocation127_spill] sm:$0xff] %v13706_v22  ;;  %v5461_v22 = vmul.f32 1.442695, %v5381_v17  ;;  %v5386_v17 = vsub.f32 %v15800_v34, %v13426_v18 }
 0x9c7   : > { %v5568_v9 = vpop.xlane.xlu1 %5567 }
 0x9c8   : > { %8867 = vrcp.f32 %v5568_v9  ;;  %v7640_v1 = vpop.f32.mrb[232].mxu0 }
 0x9c9   : > { %v7641_v23 = vpop.f32.mrb[233].mxu0  ;;  %8869 = vpow2.f32 %v5461_v22  ;;  %v4913_v22 = vunpack.c.h.bf16 %v4850_v62 }
 0x9ca   : > { %v13716_v57 = vadd.f32 %v7641_v23, %v7640_v1  ;;  %v7643_v9 = vpop.f32.mrb[234].mxu0  ;;  %v5467_v23 = vmul.f32 1.442695, %v5384_v48  ;;  %v5385_v1 = vsub.f32 %v13162_v2, %v13426_v18  ;;  %v4912_v48 = vunpack.c.l.bf16 %v4850_v62  ;;  %v15801_v2 = vld [vmem:[#allocation171_spill] sm:$0xff] }
 0x9cb   : > { %v5804_v25 = vpop.permute.xlu1 %5803  ;;  %v7644_v55 = vpop.f32.mrb[235].mxu0  ;;  %8871 = vpow2.f32 %v5463_v41 }
 0x9cc   : > { %7730 = vmatprep.subr.bf16.mxu0 %v5804_v25  ;;  %15797 = vst [vmem:[#allocation192_spill] sm:$0xff] %v13716_v57  ;;  %v13720_v51 = vadd.f32 %v7644_v55, %v7643_v9  ;;  %v5465_v25 = vmul.f32 1.442695, %v5383_v11  ;;  %v5387_v9 = vsub.f32 %v15801_v2, %v13414_v29  ;;  %v5471_v2 = vmul.f32 1.442695, %v5386_v17  ;;  %v15808_v57 = vld [vmem:[#allocation198_spill] sm:$0xff] }
 0x9cd   : > { %7731 = vmatpush3.bf16.msra.mxu0 %v5788_v20 }
 0x9ce   : > { %7732 = vmatprep.subr.bf16.mxu0 %v5806_v28  ;;  %15799 = vst [vmem:[#allocation130_spill] sm:$0xff] %v13720_v51  ;;  %v8866_v12 = vpop.eup %8865  ;;  %8873 = vpow2.f32 %v5465_v25  ;;  %v13759_v51 = vadd.f32 %v15808_v57, %v4912_v48  ;;  %v15809_v25 = vld [vmem:[#allocation67_spill] sm:$0xff] }
 0x9cf   : > { %v13729_v20 = vmul.f32 %v8866_v12, %v13516_v54  ;;  %v13735_v11 = vmul.f32 %v8866_v12, %v13520_v63  ;;  %v15802_v54 = vld [vmem:[#allocation168_spill] sm:$0xff]  ;;  %v5469_v12 = vmul.f32 1.442695, %v5385_v1  ;;  %8875 = vpow2.f32 %v5467_v23 }
 0x9d0   : > { %v7646_v19 = vpop.f32.mrb[236].mxu0  ;;  %v5388_v55 = vsub.f32 %v15802_v54, %v13414_v29  ;;  %v5389_v29 = vsub.f32 %v15805_v50, %v13438_v58  ;;  %v13762_v1 = vadd.f32 %v15809_v25, %v4913_v22  ;;  %v15811_v50 = vld [vmem:[#allocation142_spill] sm:$0xff] }
 0x9d1   : > { %v7647_v18 = vpop.f32.mrb[237].mxu0  ;;  %8877 = vpow2.f32 %v5469_v12  ;;  %v5392_v17 = vsub.f32 %v15811_v50, %v13428_v21 }
 0x9d2   : > { %v8868_v0 = vpop.eup %8867  ;;  %v13746_v34 = vadd.f32 %v7647_v18, %v7646_v19  ;;  %v7649_v63 = vpop.f32.mrb[238].mxu0  ;;  %v15807_v19 = vld [vmem:[#allocation158_spill] sm:$0xff]  ;;  %15810 = vst [vmem:[#allocation201_spill] sm:$0xff] %v13762_v1  ;;  %8879 = vpow2.f32 %v5471_v2  ;;  %v5359_v12 = vmax.f32 %v13759_v51, %v13762_v1 }
 0x9d3   : > { %v13732_v15 = vmul.f32 %v8868_v0, %v13522_v38  ;;  %v13738_v28 = vmul.f32 %v8868_v0, %v13526_v33  ;;  %v15804_v0 = vld [vmem:[#allocation96_spill] sm:$0xff]  ;;  %v7650_v62 = vpop.f32.mrb[239].mxu0  ;;  %v5473_v38 = vmul.f32 1.442695, %v5387_v9  ;;  %v5390_v18 = vsub.f32 %v15807_v19, %v13438_v58  ;;  %v4851_v33 = vld [vmem:[#allocation5 + $0x3f8] sm:$0xff]  ;;  %v13770_v48 = vpop.eup %8869 }
 0x9d4   : > { %15803 = vst [vmem:[#allocation131_spill] sm:$0xff] %v13746_v34  ;;  %v5391_v41 = vsub.f32 %v15804_v0, %v13428_v21  ;;  %v13754_v54 = vadd.f32 %v7650_v62, %v7649_v63  ;;  %v5475_v0 = vmul.f32 1.442695, %v5388_v55  ;;  %v5477_v9 = vmul.f32 1.442695, %v5389_v29  ;;  %v15812_v58 = vld [vmem:[#allocation159_spill] sm:$0xff] }
 0x9d5   : > { %v5393_v62 = vsub.f32 %v15812_v58, %v13450_v13  ;;  %v4914_v22 = vunpack.c.l.bf16 %v4851_v33  ;;  %8881 = vpow2.f32 %v5473_v38  ;;  %v5479_v19 = vmul.f32 1.442695, %v5390_v18  ;;  %v15813_v55 = vld [vmem:[#allocation71_spill] sm:$0xff]  ;;  %v15814_v21 = vld [vmem:[#allocation162_spill] sm:$0xff]  ;;  %v13780_v50 = vpop.eup %8871 }
 0x9d6   : > { %15806 = vst [vmem:[#allocation200_spill] sm:$0xff] %v13754_v54  ;;  %v5481_v63 = vmul.f32 1.442695, %v5391_v41  ;;  %v5394_v25 = vsub.f32 %v15813_v55, %v13450_v13  ;;  %8883 = vpow2.f32 %v5475_v0  ;;  %v5395_v41 = vsub.f32 %v15814_v21, %v13440_v8  ;;  %15816 = vst [vmem:[#allocation177_spill] sm:$0xff] %v13780_v50  ;;  %v15817_v18 = vld [vmem:[#allocation163_spill] sm:$0xff]  ;;  %v15818_v54 = vld [vmem:[#allocation76_spill] sm:$0xff] }
 0x9d7   : > { %v4915_v58 = vunpack.c.h.bf16 %v4851_v33  ;;  %v5483_v38 = vmul.f32 1.442695, %v5392_v17  ;;  %v5396_v34 = vsub.f32 %v15817_v18, %v13440_v8  ;;  %v5485_v55 = vmul.f32 1.442695, %v5393_v62  ;;  %v15821_v17 = vld [vmem:[#allocation172_spill] sm:$0xff] }
 0x9d8   : > { %v7652_v57 = vpop.f32.mrb[240].mxu0  ;;  %8885 = vpow2.f32 %v5481_v63  ;;  %v5397_v0 = vsub.f32 %v15818_v54, %v13464_v46  ;;  %v5487_v33 = vmul.f32 1.442695, %v5394_v25  ;;  %v5398_v63 = vsub.f32 %v15821_v17, %v13464_v46  ;;  %v15823_v62 = vld [vmem:[#allocation72_spill] sm:$0xff] }
 0x9d9   : > { %v7653_v23 = vpop.f32.mrb[241].mxu0  ;;  %8887 = vpow2.f32 %v5477_v9  ;;  %v5489_v9 = vmul.f32 1.442695, %v5395_v41  ;;  %v5399_v18 = vsub.f32 %v15823_v62, %v13458_v40  ;;  %v15825_v25 = vld [vmem:[#allocation44_spill] sm:$0xff]  ;;  %v15826_v41 = vld [vmem:[#allocation166_spill] sm:$0xff] }
 0x9da   : > { %v13778_v2 = vadd.f32 %v7653_v23, %v7652_v57  ;;  %v7655_v29 = vpop.f32.mrb[242].mxu0  ;;  %v13788_v23 = vpop.eup %8873  ;;  %v15820_v57 = vld [vmem:[#allocation153_spill] sm:$0xff]  ;;  %8889 = vpow2.f32 %v5479_v19  ;;  %v5491_v19 = vmul.f32 1.442695, %v5396_v34  ;;  %v5400_v46 = vsub.f32 %v15825_v25, %v13458_v40 }
 0x9db   : > { %v7656_v13 = vpop.f32.mrb[243].mxu0  ;;  %v13791_v21 = vadd.f32 %v15820_v57, %v4914_v22  ;;  %v13795_v8 = vpop.eup %8875  ;;  %8891 = vpow2.f32 %v5483_v38  ;;  %v5401_v57 = vsub.f32 %v15826_v41, %v13486_v3  ;;  %v5495_v54 = vmul.f32 1.442695, %v5398_v63 }
 0x9dc   : > { %15815 = vst [vmem:[#allocation25_spill] sm:$0xff] %v13778_v2  ;;  %v13786_v1 = vadd.f32 %v7656_v13, %v7655_v29  ;;  %15822 = vst [vmem:[#allocation124_spill] sm:$0xff] %v13795_v8  ;;  %v15824_v29 = vld [vmem:[#allocation138_spill] sm:$0xff]  ;;  %8893 = vpow2.f32 %v5485_v55  ;;  %v5493_v13 = vmul.f32 1.442695, %v5397_v0  ;;  %v13810_v62 = vpop.eup %8877  ;;  %v15827_v2 = vld [vmem:[#allocation75_spill] sm:$0xff]  ;;  %v5584_v34 = vadd.f32 %v13795_v8, %v13788_v23 }
 0x9dd   : > { %v13804_v22 = vadd.f32 %v15824_v29, %v4915_v58  ;;  %8895 = vpow2.f32 %v5487_v33  ;;  %v5402_v58 = vsub.f32 %v15827_v2, %v13486_v3  ;;  %v13816_v38 = vpop.eup %8879  ;;  %v5497_v40 = vmul.f32 1.442695, %v5399_v18  ;;  %v15828_v55 = vld [vmem:[#allocation57_spill] sm:$0xff]  ;;  %v15830_v2 = vld [vmem:[#allocation28_spill] sm:$0xff] }
 0x9de   : > { %15819 = vst [vmem:[#allocation52_spill] sm:$0xff] %v13786_v1  ;;  %8897 = vpow2.f32 %v5489_v9  ;;  %v5403_v0 = vsub.f32 %v15828_v55, %v13478_v6  ;;  %v5499_v3 = vmul.f32 1.442695, %v5400_v46  ;;  %v5404_v63 = vsub.f32 %v15830_v2, %v13478_v6  ;;  %v15831_v18 = vld [vmem:[#allocation169_spill] sm:$0xff] }
 0x9df   : > { %5360 = vmax.xlane.f32.xlu0 %v5359_v12  ;;  %v5581_v12 = vadd.f32 %v13780_v50, %v13770_v48  ;;  %v13822_v41 = vpop.eup %8881  ;;  %v5362_v33 = vmax.f32 %v13791_v21, %v13804_v22  ;;  %8899 = vpow2.f32 %v5491_v19  ;;  %v5501_v9 = vmul.f32 1.442695, %v5401_v57  ;;  %v15833_v19 = vld [vmem:[#allocation129_spill] sm:$0xff] }
 0x9e0   : > { %v7658_v17 = vpop.f32.mrb[244].mxu0  ;;  %v13828_v8 = vpop.eup %8883  ;;  %8901 = vpow2.f32 %v5493_v13  ;;  %v5503_v50 = vmul.f32 1.442695, %v5402_v58  ;;  %v5406_v46 = vsub.f32 %v15833_v19, %v13534_v7  ;;  %v5587_v6 = vadd.f32 %v13816_v38, %v13810_v62  ;;  %v15834_v57 = vld [vmem:[#allocation113_spill] sm:$0xff]  ;;  %v15836_v19 = vld [vmem:[#allocation199_spill] sm:$0xff] }
 0x9e1   : > { %v7659_v29 = vpop.f32.mrb[245].mxu0  ;;  %8903 = vpow2.f32 %v5495_v54  ;;  %v5505_v13 = vmul.f32 1.442695, %v5403_v0  ;;  %v5507_v54 = vmul.f32 1.442695, %v5404_v63  ;;  %v5590_v0 = vadd.f32 %v13828_v8, %v13822_v41 }
 0x9e2   : > { %v13820_v25 = vadd.f32 %v7659_v29, %v7658_v17  ;;  %v5405_v17 = vsub.f32 %v15831_v18, %v13534_v7  ;;  %v13834_v55 = vpop.eup %8885  ;;  %8905 = vpow2.f32 %v5497_v40  ;;  %v5407_v18 = vsub.f32 %v15834_v57, %v13536_v56  ;;  %v15835_v7 = vld [vmem:[#allocation27_spill] sm:$0xff] }
 0x9e3   : > { %5582 = vadd.xlane.f32.xlu0 %v5581_v12  ;;  %v7661_v12 = vpop.f32.mrb[246].mxu0  ;;  %v13840_v2 = vpop.eup %8887  ;;  %8907 = vpow2.f32 %v5499_v3  ;;  %v5408_v58 = vsub.f32 %v15835_v7, %v13536_v56  ;;  %v5409_v40 = vsub.f32 %v15836_v19, %v13542_v27 }
 0x9e4   : > { %15829 = vst [vmem:[#allocation69_spill] sm:$0xff] %v13820_v25  ;;  %v7662_v1 = vpop.f32.mrb[247].mxu0  ;;  %8909 = vpow2.f32 %v5501_v9  ;;  %v5513_v56 = vmul.f32 1.442695, %v5407_v18  ;;  %v15838_v9 = vld [vmem:[#allocation109_spill] sm:$0xff] }
 0x9e5   : > { %v13832_v29 = vadd.f32 %v7662_v1, %v7661_v12  ;;  %v5509_v12 = vmul.f32 1.442695, %v5405_v17  ;;  %8911 = vpow2.f32 %v5503_v50  ;;  %v15837_v1 = vld [vmem:[#allocation108_spill] sm:$0xff]  ;;  %v5411_v17 = vsub.f32 %v15838_v9, %v13544_v49 }
 0x9e6   : > { %v5410_v3 = vsub.f32 %v15837_v1, %v13542_v27  ;;  %8913 = vpow2.f32 %v5505_v13  ;;  %v5515_v19 = vmul.f32 1.442695, %v5408_v58  ;;  %v15839_v50 = vld [vmem:[#allocation184_spill] sm:$0xff]  ;;  %v5517_v27 = vmul.f32 1.442695, %v5409_v40 }
 0x9e7   : > { %15832 = vst [vmem:[#allocation178_spill] sm:$0xff] %v13832_v29  ;;  %5585 = vadd.xlane.f32.xlu0 %v5584_v34  ;;  %v13846_v34 = vpop.eup %8889  ;;  %8915 = vpow2.f32 %v5507_v54  ;;  %v5413_v13 = vsub.f32 %v13503_v31, %v13688_v32  ;;  %v5414_v54 = vsub.f32 %v13506_v14, %v13688_v32 }
 0x9e8   : > { %v13854_v57 = vpop.eup %8891  ;;  %8917 = vpow2.f32 %v5509_v12  ;;  %v5415_v12 = vsub.f32 %v13511_v36, %v13696_v30 }
 0x9e9   : > { %5363 = vmax.xlane.f32.xlu1 %v5362_v33  ;;  %v5511_v33 = vmul.f32 1.442695, %v5406_v46  ;;  %v13858_v63 = vpop.eup %8893  ;;  %v5412_v46 = vsub.f32 %v15839_v50, %v13544_v49  ;;  %v5596_v18 = vadd.f32 %v13854_v57, %v13834_v55  ;;  %v5521_v49 = vmul.f32 1.442695, %v5411_v17 }
 0x9ea   : > { %v13864_v7 = vpop.eup %8895  ;;  %v5525_v14 = vmul.f32 1.442695, %v5413_v13 }
 0x9eb   : > { %5588 = vadd.xlane.f32.xlu0 %v5587_v6  ;;  %v5593_v6 = vadd.f32 %v13846_v34, %v13840_v2  ;;  %v13868_v25 = vpop.eup %8897  ;;  %8919 = vpow2.f32 %v5511_v33  ;;  %v5599_v31 = vadd.f32 %v13864_v7, %v13858_v63  ;;  %v5523_v9 = vmul.f32 1.442695, %v5412_v46 }
 0x9ec   : > { %v13874_v1 = vpop.eup %8899  ;;  %8921 = vpow2.f32 %v5513_v56  ;;  %v5416_v33 = vsub.f32 %v13514_v52, %v13696_v30  ;;  %v5527_v56 = vmul.f32 1.442695, %v5414_v54 }
 0x9ed   : > { %5591 = vadd.xlane.f32.xlu1 %v5590_v0  ;;  %v5519_v0 = vmul.f32 1.442695, %v5410_v3  ;;  %v13878_v58 = vpop.eup %8901  ;;  %8923 = vpow2.f32 %v5515_v19  ;;  %v5602_v32 = vadd.f32 %v13874_v1, %v13868_v25 }
 0x9ee   : > { %v13884_v40 = vpop.eup %8903  ;;  %8925 = vpow2.f32 %v5517_v27  ;;  %v5531_v19 = vmul.f32 1.442695, %v5416_v33 }
 0x9ef   : > { %5594 = vadd.xlane.f32.xlu0 %v5593_v6  ;;  %v13888_v3 = vpop.eup %8905  ;;  %8927 = vpow2.f32 %v5519_v0  ;;  %v5529_v6 = vmul.f32 1.442695, %v5415_v12  ;;  %v5605_v52 = vadd.f32 %v13884_v40, %v13878_v58 }
 0x9f0   : > { %v13892_v36 = vpop.eup %8907  ;;  %8929 = vpow2.f32 %v5521_v49 }
 0x9f1   : > { %5597 = vadd.xlane.f32.xlu1 %v5596_v18  ;;  %v13894_v17 = vpop.eup %8909  ;;  %8931 = vpow2.f32 %v5523_v9  ;;  %v5608_v0 = vadd.f32 %v13892_v36, %v13888_v3 }
 0x9f2   : > { %v13898_v30 = vpop.eup %8911  ;;  %8933 = vpow2.f32 %v5525_v14 }
 0x9f3   : > { %5600 = vadd.xlane.f32.xlu0 %v5599_v31  ;;  %v13900_v27 = vpop.eup %8913  ;;  %8935 = vpow2.f32 %v5527_v56 }
 0x9f4   : > { %v13906_v49 = vpop.eup %8915  ;;  %8937 = vpow2.f32 %v5529_v6 }
 0x9f5   : > { %5603 = vadd.xlane.f32.xlu1 %v5602_v32  ;;  %v13910_v9 = vpop.eup %8917  ;;  %8939 = vpow2.f32 %v5531_v19  ;;  %v5614_v6 = vadd.f32 %v13906_v49, %v13900_v27 }
 0x9f6   : > { %v5349_v50 = vpop.xlane.xlu0 %5348  ;;  %v7664_v46 = vpop.f32.mrb[248].mxu0 }
 0x9f7   : > { %v5417_v13 = vsub.f32 %v13571_v39, %v5349_v50  ;;  %v5418_v18 = vsub.f32 %v13574_v24, %v5349_v50  ;;  %5606 = vadd.xlane.f32.xlu0 %v5605_v52  ;;  %v7665_v54 = vpop.f32.mrb[249].mxu0  ;;  %v5611_v24 = vadd.f32 %v13898_v30, %v13894_v17  ;;  %v13914_v32 = vpop.eup %8919 }
 0x9f8   : > { %v13908_v12 = vadd.f32 %v7665_v54, %v7664_v46  ;;  %v7667_v31 = vpop.f32.mrb[250].mxu0  ;;  %v13918_v56 = vpop.eup %8921 }
 0x9f9   : > { %v5533_v33 = vmul.f32 1.442695, %v5417_v13  ;;  %v5535_v14 = vmul.f32 1.442695, %v5418_v18  ;;  %5609 = vadd.xlane.f32.xlu1 %v5608_v0  ;;  %v7668_v39 = vpop.f32.mrb[251].mxu0  ;;  %15842 = vst [vmem:[#allocation65_spill] sm:$0xff] %v13918_v56  ;;  %v13922_v46 = vpop.eup %8923 }
 0x9fa   : > { %15840 = vst [vmem:[#allocation179_spill] sm:$0xff] %v13908_v12  ;;  %v13916_v52 = vadd.f32 %v7668_v39, %v7667_v31  ;;  %v5790_v50 = vpop.permute.xlu0 %5789  ;;  %v13926_v0 = vpop.eup %8925  ;;  %v5617_v31 = vadd.f32 %v13914_v32, %v13910_v9 }
 0x9fb   : > { %8941 = vpow2.f32 %v5533_v33  ;;  %5612 = vadd.xlane.f32.xlu0 %v5611_v24  ;;  %7733 = vmatpush3.bf16.msra.mxu0 %v5790_v50  ;;  %15843 = vst [vmem:[#allocation203_spill] sm:$0xff] %v13926_v0  ;;  %v13932_v33 = vpop.eup %8927  ;;  %v5620_v50 = vadd.f32 %v13922_v46, %v13918_v56 }
 0x9fc   : > { %15841 = vst [vmem:[#allocation70_spill] sm:$0xff] %v13916_v52  ;;  %8943 = vpow2.f32 %v5535_v14  ;;  %v5352_v18 = vpop.xlane.xlu1 %5351  ;;  %15844 = vst [vmem:[#allocation204_spill] sm:$0xff] %v13932_v33  ;;  %v13934_v39 = vpop.eup %8929 }
 0x9fd   : > { %v5419_v19 = vsub.f32 %v13583_v35, %v5352_v18  ;;  %v5420_v54 = vsub.f32 %v13586_v26, %v5352_v18  ;;  %5615 = vadd.xlane.f32.xlu1 %v5614_v6  ;;  %15845 = vst [vmem:[#allocation206_spill] sm:$0xff] %v13934_v39  ;;  %v13938_v13 = vpop.eup %8931  ;;  %v5623_v26 = vadd.f32 %v13932_v33, %v13926_v0 }
 0x9fe   : > { %15846 = vst [vmem:[#allocation207_spill] sm:$0xff] %v13938_v13  ;;  %v13940_v35 = vpop.eup %8933 }
 0x9ff   : > { %v5537_v24 = vmul.f32 1.442695, %v5419_v19  ;;  %v5539_v14 = vmul.f32 1.442695, %v5420_v54  ;;  %5618 = vadd.xlane.f32.xlu0 %v5617_v31  ;;  %15847 = vst [vmem:[#allocation104_spill] sm:$0xff] %v13940_v35  ;;  %v13944_v6 = vpop.eup %8935  ;;  %v5626_v19 = vadd.f32 %v13938_v13, %v13934_v39  ;;  %v5792_v31 = vpop.permute.xlu0 %5791 }
 0xa00   : > { %v5571_v12 = vpop.xlane.xlu1 %5570  ;;  %15848 = vst [vmem:[#allocation92_spill] sm:$0xff] %v13944_v6  ;;  %v13946_v18 = vpop.eup %8937 }
 0xa01   : > { %8945 = vpow2.f32 %v5537_v24  ;;  %5621 = vadd.xlane.f32.xlu1 %v5620_v50  ;;  %15849 = vst [vmem:[#allocation91_spill] sm:$0xff] %v13946_v18  ;;  %v13950_v54 = vpop.eup %8939  ;;  %v5629_v24 = vadd.f32 %v13944_v6, %v13940_v35 }
 0xa02   : > { %8947 = vpow2.f32 %v5539_v14  ;;  %15850 = vst [vmem:[#allocation150_spill] sm:$0xff] %v13950_v54  ;;  %v5632_v14 = vadd.f32 %v13950_v54, %v13946_v18 }
 0xa03   : > { %5624 = vadd.xlane.f32.xlu0 %v5623_v26  ;;  %v5810_v0 = vpop.permute.xlu0 %5809 }
 0xa04   : > { %v5574_v52 = vpop.xlane.xlu1 %5573 }
 0xa05   : > { %v13952_v29 = vpop.eup %8941  ;;  %5627 = vadd.xlane.f32.xlu1 %v5626_v19 }
 0xa06   : > { %15851 = vst [vmem:[#allocation182_spill] sm:$0xff] %v13952_v29  ;;  %v13956_v50 = vpop.eup %8943 }
 0xa07   : > { %15852 = vst [vmem:[#allocation157_spill] sm:$0xff] %v13956_v50  ;;  %5630 = vadd.xlane.f32.xlu0 %v5629_v24  ;;  %v5635_v39 = vadd.f32 %v13956_v50, %v13952_v29 }
 0xa08   : > { %v5808_v26 = vpop.permute.xlu1 %5807 }
 0xa09   : > { %5633 = vadd.xlane.f32.xlu1 %v5632_v14  ;;  %7734 = vmatprep.subr.bf16.mxu0 %v5808_v26 }
 0xa0a   : > { %7735 = vmatpush3.bf16.msra.mxu0 %v5792_v31 }
 0xa0b   : > { %v13962_v13 = vpop.eup %8945  ;;  %7736 = vmatprep.subr.bf16.mxu0 %v5810_v0  ;;  %5636 = vadd.xlane.f32.xlu0 %v5635_v39 }
 0xa0c   : > { %15853 = vst [vmem:[#allocation30_spill] sm:$0xff] %v13962_v13  ;;  %v13964_v19 = vpop.eup %8947 }
 0xa0d   : > { %15854 = vst [vmem:[#allocation133_spill] sm:$0xff] %v13964_v19  ;;  %v5638_v24 = vadd.f32 %v13964_v19, %v13962_v13 }
 0xa0f   : > { %5639 = vadd.xlane.f32.xlu1 %v5638_v24 }
 0xa31   : > { %v7670_v35 = vpop.f32.mrb[252].mxu0 }
 0xa32   : > { %v7671_v18 = vpop.f32.mrb[253].mxu0 }
 0xa33   : > { %v13968_v54 = vadd.f32 %v7671_v18, %v7670_v35  ;;  %v7673_v14 = vpop.f32.mrb[254].mxu0  ;;  %v5355_v26 = vpop.xlane.xlu0 %5354 }
 0xa34   : > { %v7674_v6 = vpop.f32.mrb[255].mxu0  ;;  %v5421_v29 = vsub.f32 %v13641_v16, %v5355_v26  ;;  %v5422_v31 = vsub.f32 %v13644_v5, %v5355_v26 }
 0xa35   : > { %v13972_v50 = vadd.f32 %v7674_v6, %v7673_v14 }
 0xa36   : > { %v5541_v0 = vmul.f32 1.442695, %v5421_v29  ;;  %v5543_v39 = vmul.f32 1.442695, %v5422_v31  ;;  %v15856_v31 = vpack.c.bf16 %v13738_v28, %v13735_v11 }
 0xa37   : > { %v4818_v33 = vpack.c.bf16 %v13972_v50, %v13968_v54  ;;  %v5794_v13 = vpop.permute.xlu0 %5793 }
 0xa38   : > { %8949 = vpow2.f32 %v5541_v0  ;;  %7737 = vmatpush3.bf16.msra.mxu0 %v5794_v13 }
 0xa39   : > { %8951 = vpow2.f32 %v5543_v39  ;;  %v5358_v35 = vpop.xlane.xlu1 %5357 }
 0xa3a   : > { %v5423_v18 = vsub.f32 %v13653_v60, %v5358_v35  ;;  %v5424_v24 = vsub.f32 %v13656_v42, %v5358_v35 }
 0xa3b   : > { %v5796_v26 = vpop.permute.xlu0 %5795 }
 0xa3c   : > { %v5545_v19 = vmul.f32 1.442695, %v5423_v18  ;;  %v5547_v16 = vmul.f32 1.442695, %v5424_v24 }
 0xa3d   : > { %v5577_v56 = vpop.xlane.xlu1 %5576 }
 0xa3e   : > { %8953 = vpow2.f32 %v5545_v19 }
 0xa3f   : > { %8955 = vpow2.f32 %v5547_v16 }
 0xa40   : > { %8957 = vrcp.f32 %v5574_v52 }
 0xa41   : > { %v5580_v5 = vpop.xlane.xlu1 %5579  ;;  %8959 = vrcp.f32 %v5571_v12  ;;  %v15855_v12 = vpack.c.bf16 %v13622_v45, %v13619_v10 }
 0xa42   : > { %v13978_v29 = vpop.eup %8949  ;;  %8961 = vrcp.f32 %v5580_v5 }
 0xa43   : > { %v13980_v6 = vpop.eup %8951  ;;  %8963 = vrcp.f32 %v5577_v56  ;;  %v15857_v56 = vpack.c.bf16 %v13732_v15, %v13729_v20 }
 0xa44   : > { %v5641_v13 = vadd.f32 %v13980_v6, %v13978_v29 }
 0xa45   : > { %v5812_v14 = vpop.permute.xlu1 %5811 }
 0xa46   : > { %7738 = vmatprep.subr.bf16.mxu0 %v5812_v14  ;;  %5642 = vadd.xlane.f32.xlu0 %v5641_v13 }
 0xa47   : > { %7739 = vmatpush3.bf16.msra.mxu0 %v5796_v26 }
 0xa48   : > { %v13984_v60 = vpop.eup %8953 }
 0xa49   : > { %v13986_v42 = vpop.eup %8955 }
 0xa4a   : > { %v8958_v52 = vpop.eup %8957  ;;  %5862 = vmatmul.mubr.bf16.vlgmr.msra.gmra.mrb[0].mxu0 %v15855_v12  ;;  %v5644_v19 = vadd.f32 %v13986_v42, %v13984_v60 }
 0xa4b   : > { %5869 = vmatprep.mubr.bf16.mxu0 %v15856_v31  ;;  %v8960_v0 = vpop.eup %8959  ;;  %v5696_v39 = vmul.f32 %v8958_v52, %v13606_v61  ;;  %v5695_v45 = vmul.f32 %v8958_v52, %v13600_v37  ;;  %v15858_v37 = vld [vmem:[#allocation201_spill] sm:$0xff] }
 0xa4c   : > { %5645 = vadd.xlane.f32.xlu1 %v5644_v19  ;;  %v5694_v35 = vmul.f32 %v8960_v0, %v13596_v53  ;;  %v8962_v24 = vpop.eup %8961  ;;  %v5693_v11 = vmul.f32 %v8960_v0, %v13590_v44 }
 0xa4d   : > { %v8964_v10 = vpop.eup %8963  ;;  %v5700_v16 = vmul.f32 %v8962_v24, %v13674_v59  ;;  %v5699_v53 = vmul.f32 %v8962_v24, %v13670_v4 }
 0xa4e   : > { %v5754_v18 = vpack.c.bf16 %v5696_v39, %v5694_v35  ;;  %v5698_v28 = vmul.f32 %v8964_v10, %v13666_v47  ;;  %v5753_v5 = vpack.c.bf16 %v5695_v45, %v5693_v11  ;;  %v5697_v13 = vmul.f32 %v8964_v10, %v13662_v43  ;;  %v15859_v11 = vld [vmem:[#allocation177_spill] sm:$0xff] }
 0xa50   : > { %v5756_v61 = vpack.c.bf16 %v5700_v16, %v5698_v28  ;;  %v5755_v20 = vpack.c.bf16 %v5699_v53, %v5697_v13 }
 0xa52   : > { %5870 = vmatmul.mubr.bf16.gmra.mrb[4].mxu0 %v15857_v56 }
 0xa53   : > { %5877 = vmatprep.mubr.bf16.mxu0 %v5754_v18 }
 0xa5a   : > { %5878 = vmatmul.mubr.bf16.gmra.mrb[8].mxu0 %v5753_v5  ;;  %v15860_v5 = vld [vmem:[#allocation124_spill] sm:$0xff] }
 0xa5b   : > { %5885 = vmatprep.mubr.bf16.mxu0 %v5756_v61 }
 0xa62   : > { %5886 = vmatmul.mubr.bf16.gmra.mrb[12].mxu0 %v5755_v20 }
 0xa6c   : > { %v5361_v15 = vpop.xlane.xlu0 %5360 }
 0xa6d   : > { %v5425_v14 = vsub.f32 %v13759_v51, %v5361_v15  ;;  %v5426_v26 = vsub.f32 %v15858_v37, %v5361_v15 }
 0xa6f   : > { %v5549_v59 = vmul.f32 1.442695, %v5425_v14  ;;  %v5551_v52 = vmul.f32 1.442695, %v5426_v26 }
 0xa70   : > { %v5583_v44 = vpop.xlane.xlu0 %5582 }
 0xa71   : > { %8965 = vpow2.f32 %v5549_v59 }
 0xa72   : > { %8967 = vpow2.f32 %v5551_v52 }
 0xa73   : > { %8969 = vrcp.f32 %v5583_v44 }
 0xa74   : > { %v5586_v47 = vpop.xlane.xlu0 %5585 }
 0xa75   : > { %8971 = vrcp.f32 %v5586_v47 }
 0xa76   : > { %v5364_v12 = vpop.xlane.xlu1 %5363 }
 0xa77   : > { %v5427_v4 = vsub.f32 %v13791_v21, %v5364_v12  ;;  %v5428_v43 = vsub.f32 %v13804_v22, %v5364_v12 }
 0xa78   : > { %v5589_v19 = vpop.xlane.xlu0 %5588 }
 0xa79   : > { %v5553_v31 = vmul.f32 1.442695, %v5427_v4  ;;  %v5555_v0 = vmul.f32 1.442695, %v5428_v43  ;;  %8973 = vrcp.f32 %v5589_v19 }
 0xa7a   : > { %v5592_v51 = vpop.xlane.xlu1 %5591 }
 0xa7b   : > { %v14011_v39 = vpop.eup %8965  ;;  %8975 = vpow2.f32 %v5553_v31 }
 0xa7c   : > { %v14013_v35 = vpop.eup %8967  ;;  %8977 = vpow2.f32 %v5555_v0  ;;  %v5595_v18 = vpop.xlane.xlu0 %5594 }
 0xa7d   : > { %v8970_v24 = vpop.eup %8969  ;;  %8979 = vrcp.f32 %v5592_v51  ;;  %v5647_v56 = vadd.f32 %v14013_v35, %v14011_v39 }
 0xa7e   : > { %8981 = vrcp.f32 %v5595_v18  ;;  %v5598_v21 = vpop.xlane.xlu1 %5597  ;;  %v5701_v10 = vmul.f32 %v8970_v24, %v13770_v48  ;;  %v5702_v28 = vmul.f32 %v8970_v24, %v15859_v11  ;;  %v15862_v11 = vld [vmem:[#allocation63_spill] sm:$0xff] }
 0xa7f   : > { %v8972_v22 = vpop.eup %8971  ;;  %8983 = vrcp.f32 %v5598_v21  ;;  %5648 = vadd.xlane.f32.xlu0 %v5647_v56 }
 0xa80   : > { %v5703_v45 = vmul.f32 %v8972_v22, %v13788_v23  ;;  %v5601_v16 = vpop.xlane.xlu0 %5600  ;;  %v5704_v61 = vmul.f32 %v8972_v22, %v15860_v5 }
 0xa81   : > { %8985 = vrcp.f32 %v5601_v16  ;;  %v15861_v16 = vld [vmem:[#allocation61_spill] sm:$0xff] }
 0xa82   : > { %v5757_v53 = vpack.c.bf16 %v5703_v45, %v5701_v10  ;;  %v5604_v13 = vpop.xlane.xlu1 %5603  ;;  %v5758_v20 = vpack.c.bf16 %v5704_v61, %v5702_v28  ;;  %v15863_v28 = vpack.c.bf16 %v15861_v16, %v15862_v11 }
 0xa83   : > { %v8974_v15 = vpop.eup %8973  ;;  %8987 = vrcp.f32 %v5604_v13  ;;  %v15865_v13 = vld [vmem:[#allocation59_spill] sm:$0xff] }
 0xa84   : > { %5893 = vmatprep.mubr.bf16.mxu0 %v5758_v20  ;;  %v5706_v48 = vmul.f32 %v8974_v15, %v13816_v38  ;;  %v5705_v26 = vmul.f32 %v8974_v15, %v13810_v62  ;;  %v5607_v59 = vpop.xlane.xlu0 %5606  ;;  %v15867_v15 = vld [vmem:[#allocation176_spill] sm:$0xff] }
 0xa85   : > { %v14021_v14 = vpop.eup %8975  ;;  %5894 = vmatmul.mubr.bf16.gmra.mrb[16].mxu0 %v5757_v53  ;;  %8989 = vrcp.f32 %v5607_v59  ;;  %v15864_v53 = vld [vmem:[#allocation85_spill] sm:$0xff] }
 0xa86   : > { %v14023_v37 = vpop.eup %8977  ;;  %v5610_v12 = vpop.xlane.xlu1 %5609  ;;  %v15866_v20 = vpack.c.bf16 %v15864_v53, %v15865_v13 }
 0xa87   : > { %v8980_v23 = vpop.eup %8979  ;;  %v5650_v52 = vadd.f32 %v14023_v37, %v14021_v14  ;;  %8991 = vrcp.f32 %v5610_v12 }
 0xa88   : > { %v8982_v44 = vpop.eup %8981  ;;  %v5707_v47 = vmul.f32 %v8980_v23, %v13822_v41  ;;  %v5708_v4 = vmul.f32 %v8980_v23, %v13828_v8  ;;  %v5613_v24 = vpop.xlane.xlu0 %5612 }
 0xa89   : > { %v8984_v43 = vpop.eup %8983  ;;  %5651 = vadd.xlane.f32.xlu1 %v5650_v52  ;;  %v5710_v19 = vmul.f32 %v8982_v44, %v13846_v34  ;;  %v5709_v41 = vmul.f32 %v8982_v44, %v13840_v2  ;;  %8993 = vrcp.f32 %v5613_v24 }
 0xa8a   : > { %v5760_v31 = vpack.c.bf16 %v5708_v4, %v5706_v48  ;;  %v5712_v38 = vmul.f32 %v8984_v43, %v13854_v57  ;;  %v5759_v0 = vpack.c.bf16 %v5707_v47, %v5705_v26  ;;  %v5711_v8 = vmul.f32 %v8984_v43, %v13834_v55  ;;  %v5616_v56 = vpop.xlane.xlu1 %5615  ;;  %v15868_v48 = vld [vmem:[#allocation62_spill] sm:$0xff] }
 0xa8b   : > { %v8986_v62 = vpop.eup %8985  ;;  %8995 = vrcp.f32 %v5616_v56  ;;  %v15869_v23 = vpack.c.bf16 %v15867_v15, %v15868_v48 }
 0xa8c   : > { %5901 = vmatprep.mubr.bf16.mxu0 %v5760_v31  ;;  %v5762_v51 = vpack.c.bf16 %v5712_v38, %v5710_v19  ;;  %v5714_v34 = vmul.f32 %v8986_v62, %v13864_v7  ;;  %v5761_v57 = vpack.c.bf16 %v5711_v8, %v5709_v41  ;;  %v5713_v55 = vmul.f32 %v8986_v62, %v13858_v63  ;;  %v5619_v7 = vpop.xlane.xlu0 %5618 }
 0xa8d   : > { %v8988_v18 = vpop.eup %8987  ;;  %5902 = vmatmul.mubr.bf16.gmra.mrb[20].mxu0 %v5759_v0  ;;  %8997 = vrcp.f32 %v5619_v7  ;;  %v15877_v7 = vld [vmem:[#allocation206_spill] sm:$0xff] }
 0xa8e   : > { %5909 = vmatprep.mubr.bf16.mxu0 %v5762_v51  ;;  %v5716_v21 = vmul.f32 %v8988_v18, %v13874_v1  ;;  %v5715_v2 = vmul.f32 %v8988_v18, %v13868_v25  ;;  %v5622_v5 = vpop.xlane.xlu1 %5621 }
 0xa8f   : > { %v8990_v22 = vpop.eup %8989  ;;  %8999 = vrcp.f32 %v5622_v5  ;;  %v15878_v5 = vld [vmem:[#allocation92_spill] sm:$0xff] }
 0xa90   : > { %v5764_v10 = vpack.c.bf16 %v5716_v21, %v5714_v34  ;;  %v5718_v1 = vmul.f32 %v8990_v22, %v13884_v40  ;;  %v5763_v63 = vpack.c.bf16 %v5715_v2, %v5713_v55  ;;  %v15870_v40 = vld [vmem:[#allocation58_spill] sm:$0xff]  ;;  %v5717_v44 = vmul.f32 %v8990_v22, %v13878_v58  ;;  %v5625_v12 = vpop.xlane.xlu0 %5624  ;;  %v15873_v21 = vld [vmem:[#allocation65_spill] sm:$0xff]  ;;  %v15874_v22 = vld [vmem:[#allocation204_spill] sm:$0xff] }
 0xa91   : > { %v8992_v45 = vpop.eup %8991  ;;  %9001 = vrcp.f32 %v5625_v12  ;;  %v15876_v55 = vld [vmem:[#allocation203_spill] sm:$0xff]  ;;  %v15884_v12 = vld [vmem:[#allocation182_spill] sm:$0xff] }
 0xa92   : > { %v5720_v61 = vmul.f32 %v8992_v45, %v13892_v36  ;;  %v15871_v36 = vld [vmem:[#allocation185_spill] sm:$0xff]  ;;  %v5719_v47 = vmul.f32 %v8992_v45, %v13888_v3  ;;  %v5628_v4 = vpop.xlane.xlu1 %5627  ;;  %v15875_v45 = vld [vmem:[#allocation207_spill] sm:$0xff] }
 0xa93   : > { %v8994_v25 = vpop.eup %8993  ;;  %v15872_v52 = vpack.c.bf16 %v15870_v40, %v15871_v36  ;;  %9003 = vrcp.f32 %v5628_v4  ;;  %v15883_v36 = vld [vmem:[#allocation133_spill] sm:$0xff] }
 0xa94   : > { %v5766_v26 = vpack.c.bf16 %v5720_v61, %v5718_v1  ;;  %v5722_v43 = vmul.f32 %v8994_v25, %v13898_v30  ;;  %v5765_v31 = vpack.c.bf16 %v5719_v47, %v5717_v44  ;;  %v5721_v51 = vmul.f32 %v8994_v25, %v13894_v17  ;;  %v5631_v18 = vpop.xlane.xlu0 %5630  ;;  %v15879_v61 = vld [vmem:[#allocation150_spill] sm:$0xff]  ;;  %v15881_v25 = vld [vmem:[#allocation91_spill] sm:$0xff] }
 0xa95   : > { %6022 = vrot.lane.b32.xlu0 %v15863_v28, %s9302_s19  ;;  %5910 = vmatmul.mubr.bf16.gmra.mrb[24].mxu0 %v5761_v57  ;;  %v8996_v59 = vpop.eup %8995  ;;  %9005 = vrcp.f32 %v5631_v18 }
 0xa96   : > { %5917 = vmatprep.mubr.bf16.mxu0 %v5764_v10  ;;  %v5724_v19 = vmul.f32 %v8996_v59, %v13906_v49  ;;  %v5723_v58 = vmul.f32 %v8996_v59, %v13900_v27  ;;  %v5634_v3 = vpop.xlane.xlu1 %5633  ;;  %v15882_v59 = vld [vmem:[#allocation157_spill] sm:$0xff] }
 0xa97   : > { %v8998_v38 = vpop.eup %8997  ;;  %9007 = vrcp.f32 %v5634_v3 }
 0xa98   : > { %v5768_v0 = vpack.c.bf16 %v5724_v19, %v5722_v43  ;;  %v5726_v41 = vmul.f32 %v8998_v38, %v13914_v32  ;;  %v5767_v49 = vpack.c.bf16 %v5723_v58, %v5721_v51  ;;  %v5725_v34 = vmul.f32 %v8998_v38, %v13910_v9  ;;  %v5637_v57 = vpop.xlane.xlu0 %5636  ;;  %v15885_v43 = vld [vmem:[#allocation30_spill] sm:$0xff] }
 0xa99   : > { %6072 = vrot.lane.b32.xlu0 %v15866_v20, %s9300_s8  ;;  %v9000_v62 = vpop.eup %8999  ;;  %9009 = vrcp.f32 %v5637_v57  ;;  %v8252_v57 = vld [vmem:[#allocation11 + $0x38] sm:$0xff]  }
 0xa9a   : > { %6024 = vrot.lane.b32.xlu1 %v15869_v23, %s9302_s19  ;;  %v5728_v30 = vmul.f32 %v9000_v62, %v13922_v46  ;;  %v5727_v17 = vmul.f32 %v9000_v62, %v15873_v21  ;;  %v15880_v23 = vld [vmem:[#allocation104_spill] sm:$0xff]  ;;  %v8251_v21 = vld [vmem:[#allocation11 + $0x30] sm:$0xff]  }
 0xa9b   : > { %v9002_v8 = vpop.eup %9001 }
 0xa9c   : > { %v5770_v24 = vpack.c.bf16 %v5728_v30, %v5726_v41  ;;  %v5640_v27 = vpop.xlane.xlu1 %5639  ;;  %v5730_v10 = vmul.f32 %v9002_v8, %v15874_v22  ;;  %v5769_v46 = vpack.c.bf16 %v5727_v17, %v5725_v34  ;;  %v5729_v2 = vmul.f32 %v9002_v8, %v15876_v55  ;;  %v8245_v8 = vld [vmem:[#allocation11] sm:$0xff]  }
 0xa9d   : > { %5918 = vmatmul.mubr.bf16.gmra.mrb[28].mxu0 %v5763_v63  ;;  %v9004_v56 = vpop.eup %9003  ;;  %9011 = vrcp.f32 %v5640_v27  ;;  %8004 = vmatprep.subr.bf16.mxu1 %v8245_v8  ;;  %v8249_v34 = vld [vmem:[#allocation11 + $0x20] sm:$0xff]  }
 0xa9e   : > { %6070 = vrot.lane.b32.xlu1 %v15872_v52, %s9300_s8  ;;  %5925 = vmatprep.mubr.bf16.mxu0 %v5766_v26  ;;  %v5732_v32 = vmul.f32 %v9004_v56, %v15875_v45  ;;  %v5731_v9 = vmul.f32 %v9004_v56, %v15877_v7  ;;  %v8247_v56 = vld [vmem:[#allocation11 + $0x10] sm:$0xff]  }
 0xa9f   : > { %v9006_v16 = vpop.eup %9005  ;;  %8005 = vmatpush3.bf16.msra.mxu1 %v8245_v8  ;;  %v15901_v8 = vld [vmem:[#allocation187_spill] sm:$0xff] }
 0xaa0   : > { %v5772_v11 = vpack.c.bf16 %v5732_v32, %v5730_v10  ;;  %v5734_v1 = vmul.f32 %v9006_v16, %v15878_v5  ;;  %v5771_v13 = vpack.c.bf16 %v5731_v9, %v5729_v2  ;;  %v5733_v63 = vmul.f32 %v9006_v16, %v15880_v23  ;;  %v15889_v23 = vld [vmem:[#allocation111_spill] sm:$0xff] }
 0xaa1   : > { %v9008_v28 = vpop.eup %9007 }
 0xaa2   : > { %v5736_v53 = vmul.f32 %v9008_v28, %v15879_v61  ;;  %v5735_v26 = vmul.f32 %v9008_v28, %v15881_v25 }
 0xaa3   : > { %v9010_v20 = vpop.eup %9009 }
 0xaa4   : > { %v5774_v15 = vpack.c.bf16 %v5736_v53, %v5734_v1  ;;  %v5738_v40 = vmul.f32 %v9010_v20, %v15882_v59  ;;  %v5773_v44 = vpack.c.bf16 %v5735_v26, %v5733_v63  ;;  %v5737_v4 = vmul.f32 %v9010_v20, %v15884_v12  ;;  %v15890_v63 = vld [vmem:[#allocation114_spill] sm:$0xff] }
 0xaa5   : > { %5926 = vmatmul.mubr.bf16.gmra.mrb[32].mxu0 %v5765_v31  ;;  %v15891_v25 = vpack.c.bf16 %v15889_v23, %v15890_v63  ;;  %v15917_v23 = vld [vmem:[#allocation211_spill] sm:$0xff] }
 0xaa6   : > { %5933 = vmatprep.mubr.bf16.mxu0 %v5768_v0 }
 0xaa7   : > { %v9012_v48 = vpop.eup %9011 }
 0xaa8   : > { %v5740_v52 = vmul.f32 %v9012_v48, %v15883_v36  ;;  %v5739_v19 = vmul.f32 %v9012_v48, %v15885_v43 }
 0xaaa   : > { %v5776_v47 = vpack.c.bf16 %v5740_v52, %v5738_v40  ;;  %v5775_v31 = vpack.c.bf16 %v5739_v19, %v5737_v4  ;;  %v15895_v19 = vld [vmem:[#allocation36_spill] sm:$0xff] }
 0xaad   : > { %5934 = vmatmul.mubr.bf16.gmra.mrb[36].mxu0 %v5767_v49 }
 0xaae   : > { %5941 = vmatprep.mubr.bf16.mxu0 %v5770_v24  ;;  %v8246_v24 = vld [vmem:[#allocation11 + $0x8] sm:$0xff]  }
 0xaaf   : > { %8006 = vmatprep.subr.bf16.mxu1 %v8246_v24 }
 0xab0   : > { %8007 = vmatpush3.bf16.msra.mxu1 %v8246_v24  ;;  %v15902_v24 = vld [vmem:[#allocation110_spill] sm:$0xff] }
 0xab1   : > { %8008 = vmatprep.subr.bf16.mxu1 %v8247_v56 }
 0xab4   : > { %8009 = vmatpush3.bf16.msra.mxu1 %v8247_v56  ;;  %v15903_v56 = vpack.c.bf16 %v15901_v8, %v15902_v24  ;;  %v15928_v8 = vld [vmem:[#allocation26_spill] sm:$0xff]  ;;  %v15929_v24 = vld [vmem:[#allocation64_spill] sm:$0xff] }
 0xab5   : > { %5942 = vmatmul.mubr.bf16.gmra.mrb[40].mxu0 %v5769_v46 }
 0xab6   : > { %5949 = vmatprep.mubr.bf16.mxu0 %v5772_v11 }
 0xabd   : > { %5950 = vmatmul.mubr.bf16.gmra.mrb[44].mxu0 %v5771_v13 }
 0xabe   : > { %5957 = vmatprep.mubr.bf16.mxu0 %v5774_v15 }
 0xac5   : > { %5958 = vmatmul.mubr.bf16.gmra.mrb[48].mxu0 %v5773_v44  ;;  %v15892_v44 = vld [vmem:[#allocation137_spill] sm:$0xff] }
 0xac6   : > { %5965 = vmatprep.mubr.bf16.mxu0 %v5776_v47  ;;  %v15893_v47 = vld [vmem:[#allocation134_spill] sm:$0xff] }
 0xac7   : > { %v15894_v12 = vpack.c.bf16 %v15892_v44, %v15893_v47 }
 0xacd   : > { %5966 = vmatmul.mubr.bf16.gmra.mrb[52].mxu0 %v5775_v31  ;;  %v15896_v31 = vld [vmem:[#allocation116_spill] sm:$0xff] }
 0xad3   : > { %v5643_v38 = vpop.xlane.xlu0 %5642 }
 0xad4   : > { %9013 = vrcp.f32 %v5643_v38  ;;  %v15897_v38 = vpack.c.bf16 %v15895_v19, %v15896_v31  ;;  %v15923_v19 = vld [vmem:[#allocation50_spill] sm:$0xff] }
 0xad9   : > { %v5646_v0 = vpop.xlane.xlu1 %5645 }
 0xada   : > { %9015 = vrcp.f32 %v5646_v0 }
 0xade   : > { %v9014_v62 = vpop.eup %9013 }
 0xadf   : > { %v5741_v58 = vmul.f32 %v9014_v62, %v13978_v29  ;;  %v5742_v3 = vmul.f32 %v9014_v62, %v13980_v6  ;;  %v8248_v29 = vld [vmem:[#allocation11 + $0x18] sm:$0xff]  }
 0xae0   : > { %8010 = vmatprep.subr.bf16.mxu1 %v8248_v29 }
 0xae1   : > { %8011 = vmatpush3.bf16.msra.mxu1 %v8248_v29  ;;  %v15904_v29 = vld [vmem:[#allocation141_spill] sm:$0xff] }
 0xae2   : > { %8012 = vmatprep.subr.bf16.mxu1 %v8249_v34 }
 0xae4   : > { %v9016_v51 = vpop.eup %9015 }
 0xae5   : > { %v5743_v18 = vmul.f32 %v9016_v51, %v13984_v60  ;;  %v5744_v41 = vmul.f32 %v9016_v51, %v13986_v42  ;;  %8013 = vmatpush3.bf16.msra.mxu1 %v8249_v34  ;;  %v8250_v60 = vld [vmem:[#allocation11 + $0x28] sm:$0xff]   ;;  %v15905_v34 = vld [vmem:[#allocation103_spill] sm:$0xff] }
 0xae6   : > { %8014 = vmatprep.subr.bf16.mxu1 %v8250_v60 }
 0xae7   : > { %v5777_v30 = vpack.c.bf16 %v5743_v18, %v5741_v58  ;;  %v5778_v49 = vpack.c.bf16 %v5744_v41, %v5742_v3  ;;  %v15898_v3 = vld [vmem:[#allocation139_spill] sm:$0xff]  ;;  %v15899_v41 = vld [vmem:[#allocation154_spill] sm:$0xff] }
 0xae9   : > { %5973 = vmatprep.mubr.bf16.mxu0 %v5778_v49  ;;  %8015 = vmatpush3.bf16.msra.mxu1 %v8250_v60  ;;  %v15907_v60 = vld [vmem:[#allocation120_spill] sm:$0xff] }
 0xaea   : > { %5974 = vmatmul.mubr.bf16.gmra.mrb[56].mxu0 %v5777_v30  ;;  %8016 = vmatprep.subr.bf16.mxu1 %v8251_v21  ;;  %v15900_v30 = vpack.c.bf16 %v15898_v3, %v15899_v41 }
 0xaed   : > { %8017 = vmatpush3.bf16.msra.mxu1 %v8251_v21 }
 0xaee   : > { %8018 = vmatprep.subr.bf16.mxu1 %v8252_v57 }
 0xaf1   : > { %8019 = vmatpush3.bf16.msra.mxu1 %v8252_v57 }
 0xb0c   : > { %v5649_v6 = vpop.xlane.xlu0 %5648 }
 0xb0d   : > { %9017 = vrcp.f32 %v5649_v6  ;;  %v15906_v6 = vpack.c.bf16 %v15904_v29, %v15905_v34  ;;  %v15931_v34 = vld [vmem:[#allocation127_spill] sm:$0xff] }
 0xb16   : > { %v5652_v42 = vpop.xlane.xlu1 %5651 }
 0xb17   : > { %9019 = vrcp.f32 %v5652_v42  ;;  %v9018_v22 = vpop.eup %9017  ;;  %v15908_v42 = vld [vmem:[#allocation188_spill] sm:$0xff] }
 0xb18   : > { %v5745_v11 = vmul.f32 %v9018_v22, %v14011_v39  ;;  %v5746_v55 = vmul.f32 %v9018_v22, %v14013_v35  ;;  %v15886_v39 = vld [vmem:[#allocation136_spill] sm:$0xff]  ;;  %v15909_v21 = vpack.c.bf16 %v15907_v60, %v15908_v42 }
 0xb1d   : > { %v7740_v17 = vpop.f32.mrb[0].mxu0 }
 0xb1e   : > { %v7741_v27 = vpop.f32.mrb[1].mxu0 }
 0xb1f   : > { %v7742_v10 = vadd.f32 %v7741_v27, %v7740_v17  ;;  %v7743_v45 = vpop.f32.mrb[2].mxu0 }
 0xb20   : > { %v7744_v32 = vpop.f32.mrb[3].mxu0 }
 0xb21   : > { %v9020_v46 = vpop.eup %9019  ;;  %v7745_v16 = vadd.f32 %v7744_v32, %v7743_v45 }
 0xb22   : > { %v5747_v28 = vmul.f32 %v9020_v46, %v14021_v14  ;;  %v5748_v2 = vmul.f32 %v9020_v46, %v14023_v37  ;;  %v15887_v14 = vld [vmem:[#allocation145_spill] sm:$0xff] }
 0xb23   : > { %v5990_v7 = vpack.c.bf16 %v7745_v16, %v7742_v10  ;;  %v15888_v48 = vpack.c.bf16 %v15886_v39, %v15887_v14 }
 0xb24   : > { %v5779_v9 = vpack.c.bf16 %v5747_v28, %v5745_v11  ;;  %v5780_v5 = vpack.c.bf16 %v5748_v2, %v5746_v55 }
 0xb25   : > { %v7746_v1 = vpop.f32.mrb[4].mxu0  ;;  %6118 = vrot.lane.b32.xlu1 %v5990_v7, %s9301_s17  ;;  %v15910_v7 = vld [vmem:[#allocation101_spill] sm:$0xff] }
 0xb26   : > { %5981 = vmatprep.mubr.bf16.mxu0 %v5780_v5  ;;  %v7747_v61 = vpop.f32.mrb[5].mxu0 }
 0xb27   : > { %v7748_v53 = vadd.f32 %v7747_v61, %v7746_v1  ;;  %5982 = vmatmul.mubr.bf16.gmra.mrb[60].mxu0 %v5779_v9  ;;  %v7749_v13 = vpop.f32.mrb[6].mxu0  ;;  %v15911_v9 = vld [vmem:[#allocation140_spill] sm:$0xff] }
 0xb28   : > { %v7750_v20 = vpop.f32.mrb[7].mxu0  ;;  %v15912_v5 = vpack.c.bf16 %v15910_v7, %v15911_v9  ;;  %v15913_v61 = vld [vmem:[#allocation128_spill] sm:$0xff] }
 0xb29   : > { %v7751_v15 = vadd.f32 %v7750_v20, %v7749_v13  ;;  %6026 = vrot.lane.b32.xlu1 %v15888_v48, %s9302_s19 }
 0xb2b   : > { %v5991_v35 = vpack.c.bf16 %v7751_v15, %v7748_v53  ;;  %v15914_v53 = vld [vmem:[#allocation121_spill] sm:$0xff] }
 0xb2c   : > { %v15915_v13 = vpack.c.bf16 %v15913_v61, %v15914_v53  ;;  %v15940_v61 = vld [vmem:[#allocation102_spill] sm:$0xff]  ;;  %v15941_v53 = vld [vmem:[#allocation148_spill] sm:$0xff] }
 0xb2d   : > { %v7752_v37 = vpop.f32.mrb[8].mxu0  ;;  %6120 = vrot.lane.b32.xlu0 %v5991_v35, %s9301_s17  ;;  %6074 = vrot.lane.b32.xlu1 %v15891_v25, %s9300_s8 }
 0xb2e   : > { %v7753_v26 = vpop.f32.mrb[9].mxu0 }
 0xb2f   : > { %v7754_v59 = vadd.f32 %v7753_v26, %v7752_v37  ;;  %v7755_v40 = vpop.f32.mrb[10].mxu0  ;;  %v15916_v37 = vld [vmem:[#allocation32_spill] sm:$0xff]  ;;  %v15919_v26 = vld [vmem:[#allocation118_spill] sm:$0xff] }
 0xb30   : > { %v7756_v36 = vpop.f32.mrb[11].mxu0  ;;  %v15918_v63 = vpack.c.bf16 %v15916_v37, %v15917_v23  ;;  %v6023_v23 = vpop.permute.xlu0 %6022 }
 0xb31   : > { %v7757_v52 = vadd.f32 %v7756_v36, %v7755_v40  ;;  %6028 = vrot.lane.b32.xlu0 %v15894_v12, %s9302_s19 }
 0xb33   : > { %v5992_v4 = vpack.c.bf16 %v7757_v52, %v7754_v59  ;;  %v15920_v59 = vld [vmem:[#allocation191_spill] sm:$0xff] }
 0xb34   : > { %v15921_v40 = vpack.c.bf16 %v15919_v26, %v15920_v59 }
 0xb35   : > { %v7758_v43 = vpop.f32.mrb[12].mxu0  ;;  %6076 = vrot.lane.b32.xlu0 %v15897_v38, %s9300_s8  ;;  %6122 = vrot.lane.b32.xlu1 %v5992_v4, %s9301_s17 }
 0xb36   : > { %v7759_v0 = vpop.f32.mrb[13].mxu0 }
 0xb37   : > { %v7760_v62 = vadd.f32 %v7759_v0, %v7758_v43  ;;  %v7761_v51 = vpop.f32.mrb[14].mxu0  ;;  %v15922_v43 = vld [vmem:[#allocation144_spill] sm:$0xff]  ;;  %v15925_v0 = vld [vmem:[#allocation194_spill] sm:$0xff] }
 0xb38   : > { %v7762_v58 = vpop.f32.mrb[15].mxu0  ;;  %v15924_v31 = vpack.c.bf16 %v15922_v43, %v15923_v19 }
 0xb39   : > { %v7763_v18 = vadd.f32 %v7762_v58, %v7761_v51  ;;  %6030 = vrot.lane.b32.xlu1 %v15900_v30, %s9302_s19 }
 0xb3b   : > { %v5993_v49 = vpack.c.bf16 %v7763_v18, %v7760_v62  ;;  %v15926_v62 = vld [vmem:[#allocation119_spill] sm:$0xff] }
 0xb3c   : > { %v15927_v51 = vpack.c.bf16 %v15925_v0, %v15926_v62  ;;  %v15952_v62 = vld [vmem:[#allocation52_spill] sm:$0xff] }
 0xb3d   : > { %6124 = vrot.lane.b32.xlu0 %v5993_v49, %s9301_s17  ;;  %6078 = vrot.lane.b32.xlu1 %v15903_v56, %s9300_s8  ;;  %v15930_v56 = vpack.c.bf16 %v15928_v8, %v15929_v24  ;;  %v15955_v24 = vld [vmem:[#allocation51_spill] sm:$0xff] }
 0xb41   : > { %6032 = vrot.lane.b32.xlu0 %v15906_v6, %s9302_s19  ;;  %v15932_v6 = vld [vmem:[#allocation195_spill] sm:$0xff] }
 0xb42   : > { %v15933_v60 = vpack.c.bf16 %v15931_v34, %v15932_v6 }
 0xb45   : > { %6080 = vrot.lane.b32.xlu0 %v15909_v21, %s9300_s8 }
 0xb58   : > { %v7764_v17 = vpop.f32.mrb[16].mxu0 }
 0xb59   : > { %v7765_v57 = vpop.f32.mrb[17].mxu0 }
 0xb5a   : > { %v7766_v27 = vadd.f32 %v7765_v57, %v7764_v17  ;;  %v7767_v22 = vpop.f32.mrb[18].mxu0 }
 0xb5b   : > { %v7768_v10 = vpop.f32.mrb[19].mxu0 }
 0xb5c   : > { %v7769_v45 = vadd.f32 %v7768_v10, %v7767_v22  ;;  %v15934_v10 = vld [vmem:[#allocation98_spill] sm:$0xff] }
 0xb5e   : > { %v5994_v32 = vpack.c.bf16 %v7769_v45, %v7766_v27  ;;  %v15935_v45 = vld [vmem:[#allocation180_spill] sm:$0xff] }
 0xb60   : > { %6126 = vrot.lane.b32.xlu1 %v5994_v32, %s9301_s17  ;;  %v7770_v46 = vpop.f32.mrb[20].mxu0  ;;  %v15936_v32 = vpack.c.bf16 %v15934_v10, %v15935_v45  ;;  %v15961_v45 = vld [vmem:[#allocation178_spill] sm:$0xff] }
 0xb61   : > { %v7771_v16 = vpop.f32.mrb[21].mxu0 }
 0xb62   : > { %v7772_v11 = vadd.f32 %v7771_v16, %v7770_v46  ;;  %v7773_v28 = vpop.f32.mrb[22].mxu0  ;;  %v15937_v16 = vld [vmem:[#allocation130_spill] sm:$0xff] }
 0xb63   : > { %v7774_v55 = vpop.f32.mrb[23].mxu0 }
 0xb64   : > { %v7775_v2 = vadd.f32 %v7774_v55, %v7773_v28  ;;  %6034 = vrot.lane.b32.xlu1 %v15912_v5, %s9302_s19 }
 0xb66   : > { %v5995_v1 = vpack.c.bf16 %v7775_v2, %v7772_v11  ;;  %v15938_v11 = vld [vmem:[#allocation192_spill] sm:$0xff] }
 0xb67   : > { %v15939_v28 = vpack.c.bf16 %v15937_v16, %v15938_v11 }
 0xb68   : > { %6082 = vrot.lane.b32.xlu1 %v15915_v13, %s9300_s8  ;;  %6128 = vrot.lane.b32.xlu0 %v5995_v1, %s9301_s17  ;;  %v7776_v20 = vpop.f32.mrb[24].mxu0  ;;  %v15942_v13 = vpack.c.bf16 %v15940_v61, %v15941_v53 }
 0xb69   : > { %v7777_v15 = vpop.f32.mrb[25].mxu0 }
 0xb6a   : > { %v7778_v39 = vadd.f32 %v7777_v15, %v7776_v20  ;;  %v7779_v14 = vpop.f32.mrb[26].mxu0  ;;  %v6025_v20 = vpop.permute.xlu1 %6024 }
 0xb6b   : > { %v7780_v48 = vpop.f32.mrb[27].mxu0 }
 0xb6c   : > { %v7781_v35 = vadd.f32 %v7780_v48, %v7779_v14  ;;  %6036 = vrot.lane.b32.xlu0 %v15918_v63, %s9302_s19  ;;  %v15944_v14 = vld [vmem:[#allocation131_spill] sm:$0xff] }
 0xb6e   : > { %v5996_v25 = vpack.c.bf16 %v7781_v35, %v7778_v39  ;;  %v15943_v39 = vld [vmem:[#allocation200_spill] sm:$0xff]  ;;  %v6071_v26 = vpop.permute.xlu1 %6070 }
 0xb6f   : > { %v15945_v48 = vpack.c.bf16 %v15943_v39, %v15944_v14 }
 0xb70   : > { %6084 = vrot.lane.b32.xlu0 %v15921_v40, %s9300_s8  ;;  %6130 = vrot.lane.b32.xlu1 %v5996_v25, %s9301_s17  ;;  %v7782_v36 = vpop.f32.mrb[28].mxu0 }
 0xb71   : > { %v7783_v52 = vpop.f32.mrb[29].mxu0 }
 0xb72   : > { %v7784_v44 = vadd.f32 %v7783_v52, %v7782_v36  ;;  %v7785_v47 = vpop.f32.mrb[30].mxu0  ;;  %v15946_v36 = vld [vmem:[#allocation181_spill] sm:$0xff]  ;;  %v15947_v52 = vld [vmem:[#allocation143_spill] sm:$0xff] }
 0xb73   : > { %v7786_v12 = vpop.f32.mrb[31].mxu0 }
 0xb74   : > { %v7787_v4 = vadd.f32 %v7786_v12, %v7785_v47  ;;  %6038 = vrot.lane.b32.xlu1 %v15924_v31, %s9302_s19  ;;  %v15949_v47 = vld [vmem:[#allocation99_spill] sm:$0xff]  ;;  %v15950_v12 = vld [vmem:[#allocation74_spill] sm:$0xff] }
 0xb76   : > { %v5997_v38 = vpack.c.bf16 %v7787_v4, %v7784_v44  ;;  %v15948_v44 = vpack.c.bf16 %v15946_v36, %v15947_v52  ;;  %v15951_v4 = vpack.c.bf16 %v15949_v47, %v15950_v12  ;;  %v15976_v52 = vld [vmem:[#allocation112_spill] sm:$0xff] }
 0xb78   : > { %6086 = vrot.lane.b32.xlu1 %v15927_v51, %s9300_s8  ;;  %6132 = vrot.lane.b32.xlu0 %v5997_v38, %s9301_s17  ;;  %v7788_v58 = vpop.f32.mrb[32].mxu0  ;;  %v6152_v43 = vsel %vm1418_vm0, %v15951_v4, %v6023_v23  ;;  %v15953_v51 = vld [vmem:[#allocation25_spill] sm:$0xff]  ;;  %v15970_v23 = vld [vmem:[#allocation70_spill] sm:$0xff] }
 0xb79   : > { %v7789_v18 = vpop.f32.mrb[33].mxu0  ;;  %v6200_v31 = vsel %vm6198_vm2, %v6152_v43, %v6071_v26 }
 0xb7a   : > { %v7790_v3 = vadd.f32 %v7789_v18, %v7788_v58  ;;  %v7791_v41 = vpop.f32.mrb[34].mxu0  ;;  %v15954_v58 = vpack.c.bf16 %v15952_v62, %v15953_v51 }
 0xb7b   : > { %v7792_v30 = vpop.f32.mrb[35].mxu0 }
 0xb7c   : > { %v7793_v49 = vadd.f32 %v7792_v30, %v7791_v41  ;;  %6040 = vrot.lane.b32.xlu0 %v15930_v56, %s9302_s19  ;;  %v15956_v56 = vld [vmem:[#allocation100_spill] sm:$0xff] }
 0xb7e   : > { %v5998_v29 = vpack.c.bf16 %v7793_v49, %v7790_v3  ;;  %v6073_v49 = vpop.permute.xlu0 %6072 }
 0xb80   : > { %6088 = vrot.lane.b32.xlu0 %v15933_v60, %s9300_s8  ;;  %6134 = vrot.lane.b32.xlu1 %v5998_v29, %s9301_s17  ;;  %v7794_v42 = vpop.f32.mrb[36].mxu0  ;;  %v15957_v29 = vpack.c.bf16 %v15955_v24, %v15956_v56  ;;  %v15958_v60 = vld [vmem:[#allocation132_spill] sm:$0xff] }
 0xb81   : > { %v7795_v21 = vpop.f32.mrb[37].mxu0 }
 0xb82   : > { %v7796_v17 = vadd.f32 %v7795_v21, %v7794_v42  ;;  %v7797_v57 = vpop.f32.mrb[38].mxu0  ;;  %v6155_v34 = vsel %vm1418_vm0, %v15957_v29, %v6025_v20  ;;  %v15959_v42 = vld [vmem:[#allocation156_spill] sm:$0xff]  ;;  %v15968_v20 = vld [vmem:[#allocation45_spill] sm:$0xff] }
 0xb83   : > { %v7798_v27 = vpop.f32.mrb[39].mxu0  ;;  %v15960_v21 = vpack.c.bf16 %v15958_v60, %v15959_v42  ;;  %v15983_v60 = vld [vmem:[#allocation106_spill] sm:$0xff] }
 0xb84   : > { %v7799_v22 = vadd.f32 %v7798_v27, %v7797_v57  ;;  %6042 = vrot.lane.b32.xlu1 %v15936_v32, %s9302_s19  ;;  %v15962_v32 = vld [vmem:[#allocation69_spill] sm:$0xff] }
 0xb86   : > { %v5999_v46 = vpack.c.bf16 %v7799_v22, %v7796_v17  ;;  %v6202_v22 = vsel %vm6198_vm2, %v6155_v34, %v6073_v49  ;;  %v15979_v49 = vld [vmem:[#allocation33_spill] sm:$0xff] }
 0xb88   : > { %6090 = vrot.lane.b32.xlu1 %v15939_v28, %s9300_s8  ;;  %6136 = vrot.lane.b32.xlu0 %v5999_v46, %s9301_s17  ;;  %v7800_v55 = vpop.f32.mrb[40].mxu0  ;;  %v15963_v46 = vpack.c.bf16 %v15961_v45, %v15962_v32  ;;  %v15985_v45 = vld [vmem:[#allocation115_spill] sm:$0xff]  ;;  %v15986_v32 = vld [vmem:[#allocation84_spill] sm:$0xff] }
 0xb89   : > { %v7801_v2 = vpop.f32.mrb[41].mxu0 }
 0xb8a   : > { %v7802_v7 = vadd.f32 %v7801_v2, %v7800_v55  ;;  %v7803_v9 = vpop.f32.mrb[42].mxu0 }
 0xb8b   : > { %v7804_v5 = vpop.f32.mrb[43].mxu0 }
 0xb8c   : > { %v7805_v1 = vadd.f32 %v7804_v5, %v7803_v9  ;;  %6044 = vrot.lane.b32.xlu0 %v15942_v13, %s9302_s19  ;;  %v15964_v5 = vld [vmem:[#allocation83_spill] sm:$0xff]  ;;  %v15967_v13 = vld [vmem:[#allocation105_spill] sm:$0xff] }
 0xb8e   : > { %v6000_v15 = vpack.c.bf16 %v7805_v1, %v7802_v7  ;;  %v15965_v1 = vld [vmem:[#allocation82_spill] sm:$0xff] }
 0xb8f   : > { %v15966_v61 = vpack.c.bf16 %v15964_v5, %v15965_v1  ;;  %v15989_v5 = vld [vmem:[#allocation122_spill] sm:$0xff] }
 0xb90   : > { %6092 = vrot.lane.b32.xlu0 %v15945_v48, %s9300_s8  ;;  %6138 = vrot.lane.b32.xlu1 %v6000_v15, %s9301_s17  ;;  %v7806_v35 = vpop.f32.mrb[44].mxu0  ;;  %v15969_v15 = vpack.c.bf16 %v15967_v13, %v15968_v20 }
 0xb91   : > { %v7807_v37 = vpop.f32.mrb[45].mxu0 }
 0xb92   : > { %v7808_v63 = vadd.f32 %v7807_v37, %v7806_v35  ;;  %v7809_v25 = vpop.f32.mrb[46].mxu0 }
 0xb93   : > { %v7810_v59 = vpop.f32.mrb[47].mxu0 }
 0xb94   : > { %v7811_v40 = vadd.f32 %v7810_v59, %v7809_v25  ;;  %6046 = vrot.lane.b32.xlu1 %v15948_v44, %s9302_s19  ;;  %v15973_v59 = vld [vmem:[#allocation49_spill] sm:$0xff]  ;;  %v15977_v44 = vld [vmem:[#allocation46_spill] sm:$0xff] }
 0xb95   : > { %v15978_v47 = vpack.c.bf16 %v15976_v52, %v15977_v44 }
 0xb96   : > { %v6001_v19 = vpack.c.bf16 %v7811_v40, %v7808_v63  ;;  %v15971_v63 = vld [vmem:[#allocation179_spill] sm:$0xff] }
 0xb97   : > { %v6119_v38 = vpop.permute.xlu1 %6118  ;;  %v15972_v25 = vpack.c.bf16 %v15970_v23, %v15971_v63  ;;  %v15974_v40 = vld [vmem:[#allocation43_spill] sm:$0xff] }
 0xb98   : > { %v6233_v0 = vsel %vm6231_vm1, %v6200_v31, %v6119_v38  ;;  %6094 = vrot.lane.b32.xlu1 %v15954_v58, %s9300_s8  ;;  %6140 = vrot.lane.b32.xlu0 %v6001_v19, %s9301_s17  ;;  %v7812_v18 = vpop.f32.mrb[48].mxu0  ;;  %v15975_v36 = vpack.c.bf16 %v15973_v59, %v15974_v40  ;;  %v15994_v40 = vld [vmem:[#allocation190_spill] sm:$0xff] }
 0xb99   : > { %8020 = vmatprep.mubr.bf16.mxu1 %v6233_v0  ;;  %v7813_v3 = vpop.f32.mrb[49].mxu0 }
 0xb9a   : > { %v7814_v41 = vadd.f32 %v7813_v3, %v7812_v18  ;;  %v7815_v30 = vpop.f32.mrb[50].mxu0 }
 0xb9b   : > { %v7816_v8 = vpop.f32.mrb[51].mxu0  ;;  %v6027_v17 = vpop.permute.xlu1 %6026 }
 0xb9c   : > { %v7817_v6 = vadd.f32 %v7816_v8, %v7815_v30  ;;  %6048 = vrot.lane.b32.xlu0 %v15960_v21, %s9302_s19  ;;  %v6158_v39 = vsel %vm1418_vm0, %v15969_v15, %v6027_v17  ;;  %v15980_v8 = vld [vmem:[#allocation34_spill] sm:$0xff] }
 0xb9d   : > { %v15981_v24 = vpack.c.bf16 %v15979_v49, %v15980_v8 }
 0xb9e   : > { %v6002_v57 = vpack.c.bf16 %v7817_v6, %v7814_v41  ;;  %v15982_v6 = vld [vmem:[#allocation107_spill] sm:$0xff] }
 0xb9f   : > { %v6121_v27 = vpop.permute.xlu0 %6120  ;;  %v6075_v2 = vpop.permute.xlu1 %6074  ;;  %v15984_v42 = vpack.c.bf16 %v15982_v6, %v15983_v60 }
 0xba0   : > { %v6236_v10 = vsel %vm6231_vm1, %v6202_v22, %v6121_v27  ;;  %6096 = vrot.lane.b32.xlu0 %v15963_v46, %s9300_s8  ;;  %6142 = vrot.lane.b32.xlu1 %v6002_v57, %s9301_s17  ;;  %v7818_v16 = vpop.f32.mrb[52].mxu0  ;;  %v6204_v48 = vsel %vm6198_vm2, %v6158_v39, %v6075_v2  ;;  %v15987_v46 = vpack.c.bf16 %v15985_v45, %v15986_v32 }
 0xba1   : > { %8021 = vmatmul.mubr.bf16.vlgmr.msra.gmra.mrb[32].mxu1 %v6236_v10  ;;  %v7819_v11 = vpop.f32.mrb[53].mxu0 }
 0xba2   : > { %v7820_v28 = vadd.f32 %v7819_v11, %v7818_v16  ;;  %v7821_v55 = vpop.f32.mrb[54].mxu0 }
 0xba3   : > { %v7822_v7 = vpop.f32.mrb[55].mxu0  ;;  %v6029_v53 = vpop.permute.xlu0 %6028 }
 0xba4   : > { %v7823_v9 = vadd.f32 %v7822_v7, %v7821_v55  ;;  %6050 = vrot.lane.b32.xlu1 %v15966_v61, %s9302_s19  ;;  %v6161_v12 = vsel %vm1418_vm0, %v15978_v47, %v6029_v53 }
 0xba6   : > { %v6003_v14 = vpack.c.bf16 %v7823_v9, %v7820_v28  ;;  %v15988_v9 = vld [vmem:[#allocation123_spill] sm:$0xff] }
 0xba7   : > { %v6123_v35 = vpop.permute.xlu1 %6122  ;;  %v6077_v26 = vpop.permute.xlu0 %6076  ;;  %v15990_v1 = vpack.c.bf16 %v15988_v9, %v15989_v5 }
 0xba8   : > { %v6239_v37 = vsel %vm6231_vm1, %v6204_v48, %v6123_v35  ;;  %6098 = vrot.lane.b32.xlu1 %v15972_v25, %s9300_s8  ;;  %6144 = vrot.lane.b32.xlu0 %v6003_v14, %s9301_s17  ;;  %v6206_v4 = vsel %vm6198_vm2, %v6161_v12, %v6077_v26  ;;  %v15991_v14 = vld [vmem:[#allocation186_spill] sm:$0xff]  ;;  %v15992_v48 = vld [vmem:[#allocation117_spill] sm:$0xff] }
 0xba9   : > { %8024 = vmatprep.mubr.bf16.mxu1 %v6239_v37  ;;  %v15993_v35 = vpack.c.bf16 %v15991_v14, %v15992_v48 }
 0xbab   : > { %v6031_v3 = vpop.permute.xlu1 %6030 }
 0xbac   : > { %6052 = vrot.lane.b32.xlu0 %v15975_v36, %s9302_s19  ;;  %v6164_v56 = vsel %vm1418_vm0, %v15981_v24, %v6031_v3  ;;  %v15995_v36 = vld [vmem:[#allocation189_spill] sm:$0xff] }
 0xbad   : > { %v15996_v52 = vpack.c.bf16 %v15994_v40, %v15995_v36  ;;  %v15997_v3 = vld [vmem:[#allocation193_spill] sm:$0xff] }
 0xbaf   : > { %v6125_v43 = vpop.permute.xlu0 %6124  ;;  %v6079_v41 = vpop.permute.xlu1 %6078 }
 0xbb0   : > { %v6242_v19 = vsel %vm6231_vm1, %v6206_v4, %v6125_v43  ;;  %6100 = vrot.lane.b32.xlu0 %v4818_v33, %s9300_s8  ;;  %v6208_v33 = vsel %vm6198_vm2, %v6164_v56, %v6079_v41  ;;  %v15998_v41 = vld [vmem:[#allocation126_spill] sm:$0xff] }
 0xbb1   : > { %8025 = vmatmul.mubr.bf16.gmra.mrb[36].mxu1 %v6242_v19 }
 0xbb3   : > { %v6033_v30 = vpop.permute.xlu0 %6032 }
 0xbb4   : > { %v6167_v21 = vsel %vm1418_vm0, %v15984_v42, %v6033_v30  ;;  %v15999_v30 = vpack.c.bf16 %v15997_v3, %v15998_v41 }
 0xbb7   : > { %v6081_v29 = vpop.permute.xlu0 %6080 }
 0xbb8   : > { %v6210_v17 = vsel %vm6198_vm2, %v6167_v21, %v6081_v29  ;;  %v16001_v29 = vld [vmem:[#allocation196_spill] sm:$0xff] }
 0xbbd   : > { %v7824_v31 = vpop.f32.mrb[56].mxu0 }
 0xbbe   : > { %v7825_v38 = vpop.f32.mrb[57].mxu0 }
 0xbbf   : > { %v7826_v0 = vadd.f32 %v7825_v38, %v7824_v31  ;;  %v7827_v62 = vpop.f32.mrb[58].mxu0 }
 0xbc0   : > { %v7828_v51 = vpop.f32.mrb[59].mxu0 }
 0xbc1   : > { %v7829_v58 = vadd.f32 %v7828_v51, %v7827_v62 }
 0xbc3   : > { %v6004_v18 = vpack.c.bf16 %v7829_v58, %v7826_v0 }
 0xbc5   : > { %6146 = vrot.lane.b32.xlu1 %v6004_v18, %s9301_s17 }
 0xbd2   : > { %v6127_v54 = vpop.permute.xlu1 %6126 }
 0xbd3   : > { %v6245_v50 = vsel %vm6231_vm1, %v6208_v33, %v6127_v54 }
 0xbd4   : > { %8028 = vmatprep.mubr.bf16.mxu1 %v6245_v50  ;;  %v16000_v50 = vld [vmem:[#allocation197_spill] sm:$0xff] }
 0xbd6   : > { %v6035_v34 = vpop.permute.xlu1 %6034 }
 0xbd7   : > { %v6170_v16 = vsel %vm1418_vm0, %v15987_v46, %v6035_v34  ;;  %v16002_v34 = vpack.c.bf16 %v16000_v50, %v16001_v29 }
 0xbda   : > { %v6129_v57 = vpop.permute.xlu0 %6128  ;;  %v6083_v22 = vpop.permute.xlu1 %6082 }
 0xbdb   : > { %v6248_v27 = vsel %vm6231_vm1, %v6210_v17, %v6129_v57  ;;  %v6212_v11 = vsel %vm6198_vm2, %v6170_v16, %v6083_v22  ;;  %v16004_v22 = vld [vmem:[#allocation202_spill] sm:$0xff] }
 0xbdc   : > { %8029 = vmatmul.mubr.bf16.gmra.mrb[40].mxu1 %v6248_v27  ;;  %v16003_v27 = vld [vmem:[#allocation205_spill] sm:$0xff] }
 0xbde   : > { %v6037_v10 = vpop.permute.xlu0 %6036 }
 0xbdf   : > { %v6173_v61 = vsel %vm1418_vm0, %v15990_v1, %v6037_v10  ;;  %v16005_v10 = vpack.c.bf16 %v16003_v27, %v16004_v22 }
 0xbe2   : > { %v6131_v28 = vpop.permute.xlu1 %6130  ;;  %v6085_v2 = vpop.permute.xlu0 %6084 }
 0xbe3   : > { %v6251_v55 = vsel %vm6231_vm1, %v6212_v11, %v6131_v28  ;;  %v6214_v53 = vsel %vm6198_vm2, %v6173_v61, %v6085_v2  ;;  %v16006_v28 = vld [vmem:[#allocation209_spill] sm:$0xff] }
 0xbe4   : > { %8032 = vmatprep.mubr.bf16.mxu1 %v6251_v55  ;;  %v16007_v55 = vld [vmem:[#allocation208_spill] sm:$0xff] }
 0xbe5   : > { %v16008_v2 = vpack.c.bf16 %v16006_v28, %v16007_v55 }
 0xbe6   : > { %v6039_v7 = vpop.permute.xlu1 %6038 }
 0xbe7   : > { %v6176_v37 = vsel %vm1418_vm0, %v15993_v35, %v6039_v7 }
 0xbea   : > { %v6133_v13 = vpop.permute.xlu0 %6132  ;;  %v6087_v15 = vpop.permute.xlu1 %6086 }
 0xbeb   : > { %v6254_v20 = vsel %vm6231_vm1, %v6214_v53, %v6133_v13  ;;  %v6216_v23 = vsel %vm6198_vm2, %v6176_v37, %v6087_v15  ;;  %v16009_v13 = vld [vmem:[#allocation31_spill] sm:$0xff] }
 0xbec   : > { %8033 = vmatmul.mubr.bf16.gmra.mrb[44].mxu1 %v6254_v20  ;;  %v16010_v20 = vld [vmem:[#allocation151_spill] sm:$0xff] }
 0xbed   : > { %v16011_v15 = vpack.c.bf16 %v16009_v13, %v16010_v20 }
 0xbee   : > { %v6041_v39 = vpop.permute.xlu0 %6040 }
 0xbef   : > { %v6179_v44 = vsel %vm1418_vm0, %v15996_v52, %v6041_v39 }
 0xbf2   : > { %v6135_v63 = vpop.permute.xlu1 %6134  ;;  %v6089_v26 = vpop.permute.xlu0 %6088 }
 0xbf3   : > { %v6257_v25 = vsel %vm6231_vm1, %v6216_v23, %v6135_v63  ;;  %v6218_v47 = vsel %vm6198_vm2, %v6179_v44, %v6089_v26  ;;  %v16012_v63 = vld [vmem:[#allocation161_spill] sm:$0xff]  ;;  %v14313_v44 = vld [vmem:[%s16015_s23] ss:$0 sm:$0xff]  ;;  %s9200_s23 = scalar_lea.vmem %s9199_s18, 4096 }
 0xbf4   : > { %8036 = vmatprep.mubr.bf16.mxu1 %v6257_v25  ;;  %v16013_v25 = vld [vmem:[#allocation147_spill] sm:$0xff]  ;;  %p9202_p12 = scmp.lt.s32.totalorder %s9200_s23, %s9194_s11 }
 0xbf5   : > { %v16014_v26 = vpack.c.bf16 %v16012_v63, %v16013_v25 }
 0xbf6   : > { %v6043_v59 = vpop.permute.xlu1 %6042  ;;  %p9203_p0 = por %p9202_p12, %p9201_p11 }
 0xbf7   : > { %v6182_v49 = vsel %vm1418_vm0, %v15999_v30, %v6043_v59 }
 0xbf8   : > { %p9204_p8 = pnand %p9203_p0, %p9197_p5 }
 0xbfa   : > { %v7830_v12 = vpop.f32.mrb[60].mxu0  ;;  %v6137_v4 = vpop.permute.xlu0 %6136 }
 0xbfb   : > { %v7831_v43 = vpop.f32.mrb[61].mxu0  ;;  %v6260_v19 = vsel %vm6231_vm1, %v6218_v47, %v6137_v4  ;;  %v6091_v51 = vpop.permute.xlu1 %6090 }
 0xbfc   : > { %v7832_v31 = vadd.f32 %v7831_v43, %v7830_v12  ;;  %v7833_v38 = vpop.f32.mrb[62].mxu0  ;;  %8037 = vmatmul.mubr.bf16.gmra.mrb[48].mxu1 %v6260_v19  ;;  %v6220_v8 = vsel %vm6198_vm2, %v6182_v49, %v6091_v51 }
 0xbfd   : > { %v7834_v0 = vpop.f32.mrb[63].mxu0 }
 0xbfe   : > { %v7835_v62 = vadd.f32 %v7834_v0, %v7833_v38  ;;  %v6045_v18 = vpop.permute.xlu0 %6044 }
 0xbff   : > { %v6185_v6 = vsel %vm1418_vm0, %v16002_v34, %v6045_v18 }
 0xc00   : > { %v6005_v58 = vpack.c.bf16 %v7835_v62, %v7832_v31 }
 0xc02   : > { %6148 = vrot.lane.b32.xlu0 %v6005_v58, %s9301_s17  ;;  %v6139_v24 = vpop.permute.xlu1 %6138  ;;  %v6093_v33 = vpop.permute.xlu0 %6092  ;;  %s16017_s17 = sld [smem:[#allocation214_spill]] }
 0xc03   : > { %v6263_v56 = vsel %vm6231_vm1, %v6220_v8, %v6139_v24  ;;  %v6222_v60 = vsel %vm6198_vm2, %v6185_v6, %v6093_v33 }
 0xc04   : > { %8040 = vmatprep.mubr.bf16.mxu1 %v6263_v56 }
 0xc06   : > { %v6047_v54 = vpop.permute.xlu1 %6046 }
 0xc07   : > { %v6188_v45 = vsel %vm1418_vm0, %v16005_v10, %v6047_v54 }
 0xc08   : > { %s14371_s19 = scalar_lea.hbm %s16017_s17, %s7028_s26 }
 0xc0a   : > { %v6141_v42 = vpop.permute.xlu0 %6140  ;;  %v6095_v17 = vpop.permute.xlu1 %6094 }
 0xc0b   : > { %v6266_v21 = vsel %vm6231_vm1, %v6222_v60, %v6141_v42  ;;  %v6224_v32 = vsel %vm6198_vm2, %v6188_v45, %v6095_v17 }
 0xc0c   : > { %8041 = vmatmul.mubr.bf16.gmra.mrb[52].mxu1 %v6266_v21 }
 0xc0e   : > { %v6049_v57 = vpop.permute.xlu0 %6048 }
 0xc0f   : > { %v6191_v7 = vsel %vm1418_vm0, %v16008_v2, %v6049_v57 }
 0xc12   : > { %v6143_v46 = vpop.permute.xlu1 %6142  ;;  %v6097_v11 = vpop.permute.xlu0 %6096 }
 0xc13   : > { %v6269_v16 = vsel %vm6231_vm1, %v6224_v32, %v6143_v46  ;;  %v6226_v9 = vsel %vm6198_vm2, %v6191_v7, %v6097_v11 }
 0xc14   : > { %8044 = vmatprep.mubr.bf16.mxu1 %v6269_v16 }
 0xc16   : > { %v6051_v61 = vpop.permute.xlu1 %6050 }
 0xc17   : > { %v6194_v39 = vsel %vm1418_vm0, %v16011_v15, %v6051_v61 }
 0xc1a   : > { %v6145_v5 = vpop.permute.xlu0 %6144  ;;  %v6099_v53 = vpop.permute.xlu1 %6098 }
 0xc1b   : > { %v6272_v1 = vsel %vm6231_vm1, %v6226_v9, %v6145_v5  ;;  %v6228_v14 = vsel %vm6198_vm2, %v6194_v39, %v6099_v53 }
 0xc1c   : > { %8045 = vmatmul.mubr.bf16.gmra.mrb[56].mxu1 %v6272_v1 }
 0xc1e   : > { %v6053_v37 = vpop.permute.xlu0 %6052 }
 0xc1f   : > { %v6197_v59 = vsel %vm1418_vm0, %v16014_v26, %v6053_v37 }
 0xc22   : > { %v6101_v23 = vpop.permute.xlu0 %6100 }
 0xc23   : > { %v6230_v40 = vsel %vm6198_vm2, %v6197_v59, %v6101_v23 }
 0xc37   : > { %v6147_v48 = vpop.permute.xlu1 %6146 }
 0xc38   : > { %v6275_v35 = vsel %vm6231_vm1, %v6228_v14, %v6147_v48 }
 0xc39   : > { %8048 = vmatprep.mubr.bf16.mxu1 %v6275_v35 }
 0xc74   : > { %v6149_v36 = vpop.permute.xlu0 %6148  ;;  %v8022_v52 = vpop.f32.mrb[32].mxu1 }
 0xc75   : > { %v6278_v47 = vsel %vm6231_vm1, %v6230_v40, %v6149_v36  ;;  %v6385_v12 = vpop.f32.mrb[33].mxu1  ;;  %v6394_v43 = vadd.f32 %v8022_v52, %v14313_v44 }
 0xc76   : > { %8049 = vmatmul.mubr.bf16.gmra.mrb[60].mxu1 %v6278_v47  ;;  %v8023_v4 = vpop.f32.mrb[34].mxu1  ;;  %v6386_v38 = vadd.f32 %v14313_v44, %v6385_v12 }
 0xc77   : > { %v6397_v19 = vadd.f32 %v8023_v4, %v14313_v44  ;;  %v6388_v31 = vpop.f32.mrb[35].mxu1 }
 0xc78   : > { %v6389_v0 = vadd.f32 %v14313_v44, %v6388_v31 }
 0xc79   : > { %v7037_v62 = vpack.c.bf16 %v6397_v19, %v6394_v43 }
 0xc7a   : > { %v7032_v51 = vpack.c.bf16 %v6389_v0, %v6386_v38 }
 0xc7b   : > { %7109 = vst [vmem:[%s14322_s30 + $0x8] sm:$0xff] %v7037_v62  }
 0xc7c   : > { %7033 = vst [vmem:[%s14322_s30] sm:$0xff] %v7032_v51  }
 0xc84   : > { %v8026_v58 = vpop.f32.mrb[36].mxu1 }
 0xc85   : > { %v6401_v18 = vpop.f32.mrb[37].mxu1  ;;  %v6410_v41 = vadd.f32 %v8026_v58, %v14313_v44 }
 0xc86   : > { %v8027_v3 = vpop.f32.mrb[38].mxu1  ;;  %v6402_v8 = vadd.f32 %v14313_v44, %v6401_v18 }
 0xc87   : > { %v6413_v30 = vadd.f32 %v8027_v3, %v14313_v44  ;;  %v6404_v49 = vpop.f32.mrb[39].mxu1 }
 0xc88   : > { %v6405_v24 = vadd.f32 %v14313_v44, %v6404_v49 }
 0xc89   : > { %v7047_v56 = vpack.c.bf16 %v6413_v30, %v6410_v41 }
 0xc8a   : > { %v7042_v33 = vpack.c.bf16 %v6405_v24, %v6402_v8 }
 0xc8b   : > { %7111 = vst [vmem:[%s14322_s30 + $0x18] sm:$0xff] %v7047_v56  }
 0xc8c   : > { %7110 = vst [vmem:[%s14322_s30 + $0x10] sm:$0xff] %v7042_v33  }
 0xcaf   : > { %v8030_v54 = vpop.f32.mrb[40].mxu1 }
 0xcb0   : > { %v6417_v50 = vpop.f32.mrb[41].mxu1  ;;  %v6426_v34 = vadd.f32 %v8030_v54, %v14313_v44 }
 0xcb1   : > { %v8031_v29 = vpop.f32.mrb[42].mxu1  ;;  %v6418_v42 = vadd.f32 %v14313_v44, %v6417_v50 }
 0xcb2   : > { %v6429_v6 = vadd.f32 %v8031_v29, %v14313_v44  ;;  %v6420_v60 = vpop.f32.mrb[43].mxu1 }
 0xcb3   : > { %v6421_v21 = vadd.f32 %v14313_v44, %v6420_v60 }
 0xcb4   : > { %v7057_v17 = vpack.c.bf16 %v6429_v6, %v6426_v34 }
 0xcb5   : > { %v7052_v57 = vpack.c.bf16 %v6421_v21, %v6418_v42 }
 0xcb6   : > { %7113 = vst [vmem:[%s14322_s30 + $0x28] sm:$0xff] %v7057_v17  }
 0xcb7   : > { %7112 = vst [vmem:[%s14322_s30 + $0x20] sm:$0xff] %v7052_v57  }
 0xcbf   : > { %v8034_v27 = vpop.f32.mrb[44].mxu1 }
 0xcc0   : > { %v6433_v22 = vpop.f32.mrb[45].mxu1  ;;  %v6442_v45 = vadd.f32 %v8034_v27, %v14313_v44 }
 0xcc1   : > { %v8035_v10 = vpop.f32.mrb[46].mxu1  ;;  %v6434_v16 = vadd.f32 %v14313_v44, %v6433_v22 }
 0xcc2   : > { %v6445_v32 = vadd.f32 %v8035_v10, %v14313_v44  ;;  %v6436_v46 = vpop.f32.mrb[47].mxu1 }
 0xcc3   : > { %v6437_v11 = vadd.f32 %v14313_v44, %v6436_v46 }
 0xcc4   : > { %v7067_v28 = vpack.c.bf16 %v6445_v32, %v6442_v45 }
 0xcc5   : > { %v7062_v55 = vpack.c.bf16 %v6437_v11, %v6434_v16 }
 0xcc6   : > { %7115 = vst [vmem:[%s14322_s30 + $0x38] sm:$0xff] %v7067_v28  }
 0xcc7   : > { %7114 = vst [vmem:[%s14322_s30 + $0x30] sm:$0xff] %v7062_v55  }
 0xccf   : > { %v8038_v2 = vpop.f32.mrb[48].mxu1 }
 0xcd0   : > { %v6449_v7 = vpop.f32.mrb[49].mxu1  ;;  %v6458_v5 = vadd.f32 %v8038_v2, %v14313_v44 }
 0xcd1   : > { %v8039_v9 = vpop.f32.mrb[50].mxu1  ;;  %v6450_v53 = vadd.f32 %v14313_v44, %v6449_v7 }
 0xcd2   : > { %v6461_v1 = vadd.f32 %v8039_v9, %v14313_v44  ;;  %v6452_v61 = vpop.f32.mrb[51].mxu1 }
 0xcd3   : > { %v6453_v13 = vadd.f32 %v14313_v44, %v6452_v61 }
 0xcd4   : > { %v7077_v20 = vpack.c.bf16 %v6461_v1, %v6458_v5 }
 0xcd5   : > { %v7072_v15 = vpack.c.bf16 %v6453_v13, %v6450_v53 }
 0xcd6   : > { %7117 = vst [vmem:[%s14322_s30 + $0x48] sm:$0xff] %v7077_v20  }
 0xcd7   : > { %7116 = vst [vmem:[%s14322_s30 + $0x40] sm:$0xff] %v7072_v15  }
 0xcdf   : > { %v8042_v39 = vpop.f32.mrb[52].mxu1 }
 0xce0   : > { %v6465_v14 = vpop.f32.mrb[53].mxu1  ;;  %v6474_v35 = vadd.f32 %v8042_v39, %v14313_v44 }
 0xce1   : > { %v8043_v48 = vpop.f32.mrb[54].mxu1  ;;  %v6466_v63 = vadd.f32 %v14313_v44, %v6465_v14 }
 0xce2   : > { %v6477_v37 = vadd.f32 %v8043_v48, %v14313_v44  ;;  %v6468_v23 = vpop.f32.mrb[55].mxu1 }
 0xce3   : > { %v6469_v25 = vadd.f32 %v14313_v44, %v6468_v23 }
 0xce4   : > { %v7087_v26 = vpack.c.bf16 %v6477_v37, %v6474_v35 }
 0xce5   : > { %v7082_v59 = vpack.c.bf16 %v6469_v25, %v6466_v63 }
 0xce6   : > { %7119 = vst [vmem:[%s14322_s30 + $0x58] sm:$0xff] %v7087_v26  }
 0xce7   : > { %7118 = vst [vmem:[%s14322_s30 + $0x50] sm:$0xff] %v7082_v59  }
 0xcef   : > { %v8046_v40 = vpop.f32.mrb[56].mxu1 }
 0xcf0   : > { %v6481_v36 = vpop.f32.mrb[57].mxu1  ;;  %v6490_v47 = vadd.f32 %v8046_v40, %v14313_v44 }
 0xcf1   : > { %v8047_v52 = vpop.f32.mrb[58].mxu1  ;;  %v6482_v43 = vadd.f32 %v14313_v44, %v6481_v36 }
 0xcf2   : > { %v6493_v12 = vadd.f32 %v8047_v52, %v14313_v44  ;;  %v6484_v4 = vpop.f32.mrb[59].mxu1 }
 0xcf3   : > { %v6485_v19 = vadd.f32 %v14313_v44, %v6484_v4 }
 0xcf4   : > { %v7097_v31 = vpack.c.bf16 %v6493_v12, %v6490_v47 }
 0xcf5   : > { %v7092_v38 = vpack.c.bf16 %v6485_v19, %v6482_v43 }
 0xcf6   : > { %7121 = vst [vmem:[%s14322_s30 + $0x68] sm:$0xff] %v7097_v31  }
 0xcf7   : > { %7120 = vst [vmem:[%s14322_s30 + $0x60] sm:$0xff] %v7092_v38  }
 0xd49   : > { %v8050_v0 = vpop.f32.mrb[60].mxu1 }
 0xd4a   : > { %v6497_v62 = vpop.f32.mrb[61].mxu1  ;;  %v6506_v58 = vadd.f32 %v8050_v0, %v14313_v44 }
 0xd4b   : > { %v8051_v51 = vpop.f32.mrb[62].mxu1  ;;  %v6498_v41 = vadd.f32 %v14313_v44, %v6497_v62 }
 0xd4c   : > { %v6509_v18 = vadd.f32 %v8051_v51, %v14313_v44  ;;  %v6500_v3 = vpop.f32.mrb[63].mxu1 }
 0xd4d   : > { %v6501_v30 = vadd.f32 %v14313_v44, %v6500_v3 }
 0xd4e   : > { %v7107_v49 = vpack.c.bf16 %v6509_v18, %v6506_v58 }
 0xd4f   : > { %v7102_v8 = vpack.c.bf16 %v6501_v30, %v6498_v41 }
 0xd50   : > { %7123 = vst [vmem:[%s14322_s30 + $0x78] sm:$0xff] %v7107_v49  }
 0xd51   : > { %7122 = vst [vmem:[%s14322_s30 + $0x70] sm:$0xff] %v7102_v8  }
 0xd52   : > { %9207 = shalt.err (!%p9204_p8)
}
 0xd53   : > { %s9208_s30 = scalar_lea.hbm %s14371_s19, 2048  ;;  %s9212_s12 = scalar_lea.hbm %s16017_s17, 4096 }
 0xd54   : > { %p9209_p3 = scmp.ne.s32.totalorder %s14371_s19, %s9208_s30  ;;  %p9213_p10 = scmp.lt.u32.totalorder %s14371_s19, %s16017_s17 }
 0xd55   : > { %p9214_p1 = scmp.lt.u32.totalorder %s9212_s12, %s9208_s30  ;;  %p9216_p6 = scmp.lt.u32.totalorder %s9208_s30, %s14371_s19 }
 0xd56   : > { %p9210_p7 = pnand %p9209_p3, %p16018_p2 }
 0xd57   : > { %p9215_p13 = por %p9214_p1, %p9213_p10 }
 0xd58   : > { %p9211_p9 = pneg %p9210_p7 }
 0xd59   : > { %p9217_p4 = por %p9216_p6, %p9215_p13 }
 0xd5b   : > { %p9218_p5 = pnand %p9217_p4, %p9211_p9 }
 0xd5d   : > { %9221 = shalt.err (!%p9218_p5)
}
 0xd5e   : > { %s9304_s11 = smov 4  }
 0xd5f   : > { %8106 = dma.vmem_to_hbm [thread:$0]  (%p16018_p2), %s14373_s15, 2048, %s14371_s19, %s6673_s20, %s9300_s8, %s9300_s8, %s9304_s11  }
 0xd60 PF: > { %s6703_s18 = sand.u32 1, %s9268_s27   ;;  %p16019_p11 = scmp.ne.s32.totalorder %s14844_s25, 0 }
 0xd61   : > { %p16020_p12 = scmp.ge.s32.totalorder %s9288_s10, 2  ;;  %s6704_s23 = scalar_lea.sflag [#allocation4], %s6703_s18 }
 0xd63   : > { %p8129_p0 = pnand %p16020_p12, %p16019_p11 }
 0xd65   : > { %9263 = dma.done.wait (!%p8129_p0), %s6704_s23, 2048  }
 0xd66   : > { %9265 = vsyncadd (!%p8129_p0), %s6704_s23, 4294965248  ;;  %s27_s10 = sadd.s32 1, %s9288_s10   ;;  %s16021_s27 = smov %s9272_s28 }
 0xd67   : > { %p24_p8 = scmp.ge.s32.totalorder %s27_s10, 4   ;;  %s16022_s28 = smov %s9276_s29 }
 0xd68   : > { %s16023_s29 = smov %s9540_s22  ;;  %s16024_s30 = smov %s9284_s9 }
 0xd69   : > { %s16025_s9 = smov %s16027_s24  ;;  %26 = sbr.rel (!%p24_p8) target bundleno = 12 (0xc), region = 121 }
 0xd70   :  { %6709 = vsyncpa [#allocation3], 1 }
 0xd71   :  { %6711 = vsyncpa [#allocation3 + $0x1], 1 }
 0xd72   :  { %6712 = vsyncpa [#allocation6], 1 }
 0xd73   :  { %6713 = vsyncpa [#allocation9], 1 }
 0xd74   :  { %6714 = vsyncpa [#allocation12], 1 }
 0xd75   :  { %6715 = vsyncpa [#allocation4], 1 }
 0xd76   :  { %6717 = vsyncpa [#allocation4 + $0x1], 1 }

</bundles_post_ra>
